<compile_context>
chip_gen: v5e
topology: v5e:2x2
jax: 0.10.0
libtpu: 0.0.40
codegen_flags: <defaults>
</compile_context>

<pallas_src>
import functools

import jax
import jax.numpy as jnp
from jax import lax
from jax.experimental import pallas as pl
from jax.experimental.pallas import tpu as pltpu


# ----------------------------------------------------------------------------
# Kernel 1: 3x3x3 Conv3d (+bias, +ReLU), taps folded into the contraction dim.
# One grid step = one (batch, output-depth-plane); the three padded input depth
# planes d, d+1, d+2 arrive as three BlockSpec views of the same HBM array.
# ----------------------------------------------------------------------------
def _conv3x3x3_kernel(x0_ref, x1_ref, x2_ref, w_ref, b_ref, o_ref, *, H, W,
                      apply_relu):
    # x*_ref: (1, 1, H+2, W+2, Cin) bf16 ; w_ref: (27*Cin, Cout) bf16
    # b_ref : (1, Cout) f32              ; o_ref: (1, 1, H*W, Cout) f32
    cols = []
    for r in (x0_ref, x1_ref, x2_ref):                 # kd = 0, 1, 2
        plane = r[0, 0].astype(jnp.float32)            # (H+2, W+2, Cin)
        for kh in range(3):
            for kw in range(3):
                cols.append(plane[kh:kh + H, kw:kw + W, :])
    xcol = jnp.concatenate(cols, axis=-1)              # (H, W, 27*Cin), tap-major
    xcol = xcol.reshape(H * W, xcol.shape[-1]).astype(jnp.bfloat16)
    y = jnp.dot(xcol, w_ref[...], preferred_element_type=jnp.float32)
    y = y + b_ref[...]
    if apply_relu:
        y = jnp.maximum(y, 0.0)
    o_ref[...] = y.reshape(o_ref.shape).astype(o_ref.dtype)


def conv3d_3x3x3(x, w_taps, b, *, apply_relu=True):
    """x: (N, D, H, W, Cin) f32; w_taps: (27, Cin, Cout); b: (Cout,). pad=1, stride=1."""
    N, D, H, W, Cin = x.shape
    Cout = w_taps.shape[-1]
    Hp, Wp = H + 2, W + 2
    xp = jnp.pad(x, ((0, 0), (1, 1), (1, 1), (1, 1), (0, 0))).astype(jnp.bfloat16)
    wf = w_taps.reshape(27 * Cin, Cout).astype(jnp.bfloat16)  # tap-major rows match cols
    bf = b.reshape(1, Cout).astype(jnp.float32)

    def plane_spec(off):                                # padded depth plane d + off
        return pl.BlockSpec((1, 1, Hp, Wp, Cin),
                            lambda n, d: (n, d + off, 0, 0, 0))

    out = pl.pallas_call(
        functools.partial(_conv3x3x3_kernel, H=H, W=W, apply_relu=apply_relu),
        out_shape=jax.ShapeDtypeStruct((N, D, H * W, Cout), jnp.float32),
        grid=(N, D),
        in_specs=[plane_spec(0), plane_spec(1), plane_spec(2),
                  pl.BlockSpec((27 * Cin, Cout), lambda n, d: (0, 0)),
                  pl.BlockSpec((1, Cout), lambda n, d: (0, 0))],
        out_specs=pl.BlockSpec((1, 1, H * W, Cout), lambda n, d: (n, d, 0, 0)),
        compiler_params=pltpu.CompilerParams(
            dimension_semantics=("parallel", "parallel")),
    )(xp, xp, xp, wf, bf)
    return out.reshape(N, D, H, W, Cout)


# ----------------------------------------------------------------------------
# Kernel 2: fused BatchNorm3d (training-mode batch stats) + AvgPool3d(2,2,2).
# The per-channel affine and the 1/8 pooling factor are pre-folded into a single
# scale/shift; the kernel does the 2x2x2 pair-sums + one fused multiply-add.
# ----------------------------------------------------------------------------
def _bn_pool_kernel(x_ref, s_ref, t_ref, o_ref):
    # x_ref: (1, 2, H, W/2, 2*C) f32 — one (n, d_out) slab; depth pair on axis 1,
    #        the W pair folded into the lane axis (even-w channels in [0:C), odd-w in [C:2C)).
    # s_ref/t_ref: (1, C) fused scale (= gamma*rsqrt(var+eps)/8) and shift.
    C = s_ref.shape[-1]
    x = x_ref[0]                                       # (2, H, Wo, 2C)
    d = x[0] + x[1]                                    # depth pair  -> (H, Wo, 2C)
    d = d.reshape(d.shape[0] // 2, 2, d.shape[1], d.shape[2])
    hsum = d[:, 0] + d[:, 1]                           # height pair -> (Ho, Wo, 2C)
    wsum = hsum[..., :C] + hsum[..., C:]               # width pair  -> (Ho, Wo, C)
    o_ref[...] = (wsum * s_ref[0] + t_ref[0]).reshape(o_ref.shape)


def batchnorm_avgpool(h, gamma, beta, eps=1e-5):
    """h: (N, D, H, W, C) f32 (even D/H/W) -> (N, D//2, H//2, W//2, C)."""
    # TODO(synk): ceil_mode=True only matters for odd spatial dims; even dims used here.
    N, D, H, W, C = h.shape
    Do, Ho, Wo = D // 2, H // 2, W // 2
    # Per-channel batch statistics: one fused XLA reduction over h (biased var, torch-style).
    mean = jnp.mean(h, axis=(0, 1, 2, 3))
    var = jnp.mean(jnp.square(h - mean), axis=(0, 1, 2, 3))
    scale = gamma * lax.rsqrt(var + eps)
    s_fused = (scale * 0.125).reshape(1, C)            # fold the 1/8 pooling factor
    t_fused = (beta - mean * scale).reshape(1, C)
    xv = h.reshape(N * Do, 2, H, Wo, 2 * C)            # free row-major-compatible view
    out = pl.pallas_call(
        _bn_pool_kernel,
        out_shape=jax.ShapeDtypeStruct((N * Do, Ho, Wo, C), jnp.float32),
        grid=(N * Do,),
        in_specs=[pl.BlockSpec((1, 2, H, Wo, 2 * C), lambda i: (i, 0, 0, 0, 0)),
                  pl.BlockSpec((1, C), lambda i: (0, 0)),
                  pl.BlockSpec((1, C), lambda i: (0, 0))],
        out_specs=pl.BlockSpec((1, Ho, Wo, C), lambda i: (i, 0, 0, 0)),
        compiler_params=pltpu.CompilerParams(dimension_semantics=("parallel",)),
    )(xv, s_fused, t_fused)
    return out.reshape(N, Do, Ho, Wo, C)


# ----------------------------------------------------------------------------
# Kernel 3: head = per-batch global spatial mean + single 1x1 conv (C -> 2L) + exp
# ----------------------------------------------------------------------------
def _head_kernel(x_ref, w_ref, b_ref, pooled_ref, mu_ref, sigma_ref, *, latent_dim):
    x = x_ref[...]                                     # (N, S, C)
    pooled = jnp.mean(x, axis=1)                       # (N, C)
    pooled_ref[...] = pooled
    ms = jnp.dot(pooled, w_ref[...],
                 preferred_element_type=jnp.float32) + b_ref[...]   # (N, 2L)
    mu_ref[...] = ms[:, :latent_dim]
    sigma_ref[...] = jnp.exp(ms[:, latent_dim:])


def gaussian_head(h, head_w, head_b, latent_dim):
    """h: (N, D, H, W, C) -> (pooled (N,C), mu (N,L), sigma (N,L))."""
    # TODO(synk): reference applies nn.Conv2d to a 5-D tensor after reducing only dims 2
    # and 3 (errors in PyTorch); implemented as global spatial mean + 1x1 conv.
    N, D, H, W, C = h.shape
    S = D * H * W
    L = latent_dim
    pooled, mu, sigma = pl.pallas_call(
        functools.partial(_head_kernel, latent_dim=L),
        out_shape=(jax.ShapeDtypeStruct((N, C), jnp.float32),
                   jax.ShapeDtypeStruct((N, L), jnp.float32),
                   jax.ShapeDtypeStruct((N, L), jnp.float32)),
    )(h.reshape(N, S, C), head_w, head_b.reshape(1, 2 * L))
    return pooled, mu, sigma


# ----------------------------------------------------------------------------
# Module: AxisAlignedConvGaussian (posterior, n_components=1)
#   input_channels=4, label_channels=1, num_filters=[8, 16],
#   no_convs_per_block=2, latent_dim=6, norm=True
# ----------------------------------------------------------------------------
def init_params(key):
    keys = jax.random.split(key, 10)

    def conv_w(k, cin, cout):                    # kaiming-normal-like, fan_in = cin*27
        return jax.random.normal(k, (27, cin, cout), jnp.float32) * jnp.sqrt(
            2.0 / (cin * 27))

    def conv_b(k, cin, cout):                    # PyTorch default conv bias init
        bound = 1.0 / jnp.sqrt(cin * 27.0)
        return jax.random.uniform(k, (cout,), jnp.float32, -bound, bound)

    p = {}
    # Encoder block 0 (in_ch = 4 input + 1 label = 5)
    p["w00"], p["b00"] = conv_w(keys[0], 5, 8), conv_b(keys[1], 5, 8)
    p["w01"], p["b01"] = conv_w(keys[2], 8, 8), conv_b(keys[3], 8, 8)
    p["bn0_g"] = jnp.ones((8,), jnp.float32)
    p["bn0_b"] = jnp.zeros((8,), jnp.float32)
    # Encoder block 1 (preceded by AvgPool3d)
    p["w10"], p["b10"] = conv_w(keys[4], 8, 16), conv_b(keys[5], 8, 16)
    p["w11"], p["b11"] = conv_w(keys[6], 16, 16), conv_b(keys[7], 16, 16)
    # Head 1x1 conv: Conv2d(16, 2*1*6); kaiming normal (fan_in=16), bias ~ N(0,1)
    p["head_w"] = jax.random.normal(keys[8], (16, 12), jnp.float32) * jnp.sqrt(2.0 / 16.0)
    p["head_b"] = jax.random.normal(keys[9], (12,), jnp.float32)
    return p


def axis_aligned_conv_gaussian_forward(params, x, segm=None, latent_dim=6):
    """x: (N, 4, D, H, W) NCDHW; segm: (N, 1, D, H, W).  Returns (pooled_encoding,
    (mu, sigma)) — the torch Independent(Normal(...),1) represented by its parameters."""
    if segm is not None:
        x = jnp.concatenate([x, segm], axis=1)                    # posterior concat, dim=1
    x = jnp.transpose(x, (0, 2, 3, 4, 1)).astype(jnp.float32)     # NCDHW -> NDHWC

    # Encoder block 0: conv+relu, conv+relu, batchnorm; block 1: avgpool, conv+relu, conv+relu
    h = conv3d_3x3x3(x, params["w00"], params["b00"], apply_relu=True)
    h = conv3d_3x3x3(h, params["w01"], params["b01"], apply_relu=True)
    h = batchnorm_avgpool(h, params["bn0_g"], params["bn0_b"])    # BN fused with AvgPool
    h = conv3d_3x3x3(h, params["w10"], params["b10"], apply_relu=True)
    h = conv3d_3x3x3(h, params["w11"], params["b11"], apply_relu=True)

    pooled, mu, sigma = gaussian_head(h, params["head_w"], params["head_b"], latent_dim)
    # TODO(synk): n_components > 1 mixture branch (RelaxedOneHotCategorical) not
    # implemented; this module is instantiated with n_components=1.
    return pooled, (mu, sigma)


if __name__ == "__main__":
    key = jax.random.PRNGKey(0)
    k_x, k_s, k_p = jax.random.split(key, 3)
    # N=2, input_channels=4, label_channels=1, spatial D=H=W=8
    x = jax.random.normal(k_x, (2, 4, 8, 8, 8), jnp.float32)
    segm = (jax.random.uniform(k_s, (2, 1, 8, 8, 8)) > 0.5).astype(jnp.float32)
    params = init_params(k_p)

    fwd = jax.jit(axis_aligned_conv_gaussian_forward)
    pooled, (mu, sigma) = fwd(params, x, segm)
    jax.block_until_ready((pooled, mu, sigma))

    assert pooled.shape == (2, 16)
    assert mu.shape == (2, 6) and sigma.shape == (2, 6)
    assert bool(jnp.all(sigma > 0))
    print("KERNEL_OK")
</pallas_src>

<mosaic_0001>
module attributes {stable_mosaic.version = 11 : i64} {
  func.func @_conv3x3x3_kernel(%arg0: i32, %arg1: i32, %arg2: memref<1x1x10x10x5xbf16, #tpu.memory_space<vmem>>, %arg3: memref<1x1x10x10x5xbf16, #tpu.memory_space<vmem>>, %arg4: memref<1x1x10x10x5xbf16, #tpu.memory_space<vmem>>, %arg5: memref<135x8xbf16, #tpu.memory_space<vmem>>, %arg6: memref<1x8xf32, #tpu.memory_space<vmem>>, %arg7: memref<1x1x64x8xf32, #tpu.memory_space<vmem>>) attributes {dimension_semantics = [#tpu.dimension_semantics<parallel>, #tpu.dimension_semantics<parallel>], iteration_bounds = array<i64: 2, 8>, scalar_prefetch = 0 : i64, scratch_operands = 0 : i64, tpu.core_type = #tpu.core_type<tc>, window_params = [{transform_indices = @transform_0, window_bounds = array<i64: 1, 1, 10, 10, 5>}, {transform_indices = @transform_1, window_bounds = array<i64: 1, 1, 10, 10, 5>}, {transform_indices = @transform_2, window_bounds = array<i64: 1, 1, 10, 10, 5>}, {pipeline_mode = #tpu.pipeline_mode<synchronous>, transform_indices = @transform_3, window_bounds = array<i64: 135, 8>}, {pipeline_mode = #tpu.pipeline_mode<synchronous>, transform_indices = @transform_4, window_bounds = array<i64: 1, 8>}, {transform_indices = @transform_5, window_bounds = array<i64: 1, 1, 64, 8>}]} {
    %c0 = arith.constant 0 : index
    %c0_0 = arith.constant 0 : index
    %c0_1 = arith.constant 0 : index
    %c0_2 = arith.constant 0 : index
    %c0_3 = arith.constant 0 : index
    %0 = vector.load %arg2[%c0, %c0_0, %c0_1, %c0_2, %c0_3] : memref<1x1x10x10x5xbf16, #tpu.memory_space<vmem>>, vector<1x1x10x10x5xbf16>
    %1 = vector.shape_cast %0 : vector<1x1x10x10x5xbf16> to vector<10x10x5xbf16>
    %2 = arith.extf %1 : vector<10x10x5xbf16> to vector<10x10x5xf32>
    %3 = vector.extract_strided_slice %2 {offsets = [0, 0, 0], sizes = [8, 8, 5], strides = [1, 1, 1]} : vector<10x10x5xf32> to vector<8x8x5xf32>
    %4 = vector.extract_strided_slice %2 {offsets = [0, 1, 0], sizes = [8, 8, 5], strides = [1, 1, 1]} : vector<10x10x5xf32> to vector<8x8x5xf32>
    %5 = vector.extract_strided_slice %2 {offsets = [0, 2, 0], sizes = [8, 8, 5], strides = [1, 1, 1]} : vector<10x10x5xf32> to vector<8x8x5xf32>
    %6 = vector.extract_strided_slice %2 {offsets = [1, 0, 0], sizes = [8, 8, 5], strides = [1, 1, 1]} : vector<10x10x5xf32> to vector<8x8x5xf32>
    %7 = vector.extract_strided_slice %2 {offsets = [1, 1, 0], sizes = [8, 8, 5], strides = [1, 1, 1]} : vector<10x10x5xf32> to vector<8x8x5xf32>
    %8 = vector.extract_strided_slice %2 {offsets = [1, 2, 0], sizes = [8, 8, 5], strides = [1, 1, 1]} : vector<10x10x5xf32> to vector<8x8x5xf32>
    %9 = vector.extract_strided_slice %2 {offsets = [2, 0, 0], sizes = [8, 8, 5], strides = [1, 1, 1]} : vector<10x10x5xf32> to vector<8x8x5xf32>
    %10 = vector.extract_strided_slice %2 {offsets = [2, 1, 0], sizes = [8, 8, 5], strides = [1, 1, 1]} : vector<10x10x5xf32> to vector<8x8x5xf32>
    %11 = vector.extract_strided_slice %2 {offsets = [2, 2, 0], sizes = [8, 8, 5], strides = [1, 1, 1]} : vector<10x10x5xf32> to vector<8x8x5xf32>
    %c0_4 = arith.constant 0 : index
    %c0_5 = arith.constant 0 : index
    %c0_6 = arith.constant 0 : index
    %c0_7 = arith.constant 0 : index
    %c0_8 = arith.constant 0 : index
    %12 = vector.load %arg3[%c0_4, %c0_5, %c0_6, %c0_7, %c0_8] : memref<1x1x10x10x5xbf16, #tpu.memory_space<vmem>>, vector<1x1x10x10x5xbf16>
    %13 = vector.shape_cast %12 : vector<1x1x10x10x5xbf16> to vector<10x10x5xbf16>
    %14 = arith.extf %13 : vector<10x10x5xbf16> to vector<10x10x5xf32>
    %15 = vector.extract_strided_slice %14 {offsets = [0, 0, 0], sizes = [8, 8, 5], strides = [1, 1, 1]} : vector<10x10x5xf32> to vector<8x8x5xf32>
    %16 = vector.extract_strided_slice %14 {offsets = [0, 1, 0], sizes = [8, 8, 5], strides = [1, 1, 1]} : vector<10x10x5xf32> to vector<8x8x5xf32>
    %17 = vector.extract_strided_slice %14 {offsets = [0, 2, 0], sizes = [8, 8, 5], strides = [1, 1, 1]} : vector<10x10x5xf32> to vector<8x8x5xf32>
    %18 = vector.extract_strided_slice %14 {offsets = [1, 0, 0], sizes = [8, 8, 5], strides = [1, 1, 1]} : vector<10x10x5xf32> to vector<8x8x5xf32>
    %19 = vector.extract_strided_slice %14 {offsets = [1, 1, 0], sizes = [8, 8, 5], strides = [1, 1, 1]} : vector<10x10x5xf32> to vector<8x8x5xf32>
    %20 = vector.extract_strided_slice %14 {offsets = [1, 2, 0], sizes = [8, 8, 5], strides = [1, 1, 1]} : vector<10x10x5xf32> to vector<8x8x5xf32>
    %21 = vector.extract_strided_slice %14 {offsets = [2, 0, 0], sizes = [8, 8, 5], strides = [1, 1, 1]} : vector<10x10x5xf32> to vector<8x8x5xf32>
    %22 = vector.extract_strided_slice %14 {offsets = [2, 1, 0], sizes = [8, 8, 5], strides = [1, 1, 1]} : vector<10x10x5xf32> to vector<8x8x5xf32>
    %23 = vector.extract_strided_slice %14 {offsets = [2, 2, 0], sizes = [8, 8, 5], strides = [1, 1, 1]} : vector<10x10x5xf32> to vector<8x8x5xf32>
    %c0_9 = arith.constant 0 : index
    %c0_10 = arith.constant 0 : index
    %c0_11 = arith.constant 0 : index
    %c0_12 = arith.constant 0 : index
    %c0_13 = arith.constant 0 : index
    %24 = vector.load %arg4[%c0_9, %c0_10, %c0_11, %c0_12, %c0_13] : memref<1x1x10x10x5xbf16, #tpu.memory_space<vmem>>, vector<1x1x10x10x5xbf16>
    %25 = vector.shape_cast %24 : vector<1x1x10x10x5xbf16> to vector<10x10x5xbf16>
    %26 = arith.extf %25 : vector<10x10x5xbf16> to vector<10x10x5xf32>
    %27 = vector.extract_strided_slice %26 {offsets = [0, 0, 0], sizes = [8, 8, 5], strides = [1, 1, 1]} : vector<10x10x5xf32> to vector<8x8x5xf32>
    %28 = vector.extract_strided_slice %26 {offsets = [0, 1, 0], sizes = [8, 8, 5], strides = [1, 1, 1]} : vector<10x10x5xf32> to vector<8x8x5xf32>
    %29 = vector.extract_strided_slice %26 {offsets = [0, 2, 0], sizes = [8, 8, 5], strides = [1, 1, 1]} : vector<10x10x5xf32> to vector<8x8x5xf32>
    %30 = vector.extract_strided_slice %26 {offsets = [1, 0, 0], sizes = [8, 8, 5], strides = [1, 1, 1]} : vector<10x10x5xf32> to vector<8x8x5xf32>
    %31 = vector.extract_strided_slice %26 {offsets = [1, 1, 0], sizes = [8, 8, 5], strides = [1, 1, 1]} : vector<10x10x5xf32> to vector<8x8x5xf32>
    %32 = vector.extract_strided_slice %26 {offsets = [1, 2, 0], sizes = [8, 8, 5], strides = [1, 1, 1]} : vector<10x10x5xf32> to vector<8x8x5xf32>
    %33 = vector.extract_strided_slice %26 {offsets = [2, 0, 0], sizes = [8, 8, 5], strides = [1, 1, 1]} : vector<10x10x5xf32> to vector<8x8x5xf32>
    %34 = vector.extract_strided_slice %26 {offsets = [2, 1, 0], sizes = [8, 8, 5], strides = [1, 1, 1]} : vector<10x10x5xf32> to vector<8x8x5xf32>
    %35 = vector.extract_strided_slice %26 {offsets = [2, 2, 0], sizes = [8, 8, 5], strides = [1, 1, 1]} : vector<10x10x5xf32> to vector<8x8x5xf32>
    %36 = tpu.concatenate %3, %4, %5, %6, %7, %8, %9, %10, %11, %15, %16, %17, %18, %19, %20, %21 in 2 : vector<8x8x5xf32>, vector<8x8x5xf32>, vector<8x8x5xf32>, vector<8x8x5xf32>, vector<8x8x5xf32>, vector<8x8x5xf32>, vector<8x8x5xf32>, vector<8x8x5xf32>, vector<8x8x5xf32>, vector<8x8x5xf32>, vector<8x8x5xf32>, vector<8x8x5xf32>, vector<8x8x5xf32>, vector<8x8x5xf32>, vector<8x8x5xf32>, vector<8x8x5xf32> -> vector<8x8x80xf32>
    %37 = tpu.concatenate %22, %23, %27, %28, %29, %30, %31, %32, %33, %34, %35 in 2 : vector<8x8x5xf32>, vector<8x8x5xf32>, vector<8x8x5xf32>, vector<8x8x5xf32>, vector<8x8x5xf32>, vector<8x8x5xf32>, vector<8x8x5xf32>, vector<8x8x5xf32>, vector<8x8x5xf32>, vector<8x8x5xf32>, vector<8x8x5xf32> -> vector<8x8x55xf32>
    %38 = tpu.concatenate %36, %37 in 2 : vector<8x8x80xf32>, vector<8x8x55xf32> -> vector<8x8x135xf32>
    %39 = vector.shape_cast %38 : vector<8x8x135xf32> to vector<64x135xf32>
    %40 = arith.truncf %39 : vector<64x135xf32> to vector<64x135xbf16>
    %c0_14 = arith.constant 0 : index
    %c0_15 = arith.constant 0 : index
    %41 = vector.load %arg5[%c0_14, %c0_15] : memref<135x8xbf16, #tpu.memory_space<vmem>>, vector<135x8xbf16>
    %cst = arith.constant dense<0.000000e+00> : vector<64x8xf32>
    %42 = tpu.matmul %40, %41, %cst {dimension_numbers = #tpu.dot_dimension_numbers<[1], [0], [0], [1], [0, 0, 1, 1], [], []>} : vector<64x135xbf16>, vector<135x8xbf16>, vector<64x8xf32> -> vector<64x8xf32>
    %c0_16 = arith.constant 0 : index
    %c0_17 = arith.constant 0 : index
    %43 = vector.load %arg6[%c0_16, %c0_17] : memref<1x8xf32, #tpu.memory_space<vmem>>, vector<1x8xf32>
    %44 = vector.broadcast %43 : vector<1x8xf32> to vector<64x8xf32>
    %45 = arith.addf %42, %44 : vector<64x8xf32>
    %cst_18 = arith.constant 0.000000e+00 : f32
    %46 = vector.broadcast %cst_18 : f32 to vector<64x8xf32>
    %47 = arith.maximumf %45, %46 : vector<64x8xf32>
    %48 = vector.shape_cast %47 : vector<64x8xf32> to vector<1x1x64x8xf32>
    %c0_19 = arith.constant 0 : index
    %c0_20 = arith.constant 0 : index
    %c0_21 = arith.constant 0 : index
    %c0_22 = arith.constant 0 : index
    %49 = vector.load %arg7[%c0_19, %c0_20, %c0_21, %c0_22] : memref<1x1x64x8xf32, #tpu.memory_space<vmem>>, vector<1x1x64x8xf32>
    tpu.vector_store %arg7[%c0_19, %c0_20, %c0_21, %c0_22], %48 {strides = array<i32>} : memref<1x1x64x8xf32, #tpu.memory_space<vmem>>, vector<1x1x64x8xf32>,
    return
  }
  func.func @transform_0(%arg0: i32, %arg1: i32) -> (i32, i32, i32, i32, i32) {
    %c0_i32 = arith.constant 0 : i32
    %0 = arith.addi %arg1, %c0_i32 : i32
    %c0_i32_0 = arith.constant 0 : i32
    %c0_i32_1 = arith.constant 0 : i32
    %c0_i32_2 = arith.constant 0 : i32
    %c0_i32_3 = arith.constant 0 : i32
    return %arg0, %0, %c0_i32_0, %c0_i32_1, %c0_i32_2 : i32, i32, i32, i32, i32
  }
  func.func @transform_1(%arg0: i32, %arg1: i32) -> (i32, i32, i32, i32, i32) {
    %c1_i32 = arith.constant 1 : i32
    %0 = arith.addi %arg1, %c1_i32 : i32
    %c0_i32 = arith.constant 0 : i32
    %c0_i32_0 = arith.constant 0 : i32
    %c0_i32_1 = arith.constant 0 : i32
    %c0_i32_2 = arith.constant 0 : i32
    return %arg0, %0, %c0_i32, %c0_i32_0, %c0_i32_1 : i32, i32, i32, i32, i32
  }
  func.func @transform_2(%arg0: i32, %arg1: i32) -> (i32, i32, i32, i32, i32) {
    %c2_i32 = arith.constant 2 : i32
    %0 = arith.addi %arg1, %c2_i32 : i32
    %c0_i32 = arith.constant 0 : i32
    %c0_i32_0 = arith.constant 0 : i32
    %c0_i32_1 = arith.constant 0 : i32
    %c0_i32_2 = arith.constant 0 : i32
    return %arg0, %0, %c0_i32, %c0_i32_0, %c0_i32_1 : i32, i32, i32, i32, i32
  }
  func.func @transform_3(%arg0: i32, %arg1: i32) -> (i32, i32) {
    %c0_i32 = arith.constant 0 : i32
    %c0_i32_0 = arith.constant 0 : i32
    %c0_i32_1 = arith.constant 0 : i32
    return %c0_i32, %c0_i32_0 : i32, i32
  }
  func.func @transform_4(%arg0: i32, %arg1: i32) -> (i32, i32) {
    %c0_i32 = arith.constant 0 : i32
    %c0_i32_0 = arith.constant 0 : i32
    %c0_i32_1 = arith.constant 0 : i32
    return %c0_i32, %c0_i32_0 : i32, i32
  }
  func.func @transform_5(%arg0: i32, %arg1: i32) -> (i32, i32, i32, i32) {
    %c0_i32 = arith.constant 0 : i32
    %c0_i32_0 = arith.constant 0 : i32
    %c0_i32_1 = arith.constant 0 : i32
    return %arg0, %arg1, %c0_i32, %c0_i32_0 : i32, i32, i32, i32
  }
}

module attributes {stable_mosaic.version = 11 : i64} {
  func.func @_conv3x3x3_kernel(%arg0: i32, %arg1: i32, %arg2: memref<1x1x10x10x8xbf16, #tpu.memory_space<vmem>>, %arg3: memref<1x1x10x10x8xbf16, #tpu.memory_space<vmem>>, %arg4: memref<1x1x10x10x8xbf16, #tpu.memory_space<vmem>>, %arg5: memref<216x8xbf16, #tpu.memory_space<vmem>>, %arg6: memref<1x8xf32, #tpu.memory_space<vmem>>, %arg7: memref<1x1x64x8xf32, #tpu.memory_space<vmem>>) attributes {dimension_semantics = [#tpu.dimension_semantics<parallel>, #tpu.dimension_semantics<parallel>], iteration_bounds = array<i64: 2, 8>, scalar_prefetch = 0 : i64, scratch_operands = 0 : i64, tpu.core_type = #tpu.core_type<tc>, window_params = [{transform_indices = @transform_0, window_bounds = array<i64: 1, 1, 10, 10, 8>}, {transform_indices = @transform_1, window_bounds = array<i64: 1, 1, 10, 10, 8>}, {transform_indices = @transform_2, window_bounds = array<i64: 1, 1, 10, 10, 8>}, {pipeline_mode = #tpu.pipeline_mode<synchronous>, transform_indices = @transform_3, window_bounds = array<i64: 216, 8>}, {pipeline_mode = #tpu.pipeline_mode<synchronous>, transform_indices = @transform_4, window_bounds = array<i64: 1, 8>}, {transform_indices = @transform_5, window_bounds = array<i64: 1, 1, 64, 8>}]} {
    %c0 = arith.constant 0 : index
    %c0_0 = arith.constant 0 : index
    %c0_1 = arith.constant 0 : index
    %c0_2 = arith.constant 0 : index
    %c0_3 = arith.constant 0 : index
    %0 = vector.load %arg2[%c0, %c0_0, %c0_1, %c0_2, %c0_3] : memref<1x1x10x10x8xbf16, #tpu.memory_space<vmem>>, vector<1x1x10x10x8xbf16>
    %1 = vector.shape_cast %0 : vector<1x1x10x10x8xbf16> to vector<10x10x8xbf16>
    %2 = arith.extf %1 : vector<10x10x8xbf16> to vector<10x10x8xf32>
    %3 = vector.extract_strided_slice %2 {offsets = [0, 0, 0], sizes = [8, 8, 8], strides = [1, 1, 1]} : vector<10x10x8xf32> to vector<8x8x8xf32>
    %4 = vector.extract_strided_slice %2 {offsets = [0, 1, 0], sizes = [8, 8, 8], strides = [1, 1, 1]} : vector<10x10x8xf32> to vector<8x8x8xf32>
    %5 = vector.extract_strided_slice %2 {offsets = [0, 2, 0], sizes = [8, 8, 8], strides = [1, 1, 1]} : vector<10x10x8xf32> to vector<8x8x8xf32>
    %6 = vector.extract_strided_slice %2 {offsets = [1, 0, 0], sizes = [8, 8, 8], strides = [1, 1, 1]} : vector<10x10x8xf32> to vector<8x8x8xf32>
    %7 = vector.extract_strided_slice %2 {offsets = [1, 1, 0], sizes = [8, 8, 8], strides = [1, 1, 1]} : vector<10x10x8xf32> to vector<8x8x8xf32>
    %8 = vector.extract_strided_slice %2 {offsets = [1, 2, 0], sizes = [8, 8, 8], strides = [1, 1, 1]} : vector<10x10x8xf32> to vector<8x8x8xf32>
    %9 = vector.extract_strided_slice %2 {offsets = [2, 0, 0], sizes = [8, 8, 8], strides = [1, 1, 1]} : vector<10x10x8xf32> to vector<8x8x8xf32>
    %10 = vector.extract_strided_slice %2 {offsets = [2, 1, 0], sizes = [8, 8, 8], strides = [1, 1, 1]} : vector<10x10x8xf32> to vector<8x8x8xf32>
    %11 = vector.extract_strided_slice %2 {offsets = [2, 2, 0], sizes = [8, 8, 8], strides = [1, 1, 1]} : vector<10x10x8xf32> to vector<8x8x8xf32>
    %c0_4 = arith.constant 0 : index
    %c0_5 = arith.constant 0 : index
    %c0_6 = arith.constant 0 : index
    %c0_7 = arith.constant 0 : index
    %c0_8 = arith.constant 0 : index
    %12 = vector.load %arg3[%c0_4, %c0_5, %c0_6, %c0_7, %c0_8] : memref<1x1x10x10x8xbf16, #tpu.memory_space<vmem>>, vector<1x1x10x10x8xbf16>
    %13 = vector.shape_cast %12 : vector<1x1x10x10x8xbf16> to vector<10x10x8xbf16>
    %14 = arith.extf %13 : vector<10x10x8xbf16> to vector<10x10x8xf32>
    %15 = vector.extract_strided_slice %14 {offsets = [0, 0, 0], sizes = [8, 8, 8], strides = [1, 1, 1]} : vector<10x10x8xf32> to vector<8x8x8xf32>
    %16 = vector.extract_strided_slice %14 {offsets = [0, 1, 0], sizes = [8, 8, 8], strides = [1, 1, 1]} : vector<10x10x8xf32> to vector<8x8x8xf32>
    %17 = vector.extract_strided_slice %14 {offsets = [0, 2, 0], sizes = [8, 8, 8], strides = [1, 1, 1]} : vector<10x10x8xf32> to vector<8x8x8xf32>
    %18 = vector.extract_strided_slice %14 {offsets = [1, 0, 0], sizes = [8, 8, 8], strides = [1, 1, 1]} : vector<10x10x8xf32> to vector<8x8x8xf32>
    %19 = vector.extract_strided_slice %14 {offsets = [1, 1, 0], sizes = [8, 8, 8], strides = [1, 1, 1]} : vector<10x10x8xf32> to vector<8x8x8xf32>
    %20 = vector.extract_strided_slice %14 {offsets = [1, 2, 0], sizes = [8, 8, 8], strides = [1, 1, 1]} : vector<10x10x8xf32> to vector<8x8x8xf32>
    %21 = vector.extract_strided_slice %14 {offsets = [2, 0, 0], sizes = [8, 8, 8], strides = [1, 1, 1]} : vector<10x10x8xf32> to vector<8x8x8xf32>
    %22 = vector.extract_strided_slice %14 {offsets = [2, 1, 0], sizes = [8, 8, 8], strides = [1, 1, 1]} : vector<10x10x8xf32> to vector<8x8x8xf32>
    %23 = vector.extract_strided_slice %14 {offsets = [2, 2, 0], sizes = [8, 8, 8], strides = [1, 1, 1]} : vector<10x10x8xf32> to vector<8x8x8xf32>
    %c0_9 = arith.constant 0 : index
    %c0_10 = arith.constant 0 : index
    %c0_11 = arith.constant 0 : index
    %c0_12 = arith.constant 0 : index
    %c0_13 = arith.constant 0 : index
    %24 = vector.load %arg4[%c0_9, %c0_10, %c0_11, %c0_12, %c0_13] : memref<1x1x10x10x8xbf16, #tpu.memory_space<vmem>>, vector<1x1x10x10x8xbf16>
    %25 = vector.shape_cast %24 : vector<1x1x10x10x8xbf16> to vector<10x10x8xbf16>
    %26 = arith.extf %25 : vector<10x10x8xbf16> to vector<10x10x8xf32>
    %27 = vector.extract_strided_slice %26 {offsets = [0, 0, 0], sizes = [8, 8, 8], strides = [1, 1, 1]} : vector<10x10x8xf32> to vector<8x8x8xf32>
    %28 = vector.extract_strided_slice %26 {offsets = [0, 1, 0], sizes = [8, 8, 8], strides = [1, 1, 1]} : vector<10x10x8xf32> to vector<8x8x8xf32>
    %29 = vector.extract_strided_slice %26 {offsets = [0, 2, 0], sizes = [8, 8, 8], strides = [1, 1, 1]} : vector<10x10x8xf32> to vector<8x8x8xf32>
    %30 = vector.extract_strided_slice %26 {offsets = [1, 0, 0], sizes = [8, 8, 8], strides = [1, 1, 1]} : vector<10x10x8xf32> to vector<8x8x8xf32>
    %31 = vector.extract_strided_slice %26 {offsets = [1, 1, 0], sizes = [8, 8, 8], strides = [1, 1, 1]} : vector<10x10x8xf32> to vector<8x8x8xf32>
    %32 = vector.extract_strided_slice %26 {offsets = [1, 2, 0], sizes = [8, 8, 8], strides = [1, 1, 1]} : vector<10x10x8xf32> to vector<8x8x8xf32>
    %33 = vector.extract_strided_slice %26 {offsets = [2, 0, 0], sizes = [8, 8, 8], strides = [1, 1, 1]} : vector<10x10x8xf32> to vector<8x8x8xf32>
    %34 = vector.extract_strided_slice %26 {offsets = [2, 1, 0], sizes = [8, 8, 8], strides = [1, 1, 1]} : vector<10x10x8xf32> to vector<8x8x8xf32>
    %35 = vector.extract_strided_slice %26 {offsets = [2, 2, 0], sizes = [8, 8, 8], strides = [1, 1, 1]} : vector<10x10x8xf32> to vector<8x8x8xf32>
    %36 = tpu.concatenate %3, %4, %5, %6, %7, %8, %9, %10, %11, %15, %16, %17, %18, %19, %20, %21 in 2 : vector<8x8x8xf32>, vector<8x8x8xf32>, vector<8x8x8xf32>, vector<8x8x8xf32>, vector<8x8x8xf32>, vector<8x8x8xf32>, vector<8x8x8xf32>, vector<8x8x8xf32>, vector<8x8x8xf32>, vector<8x8x8xf32>, vector<8x8x8xf32>, vector<8x8x8xf32>, vector<8x8x8xf32>, vector<8x8x8xf32>, vector<8x8x8xf32>, vector<8x8x8xf32> -> vector<8x8x128xf32>
    %37 = tpu.concatenate %22, %23, %27, %28, %29, %30, %31, %32, %33, %34, %35 in 2 : vector<8x8x8xf32>, vector<8x8x8xf32>, vector<8x8x8xf32>, vector<8x8x8xf32>, vector<8x8x8xf32>, vector<8x8x8xf32>, vector<8x8x8xf32>, vector<8x8x8xf32>, vector<8x8x8xf32>, vector<8x8x8xf32>, vector<8x8x8xf32> -> vector<8x8x88xf32>
    %38 = tpu.concatenate %36, %37 in 2 : vector<8x8x128xf32>, vector<8x8x88xf32> -> vector<8x8x216xf32>
    %39 = vector.shape_cast %38 : vector<8x8x216xf32> to vector<64x216xf32>
    %40 = arith.truncf %39 : vector<64x216xf32> to vector<64x216xbf16>
    %c0_14 = arith.constant 0 : index
    %c0_15 = arith.constant 0 : index
    %41 = vector.load %arg5[%c0_14, %c0_15] : memref<216x8xbf16, #tpu.memory_space<vmem>>, vector<216x8xbf16>
    %cst = arith.constant dense<0.000000e+00> : vector<64x8xf32>
    %42 = tpu.matmul %40, %41, %cst {dimension_numbers = #tpu.dot_dimension_numbers<[1], [0], [0], [1], [0, 0, 1, 1], [], []>} : vector<64x216xbf16>, vector<216x8xbf16>, vector<64x8xf32> -> vector<64x8xf32>
    %c0_16 = arith.constant 0 : index
    %c0_17 = arith.constant 0 : index
    %43 = vector.load %arg6[%c0_16, %c0_17] : memref<1x8xf32, #tpu.memory_space<vmem>>, vector<1x8xf32>
    %44 = vector.broadcast %43 : vector<1x8xf32> to vector<64x8xf32>
    %45 = arith.addf %42, %44 : vector<64x8xf32>
    %cst_18 = arith.constant 0.000000e+00 : f32
    %46 = vector.broadcast %cst_18 : f32 to vector<64x8xf32>
    %47 = arith.maximumf %45, %46 : vector<64x8xf32>
    %48 = vector.shape_cast %47 : vector<64x8xf32> to vector<1x1x64x8xf32>
    %c0_19 = arith.constant 0 : index
    %c0_20 = arith.constant 0 : index
    %c0_21 = arith.constant 0 : index
    %c0_22 = arith.constant 0 : index
    %49 = vector.load %arg7[%c0_19, %c0_20, %c0_21, %c0_22] : memref<1x1x64x8xf32, #tpu.memory_space<vmem>>, vector<1x1x64x8xf32>
    tpu.vector_store %arg7[%c0_19, %c0_20, %c0_21, %c0_22], %48 {strides = array<i32>} : memref<1x1x64x8xf32, #tpu.memory_space<vmem>>, vector<1x1x64x8xf32>,
    return
  }
  func.func @transform_0(%arg0: i32, %arg1: i32) -> (i32, i32, i32, i32, i32) {
    %c0_i32 = arith.constant 0 : i32
    %0 = arith.addi %arg1, %c0_i32 : i32
    %c0_i32_0 = arith.constant 0 : i32
    %c0_i32_1 = arith.constant 0 : i32
    %c0_i32_2 = arith.constant 0 : i32
    %c0_i32_3 = arith.constant 0 : i32
    return %arg0, %0, %c0_i32_0, %c0_i32_1, %c0_i32_2 : i32, i32, i32, i32, i32
  }
  func.func @transform_1(%arg0: i32, %arg1: i32) -> (i32, i32, i32, i32, i32) {
    %c1_i32 = arith.constant 1 : i32
    %0 = arith.addi %arg1, %c1_i32 : i32
    %c0_i32 = arith.constant 0 : i32
    %c0_i32_0 = arith.constant 0 : i32
    %c0_i32_1 = arith.constant 0 : i32
    %c0_i32_2 = arith.constant 0 : i32
    return %arg0, %0, %c0_i32, %c0_i32_0, %c0_i32_1 : i32, i32, i32, i32, i32
  }
  func.func @transform_2(%arg0: i32, %arg1: i32) -> (i32, i32, i32, i32, i32) {
    %c2_i32 = arith.constant 2 : i32
    %0 = arith.addi %arg1, %c2_i32 : i32
    %c0_i32 = arith.constant 0 : i32
    %c0_i32_0 = arith.constant 0 : i32
    %c0_i32_1 = arith.constant 0 : i32
    %c0_i32_2 = arith.constant 0 : i32
    return %arg0, %0, %c0_i32, %c0_i32_0, %c0_i32_1 : i32, i32, i32, i32, i32
  }
  func.func @transform_3(%arg0: i32, %arg1: i32) -> (i32, i32) {
    %c0_i32 = arith.constant 0 : i32
    %c0_i32_0 = arith.constant 0 : i32
    %c0_i32_1 = arith.constant 0 : i32
    return %c0_i32, %c0_i32_0 : i32, i32
  }
  func.func @transform_4(%arg0: i32, %arg1: i32) -> (i32, i32) {
    %c0_i32 = arith.constant 0 : i32
    %c0_i32_0 = arith.constant 0 : i32
    %c0_i32_1 = arith.constant 0 : i32
    return %c0_i32, %c0_i32_0 : i32, i32
  }
  func.func @transform_5(%arg0: i32, %arg1: i32) -> (i32, i32, i32, i32) {
    %c0_i32 = arith.constant 0 : i32
    %c0_i32_0 = arith.constant 0 : i32
    %c0_i32_1 = arith.constant 0 : i32
    return %arg0, %arg1, %c0_i32, %c0_i32_0 : i32, i32, i32, i32
  }
}

module attributes {stable_mosaic.version = 11 : i64} {
  func.func @_bn_pool_kernel(%arg0: i32, %arg1: memref<1x2x8x4x16xf32, #tpu.memory_space<vmem>>, %arg2: memref<1x8xf32, #tpu.memory_space<vmem>>, %arg3: memref<1x8xf32, #tpu.memory_space<vmem>>, %arg4: memref<1x4x4x8xf32, #tpu.memory_space<vmem>>) attributes {dimension_semantics = [#tpu.dimension_semantics<parallel>], iteration_bounds = array<i64: 8>, scalar_prefetch = 0 : i64, scratch_operands = 0 : i64, tpu.core_type = #tpu.core_type<tc>, window_params = [{transform_indices = @transform_0, window_bounds = array<i64: 1, 2, 8, 4, 16>}, {pipeline_mode = #tpu.pipeline_mode<synchronous>, transform_indices = @transform_1, window_bounds = array<i64: 1, 8>}, {pipeline_mode = #tpu.pipeline_mode<synchronous>, transform_indices = @transform_2, window_bounds = array<i64: 1, 8>}, {transform_indices = @transform_3, window_bounds = array<i64: 1, 4, 4, 8>}]} {
    %c0 = arith.constant 0 : index
    %c0_0 = arith.constant 0 : index
    %c0_1 = arith.constant 0 : index
    %c0_2 = arith.constant 0 : index
    %c0_3 = arith.constant 0 : index
    %0 = vector.load %arg1[%c0, %c0_0, %c0_1, %c0_2, %c0_3] : memref<1x2x8x4x16xf32, #tpu.memory_space<vmem>>, vector<1x2x8x4x16xf32>
    %1 = vector.shape_cast %0 : vector<1x2x8x4x16xf32> to vector<2x8x4x16xf32>
    %2 = vector.extract_strided_slice %1 {offsets = [0, 0, 0, 0], sizes = [1, 8, 4, 16], strides = [1, 1, 1, 1]} : vector<2x8x4x16xf32> to vector<1x8x4x16xf32>
    %3 = vector.shape_cast %2 : vector<1x8x4x16xf32> to vector<8x4x16xf32>
    %4 = vector.extract_strided_slice %1 {offsets = [1, 0, 0, 0], sizes = [1, 8, 4, 16], strides = [1, 1, 1, 1]} : vector<2x8x4x16xf32> to vector<1x8x4x16xf32>
    %5 = vector.shape_cast %4 : vector<1x8x4x16xf32> to vector<8x4x16xf32>
    %6 = arith.addf %3, %5 : vector<8x4x16xf32>
    %7 = vector.shape_cast %6 : vector<8x4x16xf32> to vector<4x2x4x16xf32>
    %8 = vector.extract_strided_slice %7 {offsets = [0, 0, 0, 0], sizes = [4, 1, 4, 16], strides = [1, 1, 1, 1]} : vector<4x2x4x16xf32> to vector<4x1x4x16xf32>
    %9 = vector.shape_cast %8 : vector<4x1x4x16xf32> to vector<4x4x16xf32>
    %10 = vector.extract_strided_slice %7 {offsets = [0, 1, 0, 0], sizes = [4, 1, 4, 16], strides = [1, 1, 1, 1]} : vector<4x2x4x16xf32> to vector<4x1x4x16xf32>
    %11 = vector.shape_cast %10 : vector<4x1x4x16xf32> to vector<4x4x16xf32>
    %12 = arith.addf %9, %11 : vector<4x4x16xf32>
    %13 = vector.extract_strided_slice %12 {offsets = [0, 0, 0], sizes = [4, 4, 8], strides = [1, 1, 1]} : vector<4x4x16xf32> to vector<4x4x8xf32>
    %14 = vector.extract_strided_slice %12 {offsets = [0, 0, 8], sizes = [4, 4, 8], strides = [1, 1, 1]} : vector<4x4x16xf32> to vector<4x4x8xf32>
    %15 = arith.addf %13, %14 : vector<4x4x8xf32>
    %c0_4 = arith.constant 0 : index
    %c0_5 = arith.constant 0 : index
    %16 = vector.load %arg2[%c0_4, %c0_5] : memref<1x8xf32, #tpu.memory_space<vmem>>, vector<1x8xf32>
    %17 = vector.shape_cast %16 : vector<1x8xf32> to vector<8xf32>
    %18 = vector.shape_cast %17 : vector<8xf32> to vector<1x1x8xf32>
    %19 = vector.broadcast %18 : vector<1x1x8xf32> to vector<4x4x8xf32>
    %20 = arith.mulf %15, %19 : vector<4x4x8xf32>
    %c0_6 = arith.constant 0 : index
    %c0_7 = arith.constant 0 : index
    %21 = vector.load %arg3[%c0_6, %c0_7] : memref<1x8xf32, #tpu.memory_space<vmem>>, vector<1x8xf32>
    %22 = vector.shape_cast %21 : vector<1x8xf32> to vector<8xf32>
    %23 = vector.shape_cast %22 : vector<8xf32> to vector<1x1x8xf32>
    %24 = vector.broadcast %23 : vector<1x1x8xf32> to vector<4x4x8xf32>
    %25 = arith.addf %20, %24 : vector<4x4x8xf32>
    %26 = vector.shape_cast %25 : vector<4x4x8xf32> to vector<1x4x4x8xf32>
    %c0_8 = arith.constant 0 : index
    %c0_9 = arith.constant 0 : index
    %c0_10 = arith.constant 0 : index
    %c0_11 = arith.constant 0 : index
    %27 = vector.load %arg4[%c0_8, %c0_9, %c0_10, %c0_11] : memref<1x4x4x8xf32, #tpu.memory_space<vmem>>, vector<1x4x4x8xf32>
    tpu.vector_store %arg4[%c0_8, %c0_9, %c0_10, %c0_11], %26 {strides = array<i32>} : memref<1x4x4x8xf32, #tpu.memory_space<vmem>>, vector<1x4x4x8xf32>,
    return
  }
  func.func @transform_0(%arg0: i32) -> (i32, i32, i32, i32, i32) {
    %c0_i32 = arith.constant 0 : i32
    %c0_i32_0 = arith.constant 0 : i32
    %c0_i32_1 = arith.constant 0 : i32
    %c0_i32_2 = arith.constant 0 : i32
    %c0_i32_3 = arith.constant 0 : i32
    return %arg0, %c0_i32, %c0_i32_0, %c0_i32_1, %c0_i32_2 : i32, i32, i32, i32, i32
  }
  func.func @transform_1(%arg0: i32) -> (i32, i32) {
    %c0_i32 = arith.constant 0 : i32
    %c0_i32_0 = arith.constant 0 : i32
    %c0_i32_1 = arith.constant 0 : i32
    return %c0_i32, %c0_i32_0 : i32, i32
  }
  func.func @transform_2(%arg0: i32) -> (i32, i32) {
    %c0_i32 = arith.constant 0 : i32
    %c0_i32_0 = arith.constant 0 : i32
    %c0_i32_1 = arith.constant 0 : i32
    return %c0_i32, %c0_i32_0 : i32, i32
  }
  func.func @transform_3(%arg0: i32) -> (i32, i32, i32, i32) {
    %c0_i32 = arith.constant 0 : i32
    %c0_i32_0 = arith.constant 0 : i32
    %c0_i32_1 = arith.constant 0 : i32
    %c0_i32_2 = arith.constant 0 : i32
    return %arg0, %c0_i32, %c0_i32_0, %c0_i32_1 : i32, i32, i32, i32
  }
}

module attributes {stable_mosaic.version = 11 : i64} {
  func.func @_conv3x3x3_kernel(%arg0: i32, %arg1: i32, %arg2: memref<1x1x6x6x8xbf16, #tpu.memory_space<vmem>>, %arg3: memref<1x1x6x6x8xbf16, #tpu.memory_space<vmem>>, %arg4: memref<1x1x6x6x8xbf16, #tpu.memory_space<vmem>>, %arg5: memref<216x16xbf16, #tpu.memory_space<vmem>>, %arg6: memref<1x16xf32, #tpu.memory_space<vmem>>, %arg7: memref<1x1x16x16xf32, #tpu.memory_space<vmem>>) attributes {dimension_semantics = [#tpu.dimension_semantics<parallel>, #tpu.dimension_semantics<parallel>], iteration_bounds = array<i64: 2, 4>, scalar_prefetch = 0 : i64, scratch_operands = 0 : i64, tpu.core_type = #tpu.core_type<tc>, window_params = [{transform_indices = @transform_0, window_bounds = array<i64: 1, 1, 6, 6, 8>}, {transform_indices = @transform_1, window_bounds = array<i64: 1, 1, 6, 6, 8>}, {transform_indices = @transform_2, window_bounds = array<i64: 1, 1, 6, 6, 8>}, {pipeline_mode = #tpu.pipeline_mode<synchronous>, transform_indices = @transform_3, window_bounds = array<i64: 216, 16>}, {pipeline_mode = #tpu.pipeline_mode<synchronous>, transform_indices = @transform_4, window_bounds = array<i64: 1, 16>}, {transform_indices = @transform_5, window_bounds = array<i64: 1, 1, 16, 16>}]} {
    %c0 = arith.constant 0 : index
    %c0_0 = arith.constant 0 : index
    %c0_1 = arith.constant 0 : index
    %c0_2 = arith.constant 0 : index
    %c0_3 = arith.constant 0 : index
    %0 = vector.load %arg2[%c0, %c0_0, %c0_1, %c0_2, %c0_3] : memref<1x1x6x6x8xbf16, #tpu.memory_space<vmem>>, vector<1x1x6x6x8xbf16>
    %1 = vector.shape_cast %0 : vector<1x1x6x6x8xbf16> to vector<6x6x8xbf16>
    %2 = arith.extf %1 : vector<6x6x8xbf16> to vector<6x6x8xf32>
    %3 = vector.extract_strided_slice %2 {offsets = [0, 0, 0], sizes = [4, 4, 8], strides = [1, 1, 1]} : vector<6x6x8xf32> to vector<4x4x8xf32>
    %4 = vector.extract_strided_slice %2 {offsets = [0, 1, 0], sizes = [4, 4, 8], strides = [1, 1, 1]} : vector<6x6x8xf32> to vector<4x4x8xf32>
    %5 = vector.extract_strided_slice %2 {offsets = [0, 2, 0], sizes = [4, 4, 8], strides = [1, 1, 1]} : vector<6x6x8xf32> to vector<4x4x8xf32>
    %6 = vector.extract_strided_slice %2 {offsets = [1, 0, 0], sizes = [4, 4, 8], strides = [1, 1, 1]} : vector<6x6x8xf32> to vector<4x4x8xf32>
    %7 = vector.extract_strided_slice %2 {offsets = [1, 1, 0], sizes = [4, 4, 8], strides = [1, 1, 1]} : vector<6x6x8xf32> to vector<4x4x8xf32>
    %8 = vector.extract_strided_slice %2 {offsets = [1, 2, 0], sizes = [4, 4, 8], strides = [1, 1, 1]} : vector<6x6x8xf32> to vector<4x4x8xf32>
    %9 = vector.extract_strided_slice %2 {offsets = [2, 0, 0], sizes = [4, 4, 8], strides = [1, 1, 1]} : vector<6x6x8xf32> to vector<4x4x8xf32>
    %10 = vector.extract_strided_slice %2 {offsets = [2, 1, 0], sizes = [4, 4, 8], strides = [1, 1, 1]} : vector<6x6x8xf32> to vector<4x4x8xf32>
    %11 = vector.extract_strided_slice %2 {offsets = [2, 2, 0], sizes = [4, 4, 8], strides = [1, 1, 1]} : vector<6x6x8xf32> to vector<4x4x8xf32>
    %c0_4 = arith.constant 0 : index
    %c0_5 = arith.constant 0 : index
    %c0_6 = arith.constant 0 : index
    %c0_7 = arith.constant 0 : index
    %c0_8 = arith.constant 0 : index
    %12 = vector.load %arg3[%c0_4, %c0_5, %c0_6, %c0_7, %c0_8] : memref<1x1x6x6x8xbf16, #tpu.memory_space<vmem>>, vector<1x1x6x6x8xbf16>
    %13 = vector.shape_cast %12 : vector<1x1x6x6x8xbf16> to vector<6x6x8xbf16>
    %14 = arith.extf %13 : vector<6x6x8xbf16> to vector<6x6x8xf32>
    %15 = vector.extract_strided_slice %14 {offsets = [0, 0, 0], sizes = [4, 4, 8], strides = [1, 1, 1]} : vector<6x6x8xf32> to vector<4x4x8xf32>
    %16 = vector.extract_strided_slice %14 {offsets = [0, 1, 0], sizes = [4, 4, 8], strides = [1, 1, 1]} : vector<6x6x8xf32> to vector<4x4x8xf32>
    %17 = vector.extract_strided_slice %14 {offsets = [0, 2, 0], sizes = [4, 4, 8], strides = [1, 1, 1]} : vector<6x6x8xf32> to vector<4x4x8xf32>
    %18 = vector.extract_strided_slice %14 {offsets = [1, 0, 0], sizes = [4, 4, 8], strides = [1, 1, 1]} : vector<6x6x8xf32> to vector<4x4x8xf32>
    %19 = vector.extract_strided_slice %14 {offsets = [1, 1, 0], sizes = [4, 4, 8], strides = [1, 1, 1]} : vector<6x6x8xf32> to vector<4x4x8xf32>
    %20 = vector.extract_strided_slice %14 {offsets = [1, 2, 0], sizes = [4, 4, 8], strides = [1, 1, 1]} : vector<6x6x8xf32> to vector<4x4x8xf32>
    %21 = vector.extract_strided_slice %14 {offsets = [2, 0, 0], sizes = [4, 4, 8], strides = [1, 1, 1]} : vector<6x6x8xf32> to vector<4x4x8xf32>
    %22 = vector.extract_strided_slice %14 {offsets = [2, 1, 0], sizes = [4, 4, 8], strides = [1, 1, 1]} : vector<6x6x8xf32> to vector<4x4x8xf32>
    %23 = vector.extract_strided_slice %14 {offsets = [2, 2, 0], sizes = [4, 4, 8], strides = [1, 1, 1]} : vector<6x6x8xf32> to vector<4x4x8xf32>
    %c0_9 = arith.constant 0 : index
    %c0_10 = arith.constant 0 : index
    %c0_11 = arith.constant 0 : index
    %c0_12 = arith.constant 0 : index
    %c0_13 = arith.constant 0 : index
    %24 = vector.load %arg4[%c0_9, %c0_10, %c0_11, %c0_12, %c0_13] : memref<1x1x6x6x8xbf16, #tpu.memory_space<vmem>>, vector<1x1x6x6x8xbf16>
    %25 = vector.shape_cast %24 : vector<1x1x6x6x8xbf16> to vector<6x6x8xbf16>
    %26 = arith.extf %25 : vector<6x6x8xbf16> to vector<6x6x8xf32>
    %27 = vector.extract_strided_slice %26 {offsets = [0, 0, 0], sizes = [4, 4, 8], strides = [1, 1, 1]} : vector<6x6x8xf32> to vector<4x4x8xf32>
    %28 = vector.extract_strided_slice %26 {offsets = [0, 1, 0], sizes = [4, 4, 8], strides = [1, 1, 1]} : vector<6x6x8xf32> to vector<4x4x8xf32>
    %29 = vector.extract_strided_slice %26 {offsets = [0, 2, 0], sizes = [4, 4, 8], strides = [1, 1, 1]} : vector<6x6x8xf32> to vector<4x4x8xf32>
    %30 = vector.extract_strided_slice %26 {offsets = [1, 0, 0], sizes = [4, 4, 8], strides = [1, 1, 1]} : vector<6x6x8xf32> to vector<4x4x8xf32>
    %31 = vector.extract_strided_slice %26 {offsets = [1, 1, 0], sizes = [4, 4, 8], strides = [1, 1, 1]} : vector<6x6x8xf32> to vector<4x4x8xf32>
    %32 = vector.extract_strided_slice %26 {offsets = [1, 2, 0], sizes = [4, 4, 8], strides = [1, 1, 1]} : vector<6x6x8xf32> to vector<4x4x8xf32>
    %33 = vector.extract_strided_slice %26 {offsets = [2, 0, 0], sizes = [4, 4, 8], strides = [1, 1, 1]} : vector<6x6x8xf32> to vector<4x4x8xf32>
    %34 = vector.extract_strided_slice %26 {offsets = [2, 1, 0], sizes = [4, 4, 8], strides = [1, 1, 1]} : vector<6x6x8xf32> to vector<4x4x8xf32>
    %35 = vector.extract_strided_slice %26 {offsets = [2, 2, 0], sizes = [4, 4, 8], strides = [1, 1, 1]} : vector<6x6x8xf32> to vector<4x4x8xf32>
    %36 = tpu.concatenate %3, %4, %5, %6, %7, %8, %9, %10, %11, %15, %16, %17, %18, %19, %20, %21 in 2 : vector<4x4x8xf32>, vector<4x4x8xf32>, vector<4x4x8xf32>, vector<4x4x8xf32>, vector<4x4x8xf32>, vector<4x4x8xf32>, vector<4x4x8xf32>, vector<4x4x8xf32>, vector<4x4x8xf32>, vector<4x4x8xf32>, vector<4x4x8xf32>, vector<4x4x8xf32>, vector<4x4x8xf32>, vector<4x4x8xf32>, vector<4x4x8xf32>, vector<4x4x8xf32> -> vector<4x4x128xf32>
    %37 = tpu.concatenate %22, %23, %27, %28, %29, %30, %31, %32, %33, %34, %35 in 2 : vector<4x4x8xf32>, vector<4x4x8xf32>, vector<4x4x8xf32>, vector<4x4x8xf32>, vector<4x4x8xf32>, vector<4x4x8xf32>, vector<4x4x8xf32>, vector<4x4x8xf32>, vector<4x4x8xf32>, vector<4x4x8xf32>, vector<4x4x8xf32> -> vector<4x4x88xf32>
    %38 = tpu.concatenate %36, %37 in 2 : vector<4x4x128xf32>, vector<4x4x88xf32> -> vector<4x4x216xf32>
    %39 = vector.shape_cast %38 : vector<4x4x216xf32> to vector<16x216xf32>
    %40 = arith.truncf %39 : vector<16x216xf32> to vector<16x216xbf16>
    %c0_14 = arith.constant 0 : index
    %c0_15 = arith.constant 0 : index
    %41 = vector.load %arg5[%c0_14, %c0_15] : memref<216x16xbf16, #tpu.memory_space<vmem>>, vector<216x16xbf16>
    %cst = arith.constant dense<0.000000e+00> : vector<16x16xf32>
    %42 = tpu.matmul %40, %41, %cst {dimension_numbers = #tpu.dot_dimension_numbers<[1], [0], [0], [1], [0, 0, 1, 1], [], []>} : vector<16x216xbf16>, vector<216x16xbf16>, vector<16x16xf32> -> vector<16x16xf32>
    %c0_16 = arith.constant 0 : index
    %c0_17 = arith.constant 0 : index
    %43 = vector.load %arg6[%c0_16, %c0_17] : memref<1x16xf32, #tpu.memory_space<vmem>>, vector<1x16xf32>
    %44 = vector.broadcast %43 : vector<1x16xf32> to vector<16x16xf32>
    %45 = arith.addf %42, %44 : vector<16x16xf32>
    %cst_18 = arith.constant 0.000000e+00 : f32
    %46 = vector.broadcast %cst_18 : f32 to vector<16x16xf32>
    %47 = arith.maximumf %45, %46 : vector<16x16xf32>
    %48 = vector.shape_cast %47 : vector<16x16xf32> to vector<1x1x16x16xf32>
    %c0_19 = arith.constant 0 : index
    %c0_20 = arith.constant 0 : index
    %c0_21 = arith.constant 0 : index
    %c0_22 = arith.constant 0 : index
    %49 = vector.load %arg7[%c0_19, %c0_20, %c0_21, %c0_22] : memref<1x1x16x16xf32, #tpu.memory_space<vmem>>, vector<1x1x16x16xf32>
    tpu.vector_store %arg7[%c0_19, %c0_20, %c0_21, %c0_22], %48 {strides = array<i32>} : memref<1x1x16x16xf32, #tpu.memory_space<vmem>>, vector<1x1x16x16xf32>,
    return
  }
  func.func @transform_0(%arg0: i32, %arg1: i32) -> (i32, i32, i32, i32, i32) {
    %c0_i32 = arith.constant 0 : i32
    %0 = arith.addi %arg1, %c0_i32 : i32
    %c0_i32_0 = arith.constant 0 : i32
    %c0_i32_1 = arith.constant 0 : i32
    %c0_i32_2 = arith.constant 0 : i32
    %c0_i32_3 = arith.constant 0 : i32
    return %arg0, %0, %c0_i32_0, %c0_i32_1, %c0_i32_2 : i32, i32, i32, i32, i32
  }
  func.func @transform_1(%arg0: i32, %arg1: i32) -> (i32, i32, i32, i32, i32) {
    %c1_i32 = arith.constant 1 : i32
    %0 = arith.addi %arg1, %c1_i32 : i32
    %c0_i32 = arith.constant 0 : i32
    %c0_i32_0 = arith.constant 0 : i32
    %c0_i32_1 = arith.constant 0 : i32
    %c0_i32_2 = arith.constant 0 : i32
    return %arg0, %0, %c0_i32, %c0_i32_0, %c0_i32_1 : i32, i32, i32, i32, i32
  }
  func.func @transform_2(%arg0: i32, %arg1: i32) -> (i32, i32, i32, i32, i32) {
    %c2_i32 = arith.constant 2 : i32
    %0 = arith.addi %arg1, %c2_i32 : i32
    %c0_i32 = arith.constant 0 : i32
    %c0_i32_0 = arith.constant 0 : i32
    %c0_i32_1 = arith.constant 0 : i32
    %c0_i32_2 = arith.constant 0 : i32
    return %arg0, %0, %c0_i32, %c0_i32_0, %c0_i32_1 : i32, i32, i32, i32, i32
  }
  func.func @transform_3(%arg0: i32, %arg1: i32) -> (i32, i32) {
    %c0_i32 = arith.constant 0 : i32
    %c0_i32_0 = arith.constant 0 : i32
    %c0_i32_1 = arith.constant 0 : i32
    return %c0_i32, %c0_i32_0 : i32, i32
  }
  func.func @transform_4(%arg0: i32, %arg1: i32) -> (i32, i32) {
    %c0_i32 = arith.constant 0 : i32
    %c0_i32_0 = arith.constant 0 : i32
    %c0_i32_1 = arith.constant 0 : i32
    return %c0_i32, %c0_i32_0 : i32, i32
  }
  func.func @transform_5(%arg0: i32, %arg1: i32) -> (i32, i32, i32, i32) {
    %c0_i32 = arith.constant 0 : i32
    %c0_i32_0 = arith.constant 0 : i32
    %c0_i32_1 = arith.constant 0 : i32
    return %arg0, %arg1, %c0_i32, %c0_i32_0 : i32, i32, i32, i32
  }
}

module attributes {stable_mosaic.version = 11 : i64} {
  func.func @_head_kernel(%arg0: memref<2x64x16xf32, #tpu.memory_space<vmem>>, %arg1: memref<16x12xf32, #tpu.memory_space<vmem>>, %arg2: memref<1x12xf32, #tpu.memory_space<vmem>>, %arg3: memref<2x16xf32, #tpu.memory_space<vmem>>, %arg4: memref<2x6xf32, #tpu.memory_space<vmem>>, %arg5: memref<2x6xf32, #tpu.memory_space<vmem>>) attributes {dimension_semantics = [], scalar_prefetch = 0 : i64, scratch_operands = 0 : i64, tpu.core_type = #tpu.core_type<tc>} {
    %c0 = arith.constant 0 : index
    %c0_0 = arith.constant 0 : index
    %c0_1 = arith.constant 0 : index
    %0 = vector.load %arg0[%c0, %c0_0, %c0_1] : memref<2x64x16xf32, #tpu.memory_space<vmem>>, vector<2x64x16xf32>
    %cst = arith.constant dense<0.000000e+00> : vector<2x16xf32>
    %1 = vector.multi_reduction <add>, %0, %cst [1] : vector<2x64x16xf32> to vector<2x16xf32>
    %cst_2 = arith.constant 6.400000e+01 : f32
    %2 = vector.broadcast %cst_2 : f32 to vector<2x16xf32>
    %3 = arith.divf %1, %2 : vector<2x16xf32>
    %c0_3 = arith.constant 0 : index
    %c0_4 = arith.constant 0 : index
    %4 = vector.load %arg3[%c0_3, %c0_4] : memref<2x16xf32, #tpu.memory_space<vmem>>, vector<2x16xf32>
    tpu.vector_store %arg3[%c0_3, %c0_4], %3 {strides = array<i32>} : memref<2x16xf32, #tpu.memory_space<vmem>>, vector<2x16xf32>,
    %c0_5 = arith.constant 0 : index
    %c0_6 = arith.constant 0 : index
    %5 = vector.load %arg1[%c0_5, %c0_6] : memref<16x12xf32, #tpu.memory_space<vmem>>, vector<16x12xf32>
    %cst_7 = arith.constant dense<0.000000e+00> : vector<2x12xf32>
    %6 = tpu.matmul %3, %5, %cst_7 {dimension_numbers = #tpu.dot_dimension_numbers<[1], [0], [0], [1], [0, 0, 1, 1], [], []>} : vector<2x16xf32>, vector<16x12xf32>, vector<2x12xf32> -> vector<2x12xf32>
    %c0_8 = arith.constant 0 : index
    %c0_9 = arith.constant 0 : index
    %7 = vector.load %arg2[%c0_8, %c0_9] : memref<1x12xf32, #tpu.memory_space<vmem>>, vector<1x12xf32>
    %8 = vector.broadcast %7 : vector<1x12xf32> to vector<2x12xf32>
    %9 = arith.addf %6, %8 : vector<2x12xf32>
    %10 = vector.extract_strided_slice %9 {offsets = [0, 0], sizes = [2, 6], strides = [1, 1]} : vector<2x12xf32> to vector<2x6xf32>
    %c0_10 = arith.constant 0 : index
    %c0_11 = arith.constant 0 : index
    %11 = vector.load %arg4[%c0_10, %c0_11] : memref<2x6xf32, #tpu.memory_space<vmem>>, vector<2x6xf32>
    tpu.vector_store %arg4[%c0_10, %c0_11], %10 {strides = array<i32>} : memref<2x6xf32, #tpu.memory_space<vmem>>, vector<2x6xf32>,
    %12 = vector.extract_strided_slice %9 {offsets = [0, 6], sizes = [2, 6], strides = [1, 1]} : vector<2x12xf32> to vector<2x6xf32>
    %13 = math.exp %12 : vector<2x6xf32>
    %c0_12 = arith.constant 0 : index
    %c0_13 = arith.constant 0 : index
    %14 = vector.load %arg5[%c0_12, %c0_13] : memref<2x6xf32, #tpu.memory_space<vmem>>, vector<2x6xf32>
    tpu.vector_store %arg5[%c0_12, %c0_13], %13 {strides = array<i32>} : memref<2x6xf32, #tpu.memory_space<vmem>>, vector<2x6xf32>,
    return
  }
}

module attributes {stable_mosaic.version = 11 : i64} {
  func.func @_conv3x3x3_kernel(%arg0: i32, %arg1: i32, %arg2: memref<1x1x6x6x16xbf16, #tpu.memory_space<vmem>>, %arg3: memref<1x1x6x6x16xbf16, #tpu.memory_space<vmem>>, %arg4: memref<1x1x6x6x16xbf16, #tpu.memory_space<vmem>>, %arg5: memref<432x16xbf16, #tpu.memory_space<vmem>>, %arg6: memref<1x16xf32, #tpu.memory_space<vmem>>, %arg7: memref<1x1x16x16xf32, #tpu.memory_space<vmem>>) attributes {dimension_semantics = [#tpu.dimension_semantics<parallel>, #tpu.dimension_semantics<parallel>], iteration_bounds = array<i64: 2, 4>, scalar_prefetch = 0 : i64, scratch_operands = 0 : i64, tpu.core_type = #tpu.core_type<tc>, window_params = [{transform_indices = @transform_0, window_bounds = array<i64: 1, 1, 6, 6, 16>}, {transform_indices = @transform_1, window_bounds = array<i64: 1, 1, 6, 6, 16>}, {transform_indices = @transform_2, window_bounds = array<i64: 1, 1, 6, 6, 16>}, {pipeline_mode = #tpu.pipeline_mode<synchronous>, transform_indices = @transform_3, window_bounds = array<i64: 432, 16>}, {pipeline_mode = #tpu.pipeline_mode<synchronous>, transform_indices = @transform_4, window_bounds = array<i64: 1, 16>}, {transform_indices = @transform_5, window_bounds = array<i64: 1, 1, 16, 16>}]} {
    %c0 = arith.constant 0 : index
    %c0_0 = arith.constant 0 : index
    %c0_1 = arith.constant 0 : index
    %c0_2 = arith.constant 0 : index
    %c0_3 = arith.constant 0 : index
    %0 = vector.load %arg2[%c0, %c0_0, %c0_1, %c0_2, %c0_3] : memref<1x1x6x6x16xbf16, #tpu.memory_space<vmem>>, vector<1x1x6x6x16xbf16>
    %1 = vector.shape_cast %0 : vector<1x1x6x6x16xbf16> to vector<6x6x16xbf16>
    %2 = arith.extf %1 : vector<6x6x16xbf16> to vector<6x6x16xf32>
    %3 = vector.extract_strided_slice %2 {offsets = [0, 0, 0], sizes = [4, 4, 16], strides = [1, 1, 1]} : vector<6x6x16xf32> to vector<4x4x16xf32>
    %4 = vector.extract_strided_slice %2 {offsets = [0, 1, 0], sizes = [4, 4, 16], strides = [1, 1, 1]} : vector<6x6x16xf32> to vector<4x4x16xf32>
    %5 = vector.extract_strided_slice %2 {offsets = [0, 2, 0], sizes = [4, 4, 16], strides = [1, 1, 1]} : vector<6x6x16xf32> to vector<4x4x16xf32>
    %6 = vector.extract_strided_slice %2 {offsets = [1, 0, 0], sizes = [4, 4, 16], strides = [1, 1, 1]} : vector<6x6x16xf32> to vector<4x4x16xf32>
    %7 = vector.extract_strided_slice %2 {offsets = [1, 1, 0], sizes = [4, 4, 16], strides = [1, 1, 1]} : vector<6x6x16xf32> to vector<4x4x16xf32>
    %8 = vector.extract_strided_slice %2 {offsets = [1, 2, 0], sizes = [4, 4, 16], strides = [1, 1, 1]} : vector<6x6x16xf32> to vector<4x4x16xf32>
    %9 = vector.extract_strided_slice %2 {offsets = [2, 0, 0], sizes = [4, 4, 16], strides = [1, 1, 1]} : vector<6x6x16xf32> to vector<4x4x16xf32>
    %10 = vector.extract_strided_slice %2 {offsets = [2, 1, 0], sizes = [4, 4, 16], strides = [1, 1, 1]} : vector<6x6x16xf32> to vector<4x4x16xf32>
    %11 = vector.extract_strided_slice %2 {offsets = [2, 2, 0], sizes = [4, 4, 16], strides = [1, 1, 1]} : vector<6x6x16xf32> to vector<4x4x16xf32>
    %c0_4 = arith.constant 0 : index
    %c0_5 = arith.constant 0 : index
    %c0_6 = arith.constant 0 : index
    %c0_7 = arith.constant 0 : index
    %c0_8 = arith.constant 0 : index
    %12 = vector.load %arg3[%c0_4, %c0_5, %c0_6, %c0_7, %c0_8] : memref<1x1x6x6x16xbf16, #tpu.memory_space<vmem>>, vector<1x1x6x6x16xbf16>
    %13 = vector.shape_cast %12 : vector<1x1x6x6x16xbf16> to vector<6x6x16xbf16>
    %14 = arith.extf %13 : vector<6x6x16xbf16> to vector<6x6x16xf32>
    %15 = vector.extract_strided_slice %14 {offsets = [0, 0, 0], sizes = [4, 4, 16], strides = [1, 1, 1]} : vector<6x6x16xf32> to vector<4x4x16xf32>
    %16 = vector.extract_strided_slice %14 {offsets = [0, 1, 0], sizes = [4, 4, 16], strides = [1, 1, 1]} : vector<6x6x16xf32> to vector<4x4x16xf32>
    %17 = vector.extract_strided_slice %14 {offsets = [0, 2, 0], sizes = [4, 4, 16], strides = [1, 1, 1]} : vector<6x6x16xf32> to vector<4x4x16xf32>
    %18 = vector.extract_strided_slice %14 {offsets = [1, 0, 0], sizes = [4, 4, 16], strides = [1, 1, 1]} : vector<6x6x16xf32> to vector<4x4x16xf32>
    %19 = vector.extract_strided_slice %14 {offsets = [1, 1, 0], sizes = [4, 4, 16], strides = [1, 1, 1]} : vector<6x6x16xf32> to vector<4x4x16xf32>
    %20 = vector.extract_strided_slice %14 {offsets = [1, 2, 0], sizes = [4, 4, 16], strides = [1, 1, 1]} : vector<6x6x16xf32> to vector<4x4x16xf32>
    %21 = vector.extract_strided_slice %14 {offsets = [2, 0, 0], sizes = [4, 4, 16], strides = [1, 1, 1]} : vector<6x6x16xf32> to vector<4x4x16xf32>
    %22 = vector.extract_strided_slice %14 {offsets = [2, 1, 0], sizes = [4, 4, 16], strides = [1, 1, 1]} : vector<6x6x16xf32> to vector<4x4x16xf32>
    %23 = vector.extract_strided_slice %14 {offsets = [2, 2, 0], sizes = [4, 4, 16], strides = [1, 1, 1]} : vector<6x6x16xf32> to vector<4x4x16xf32>
    %c0_9 = arith.constant 0 : index
    %c0_10 = arith.constant 0 : index
    %c0_11 = arith.constant 0 : index
    %c0_12 = arith.constant 0 : index
    %c0_13 = arith.constant 0 : index
    %24 = vector.load %arg4[%c0_9, %c0_10, %c0_11, %c0_12, %c0_13] : memref<1x1x6x6x16xbf16, #tpu.memory_space<vmem>>, vector<1x1x6x6x16xbf16>
    %25 = vector.shape_cast %24 : vector<1x1x6x6x16xbf16> to vector<6x6x16xbf16>
    %26 = arith.extf %25 : vector<6x6x16xbf16> to vector<6x6x16xf32>
    %27 = vector.extract_strided_slice %26 {offsets = [0, 0, 0], sizes = [4, 4, 16], strides = [1, 1, 1]} : vector<6x6x16xf32> to vector<4x4x16xf32>
    %28 = vector.extract_strided_slice %26 {offsets = [0, 1, 0], sizes = [4, 4, 16], strides = [1, 1, 1]} : vector<6x6x16xf32> to vector<4x4x16xf32>
    %29 = vector.extract_strided_slice %26 {offsets = [0, 2, 0], sizes = [4, 4, 16], strides = [1, 1, 1]} : vector<6x6x16xf32> to vector<4x4x16xf32>
    %30 = vector.extract_strided_slice %26 {offsets = [1, 0, 0], sizes = [4, 4, 16], strides = [1, 1, 1]} : vector<6x6x16xf32> to vector<4x4x16xf32>
    %31 = vector.extract_strided_slice %26 {offsets = [1, 1, 0], sizes = [4, 4, 16], strides = [1, 1, 1]} : vector<6x6x16xf32> to vector<4x4x16xf32>
    %32 = vector.extract_strided_slice %26 {offsets = [1, 2, 0], sizes = [4, 4, 16], strides = [1, 1, 1]} : vector<6x6x16xf32> to vector<4x4x16xf32>
    %33 = vector.extract_strided_slice %26 {offsets = [2, 0, 0], sizes = [4, 4, 16], strides = [1, 1, 1]} : vector<6x6x16xf32> to vector<4x4x16xf32>
    %34 = vector.extract_strided_slice %26 {offsets = [2, 1, 0], sizes = [4, 4, 16], strides = [1, 1, 1]} : vector<6x6x16xf32> to vector<4x4x16xf32>
    %35 = vector.extract_strided_slice %26 {offsets = [2, 2, 0], sizes = [4, 4, 16], strides = [1, 1, 1]} : vector<6x6x16xf32> to vector<4x4x16xf32>
    %36 = tpu.concatenate %3, %4, %5, %6, %7, %8, %9, %10, %11, %15, %16, %17, %18, %19, %20, %21 in 2 : vector<4x4x16xf32>, vector<4x4x16xf32>, vector<4x4x16xf32>, vector<4x4x16xf32>, vector<4x4x16xf32>, vector<4x4x16xf32>, vector<4x4x16xf32>, vector<4x4x16xf32>, vector<4x4x16xf32>, vector<4x4x16xf32>, vector<4x4x16xf32>, vector<4x4x16xf32>, vector<4x4x16xf32>, vector<4x4x16xf32>, vector<4x4x16xf32>, vector<4x4x16xf32> -> vector<4x4x256xf32>
    %37 = tpu.concatenate %22, %23, %27, %28, %29, %30, %31, %32, %33, %34, %35 in 2 : vector<4x4x16xf32>, vector<4x4x16xf32>, vector<4x4x16xf32>, vector<4x4x16xf32>, vector<4x4x16xf32>, vector<4x4x16xf32>, vector<4x4x16xf32>, vector<4x4x16xf32>, vector<4x4x16xf32>, vector<4x4x16xf32>, vector<4x4x16xf32> -> vector<4x4x176xf32>
    %38 = tpu.concatenate %36, %37 in 2 : vector<4x4x256xf32>, vector<4x4x176xf32> -> vector<4x4x432xf32>
    %39 = vector.shape_cast %38 : vector<4x4x432xf32> to vector<16x432xf32>
    %40 = arith.truncf %39 : vector<16x432xf32> to vector<16x432xbf16>
    %c0_14 = arith.constant 0 : index
    %c0_15 = arith.constant 0 : index
    %41 = vector.load %arg5[%c0_14, %c0_15] : memref<432x16xbf16, #tpu.memory_space<vmem>>, vector<432x16xbf16>
    %cst = arith.constant dense<0.000000e+00> : vector<16x16xf32>
    %42 = tpu.matmul %40, %41, %cst {dimension_numbers = #tpu.dot_dimension_numbers<[1], [0], [0], [1], [0, 0, 1, 1], [], []>} : vector<16x432xbf16>, vector<432x16xbf16>, vector<16x16xf32> -> vector<16x16xf32>
    %c0_16 = arith.constant 0 : index
    %c0_17 = arith.constant 0 : index
    %43 = vector.load %arg6[%c0_16, %c0_17] : memref<1x16xf32, #tpu.memory_space<vmem>>, vector<1x16xf32>
    %44 = vector.broadcast %43 : vector<1x16xf32> to vector<16x16xf32>
    %45 = arith.addf %42, %44 : vector<16x16xf32>
    %cst_18 = arith.constant 0.000000e+00 : f32
    %46 = vector.broadcast %cst_18 : f32 to vector<16x16xf32>
    %47 = arith.maximumf %45, %46 : vector<16x16xf32>
    %48 = vector.shape_cast %47 : vector<16x16xf32> to vector<1x1x16x16xf32>
    %c0_19 = arith.constant 0 : index
    %c0_20 = arith.constant 0 : index
    %c0_21 = arith.constant 0 : index
    %c0_22 = arith.constant 0 : index
    %49 = vector.load %arg7[%c0_19, %c0_20, %c0_21, %c0_22] : memref<1x1x16x16xf32, #tpu.memory_space<vmem>>, vector<1x1x16x16xf32>
    tpu.vector_store %arg7[%c0_19, %c0_20, %c0_21, %c0_22], %48 {strides = array<i32>} : memref<1x1x16x16xf32, #tpu.memory_space<vmem>>, vector<1x1x16x16xf32>,
    return
  }
  func.func @transform_0(%arg0: i32, %arg1: i32) -> (i32, i32, i32, i32, i32) {
    %c0_i32 = arith.constant 0 : i32
    %0 = arith.addi %arg1, %c0_i32 : i32
    %c0_i32_0 = arith.constant 0 : i32
    %c0_i32_1 = arith.constant 0 : i32
    %c0_i32_2 = arith.constant 0 : i32
    %c0_i32_3 = arith.constant 0 : i32
    return %arg0, %0, %c0_i32_0, %c0_i32_1, %c0_i32_2 : i32, i32, i32, i32, i32
  }
  func.func @transform_1(%arg0: i32, %arg1: i32) -> (i32, i32, i32, i32, i32) {
    %c1_i32 = arith.constant 1 : i32
    %0 = arith.addi %arg1, %c1_i32 : i32
    %c0_i32 = arith.constant 0 : i32
    %c0_i32_0 = arith.constant 0 : i32
    %c0_i32_1 = arith.constant 0 : i32
    %c0_i32_2 = arith.constant 0 : i32
    return %arg0, %0, %c0_i32, %c0_i32_0, %c0_i32_1 : i32, i32, i32, i32, i32
  }
  func.func @transform_2(%arg0: i32, %arg1: i32) -> (i32, i32, i32, i32, i32) {
    %c2_i32 = arith.constant 2 : i32
    %0 = arith.addi %arg1, %c2_i32 : i32
    %c0_i32 = arith.constant 0 : i32
    %c0_i32_0 = arith.constant 0 : i32
    %c0_i32_1 = arith.constant 0 : i32
    %c0_i32_2 = arith.constant 0 : i32
    return %arg0, %0, %c0_i32, %c0_i32_0, %c0_i32_1 : i32, i32, i32, i32, i32
  }
  func.func @transform_3(%arg0: i32, %arg1: i32) -> (i32, i32) {
    %c0_i32 = arith.constant 0 : i32
    %c0_i32_0 = arith.constant 0 : i32
    %c0_i32_1 = arith.constant 0 : i32
    return %c0_i32, %c0_i32_0 : i32, i32
  }
  func.func @transform_4(%arg0: i32, %arg1: i32) -> (i32, i32) {
    %c0_i32 = arith.constant 0 : i32
    %c0_i32_0 = arith.constant 0 : i32
    %c0_i32_1 = arith.constant 0 : i32
    return %c0_i32, %c0_i32_0 : i32, i32
  }
  func.func @transform_5(%arg0: i32, %arg1: i32) -> (i32, i32, i32, i32) {
    %c0_i32 = arith.constant 0 : i32
    %c0_i32_0 = arith.constant 0 : i32
    %c0_i32_1 = arith.constant 0 : i32
    return %arg0, %arg1, %c0_i32, %c0_i32_0 : i32, i32, i32, i32
  }
}

</mosaic_0001>

<bundles_post_ra>
// kernel: axis_aligned_conv_gaussian_forward.6
= control target key start
LH: loop header
LB: loop body
LE: loop exit
PB: predicated region body
PF: predicated region fallthrough
CT: control target
= control target key end

     0   :  { %s3006_s18 = smov 0   ;;  %s3008_s19 = smov 0   ;;  %s4493_s0 = inlined_call_operand.vmem [shape: bf16[2,10,10,10,5], index: 0, kind: input, shape index: {}, may-alias: {0,1,2}]   ;;  %s4494_s1 = inlined_call_operand.vmem [shape: bf16[2,10,10,10,5], index: 1, kind: input, shape index: {}, may-alias: {0,1,2}]   ;;  %s4495_s2 = inlined_call_operand.vmem [shape: bf16[2,10,10,10,5], index: 2, kind: input, shape index: {}, may-alias: {0,1,2}]   ;;  %s4496_s3 = inlined_call_operand.vmem [shape: bf16[135,8], index: 3, kind: input, shape index: {}]   ;;  %s4497_s4 = inlined_call_operand.vmem [shape: f32[1,8], index: 4, kind: input, shape index: {}]   ;;  %s4498_s5 = inlined_call_operand.vmem [shape: f32[2,8,64,8], index: 5, kind: output, shape index: {}]  }
   0x1   :  { %s3010_s20 = smov 0   ;;  %s3012_s21 = smov 0  }
   0x2   :  { %s3014_s22 = smov 0  }
   0x3 LB: > { %s24_s23 = sadd.s32 1, %s2949_s20  ;;  %s27_s24 = sadd.s32 1, %s2953_s21  ;;  %s2957_s22 = sphi %s3014_s22, %s15_s22   ;;  %s2953_s21 = sphi %s3012_s21, %s4535_s21   ;;  %s2949_s20 = sphi %s3010_s20, %s4534_s20   ;;  %s2945_s19 = sphi %s3008_s19, %s4533_s19   ;;  %s2941_s18 = sphi %s3006_s18, %s4532_s18  }
   0x4   : > { %p25_p0 = scmp.ge.s32.totalorder %s24_s23, 8  ;;  %p2135_p1 = scmp.ge.s32.totalorder %s2957_s22, 1 }
   0x5   : > { %p247_p2 = scmp.lt.s32.totalorder %s2957_s22, 17 }
   0x6   : > { %s4537_s23 = smov (%p25_p0, %s24_s23), 0  ;;  %s4539_s24 = smov (!%p25_p0, %s27_s24), %s2953_s21 }
   0x7   : > { %p248_p3 = pnand %p2135_p1, %p247_p2  ;;  %p29_p4 = scmp.ge.s32.totalorder %s4539_s24, 2 }
   0x9   : > { %s4541_s24 = smov (%p29_p4, %s4539_s24), 0  ;;  %251 = sbr.rel (%p248_p3) target bundleno = 750 (0x2ee), region = 40 }
   0xe   : > { %p303_p5 = scmp.lt.s32.totalorder %s2945_s19, 1  ;;  %p305_p6 = scmp.lt.s32.totalorder %s2941_s18, 9  ;;  %vm480_vm0 = vcmask 1046528   ;;  %vm529_vm1 = vcmask 1045504   ;;  %vm979_vm2 = vcmask 39936   ;;  %vm988_vm3 = vcmask 80896  }
   0xf   : > { %s2959_s8 = smov 5   ;;  %s2960_s9 = smov 10   ;;  %vm997_vm4 = vcmask 121856   ;;  %vm1006_vm5 = vcmask 162816   ;;  %vm1015_vm6 = vcmask 203776   ;;  %vm1024_vm7 = vcmask 244736  }
  0x10   : > { %s4543_s19 = smov (!%p303_p5, %s2945_s19), 1  ;;  %s2961_s10 = smov 15   ;;  %vm1033_vm8 = vcmask 285696   ;;  %vm1042_vm9 = vcmask 326656   ;;  %vm1051_vm10 = vcmask 367616   ;;  %vm1060_vm11 = vcmask 408576  }
  0x11   : > { %s306_s25 = scalar_select %p305_p6, %s2941_s18, 9  ;;  %vm1069_vm12 = vcmask 449536   ;;  %vm1078_vm13 = vcmask 490496   ;;  %vm1087_vm14 = vcmask 531456   ;;  %vm1096_vm15 = vcmask 572416  }
  0x12   : > { %s3043_s26 = smul.u32 200, %s4543_s19  ;;  %s2962_s11 = smov 20  }
  0x13   : > { %s2197_s27 = smul.u32 20, %s306_s25  ;;  %s2963_s12 = smov 25  }
  0x14   : > { %s312_s13 = sadd.s32 1, %s2941_s18  ;;  %s2964_s14 = smov 30  }
  0x15   : > { %s309_s28 = sadd.s32 %s3043_s26, %s2197_s27  ;;  %p315_p7 = scmp.lt.s32.totalorder %s312_s13, 9 }
  0x16   : > { %s2136_s29 = sshll.u32 %s309_s28, 2  ;;  %s2965_s17 = smov 35  }
  0x17   : > { %s3049_s7 = scalar_lea.vmem %s4493_s0, %s2136_s29  ;;  %s4545_s13 = smov (!%p315_p7, %s312_s13), 9 }
  0x18   : > { %v352_v0 = vld [vmem:[%s3049_s7 + $0x20] sm:$0xf]  ;;  %v3053_v1 = vld [vmem:[%s3049_s7 + $0x24] sm:$0x1]  ;;  %v354_v2 = vld [vmem:[%s3049_s7 + $0x28] sm:$0xf] }
  0x19   : > { %v3057_v3 = vld [vmem:[%s3049_s7 + $0x2c] sm:$0x1]  ;;  %v3059_v4 = vunpack.c.l.bf16 %v352_v0  ;;  %v373_v5 = vunpack.c.l.bf16 %v3053_v1  ;;  %v3062_v6 = vunpack.c.l.bf16 %v354_v2  ;;  %v346_v7 = vld [vmem:[%s3049_s7 + $0x8] sm:$0xf]  ;;  %v348_v10 = vld [vmem:[%s3049_s7 + $0x10] sm:$0xf] }
  0x1a   : > { %v347_v8 = vld [vmem:[%s3049_s7 + $0xc] sm:$0x1]  ;;  %v375_v9 = vunpack.c.l.bf16 %v3057_v3  ;;  %v349_v11 = vld [vmem:[%s3049_s7 + $0x14] sm:$0x1]  ;;  %v3069_v12 = vunpack.c.l.bf16 %v346_v7  ;;  %v344_v14 = vld [vmem:[%s3049_s7] sm:$0xf]  ;;  %v3076_v18 = vunpack.c.l.bf16 %v348_v10 }
  0x1b   : > { %v367_v13 = vunpack.c.l.bf16 %v347_v8  ;;  %v493_v15 = vrot.slane %v3059_v4, 1  ;;  %v494_v16 = vrot.slane %v373_v5, 1  ;;  %v496_v17 = vrot.slane %v3062_v6, 1  ;;  %v345_v19 = vld [vmem:[%s3049_s7 + $0x4] sm:$0x1]  ;;  %s2199_s15 = smul.u32 20, %s4545_s13 }
  0x1c   : > { %v497_v20 = vrot.slane %v375_v9, 1  ;;  %v369_v21 = vunpack.c.l.bf16 %v349_v11  ;;  %v533_v22 = vrot.slane %v3069_v12, 2  ;;  %v536_v25 = vrot.slane %v3076_v18, 2  ;;  %v356_v32 = vld [vmem:[%s3049_s7 + $0x30] sm:$0xf]  ;;  %s2966_s30 = smov 40  }
  0x1d   : > { %v534_v23 = vrot.slane %v367_v13, 2  ;;  %v3083_v24 = vsel %vm480_vm0, %v493_v15, %v494_v16  ;;  %v3086_v26 = vunpack.c.l.bf16 %v344_v14  ;;  %v365_v27 = vunpack.c.l.bf16 %v345_v19  ;;  %v357_v33 = vld [vmem:[%s3049_s7 + $0x34] sm:$0x1]  ;;  %v358_v38 = vld [vmem:[%s3049_s7 + $0x38] sm:$0xf]  ;;  %s319_s16 = sadd.s32 %s2199_s15, %s3043_s26  ;;  %s2967_s6 = smov 45  }
  0x1e   : > { %v3089_v28 = vsel %vm480_vm0, %v496_v17, %v497_v20  ;;  %v537_v30 = vrot.slane %v369_v21, 2  ;;  %v484_v31 = vrot.slane %v3069_v12, 1  ;;  %v485_v37 = vrot.slane %v367_v13, 1  ;;  %v359_v42 = vld [vmem:[%s3049_s7 + $0x3c] sm:$0x1]  ;;  %s2137_s25 = sshll.u32 %s319_s16, 2 }
  0x1f   : > { %v3092_v29 = vsel %vm529_vm1, %v533_v22, %v534_v23  ;;  %v3099_v34 = vpack.i.bf16 %v3089_v28, %v3083_v24  ;;  %v530_v35 = vrot.slane %v3086_v26, 2  ;;  %v531_v36 = vrot.slane %v365_v27, 2  ;;  %v350_v46 = vld [vmem:[%s3049_s7 + $0x18] sm:$0xf]  ;;  %v351_v51 = vld [vmem:[%s3049_s7 + $0x1c] sm:$0x1]  ;;  %s3225_s29 = scalar_lea.vmem %s4494_s1, %s2137_s25 }
  0x20   : > { %v487_v39 = vrot.slane %v3076_v18, 1  ;;  %v488_v40 = vrot.slane %v369_v21, 1  ;;  %v481_v41 = vrot.slane %v3086_v26, 1  ;;  %v3110_v44 = vsel %vm480_vm0, %v484_v31, %v485_v37  ;;  %s2969_s13 = smov 55   ;;  %s2970_s15 = smov 60  }
  0x21   : > { %2269 = vrot.lane.b32.xlu1 %v3099_v34, %s2959_s8  ;;  %v532_v43 = vsel %vm529_vm1, %v530_v35, %v531_v36  ;;  %v482_v45 = vrot.slane %v365_v27, 1  ;;  %v3114_v47 = vsel %vm529_vm1, %v536_v25, %v537_v30  ;;  %v3117_v49 = vunpack.c.l.bf16 %v356_v32  ;;  %s2971_s16 = smov 65   ;;  %s2972_s25 = smov 70  }
  0x22   : > { %v2278_v48 = vpack.i.bf16 %v3092_v29, %v532_v43  ;;  %v377_v50 = vunpack.c.l.bf16 %v357_v33  ;;  %v3121_v52 = vsel %vm480_vm0, %v487_v39, %v488_v40  ;;  %v3124_v54 = vunpack.c.l.bf16 %v358_v38  ;;  %v361_v39 = vld [vmem:[%s3049_s7 + $0x44] sm:$0x1]  ;;  %s323_s27 = sadd.s32 2, %s2941_s18  ;;  %s2973_s28 = smov 75  }
  0x23   : > { %v483_v53 = vsel %vm480_vm0, %v481_v41, %v482_v45  ;;  %v379_v55 = vunpack.c.l.bf16 %v359_v42  ;;  %v499_v57 = vrot.slane %v3117_v49, 1  ;;  %v3129_v59 = vunpack.c.l.bf16 %v350_v46  ;;  %p326_p8 = scmp.lt.s32.totalorder %s323_s27, 9  ;;  %p336_p9 = scmp.lt.s32.totalorder %s2941_s18, 7 }
  0x24   : > { %2279 = vrot.lane.b32.xlu2 %v2278_v48, %s2960_s9  ;;  %v2258_v56 = vpack.i.bf16 %v3110_v44, %v483_v53  ;;  %v500_v58 = vrot.slane %v377_v50, 1  ;;  %v502_v60 = vrot.slane %v3124_v54, 1  ;;  %v371_v62 = vunpack.c.l.bf16 %v351_v51 }
  0x25   : > { %v503_v61 = vrot.slane %v379_v55, 1  ;;  %v548_v63 = vrot.slane %v3117_v49, 2  ;;  %v539_v2 = vrot.slane %v3129_v59, 2  ;;  %v490_v7 = vrot.slane %v3129_v59, 1  ;;  %s4547_s27 = smov (!%p326_p8, %s323_s27), 9  ;;  %s4549_s18 = smov (!%p336_p9, %s2941_s18), 7 }
  0x26   : > { %2259 = vrot.lane.b32.xlu0 %v2258_v56, %s2959_s8  ;;  %v501_v0 = vsel %vm480_vm0, %v499_v57, %v500_v58  ;;  %v549_v8 = vrot.slane %v377_v50, 2  ;;  %v540_v11 = vrot.slane %v371_v62, 2  ;;  %v491_v13 = vrot.slane %v371_v62, 1 }
  0x27   : > { %v504_v10 = vsel %vm480_vm0, %v502_v60, %v503_v61  ;;  %v551_v14 = vrot.slane %v3124_v54, 2  ;;  %v552_v16 = vrot.slane %v379_v55, 2  ;;  %v542_v23 = vrot.slane %v3059_v4, 2  ;;  %v363_v61 = vld [vmem:[%s3049_s7 + $0x4c] sm:$0x1] }
  0x28   : > { %v3139_v15 = vpack.i.bf16 %v504_v10, %v501_v0  ;;  %v541_v17 = vsel %vm529_vm1, %v539_v2, %v540_v11  ;;  %v492_v19 = vsel %vm480_vm0, %v490_v7, %v491_v13  ;;  %v550_v22 = vsel %vm529_vm1, %v548_v63, %v549_v8  ;;  %v384_v8 = vld [vmem:[%s3225_s29] sm:$0xf] }
  0x29   : > { %v3146_v20 = vpack.i.bf16 %v541_v17, %v3114_v47  ;;  %v3149_v21 = vpack.i.bf16 %v492_v19, %v3121_v52  ;;  %v553_v25 = vsel %vm529_vm1, %v551_v14, %v552_v16  ;;  %v543_v27 = vrot.slane %v373_v5, 2  ;;  %v360_v5 = vld [vmem:[%s3049_s7 + $0x40] sm:$0xf] }
  0x2a   : > { %2274 = vrot.lane.b32.xlu1 %v3139_v15, %s2959_s8  ;;  %v545_v30 = vrot.slane %v3062_v6, 2  ;;  %v546_v31 = vrot.slane %v375_v9, 2  ;;  %v3163_v32 = vpack.i.bf16 %v553_v25, %v550_v22  ;;  %v2298_v1 = vpack.i.bf16 %v3076_v18, %v3069_v12 }
  0x2b   : > { %v544_v33 = vsel %vm529_vm1, %v542_v23, %v543_v27  ;;  %v380_v9 = vunpack.c.l.bf16 %v360_v5  ;;  %v2308_v36 = vpack.i.bf16 %v3117_v49, %v3062_v6  ;;  %v2303_v38 = vpack.i.bf16 %v3059_v4, %v3129_v59  ;;  %v396_v23 = vld [vmem:[%s3225_s29 + $0x30] sm:$0xf]  ;;  %v393_v5 = vld [vmem:[%s3225_s29 + $0x24] sm:$0x1] }
  0x2c   : > { %2284 = vrot.lane.b32.xlu2 %v3146_v20, %s2960_s9  ;;  %v547_v35 = vsel %vm529_vm1, %v545_v30, %v546_v31  ;;  %v2323_v40 = vpack.i.bf16 %v3083_v24, %v492_v19  ;;  %v381_v41 = vunpack.c.l.bf16 %v361_v39  ;;  %v2328_v42 = vpack.i.bf16 %v501_v0, %v3089_v28  ;;  %v394_v19 = vld [vmem:[%s3225_s29 + $0x28] sm:$0xf]  ;;  %v398_v30 = vld [vmem:[%s3225_s29 + $0x38] sm:$0xf]  ;;  %v388_v31 = vld [vmem:[%s3225_s29 + $0x10] sm:$0xf] }
  0x2d   : > { %v3172_v3 = vpack.i.bf16 %v547_v35, %v544_v33  ;;  %v2313_v37 = vpack.i.bf16 %v380_v9, %v3124_v54  ;;  %v2318_v43 = vpack.i.bf16 %v3121_v52, %v3110_v44  ;;  %v604_v45 = vrot.slane %v380_v9, 1  ;;  %v385_v39 = vld [vmem:[%s3225_s29 + $0x4] sm:$0x1] }
  0x2e   : > { %2264 = vrot.lane.b32.xlu0 %v3149_v21, %s2959_s8  ;;  %v605_v46 = vrot.slane %v381_v41, 1  ;;  %v2338_v48 = vpack.i.bf16 %v3114_v47, %v3092_v29  ;;  %v631_v28 = vrot.slane %v380_v9, 2  ;;  %v632_v50 = vrot.slane %v381_v41, 2  ;;  %v362_v47 = vld [vmem:[%s3049_s7 + $0x48] sm:$0xf]  ;;  %s2968_s7 = smov 50  }
  0x2f   : > { %v2343_v51 = vpack.i.bf16 %v544_v33, %v541_v17  ;;  %v2358_v29 = vpack.i.bf16 %v3129_v59, %v3076_v18  ;;  %v2348_v55 = vpack.i.bf16 %v550_v22, %v547_v35  ;;  %v382_v56 = vunpack.c.l.bf16 %v362_v47  ;;  %v392_v17 = vld [vmem:[%s3225_s29 + $0x20] sm:$0xf]  ;;  %v390_v33 = vld [vmem:[%s3225_s29 + $0x18] sm:$0xf] }
  0x30   : > { %v606_v24 = vsel %vm480_vm0, %v604_v45, %v605_v46  ;;  %v633_v52 = vsel %vm529_vm1, %v631_v28, %v632_v50  ;;  %v2368_v57 = vpack.i.bf16 %v3124_v54, %v3117_v49  ;;  %v2363_v60 = vpack.i.bf16 %v3062_v6, %v3059_v4 }
  0x31   : > { %v2333_v44 = vpack.i.bf16 %v606_v24, %v504_v10  ;;  %v2353_v53 = vpack.i.bf16 %v633_v52, %v553_v25  ;;  %v2373_v58 = vpack.i.bf16 %v382_v56, %v380_v9  ;;  %v383_v62 = vunpack.c.l.bf16 %v363_v61  ;;  %v386_v10 = vld [vmem:[%s3225_s29 + $0x8] sm:$0xf]  ;;  %v397_v61 = vld [vmem:[%s3225_s29 + $0x34] sm:$0x1] }
  0x32   : > { %2294 = vrot.lane.b32.xlu1 %v3163_v32, %s2960_s9  ;;  %v684_v63 = vrot.slane %v382_v56, 1  ;;  %v711_v2 = vrot.slane %v382_v56, 2  ;;  %v3235_v14 = vunpack.c.l.bf16 %v384_v8  ;;  %v3247_v25 = vunpack.c.l.bf16 %v392_v17 }
  0x33   : > { %v685_v0 = vrot.slane %v383_v62, 1  ;;  %v712_v7 = vrot.slane %v383_v62, 2  ;;  %v3249_v27 = vunpack.c.l.bf16 %v394_v19  ;;  %v3262_v9 = vunpack.c.l.bf16 %v396_v23  ;;  %v399_v62 = vld [vmem:[%s3225_s29 + $0x3c] sm:$0x1] }
  0x34   : > { %2299 = vrot.lane.b32.xlu2 %v2298_v1, %s2961_s10  ;;  %4514 = vst [vmem:[#allocation2_spill] sm:$0xff] %v3247_v25  ;;  %v405_v28 = vunpack.c.l.bf16 %v385_v39  ;;  %v778_v56 = vrot.slane %v3235_v14, 1  ;;  %v3338_v17 = vunpack.c.l.bf16 %v397_v61  ;;  %v3340_v19 = vunpack.c.l.bf16 %v399_v62 }
  0x35   : > { %v713_v13 = vsel %vm529_vm1, %v711_v2, %v712_v7  ;;  %4515 = vst [vmem:[#allocation3_spill] sm:$0xff] %v3249_v27  ;;  %v3274_v41 = vpack.i.bf16 %v3249_v27, %v3247_v25  ;;  %v826_v7 = vrot.slane %v3235_v14, 2 }
  0x36   : > { %2289 = vrot.lane.b32.xlu0 %v3172_v3, %s2960_s9  ;;  %v2413_v16 = vpack.i.bf16 %v713_v13, %v633_v52  ;;  %v793_v52 = vrot.slane %v3249_v27, 1  ;;  %v827_v8 = vrot.slane %v405_v28, 2 }
  0x3a   : > { %2309 = vrot.lane.b32.xlu1 %v2308_v36, %s2961_s10  ;;  %v3264_v36 = vunpack.c.l.bf16 %v398_v30 }
  0x3c   : > { %2314 = vrot.lane.b32.xlu2 %v2313_v37, %s2961_s10  ;;  %v3266_v37 = vunpack.c.l.bf16 %v388_v31  ;;  %v828_v31 = vsel %vm529_vm1, %v826_v7, %v827_v8  ;;  %v799_v39 = vrot.slane %v3264_v36, 1  ;;  %v838_v8 = vrot.slane %v3247_v25, 2 }
  0x3e   : > { %2304 = vrot.lane.b32.xlu0 %v2303_v38, %s2961_s10  ;;  %v3268_v38 = vunpack.c.l.bf16 %v390_v33  ;;  %v784_v45 = vrot.slane %v3266_v37, 1 }
  0x42   : > { %2324 = vrot.lane.b32.xlu1 %v2323_v40, %s2962_s11  ;;  %v387_v40 = vld [vmem:[%s3225_s29 + $0xc] sm:$0x1] }
  0x43   : > { %v407_v50 = vunpack.c.l.bf16 %v387_v40  ;;  %v800_v40 = vrot.slane %v3340_v19, 1 }
  0x44   : > { %2329 = vrot.lane.b32.xlu2 %v2328_v42, %s2962_s11  ;;  %v3276_v42 = vunpack.c.l.bf16 %v393_v5  ;;  %v796_v5 = vrot.slane %v3262_v9, 1 }
  0x46   : > { %2319 = vrot.lane.b32.xlu0 %v2318_v43, %s2962_s11 }
  0x4a   : > { %2339 = vrot.lane.b32.xlu1 %v2338_v48, %s2963_s12  ;;  %v787_v48 = vrot.slane %v3268_v38, 1 }
  0x4c   : > { %2344 = vrot.lane.b32.xlu2 %v2343_v51, %s2963_s12  ;;  %v3288_v51 = vpack.i.bf16 %v3264_v36, %v3262_v9 }
  0x4e   : > { %2334 = vrot.lane.b32.xlu0 %v2333_v44, %s2962_s11  ;;  %v790_v44 = vrot.slane %v3247_v25, 1 }
  0x52   : > { %2354 = vrot.lane.b32.xlu1 %v2353_v53, %s2963_s12 }
  0x54   : > { %2359 = vrot.lane.b32.xlu2 %v2358_v29, %s2964_s14  ;;  %v3298_v29 = vpack.i.bf16 %v3268_v38, %v3266_v37 }
  0x56   : > { %2349 = vrot.lane.b32.xlu0 %v2348_v55, %s2963_s12 }
  0x5a   : > { %2369 = vrot.lane.b32.xlu1 %v2368_v57, %s2964_s14  ;;  %v779_v57 = vrot.slane %v405_v28, 1 }
  0x5c   : > { %2374 = vrot.lane.b32.xlu2 %v2373_v58, %s2964_s14  ;;  %v780_v13 = vsel %vm480_vm0, %v778_v56, %v779_v57  ;;  %v847_v56 = vrot.slane %v3264_v36, 2  ;;  %v848_v57 = vrot.slane %v3340_v19, 2 }
  0x5e   : > { %2364 = vrot.lane.b32.xlu0 %v2363_v60, %s2964_s14  ;;  %v782_v60 = vrot.slane %v407_v50, 1  ;;  %v3391_v7 = vsel %vm529_vm1, %v847_v56, %v848_v57 }
  0x62   : > { %2384 = vrot.lane.b32.xlu1 %v3099_v34, %s2965_s17  ;;  %v686_v34 = vsel %vm480_vm0, %v684_v63, %v685_v0 }
  0x63   : > { %v2393_v11 = vpack.i.bf16 %v686_v34, %v606_v24 }
  0x64   : > { %2389 = vrot.lane.b32.xlu2 %v3139_v15, %s2965_s17  ;;  %v3237_v15 = vunpack.c.l.bf16 %v386_v10 }
  0x66   : > { %2379 = vrot.lane.b32.xlu0 %v3149_v21, %s2965_s17  ;;  %v391_v21 = vld [vmem:[%s3225_s29 + $0x1c] sm:$0x1]  ;;  %v2418_v22 = vpack.i.bf16 %v3237_v15, %v3235_v14  ;;  %v781_v58 = vrot.slane %v3237_v15, 1  ;;  %v829_v10 = vrot.slane %v3237_v15, 2 }
  0x67   : > { %v3257_v1 = vunpack.c.l.bf16 %v391_v21  ;;  %v832_v21 = vrot.slane %v3266_v37, 2 }
  0x69   : > { %v788_v24 = vrot.slane %v3257_v1, 1  ;;  %v836_v23 = vrot.slane %v3257_v1, 2 }
  0x6a   : > { %2399 = vrot.lane.b32.xlu1 %v3146_v20, %s2966_s30  ;;  %v389_v20 = vld [vmem:[%s3225_s29 + $0x14] sm:$0x1] }
  0x6b   : > { %v3255_v35 = vunpack.c.l.bf16 %v389_v20  ;;  %v3308_v55 = vsel %vm480_vm0, %v787_v48, %v788_v24 }
  0x6c   : > { %2404 = vrot.lane.b32.xlu2 %v3172_v3, %s2966_s30  ;;  %v395_v3 = vld [vmem:[%s3225_s29 + $0x2c] sm:$0x1] }
  0x6d   : > { %v3278_v43 = vunpack.c.l.bf16 %v395_v3  ;;  %v785_v46 = vrot.slane %v3255_v35, 1  ;;  %v833_v14 = vrot.slane %v3255_v35, 2  ;;  %v797_v3 = vrot.slane %v3338_v17, 1 }
  0x6e   : > { %2394 = vrot.lane.b32.xlu0 %v2393_v11, %s2965_s17  ;;  %v830_v11 = vrot.slane %v407_v50, 2 }
  0x6f   : > { %4516 = vst [vmem:[#allocation4_spill] sm:$0xff] %v3278_v43  ;;  %v794_v53 = vrot.slane %v3278_v43, 1  ;;  %v3303_v47 = vsel %vm480_vm0, %v784_v45, %v785_v46  ;;  %v3361_v48 = vsel %vm529_vm1, %v832_v21, %v833_v14 }
  0x70   : > { %v2443_v63 = vpack.i.bf16 %v3308_v55, %v3303_v47  ;;  %v3352_v33 = vsel %vm529_vm1, %v829_v10, %v830_v11  ;;  %v839_v10 = vrot.slane %v3276_v42, 2  ;;  %v841_v11 = vrot.slane %v3249_v27, 2 }
  0x71   : > { %v3326_v34 = vsel %vm480_vm0, %v793_v52, %v794_v53  ;;  %v2458_v45 = vpack.i.bf16 %v3352_v33, %v828_v31  ;;  %v845_v52 = vrot.slane %v3338_v17, 2 }
  0x72   : > { %2414 = vrot.lane.b32.xlu1 %v2413_v16, %s2966_s30  ;;  %v3336_v16 = vsel %vm480_vm0, %v781_v58, %v782_v60  ;;  %v3376_v58 = vsel %vm480_vm0, %v796_v5, %v797_v3  ;;  %v3381_v60 = vsel %vm480_vm0, %v799_v39, %v800_v40  ;;  %v3401_v14 = vsel %vm529_vm1, %v838_v8, %v839_v10 }
  0x73   : > { %v2438_v30 = vpack.i.bf16 %v3336_v16, %v780_v13  ;;  %v2453_v62 = vpack.i.bf16 %v3381_v60, %v3376_v58  ;;  %v842_v13 = vrot.slane %v3278_v43, 2 }
  0x74   : > { %2419 = vrot.lane.b32.xlu2 %v2418_v22, %s2967_s6  ;;  %v835_v22 = vrot.slane %v3268_v38, 2 }
  0x76   : > { %2409 = vrot.lane.b32.xlu0 %v3163_v32, %s2966_s30  ;;  %v791_v32 = vrot.slane %v3276_v42, 1  ;;  %v3364_v28 = vsel %vm529_vm1, %v835_v22, %v836_v23  ;;  %v3404_v22 = vsel %vm529_vm1, %v841_v11, %v842_v13  ;;  %v2478_v23 = vpack.i.bf16 %v3266_v37, %v3237_v15 }
  0x77   : > { %v2463_v61 = vpack.i.bf16 %v3364_v28, %v3361_v48  ;;  %v2468_v31 = vpack.i.bf16 %v3404_v22, %v3401_v14  ;;  %v2483_v11 = vpack.i.bf16 %v3247_v25, %v3268_v38 }
  0x78   : > { %v3321_v0 = vsel %vm480_vm0, %v790_v44, %v791_v32  ;;  %v844_v44 = vrot.slane %v3262_v9, 2 }
  0x79   : > { %v2448_v20 = vpack.i.bf16 %v3326_v34, %v3321_v0 }
  0x7a   : > { %2429 = vrot.lane.b32.xlu1 %v3274_v41, %s2967_s6 }
  0x7c   : > { %2434 = vrot.lane.b32.xlu2 %v3288_v51, %s2967_s6 }
  0x7e   : > { %2424 = vrot.lane.b32.xlu0 %v3298_v29, %s2967_s6  ;;  %v3330_v2 = vpop.permute.xlu2 %2279 }
  0x7f   : > { %v2282_v15 = vunpack.i.h.bf16 %v3330_v2 }
  0x82   : > { %2444 = vrot.lane.b32.xlu1 %v2443_v63, %s2968_s7  ;;  %v3388_v63 = vsel %vm529_vm1, %v844_v44, %v845_v52  ;;  %v2488_v44 = vpack.i.bf16 %v3262_v9, %v3249_v27  ;;  %v2281_v52 = vunpack.i.l.bf16 %v3330_v2 }
  0x83   : > { %v2473_v21 = vpack.i.bf16 %v3391_v7, %v3388_v63 }
  0x84   : > { %2449 = vrot.lane.b32.xlu2 %v2448_v20, %s2968_s7 }
  0x86   : > { %2439 = vrot.lane.b32.xlu0 %v2438_v30, %s2968_s7  ;;  %v3367_v50 = vpop.permute.xlu2 %2284  ;;  %v400_v30 = vld [vmem:[%s3225_s29 + $0x40] sm:$0xf] }
  0x87   : > { %v3413_v39 = vunpack.c.l.bf16 %v400_v30 }
  0x89   : > { %v2493_v57 = vpack.i.bf16 %v3413_v39, %v3264_v36 }
  0x8a   : > { %2459 = vrot.lane.b32.xlu1 %v2458_v45, %s2969_s13 }
  0x8c   : > { %2464 = vrot.lane.b32.xlu2 %v2463_v61, %s2969_s13 }
  0x8e   : > { %2454 = vrot.lane.b32.xlu0 %v2453_v62, %s2968_s7  ;;  %v2300_v20 = vpop.permute.xlu2 %2299 }
  0x8f   : > { %v2302_v61 = vunpack.i.h.bf16 %v2300_v20  ;;  %v2301_v62 = vunpack.i.l.bf16 %v2300_v20 }
  0x92   : > { %2474 = vrot.lane.b32.xlu1 %v2473_v21, %s2969_s13  ;;  %v401_v21 = vld [vmem:[%s3225_s29 + $0x44] sm:$0x1] }
  0x93   : > { %v3411_v5 = vpop.permute.xlu1 %2269 }
  0x94   : > { %2479 = vrot.lane.b32.xlu2 %v2478_v23, %s2970_s15 }
  0x96   : > { %2469 = vrot.lane.b32.xlu0 %v2468_v31, %s2969_s13  ;;  %v3415_v45 = vpop.permute.xlu2 %2314  ;;  %s2200_s13 = smul.u32 20, %s4547_s27 }
  0x98   : > { %v2260_v56 = vpop.permute.xlu0 %2259 }
  0x99   : > { %v2262_v8 = vunpack.i.h.bf16 %v2260_v56  ;;  %v2261_v10 = vunpack.i.l.bf16 %v2260_v56 }
  0x9a   : > { %2489 = vrot.lane.b32.xlu1 %v2488_v44, %s2970_s15 }
  0x9b   : > { %v981_v13 = vsel %vm979_vm2, %v3069_v12, %v2262_v8  ;;  %v980_v2 = vsel %vm979_vm2, %v3086_v26, %v2261_v10  ;;  %v2503_v12 = vpack.i.bf16 %v3321_v0, %v3308_v55  ;;  %v3442_v26 = vunpack.c.l.bf16 %v401_v21 }
  0x9c   : > { %v990_v23 = vsel %vm988_vm3, %v981_v13, %v2282_v15  ;;  %v989_v30 = vsel %vm988_vm3, %v980_v2, %v2281_v52  ;;  %2494 = vrot.lane.b32.xlu2 %v2493_v57, %s2970_s15  ;;  %v2275_v20 = vpop.permute.xlu1 %2274  ;;  %v2508_v15 = vpack.i.bf16 %v3376_v58, %v3326_v34  ;;  %v2287_v52 = vunpack.i.h.bf16 %v3367_v50 }
  0x9d   : > { %v3433_v31 = vsel %vm997_vm4, %v989_v30, %v2301_v62  ;;  %v3436_v44 = vsel %vm997_vm4, %v990_v23, %v2302_v61  ;;  %v2286_v57 = vunpack.i.l.bf16 %v3367_v50  ;;  %v2277_v62 = vunpack.i.h.bf16 %v2275_v20 }
  0x9e   : > { %2484 = vrot.lane.b32.xlu0 %v2483_v11, %s2970_s15  ;;  %v3438_v56 = vpop.permute.xlu2 %2329  ;;  %v2276_v8 = vunpack.i.l.bf16 %v2275_v20  ;;  %v2498_v11 = vpack.i.bf16 %v3303_v47, %v3336_v16  ;;  %v2317_v2 = vunpack.i.h.bf16 %v3415_v45  ;;  %v2316_v21 = vunpack.i.l.bf16 %v3415_v45  ;;  %s330_s15 = sadd.s32 %s2200_s13, %s3043_s26 }
  0x9f   : > { %v900_v23 = vrot.slane %v3413_v39, 1  ;;  %v901_v30 = vrot.slane %v3442_v26, 1  ;;  %v3462_v16 = vpack.i.bf16 %v788_v24, %v3308_v55  ;;  %v3467_v45 = vpack.i.bf16 %v791_v32, %v3321_v0 }
  0xa0   : > { %v2265_v10 = vpop.permute.xlu0 %2264  ;;  %v2271_v32 = vunpack.i.l.bf16 %v3411_v5 }
  0xa1   : > { %v2267_v61 = vunpack.i.h.bf16 %v2265_v10  ;;  %v2266_v13 = vunpack.i.l.bf16 %v2265_v10  ;;  %v986_v10 = vsel %vm979_vm2, %v3117_v49, %v2276_v8  ;;  %v2518_v49 = vpack.i.bf16 %v3361_v48, %v3352_v33 }
  0xa2   : > { %2504 = vrot.lane.b32.xlu1 %v2503_v12, %s2971_s16  ;;  %v987_v12 = vsel %vm979_vm2, %v3124_v54, %v2277_v62  ;;  %v3486_v54 = vsel %vm480_vm0, %v900_v23, %v901_v30  ;;  %v2523_v8 = vpack.i.bf16 %v3401_v14, %v3364_v28 }
  0xa3   : > { %v983_v50 = vsel %vm979_vm2, %v3129_v59, %v2267_v61  ;;  %v982_v20 = vsel %vm979_vm2, %v3076_v18, %v2266_v13  ;;  %v2272_v13 = vunpack.i.h.bf16 %v3411_v5  ;;  %v928_v5 = vrot.slane %v3442_v26, 2 }
  0xa4   : > { %2509 = vrot.lane.b32.xlu2 %v2508_v15, %s2971_s16  ;;  %v2295_v59 = vpop.permute.xlu1 %2294  ;;  %v991_v18 = vsel %vm988_vm3, %v982_v20, %v2286_v57  ;;  %v992_v61 = vsel %vm988_vm3, %v983_v50, %v2287_v52  ;;  %v927_v57 = vrot.slane %v3413_v39, 2  ;;  %v984_v20 = vsel %vm979_vm2, %v3059_v4, %v2271_v32 }
  0xa5   : > { %v2297_v24 = vunpack.i.h.bf16 %v2295_v59  ;;  %v2296_v55 = vunpack.i.l.bf16 %v2295_v59  ;;  %v985_v50 = vsel %vm979_vm2, %v3062_v6, %v2272_v13  ;;  %v2513_v28 = vpack.i.bf16 %v3486_v54, %v3381_v60 }
  0xa6   : > { %2499 = vrot.lane.b32.xlu0 %v2498_v11, %s2971_s16  ;;  %v3479_v0 = vpop.permute.xlu2 %2344  ;;  %v2331_v6 = vunpack.i.l.bf16 %v3438_v56 }
  0xa7   : > { %v995_v15 = vsel %vm988_vm3, %v986_v10, %v2296_v55  ;;  %v996_v52 = vsel %vm988_vm3, %v987_v12, %v2297_v24  ;;  %v2332_v12 = vunpack.i.h.bf16 %v3438_v56 }
  0xa8   : > { %v2290_v62 = vpop.permute.xlu0 %2289  ;;  %v3495_v33 = vsel %vm997_vm4, %v995_v15, %v2316_v21  ;;  %v3498_v48 = vsel %vm997_vm4, %v996_v52, %v2317_v2  ;;  %v929_v2 = vsel %vm529_vm1, %v927_v57, %v928_v5  ;;  %v402_v5 = vld [vmem:[%s3225_s29 + $0x48] sm:$0xf]  ;;  %vm1105_vm1 = vcmask 613376  }
  0xa9   : > { %v2292_v11 = vunpack.i.h.bf16 %v2290_v62  ;;  %v2291_v23 = vunpack.i.l.bf16 %v2290_v62  ;;  %v2533_v55 = vpack.i.bf16 %v929_v2, %v3391_v7  ;;  %v2528_v7 = vpack.i.bf16 %v3388_v63, %v3404_v22 }
  0xaa   : > { %2519 = vrot.lane.b32.xlu1 %v2518_v49, %s2972_s25 }
  0xab   : > { %v994_v14 = vsel %vm988_vm3, %v985_v50, %v2292_v11  ;;  %v993_v21 = vsel %vm988_vm3, %v984_v20, %v2291_v23  ;;  %v2347_v11 = vunpack.i.h.bf16 %v3479_v0  ;;  %v2346_v23 = vunpack.i.l.bf16 %v3479_v0 }
  0xac   : > { %2524 = vrot.lane.b32.xlu2 %v2523_v8, %s2972_s25  ;;  %v2310_v4 = vpop.permute.xlu1 %2309  ;;  %v3534_v20 = vunpack.c.l.bf16 %v402_v5 }
  0xad   : > { %v2312_v10 = vunpack.i.h.bf16 %v2310_v4  ;;  %v2311_v59 = vunpack.i.l.bf16 %v2310_v4 }
  0xae   : > { %2514 = vrot.lane.b32.xlu0 %v2513_v28, %s2971_s16  ;;  %v2360_v24 = vpop.permute.xlu2 %2359  ;;  %v2553_v0 = vpack.i.bf16 %v3534_v20, %v3413_v39  ;;  %s2138_s16 = sshll.u32 %s330_s15, 2 }
  0xaf   : > { %v1002_v13 = vsel %vm997_vm4, %v993_v21, %v2311_v59  ;;  %v1003_v32 = vsel %vm997_vm4, %v994_v14, %v2312_v10  ;;  %v2362_v10 = vunpack.i.h.bf16 %v2360_v24  ;;  %v2361_v59 = vunpack.i.l.bf16 %v2360_v24  ;;  %s3567_s27 = scalar_lea.vmem %s4495_s2, %s2138_s16 }
  0xb0   : > { %v2305_v49 = vpop.permute.xlu0 %2304  ;;  %v3519_v56 = vsel %vm1006_vm5, %v1002_v13, %v2331_v6  ;;  %v3522_v15 = vsel %vm1006_vm5, %v1003_v32, %v2332_v12 }
  0xb1   : > { %v2307_v52 = vunpack.i.h.bf16 %v2305_v49  ;;  %v2306_v57 = vunpack.i.l.bf16 %v2305_v49 }
  0xb2   : > { %2534 = vrot.lane.b32.xlu1 %v2533_v55, %s2972_s25 }
  0xb3   : > { %v1000_v62 = vsel %vm997_vm4, %v991_v18, %v2306_v57  ;;  %v1001_v8 = vsel %vm997_vm4, %v992_v61, %v2307_v52 }
  0xb4   : > { %2539 = vrot.lane.b32.xlu2 %v3298_v29, %s2973_s28  ;;  %v2325_v50 = vpop.permute.xlu1 %2324 }
  0xb5   : > { %v2327_v28 = vunpack.i.h.bf16 %v2325_v50  ;;  %v2326_v14 = vunpack.i.l.bf16 %v2325_v50 }
  0xb6   : > { %2529 = vrot.lane.b32.xlu0 %v2528_v7, %s2972_s25  ;;  %v2375_v63 = vpop.permute.xlu2 %2374  ;;  %v2558_v7 = vpack.i.bf16 %v785_v46, %v3303_v47  ;;  %v2578_v47 = vpack.i.bf16 %v797_v3, %v3376_v58  ;;  %v2583_v3 = vpack.i.bf16 %v800_v40, %v3381_v60 }
  0xb7   : > { %v1009_v22 = vsel %vm1006_vm5, %v1000_v62, %v2326_v14  ;;  %v1010_v18 = vsel %vm1006_vm5, %v1001_v8, %v2327_v28  ;;  %v2377_v50 = vunpack.i.h.bf16 %v2375_v63  ;;  %v2376_v28 = vunpack.i.l.bf16 %v2375_v63 }
  0xb8   : > { %v2320_v61 = vpop.permute.xlu0 %2319  ;;  %v3542_v29 = vsel %vm1015_vm6, %v1009_v22, %v2346_v23  ;;  %v3545_v21 = vsel %vm1015_vm6, %v1010_v18, %v2347_v11  ;;  %v424_v23 = vld [vmem:[%s3567_s27] sm:$0xf] }
  0xb9   : > { %v2322_v2 = vunpack.i.h.bf16 %v2320_v61  ;;  %v2321_v12 = vunpack.i.l.bf16 %v2320_v61 }
  0xba   : > { %2549 = vrot.lane.b32.xlu1 %v3288_v51, %s2973_s28 }
  0xbb   : > { %v1007_v6 = vsel %vm1006_vm5, %v3433_v31, %v2321_v12  ;;  %v1008_v4 = vsel %vm1006_vm5, %v3436_v44, %v2322_v2  ;;  %v3562_v44 = vld [vmem:[%s3225_s29 + $0x4c] sm:$0x1] }
  0xbc   : > { %2554 = vrot.lane.b32.xlu2 %v2553_v0, %s2973_s28  ;;  %v2340_v55 = vpop.permute.xlu1 %2339  ;;  %v4500_v11 = vunpack.c.l.bf16 %v3562_v44 }
  0xbd   : > { %v2342_v13 = vunpack.i.h.bf16 %v2340_v55  ;;  %v2341_v32 = vunpack.i.l.bf16 %v2340_v55 }
  0xbe   : > { %2544 = vrot.lane.b32.xlu0 %v3274_v41, %s2973_s28  ;;  %v3557_v51 = vpop.permute.xlu2 %2389  ;;  %v1116_v61 = vrot.slane %v4500_v11, 1 }
  0xbf   : > { %v1016_v49 = vsel %vm1015_vm6, %v1007_v6, %v2341_v32  ;;  %v1017_v31 = vsel %vm1015_vm6, %v1008_v4, %v2342_v13  ;;  %v432_v32 = vld [vmem:[%s3567_s27 + $0x20] sm:$0xf] }
  0xc0   : > { %v2335_v52 = vpop.permute.xlu0 %2334  ;;  %v3570_v24 = vsel %vm1024_vm7, %v1016_v49, %v2361_v59  ;;  %v3573_v41 = vsel %vm1024_vm7, %v1017_v31, %v2362_v10  ;;  %v2573_v10 = vpack.i.bf16 %v794_v53, %v3326_v34  ;;  %v434_v49 = vld [vmem:[%s3567_s27 + $0x28] sm:$0xf]  ;;  %v2392_v31 = vunpack.i.h.bf16 %v3557_v51 }
  0xc1   : > { %v2337_v57 = vunpack.i.h.bf16 %v2335_v52  ;;  %v2336_v5 = vunpack.i.l.bf16 %v2335_v52  ;;  %v2391_v52 = vunpack.i.l.bf16 %v3557_v51 }
  0xc2   : > { %2564 = vrot.lane.b32.xlu1 %v3462_v16, %s2959_s8  ;;  %v426_v16 = vld [vmem:[%s3567_s27 + $0x8] sm:$0xf] }
  0xc3   : > { %v1014_v62 = vsel %vm1006_vm5, %v3498_v48, %v2337_v57  ;;  %v1013_v8 = vsel %vm1006_vm5, %v3495_v33, %v2336_v5  ;;  %v1115_v33 = vrot.slane %v3534_v20, 1  ;;  %v3596_v48 = vunpack.c.l.bf16 %v424_v23  ;;  %v436_v57 = vld [vmem:[%s3567_s27 + $0x30] sm:$0xf] }
  0xc4   : > { %2569 = vrot.lane.b32.xlu2 %v3467_v45, %s2959_s8  ;;  %v2355_v14 = vpop.permute.xlu1 %2354  ;;  %v3602_v0 = vunpack.c.l.bf16 %v426_v16 }
  0xc5   : > { %v2357_v22 = vunpack.i.h.bf16 %v2355_v14  ;;  %v2356_v18 = vunpack.i.l.bf16 %v2355_v14  ;;  %v1174_v59 = vrot.slane %v3596_v48, 7  ;;  %v1117_v55 = vsel %vm480_vm0, %v1115_v33, %v1116_v61  ;;  %v430_v14 = vld [vmem:[%s3567_s27 + $0x18] sm:$0xf] }
  0xc6   : > { %2559 = vrot.lane.b32.xlu0 %v2558_v7, %s2959_s8  ;;  %v3590_v46 = vpop.permute.xlu2 %2404  ;;  %v4502_v13 = vrot.slane %v3602_v0, 7  ;;  %v2593_v7 = vpack.i.bf16 %v1116_v61, %v1117_v55  ;;  %v2588_v61 = vpack.i.bf16 %v901_v30, %v3486_v54 }
  0xc7   : > { %v1022_v63 = vsel %vm1015_vm6, %v1013_v8, %v2356_v18  ;;  %v1023_v45 = vsel %vm1015_vm6, %v1014_v62, %v2357_v22  ;;  %v3634_v62 = vunpack.c.l.bf16 %v432_v32  ;;  %v3636_v8 = vunpack.c.l.bf16 %v434_v49 }
  0xc8   : > { %v2350_v2 = vpop.permute.xlu0 %2349  ;;  %v3608_v58 = vsel %vm1024_vm7, %v1022_v63, %v2376_v28  ;;  %v3611_v12 = vsel %vm1024_vm7, %v1023_v45, %v2377_v50  ;;  %v2598_v50 = vpack.i.bf16 %v4502_v13, %v1174_v59  ;;  %v428_v28 = vld [vmem:[%s3567_s27 + $0x10] sm:$0xf]  ;;  %v3644_v22 = vunpack.c.l.bf16 %v436_v57  ;;  %v3776_v13 = vld [vmem:[%s3567_s27 + $0x3c] sm:$0x1] }
  0xc9   : > { %v2352_v6 = vunpack.i.h.bf16 %v2350_v2  ;;  %v2351_v4 = vunpack.i.l.bf16 %v2350_v2  ;;  %v4505_v2 = vrot.slane %v3634_v62, 7  ;;  %v2406_v30 = vunpack.i.l.bf16 %v3590_v46 }
  0xca   : > { %2579 = vrot.lane.b32.xlu1 %v2578_v47, %s2959_s8 }
  0xcb   : > { %v1020_v40 = vsel %vm1015_vm6, %v3519_v56, %v2351_v4  ;;  %v1021_v60 = vsel %vm1015_vm6, %v3522_v15, %v2352_v6  ;;  %v438_v15 = vld [vmem:[%s3567_s27 + $0x38] sm:$0xf]  ;;  %v3660_v6 = vunpack.c.l.bf16 %v428_v28  ;;  %v3662_v4 = vunpack.c.l.bf16 %v430_v14 }
  0xcc   : > { %2584 = vrot.lane.b32.xlu2 %v2583_v3, %s2959_s8  ;;  %v2370_v53 = vpop.permute.xlu1 %2369  ;;  %v3646_v18 = vunpack.c.l.bf16 %v438_v15  ;;  %v4504_v3 = vrot.slane %v3636_v8, 7 }
  0xcd   : > { %v2372_v34 = vunpack.i.h.bf16 %v2370_v53  ;;  %v2371_v56 = vunpack.i.l.bf16 %v2370_v53 }
  0xce   : > { %2574 = vrot.lane.b32.xlu0 %v2573_v10, %s2959_s8  ;;  %v3632_v5 = vpop.permute.xlu2 %2419  ;;  %v4499_v55 = vrot.slane %v3646_v18, 7 }
  0xcf   : > { %v1029_v51 = vsel %vm1024_vm7, %v1020_v40, %v2371_v56  ;;  %v1030_v23 = vsel %vm1024_vm7, %v1021_v60, %v2372_v34  ;;  %v2407_v40 = vunpack.i.h.bf16 %v3590_v46  ;;  %v4503_v60 = vrot.slane %v3644_v22, 7  ;;  %v3687_v34 = vld [vmem:[%s3567_s27 + $0xc] sm:$0x1] }
  0xd0   : > { %v2365_v16 = vpop.permute.xlu0 %2364  ;;  %v3649_v47 = vsel %vm1033_vm8, %v1029_v51, %v2391_v52  ;;  %v3652_v33 = vsel %vm1033_vm8, %v1030_v23, %v2392_v31  ;;  %v4501_v46 = vrot.slane %v3660_v6, 7  ;;  %v4506_v31 = vrot.slane %v3662_v4, 7 }
  0xd1   : > { %v2367_v63 = vunpack.i.h.bf16 %v2365_v16  ;;  %v2366_v45 = vunpack.i.l.bf16 %v2365_v16  ;;  %v3693_v57 = vpack.i.bf16 %v4499_v55, %v4503_v60  ;;  %v4509_v14 = vunpack.c.l.bf16 %v3687_v34  ;;  %v3749_v55 = vld [vmem:[%s3567_s27 + $0x2c] sm:$0x1] }
  0xd2   : > { %2594 = vrot.lane.b32.xlu1 %v2593_v7, %s2959_s8  ;;  %v3710_v28 = vpack.i.bf16 %v4506_v31, %v4501_v46 }
  0xd3   : > { %v1027_v10 = vsel %vm1024_vm7, %v3542_v29, %v2366_v45  ;;  %v1028_v59 = vsel %vm1024_vm7, %v3545_v21, %v2367_v63  ;;  %v3680_v21 = vpack.i.bf16 %v4504_v3, %v4505_v2  ;;  %v425_v45 = vld [vmem:[%s3567_s27 + $0x4] sm:$0x1] }
  0xd4   : > { %2599 = vrot.lane.b32.xlu2 %v2598_v50, %s2960_s9  ;;  %v2385_v54 = vpop.permute.xlu1 %2384  ;;  %v3702_v50 = vld [vmem:[%s3567_s27 + $0x14] sm:$0x1] }
  0xd5   : > { %v2387_v32 = vunpack.i.h.bf16 %v2385_v54  ;;  %v2386_v49 = vunpack.i.l.bf16 %v2385_v54 }
  0xd6   : > { %2589 = vrot.lane.b32.xlu0 %v2588_v61, %s2959_s8  ;;  %v3674_v29 = vpop.permute.xlu2 %2434  ;;  %v2422_v61 = vunpack.i.h.bf16 %v3632_v5  ;;  %s2974_s8 = smov 80  }
  0xd7   : > { %v1036_v52 = vsel %vm1033_vm8, %v1027_v10, %v2386_v49  ;;  %v1037_v53 = vsel %vm1033_vm8, %v1028_v59, %v2387_v32  ;;  %v2421_v10 = vunpack.i.l.bf16 %v3632_v5  ;;  %v445_v5 = vunpack.c.l.bf16 %v425_v45 }
  0xd8   : > { %v2380_v56 = vpop.permute.xlu0 %2379  ;;  %v3696_v15 = vsel %vm1042_vm9, %v1036_v52, %v2406_v30  ;;  %v3699_v7 = vsel %vm1042_vm9, %v1037_v53, %v2407_v40  ;;  %v449_v40 = vunpack.c.l.bf16 %v3702_v50  ;;  %v3735_v52 = vld [vmem:[%s3567_s27 + $0x24] sm:$0x1]  ;;  %v1265_v50 = vrot.slane %v3602_v0, 1 }
  0xd9   : > { %v2382_v51 = vunpack.i.h.bf16 %v2380_v56  ;;  %v2381_v23 = vunpack.i.l.bf16 %v2380_v56 }
  0xda   : > { %2609 = vrot.lane.b32.xlu1 %v3680_v21, %s2960_s9  ;;  %v3740_v56 = vpack.i.bf16 %v449_v40, %v3660_v6 }
  0xdb   : > { %v1034_v16 = vsel %vm1033_vm8, %v3570_v24, %v2381_v23  ;;  %v1035_v63 = vsel %vm1033_vm8, %v3573_v41, %v2382_v51  ;;  %v3730_v41 = vpack.i.bf16 %v4509_v14, %v3602_v0 }
  0xdc   : > { %2614 = vrot.lane.b32.xlu2 %v3693_v57, %s2960_s9  ;;  %v2400_v59 = vpop.permute.xlu1 %2399 }
  0xdd   : > { %v2402_v30 = vunpack.i.h.bf16 %v2400_v59  ;;  %v2401_v54 = vunpack.i.l.bf16 %v2400_v59 }
  0xde   : > { %2604 = vrot.lane.b32.xlu0 %v3710_v28, %s2960_s9  ;;  %v3725_v24 = vpop.permute.xlu2 %2449  ;;  %s2139_s9 = sshll.u32 %s4549_s18, 3 }
  0xdf   : > { %v1043_v32 = vsel %vm1042_vm9, %v1034_v16, %v2401_v54  ;;  %v1044_v49 = vsel %vm1042_vm9, %v1035_v63, %v2402_v30  ;;  %v2618_v16 = vpack.i.bf16 %v445_v5, %v3596_v48  ;;  %v4507_v63 = vunpack.c.l.bf16 %v3735_v52 }
  0xe0   : > { %v2395_v53 = vpop.permute.xlu0 %2394  ;;  %v3743_v51 = vsel %vm1051_vm10, %v1043_v32, %v2421_v10  ;;  %v3746_v23 = vsel %vm1051_vm10, %v1044_v49, %v2422_v61  ;;  %v431_v61 = vld [vmem:[%s3567_s27 + $0x1c] sm:$0x1]  ;;  %v2437_v54 = vunpack.i.h.bf16 %v3674_v29  ;;  %v2436_v32 = vunpack.i.l.bf16 %v3674_v29 }
  0xe1   : > { %v2397_v45 = vunpack.i.h.bf16 %v2395_v53  ;;  %v2396_v59 = vunpack.i.l.bf16 %v2395_v53  ;;  %v4508_v53 = vunpack.c.l.bf16 %v3749_v55 }
  0xe2   : > { %2624 = vrot.lane.b32.xlu1 %v3730_v41, %s2961_s10 }
  0xe3   : > { %v1040_v30 = vsel %vm1033_vm8, %v3608_v58, %v2396_v59  ;;  %v1041_v10 = vsel %vm1033_vm8, %v3611_v12, %v2397_v45  ;;  %v3771_v12 = vpack.i.bf16 %v4507_v63, %v3634_v62  ;;  %v451_v45 = vunpack.c.l.bf16 %v431_v61 }
  0xe4   : > { %2629 = vrot.lane.b32.xlu2 %v3740_v56, %s2961_s10  ;;  %v2415_v49 = vpop.permute.xlu1 %2414 }
  0xe5   : > { %v2417_v11 = vunpack.i.h.bf16 %v2415_v49  ;;  %v2416_v46 = vunpack.i.l.bf16 %v2415_v49 }
  0xe6   : > { %2619 = vrot.lane.b32.xlu0 %v2618_v16, %s2961_s10  ;;  %v3766_v58 = vpop.permute.xlu2 %2464  ;;  %v3781_v16 = vpack.i.bf16 %v4508_v53, %v3636_v8 }
  0xe7   : > { %v1049_v29 = vsel %vm1042_vm9, %v1040_v30, %v2416_v46  ;;  %v1050_v59 = vsel %vm1042_vm9, %v1041_v10, %v2417_v11  ;;  %v1262_v46 = vrot.slane %v3596_v48, 1  ;;  %v1263_v30 = vrot.slane %v445_v5, 1 }
  0xe8   : > { %v2410_v60 = vpop.permute.xlu0 %2409  ;;  %v3784_v49 = vsel %vm1051_vm10, %v1049_v29, %v2436_v32  ;;  %v3787_v3 = vsel %vm1051_vm10, %v1050_v59, %v2437_v54  ;;  %v3793_v11 = vpack.i.bf16 %v451_v45, %v3662_v4  ;;  %v4512_v10 = vunpack.c.l.bf16 %v3776_v13  ;;  %v437_v29 = vld [vmem:[%s3567_s27 + $0x34] sm:$0x1] }
  0xe9   : > { %v2412_v61 = vunpack.i.h.bf16 %v2410_v60  ;;  %v2411_v2 = vunpack.i.l.bf16 %v2410_v60  ;;  %v2452_v60 = vunpack.i.h.bf16 %v3725_v24  ;;  %v2451_v48 = vunpack.i.l.bf16 %v3725_v24 }
  0xea   : > { %2639 = vrot.lane.b32.xlu1 %v3771_v12, %s2961_s10  ;;  %v1264_v63 = vsel %vm480_vm0, %v1262_v46, %v1263_v30  ;;  %v1269_v46 = vrot.slane %v449_v40, 1  ;;  %v4517_v40 = vunpack.c.l.bf16 %v3687_v34 }
  0xeb   : > { %v1047_v32 = vsel %vm1042_vm9, %v3649_v47, %v2411_v2  ;;  %v1048_v54 = vsel %vm1042_vm9, %v3652_v33, %v2412_v61  ;;  %v3813_v33 = vpack.i.bf16 %v4512_v10, %v3646_v18  ;;  %v457_v2 = vunpack.c.l.bf16 %v437_v29 }
  0xec   : > { %2644 = vrot.lane.b32.xlu2 %v3781_v16, %s2961_s10  ;;  %v2430_v5 = vpop.permute.xlu1 %2429  ;;  %v2658_v14 = vpack.i.bf16 %v1263_v30, %v1264_v63  ;;  %v1271_v29 = vrot.slane %v3662_v4, 1  ;;  %v1266_v63 = vrot.slane %v4517_v40, 1 }
  0xed   : > { %v2432_v59 = vunpack.i.h.bf16 %v2430_v5  ;;  %v2431_v31 = vunpack.i.l.bf16 %v2430_v5  ;;  %v1268_v5 = vrot.slane %v3660_v6, 1 }
  0xee   : > { %2634 = vrot.lane.b32.xlu0 %v3793_v11, %s2961_s10  ;;  %v3808_v47 = vpop.permute.xlu2 %2479 }
  0xef   : > { %v1056_v24 = vsel %vm1051_vm10, %v1047_v32, %v2431_v31  ;;  %v1057_v61 = vsel %vm1051_vm10, %v1048_v54, %v2432_v59  ;;  %v1272_v31 = vrot.slane %v451_v45, 1  ;;  %v3830_v32 = vpack.i.bf16 %v457_v2, %v3644_v22 }
  0xf0   : > { %v2425_v53 = vpop.permute.xlu0 %2424  ;;  %v3821_v27 = vsel %vm1060_vm11, %v1056_v24, %v2451_v48  ;;  %v3824_v43 = vsel %vm1060_vm11, %v1057_v61, %v2452_v60  ;;  %v1270_v54 = vsel %vm480_vm0, %v1268_v5, %v1269_v46  ;;  %v2467_v45 = vunpack.i.h.bf16 %v3766_v58 }
  0xf1   : > { %v2427_v10 = vunpack.i.h.bf16 %v2425_v53  ;;  %v2426_v25 = vunpack.i.l.bf16 %v2425_v53  ;;  %v2466_v60 = vunpack.i.l.bf16 %v3766_v58  ;;  %v1273_v34 = vsel %vm480_vm0, %v1271_v29, %v1272_v31 }
  0xf2   : > { %2654 = vrot.lane.b32.xlu1 %v3813_v33, %s2961_s10  ;;  %v4518_v61 = vunpack.c.l.bf16 %v3749_v55  ;;  %v3856_v40 = vpack.i.bf16 %v1272_v31, %v1273_v34  ;;  %v1274_v55 = vrot.slane %v3634_v62, 1 }
  0xf3   : > { %v1054_v30 = vsel %vm1051_vm10, %v3696_v15, %v2426_v25  ;;  %v1055_v53 = vsel %vm1051_vm10, %v3699_v7, %v2427_v10  ;;  %v3848_v15 = vpack.i.bf16 %v1269_v46, %v1270_v54  ;;  %v1267_v7 = vsel %vm480_vm0, %v1265_v50, %v1266_v63 }
  0xf4   : > { %2659 = vrot.lane.b32.xlu2 %v2658_v14, %s2962_s11  ;;  %v2445_v48 = vpop.permute.xlu1 %2444  ;;  %v1277_v14 = vrot.slane %v3636_v8, 1  ;;  %v1278_v5 = vrot.slane %v4518_v61, 1 }
  0xf5   : > { %v2447_v59 = vunpack.i.h.bf16 %v2445_v48  ;;  %v2446_v24 = vunpack.i.l.bf16 %v2445_v48 }
  0xf6   : > { %2649 = vrot.lane.b32.xlu0 %v3830_v32, %s2961_s10  ;;  %v3846_v25 = vpop.permute.xlu2 %2494  ;;  %s2140_s10 = sshll.u32 %s4543_s19, 6 }
  0xf7   : > { %v1063_v10 = vsel %vm1060_vm11, %v1054_v30, %v2446_v24  ;;  %v1064_v58 = vsel %vm1060_vm11, %v1055_v53, %v2447_v59  ;;  %v1280_v30 = vrot.slane %v3644_v22, 1  ;;  %v1281_v24 = vrot.slane %v457_v2, 1 }
  0xf8   : > { %v2440_v29 = vpop.permute.xlu0 %2439  ;;  %v3859_v48 = vsel %vm1069_vm12, %v1063_v10, %v2466_v60  ;;  %v3862_v46 = vsel %vm1069_vm12, %v1064_v58, %v2467_v45  ;;  %v3867_v53 = vpack.i.bf16 %v1266_v63, %v1267_v7  ;;  %v1279_v45 = vsel %vm480_vm0, %v1277_v14, %v1278_v5 }
  0xf9   : > { %v2442_v54 = vunpack.i.h.bf16 %v2440_v29  ;;  %v2441_v50 = vunpack.i.l.bf16 %v2440_v29  ;;  %v4519_v59 = vunpack.c.l.bf16 %v3735_v52  ;;  %v2482_v2 = vunpack.i.h.bf16 %v3808_v47 }
  0xfa   : > { %2669 = vrot.lane.b32.xlu1 %v3848_v15, %s2962_s11  ;;  %v2481_v10 = vunpack.i.l.bf16 %v3808_v47  ;;  %v3884_v14 = vpack.i.bf16 %v1278_v5, %v1279_v45 }
  0xfb   : > { %v1061_v31 = vsel %vm1060_vm11, %v3743_v51, %v2441_v50  ;;  %v1062_v60 = vsel %vm1060_vm11, %v3746_v23, %v2442_v54  ;;  %v1275_v34 = vrot.slane %v4519_v59, 1  ;;  %v1282_v51 = vsel %vm480_vm0, %v1280_v30, %v1281_v24 }
  0xfc   : > { %2674 = vrot.lane.b32.xlu2 %v3856_v40, %s2962_s11  ;;  %v2460_v63 = vpop.permute.xlu1 %2459  ;;  %v3889_v54 = vpack.i.bf16 %v1281_v24, %v1282_v51  ;;  %v4522_v51 = vrot.slane %v3634_v62, 7 }
  0xfd   : > { %v2462_v7 = vunpack.i.h.bf16 %v2460_v63  ;;  %v2461_v58 = vunpack.i.l.bf16 %v2460_v63  ;;  %v1276_v47 = vsel %vm480_vm0, %v1274_v55, %v1275_v34  ;;  %v1283_v55 = vrot.slane %v3646_v18, 1 }
  0xfe   : > { %2664 = vrot.lane.b32.xlu0 %v3867_v53, %s2962_s11  ;;  %v2510_v23 = vpop.permute.xlu2 %2509  ;;  %v3899_v5 = vpack.i.bf16 %v1275_v34, %v1276_v47 }
  0xff   : > { %v1070_v52 = vsel %vm1069_vm12, %v1061_v31, %v2461_v58  ;;  %v1071_v61 = vsel %vm1069_vm12, %v1062_v60, %v2462_v7  ;;  %v4520_v60 = vunpack.c.l.bf16 %v3776_v13 }
 0x100   : > { %v2455_v29 = vpop.permute.xlu0 %2454  ;;  %v3892_v50 = vsel %vm1078_vm13, %v1070_v52, %v2481_v10  ;;  %v3895_v30 = vsel %vm1078_vm13, %v1071_v61, %v2482_v2  ;;  %v2497_v2 = vunpack.i.h.bf16 %v3846_v25  ;;  %v2496_v10 = vunpack.i.l.bf16 %v3846_v25 }
 0x101   : > { %v2457_v59 = vunpack.i.h.bf16 %v2455_v29  ;;  %v2456_v63 = vunpack.i.l.bf16 %v2455_v29  ;;  %v1284_v45 = vrot.slane %v4520_v60, 1 }
 0x102   : > { %2684 = vrot.lane.b32.xlu1 %v3884_v14, %s2962_s11 }
 0x103   : > { %v1067_v31 = vsel %vm1060_vm11, %v3784_v49, %v2456_v63  ;;  %v1068_v24 = vsel %vm1060_vm11, %v3787_v3, %v2457_v59  ;;  %v4521_v3 = vrot.slane %v3662_v4, 7  ;;  %v1285_v25 = vsel %vm480_vm0, %v1283_v55, %v1284_v45 }
 0x104   : > { %2689 = vrot.lane.b32.xlu2 %v3889_v54, %s2962_s11  ;;  %v2475_v34 = vpop.permute.xlu1 %2474  ;;  %v3928_v4 = vpack.i.bf16 %v1284_v45, %v1285_v25  ;;  %v2511_v55 = vunpack.i.l.bf16 %v2510_v23 }
 0x105   : > { %v2477_v7 = vunpack.i.h.bf16 %v2475_v34  ;;  %v2476_v58 = vunpack.i.l.bf16 %v2475_v34  ;;  %v2698_v13 = vpack.i.bf16 %v4522_v51, %v4521_v3 }
 0x106   : > { %2679 = vrot.lane.b32.xlu0 %v3899_v5, %s2962_s11  ;;  %v2525_v49 = vpop.permute.xlu2 %2524 }
 0x107   : > { %v1076_v52 = vsel %vm1069_vm12, %v1067_v31, %v2476_v58  ;;  %v1077_v61 = vsel %vm1069_vm12, %v1068_v24, %v2477_v7  ;;  %v2512_v24 = vunpack.i.h.bf16 %v2510_v23  ;;  %v2526_v25 = vunpack.i.l.bf16 %v2525_v49 }
 0x108   : > { %v2470_v47 = vpop.permute.xlu0 %2469  ;;  %v3922_v29 = vsel %vm1078_vm13, %v1076_v52, %v2496_v10  ;;  %v3925_v59 = vsel %vm1078_vm13, %v1077_v61, %v2497_v2  ;;  %v2527_v61 = vunpack.i.h.bf16 %v2525_v49 }
 0x109   : > { %v2472_v63 = vunpack.i.h.bf16 %v2470_v47  ;;  %v2471_v60 = vunpack.i.l.bf16 %v2470_v47 }
 0x10a   : > { %2699 = vrot.lane.b32.xlu1 %v2698_v13, %s2963_s12 }
 0x10b   : > { %v1074_v62 = vsel %vm1069_vm12, %v3821_v27, %v2471_v60  ;;  %v1075_v31 = vsel %vm1069_vm12, %v3824_v43, %v2472_v63 }
 0x10c   : > { %2704 = vrot.lane.b32.xlu2 %v3793_v11, %s2964_s14  ;;  %v2490_v10 = vpop.permute.xlu1 %2489 }
 0x10d   : > { %v2492_v2 = vunpack.i.h.bf16 %v2490_v10  ;;  %v2491_v34 = vunpack.i.l.bf16 %v2490_v10 }
 0x10e   : > { %2694 = vrot.lane.b32.xlu0 %v3928_v4, %s2962_s11  ;;  %v2540_v45 = vpop.permute.xlu2 %2539 }
 0x10f   : > { %v1083_v7 = vsel %vm1078_vm13, %v1074_v62, %v2491_v34  ;;  %v1084_v27 = vsel %vm1078_vm13, %v1075_v31, %v2492_v2 }
 0x110   : > { %v2485_v58 = vpop.permute.xlu0 %2484  ;;  %v3941_v43 = vsel %vm1087_vm14, %v1083_v7, %v2511_v55  ;;  %v3944_v23 = vsel %vm1087_vm14, %v1084_v27, %v2512_v24  ;;  %v2542_v7 = vunpack.i.h.bf16 %v2540_v45  ;;  %v2541_v27 = vunpack.i.l.bf16 %v2540_v45 }
 0x111   : > { %v2487_v3 = vunpack.i.h.bf16 %v2485_v58  ;;  %v2486_v51 = vunpack.i.l.bf16 %v2485_v58  ;;  %v4524_v45 = vrot.slane %v3644_v22, 7 }
 0x112   : > { %2714 = vrot.lane.b32.xlu1 %v3856_v40, %s2965_s17 }
 0x113   : > { %v1081_v13 = vsel %vm1078_vm13, %v3859_v48, %v2486_v51  ;;  %v1082_v52 = vsel %vm1078_vm13, %v3862_v46, %v2487_v3 }
 0x114   : > { %2719 = vrot.lane.b32.xlu2 %v3899_v5, %s2965_s17  ;;  %v2505_v47 = vpop.permute.xlu1 %2504 }
 0x115   : > { %v2507_v63 = vunpack.i.h.bf16 %v2505_v47  ;;  %v2506_v60 = vunpack.i.l.bf16 %v2505_v47 }
 0x116   : > { %2709 = vrot.lane.b32.xlu0 %v3771_v12, %s2964_s14  ;;  %v2555_v62 = vpop.permute.xlu2 %2554 }
 0x117   : > { %v1090_v31 = vsel %vm1087_vm14, %v1081_v13, %v2506_v60  ;;  %v1091_v48 = vsel %vm1087_vm14, %v1082_v52, %v2507_v63  ;;  %v2556_v22 = vunpack.i.l.bf16 %v2555_v62 }
 0x118   : > { %v2500_v24 = vpop.permute.xlu0 %2499  ;;  %v1099_v46 = vsel %vm1096_vm15, %v1090_v31, %v2526_v25  ;;  %v1100_v49 = vsel %vm1096_vm15, %v1091_v48, %v2527_v61  ;;  %v2557_v31 = vunpack.i.h.bf16 %v2555_v62 }
 0x119   : > { %v2502_v55 = vunpack.i.h.bf16 %v2500_v24  ;;  %v2501_v10 = vunpack.i.l.bf16 %v2500_v24 }
 0x11a   : > { %2729 = vrot.lane.b32.xlu1 %v3771_v12, %s2967_s6 }
 0x11b   : > { %v1088_v2 = vsel %vm1087_vm14, %v3892_v50, %v2501_v10  ;;  %v1089_v34 = vsel %vm1087_vm14, %v3895_v30, %v2502_v55  ;;  %v4523_v30 = vrot.slane %v3636_v8, 7 }
 0x11c   : > { %2734 = vrot.lane.b32.xlu2 %v3781_v16, %s2967_s6  ;;  %v2520_v58 = vpop.permute.xlu1 %2519 }
 0x11d   : > { %v2522_v3 = vunpack.i.h.bf16 %v2520_v58  ;;  %v2521_v51 = vunpack.i.l.bf16 %v2520_v58  ;;  %v2748_v61 = vpack.i.bf16 %v4524_v45, %v4523_v30 }
 0x11e   : > { %2724 = vrot.lane.b32.xlu0 %v3680_v21, %s2966_s30  ;;  %v3970_v13 = vpop.permute.xlu2 %2569 }
 0x11f   : > { %v1097_v12 = vsel %vm1096_vm15, %v1088_v2, %v2521_v51  ;;  %v1098_v50 = vsel %vm1096_vm15, %v1089_v34, %v2522_v3 }
 0x120   : > { %v2515_v52 = vpop.permute.xlu0 %2514  ;;  %v3979_v25 = vsel %vm1105_vm1, %v1097_v12, %v2541_v27  ;;  %v3982_v47 = vsel %vm1105_vm1, %v1098_v50, %v2542_v7 }
 0x121   : > { %v2517_v63 = vunpack.i.h.bf16 %v2515_v52  ;;  %v2516_v21 = vunpack.i.l.bf16 %v2515_v52 }
 0x122   : > { %2744 = vrot.lane.b32.xlu1 %v3884_v14, %s2968_s7 }
 0x123   : > { %v1094_v60 = vsel %vm1087_vm14, %v3922_v29, %v2516_v21  ;;  %v1095_v8 = vsel %vm1087_vm14, %v3925_v59, %v2517_v63 }
 0x124   : > { %2749 = vrot.lane.b32.xlu2 %v2748_v61, %s2963_s12  ;;  %v2535_v48 = vpop.permute.xlu1 %2534 }
 0x125   : > { %v2537_v24 = vunpack.i.h.bf16 %v2535_v48  ;;  %v2536_v55 = vunpack.i.l.bf16 %v2535_v48 }
 0x126   : > { %2739 = vrot.lane.b32.xlu0 %v3899_v5, %s2968_s7  ;;  %v3993_v10 = vpop.permute.xlu2 %2584 }
 0x127   : > { %v1103_v2 = vsel %vm1096_vm15, %v1094_v60, %v2536_v55  ;;  %v1104_v34 = vsel %vm1096_vm15, %v1095_v8, %v2537_v24 }
 0x128   : > { %v2530_v29 = vpop.permute.xlu0 %2529  ;;  %v3998_v7 = vsel %vm1105_vm1, %v1103_v2, %v2556_v22  ;;  %v4001_v59 = vsel %vm1105_vm1, %v1104_v34, %v2557_v31 }
 0x129   : > { %v2532_v62 = vunpack.i.h.bf16 %v2530_v29  ;;  %v2531_v27 = vunpack.i.l.bf16 %v2530_v29 }
 0x12a   : > { %2759 = vrot.lane.b32.xlu1 %v3830_v32, %s2964_s14 }
 0x12b   : > { %v1101_v5 = vsel %vm1096_vm15, %v3941_v43, %v2531_v27  ;;  %v1102_v58 = vsel %vm1096_vm15, %v3944_v23, %v2532_v62 }
 0x12c   : > { %v2550_v3 = vpop.permute.xlu1 %2549  ;;  %2764 = vrot.lane.b32.xlu2 %v3884_v14, %s2965_s17 }
 0x12d   : > { %v2552_v51 = vunpack.i.h.bf16 %v2550_v3  ;;  %v2551_v12 = vunpack.i.l.bf16 %v2550_v3 }
 0x12e   : > { %2754 = vrot.lane.b32.xlu0 %v3781_v16, %s2964_s14  ;;  %v2600_v50 = vpop.permute.xlu2 %2599 }
 0x12f   : > { %v4014_v52 = vsel %vm1105_vm1, %v1101_v5, %v2551_v12  ;;  %v4017_v30 = vsel %vm1105_vm1, %v1102_v58, %v2552_v51  ;;  %v2602_v16 = vunpack.i.h.bf16 %v2600_v50  ;;  %v2601_v31 = vunpack.i.l.bf16 %v2600_v50 }
 0x130   : > { %v2545_v43 = vpop.permute.xlu0 %2544  ;;  %v2587_v12 = vunpack.i.h.bf16 %v3993_v10 }
 0x131   : > { %v2547_v45 = vunpack.i.h.bf16 %v2545_v43  ;;  %v2546_v61 = vunpack.i.l.bf16 %v2545_v43 }
 0x132   : > { %2774 = vrot.lane.b32.xlu1 %v3693_v57, %s2966_s30 }
 0x133   : > { %v4022_v14 = vsel %vm1105_vm1, %v1099_v46, %v2546_v61  ;;  %v4025_v23 = vsel %vm1105_vm1, %v1100_v49, %v2547_v45 }
 0x134   : > { %v2565_v63 = vpop.permute.xlu1 %2564  ;;  %2779 = vrot.lane.b32.xlu2 %v3830_v32, %s2967_s6 }
 0x135   : > { %v2567_v21 = vunpack.i.h.bf16 %v2565_v63  ;;  %v2566_v60 = vunpack.i.l.bf16 %v2565_v63 }
 0x136   : > { %2769 = vrot.lane.b32.xlu0 %v3889_v54, %s2965_s17  ;;  %v2615_v8 = vpop.permute.xlu2 %2614 }
 0x137   : > { %v1589_v57 = vsel %vm979_vm2, %v3257_v1, %v2567_v21  ;;  %v1588_v46 = vsel %vm979_vm2, %v3268_v38, %v2566_v60  ;;  %v2617_v27 = vunpack.i.h.bf16 %v2615_v8  ;;  %v2616_v43 = vunpack.i.l.bf16 %v2615_v8 }
 0x138   : > { %v2560_v49 = vpop.permute.xlu0 %2559  ;;  %v4036_v22 = vsel %vm988_vm3, %v1588_v46, %v2602_v16  ;;  %v4039_v48 = vsel %vm988_vm3, %v1589_v57, %v2602_v16  ;;  %v1597_v8 = vsel %vm979_vm2, %v3340_v19, %v2587_v12 }
 0x139   : > { %v2562_v32 = vunpack.i.h.bf16 %v2560_v49  ;;  %v2561_v24 = vunpack.i.l.bf16 %v2560_v49 }
 0x13a   : > { %2789 = vrot.lane.b32.xlu1 %v3889_v54, %s2968_s7 }
 0x13b   : > { %v1587_v55 = vsel %vm979_vm2, %v3255_v35, %v2562_v32  ;;  %v1586_v1 = vsel %vm979_vm2, %v3266_v37, %v2561_v24  ;;  %v4525_v35 = vrot.slane %v3602_v0, 7  ;;  %v4526_v37 = vrot.slane %v3660_v6, 7 }
 0x13c   : > { %v2580_v38 = vpop.permute.xlu1 %2579  ;;  %2794 = vrot.lane.b32.xlu2 %v3928_v4, %s2968_s7  ;;  %v4050_v2 = vsel %vm988_vm3, %v1586_v1, %v2601_v31  ;;  %v4053_v34 = vsel %vm988_vm3, %v1587_v55, %v2601_v31  ;;  %v4527_v0 = vunpack.c.l.bf16 %v3562_v44  ;;  %v2571_v44 = vunpack.i.l.bf16 %v3970_v13 }
 0x13d   : > { %v2798_v62 = vpack.i.bf16 %v4526_v37, %v4525_v35  ;;  %v2582_v63 = vunpack.i.h.bf16 %v2580_v38  ;;  %v2581_v57 = vunpack.i.l.bf16 %v2580_v38 }
 0x13e   : > { %2784 = vrot.lane.b32.xlu0 %v3813_v33, %s2967_s6  ;;  %v4057_v54 = vpop.permute.xlu2 %2629 }
 0x140   : > { %v2575_v29 = vpop.permute.xlu0 %2574 }
 0x141   : > { %v2577_v38 = vunpack.i.h.bf16 %v2575_v29  ;;  %v2576_v35 = vunpack.i.l.bf16 %v2575_v29  ;;  %v4528_v29 = vld [vmem:[#allocation2_spill] sm:$0xff] }
 0x142   : > { %2804 = vrot.lane.b32.xlu1 %v3730_v41, %s2964_s14  ;;  %v2586_v41 = vunpack.i.l.bf16 %v3993_v10  ;;  %v2572_v10 = vunpack.i.h.bf16 %v3970_v13 }
 0x144   : > { %v2595_v5 = vpop.permute.xlu1 %2594  ;;  %2809 = vrot.lane.b32.xlu2 %v3740_v56, %s2964_s14  ;;  %v1596_v46 = vsel %vm979_vm2, %v3264_v36, %v2586_v41  ;;  %v1595_v36 = vsel %vm979_vm2, %v3338_v17, %v2582_v63  ;;  %v4529_v41 = vld [vmem:[#allocation4_spill] sm:$0xff] }
 0x145   : > { %v2597_v58 = vunpack.i.h.bf16 %v2595_v5  ;;  %v2596_v3 = vunpack.i.l.bf16 %v2595_v5 }
 0x146   : > { %2799 = vrot.lane.b32.xlu0 %v2798_v62, %s2963_s12  ;;  %v2645_v51 = vpop.permute.xlu2 %2644 }
 0x147   : > { %v1601_v6 = vsel %vm979_vm2, %v4527_v0, %v2597_v58  ;;  %v1600_v50 = vsel %vm979_vm2, %v3534_v20, %v2596_v3  ;;  %v440_v20 = vld [vmem:[%s3567_s27 + $0x40] sm:$0xf]  ;;  %v2646_v32 = vunpack.i.l.bf16 %v2645_v51  ;;  %v2647_v37 = vunpack.i.h.bf16 %v2645_v51 }
 0x148   : > { %v2590_v45 = vpop.permute.xlu0 %2589  ;;  %v4076_v61 = vsel %vm988_vm3, %v1600_v50, %v2617_v27  ;;  %v4079_v16 = vsel %vm988_vm3, %v1601_v6, %v2617_v27  ;;  %v1591_v58 = vsel %vm979_vm2, %v3276_v42, %v2572_v10  ;;  %v1590_v51 = vsel %vm979_vm2, %v4528_v29, %v2571_v44  ;;  %v4530_v6 = vld [vmem:[#allocation3_spill] sm:$0xff] }
 0x149   : > { %v2592_v21 = vunpack.i.h.bf16 %v2590_v45  ;;  %v2591_v60 = vunpack.i.l.bf16 %v2590_v45  ;;  %v1593_v0 = vsel %vm979_vm2, %v4529_v41, %v2577_v38  ;;  %v1592_v50 = vsel %vm979_vm2, %v4530_v6, %v2576_v35 }
 0x14a   : > { %2819 = vrot.lane.b32.xlu1 %v3848_v15, %s2965_s17 }
 0x14b   : > { %v1599_v31 = vsel %vm979_vm2, %v3442_v26, %v2592_v21  ;;  %v1598_v49 = vsel %vm979_vm2, %v3413_v39, %v2591_v60  ;;  %v4104_v26 = vunpack.c.l.bf16 %v440_v20  ;;  %v1594_v39 = vsel %vm979_vm2, %v3262_v9, %v2581_v57 }
 0x14c   : > { %v2610_v24 = vpop.permute.xlu1 %2609  ;;  %2824 = vrot.lane.b32.xlu2 %v3710_v28, %s2966_s30  ;;  %v4097_v13 = vsel %vm988_vm3, %v1598_v49, %v2616_v43  ;;  %v4100_v55 = vsel %vm988_vm3, %v1599_v31, %v2616_v43  ;;  %v4531_v20 = vrot.slane %v3646_v18, 7  ;;  %vm1912_vm2 = vcmask 1042432  }
 0x14d   : > { %v2612_v19 = vunpack.i.h.bf16 %v2610_v24  ;;  %v2611_v1 = vunpack.i.l.bf16 %v2610_v24  ;;  %v1335_v42 = vrot.slane %v4104_v26, 7 }
 0x14e   : > { %2814 = vrot.lane.b32.xlu0 %v3867_v53, %s2965_s17  ;;  %v2660_v28 = vpop.permute.xlu2 %2659 }
 0x14f   : > { %v1610_v62 = vsel %vm988_vm3, %v1594_v39, %v2611_v1  ;;  %v1611_v27 = vsel %vm988_vm3, %v1595_v36, %v2611_v1  ;;  %v1612_v17 = vsel %vm988_vm3, %v1596_v46, %v2612_v19  ;;  %v1613_v5 = vsel %vm988_vm3, %v1597_v8, %v2612_v19  ;;  %v441_v46 = vld [vmem:[%s3567_s27 + $0x44] sm:$0x1] }
 0x150   : > { %v2605_v3 = vpop.permute.xlu0 %2604  ;;  %v4117_v9 = vsel %vm997_vm4, %v1612_v17, %v2646_v32  ;;  %v4129_v43 = vsel %vm997_vm4, %v1613_v5, %v2647_v37  ;;  %v2848_v8 = vpack.i.bf16 %v1335_v42, %v4531_v20  ;;  %v2662_v49 = vunpack.i.h.bf16 %v2660_v28  ;;  %v442_v5 = vld [vmem:[%s3567_s27 + $0x48] sm:$0xf] }
 0x151   : > { %v2607_v53 = vunpack.i.h.bf16 %v2605_v3  ;;  %v2606_v12 = vunpack.i.l.bf16 %v2605_v3  ;;  %v2661_v32 = vunpack.i.l.bf16 %v2660_v28  ;;  %v461_v19 = vunpack.c.l.bf16 %v441_v46  ;;  %v443_v3 = vld [vmem:[%s3567_s27 + $0x4c] sm:$0x1] }
 0x152   : > { %2834 = vrot.lane.b32.xlu1 %v3793_v11, %s2967_s6  ;;  %v1409_v1 = vrot.slane %v4104_v26, 1 }
 0x153   : > { %v4132_v45 = vsel %vm988_vm3, %v1590_v51, %v2606_v12  ;;  %v4135_v63 = vsel %vm988_vm3, %v1591_v58, %v2606_v12  ;;  %v4138_v21 = vsel %vm988_vm3, %v1592_v50, %v2607_v53  ;;  %v4141_v60 = vsel %vm988_vm3, %v1593_v0, %v2607_v53 }
 0x154   : > { %v2625_v10 = vpop.permute.xlu1 %2624  ;;  %2839 = vrot.lane.b32.xlu2 %v3848_v15, %s2968_s7  ;;  %v2858_v51 = vpack.i.bf16 %v461_v19, %v4104_v26  ;;  %v463_v53 = vunpack.c.l.bf16 %v443_v3  ;;  %vm1913_vm3 = vcmask 1043456  }
 0x155   : > { %v2627_v11 = vunpack.i.h.bf16 %v2625_v10  ;;  %v2626_v44 = vunpack.i.l.bf16 %v2625_v10 }
 0x156   : > { %2829 = vrot.lane.b32.xlu0 %v3740_v56, %s2967_s6  ;;  %v4147_v57 = vpop.permute.xlu2 %2674 }
 0x157   : > { %v4156_v31 = vsel %vm997_vm4, %v4036_v22, %v2626_v44  ;;  %v4160_v15 = vsel %vm997_vm4, %v4039_v48, %v2627_v11  ;;  %v1410_v48 = vrot.slane %v461_v19, 1 }
 0x158   : > { %v2620_v24 = vpop.permute.xlu0 %2619 }
 0x159   : > { %v2622_v56 = vunpack.i.h.bf16 %v2620_v24  ;;  %v2621_v36 = vunpack.i.l.bf16 %v2620_v24 }
 0x15a   : > { %2849 = vrot.lane.b32.xlu1 %v2848_v8, %s2963_s12 }
 0x15b   : > { %v1618_v18 = vsel %vm997_vm4, %v4050_v2, %v2621_v36  ;;  %v1619_v22 = vsel %vm997_vm4, %v4053_v34, %v2622_v56 }
 0x15c   : > { %v2640_v39 = vpop.permute.xlu1 %2639  ;;  %2854 = vrot.lane.b32.xlu2 %v3813_v33, %s2964_s14  ;;  %v4171_v38 = vsel %vm1006_vm5, %v1618_v18, %v2661_v32  ;;  %v4174_v35 = vsel %vm1006_vm5, %v1619_v22, %v2662_v49  ;;  %v1411_v33 = vsel %vm480_vm0, %v1409_v1, %v1410_v48 }
 0x15d   : > { %v2642_v37 = vunpack.i.h.bf16 %v2640_v39  ;;  %v2641_v28 = vunpack.i.l.bf16 %v2640_v39  ;;  %v2868_v29 = vpack.i.bf16 %v1410_v48, %v1411_v33 }
 0x15e   : > { %2844 = vrot.lane.b32.xlu0 %v3856_v40, %s2968_s7  ;;  %v2690_v17 = vpop.permute.xlu2 %2689  ;;  %v462_v40 = vunpack.c.l.bf16 %v442_v5 }
 0x15f   : > { %v4179_v2 = vsel %vm997_vm4, %v1610_v62, %v2641_v28  ;;  %v4182_v34 = vsel %vm997_vm4, %v1611_v27, %v2642_v37  ;;  %v2692_v10 = vunpack.i.h.bf16 %v2690_v17  ;;  %v2691_v11 = vunpack.i.l.bf16 %v2690_v17 }
 0x160   : > { %v4186_v58 = vpop.permute.xlu0 %2634  ;;  %v1461_v41 = vrot.slane %v462_v40, 7  ;;  %v1535_v50 = vrot.slane %v462_v40, 1  ;;  %v2883_v20 = vpack.i.bf16 %v463_v53, %v462_v40 }
 0x161   : > { %v2636_v40 = vunpack.i.l.bf16 %v4186_v58 }
 0x162   : > { %2864 = vrot.lane.b32.xlu1 %v3928_v4, %s2965_s17  ;;  %v1536_v4 = vrot.slane %v463_v53, 1  ;;  %v2873_v32 = vpack.i.bf16 %v1461_v41, %v1335_v42 }
 0x163   : > { %v1624_v41 = vsel %vm997_vm4, %v4138_v21, %v2636_v40 }
 0x164   : > { %v2655_v62 = vpop.permute.xlu1 %2654  ;;  %2869 = vrot.lane.b32.xlu2 %v2868_v29, %s2965_s17  ;;  %v1537_v24 = vsel %vm480_vm0, %v1535_v50, %v1536_v4  ;;  %v2632_v50 = vunpack.i.h.bf16 %v4057_v54 }
 0x165   : > { %v2657_v27 = vunpack.i.h.bf16 %v2655_v62  ;;  %v2656_v12 = vunpack.i.l.bf16 %v2655_v62  ;;  %v2893_v26 = vpack.i.bf16 %v1536_v4, %v1537_v24  ;;  %v2631_v62 = vunpack.i.l.bf16 %v4057_v54 }
 0x166   : > { %2859 = vrot.lane.b32.xlu0 %v2858_v51, %s2964_s14  ;;  %v4198_v8 = vpop.permute.xlu2 %2704  ;;  %v1623_v54 = vsel %vm997_vm4, %v4135_v63, %v2632_v50  ;;  %s340_s14 = sadd.s32 %s2140_s10, %s2139_s9 }
 0x167   : > { %v1632_v0 = vsel %vm997_vm4, %v4076_v61, %v2656_v12  ;;  %v1633_v6 = vsel %vm997_vm4, %v4079_v16, %v2657_v27  ;;  %v2677_v27 = vunpack.i.h.bf16 %v4147_v57  ;;  %v2676_v12 = vunpack.i.l.bf16 %v4147_v57  ;;  %s2141_s17 = sshll.u32 %s340_s14, 3 }
 0x168   : > { %v2650_v44 = vpop.permute.xlu0 %2649 }
 0x169   : > { %v2652_v46 = vunpack.i.h.bf16 %v2650_v44  ;;  %v2651_v49 = vunpack.i.l.bf16 %v2650_v44  ;;  %v1640_v57 = vsel %vm1006_vm5, %v1624_v41, %v2676_v12 }
 0x16a   : > { %2879 = vrot.lane.b32.xlu1 %v2858_v51, %s2967_s6  ;;  %v2637_v51 = vunpack.i.h.bf16 %v4186_v58 }
 0x16b   : > { %v1630_v61 = vsel %vm997_vm4, %v4097_v13, %v2651_v49  ;;  %v1631_v16 = vsel %vm997_vm4, %v4100_v55, %v2652_v46  ;;  %v1622_v46 = vsel %vm997_vm4, %v4132_v45, %v2631_v62 }
 0x16c   : > { %v2670_v56 = vpop.permute.xlu1 %2669  ;;  %2884 = vrot.lane.b32.xlu2 %v2883_v20, %s2967_s6  ;;  %v4210_v36 = vsel %vm1006_vm5, %v1630_v61, %v2691_v11  ;;  %v4213_v19 = vsel %vm1006_vm5, %v1631_v16, %v2692_v10  ;;  %s4460_s6 = scalar_lea.vmem %s4498_s5, %s2141_s17 }
 0x16d   : > { %v2671_v4 = vunpack.i.l.bf16 %v2670_v56  ;;  %v2672_v11 = vunpack.i.h.bf16 %v2670_v56 }
 0x16e   : > { %2874 = vrot.lane.b32.xlu0 %v2873_v32, %s2966_s30  ;;  %v2720_v55 = vpop.permute.xlu2 %2719 }
 0x16f   : > { %v2722_v21 = vunpack.i.h.bf16 %v2720_v55  ;;  %v2721_v32 = vunpack.i.l.bf16 %v2720_v55  ;;  %v1638_v16 = vsel %vm1006_vm5, %v1622_v46, %v2671_v4 }
 0x170   : > { %v2665_v42 = vpop.permute.xlu0 %2664 }
 0x171   : > { %v2667_v18 = vunpack.i.h.bf16 %v2665_v42  ;;  %v2666_v13 = vunpack.i.l.bf16 %v2665_v42  ;;  %v2706_v42 = vunpack.i.l.bf16 %v4198_v8 }
 0x172   : > { %2894 = vrot.lane.b32.xlu1 %v2893_v26, %s2968_s7  ;;  %v2707_v26 = vunpack.i.h.bf16 %v4198_v8 }
 0x173   : > { %v4219_v22 = vsel %vm1006_vm5, %v4160_v15, %v2667_v18  ;;  %v4223_v1 = vsel %vm1006_vm5, %v4156_v31, %v2666_v13  ;;  %v1639_v18 = vsel %vm1006_vm5, %v1623_v54, %v2672_v11 }
 0x174   : > { %v4225_v48 = vpop.permute.xlu1 %2684 }
 0x176   : > { %2889 = vrot.lane.b32.xlu0 %v2868_v29, %s2968_s7  ;;  %v4230_v28 = vpop.permute.xlu2 %2734 }
 0x178   : > { %v4228_v39 = vpop.permute.xlu0 %2679 }
 0x17c   : > { %v2700_v37 = vpop.permute.xlu1 %2699 }
 0x17d   : > { %v2701_v44 = vunpack.i.l.bf16 %v2700_v37 }
 0x17e   : > { %v4240_v29 = vpop.permute.xlu2 %2749 }
 0x17f   : > { %v1654_v13 = vsel %vm1015_vm6, %v1638_v16, %v2701_v44 }
 0x180   : > { %v2695_v17 = vpop.permute.xlu0 %2694  ;;  %v1670_v12 = vsel %vm1024_vm7, %v1654_v13, %v2706_v42 }
 0x181   : > { %v2697_v5 = vunpack.i.h.bf16 %v2695_v17  ;;  %v2696_v33 = vunpack.i.l.bf16 %v2695_v17 }
 0x183   : > { %v4233_v3 = vsel %vm1006_vm5, %v1633_v6, %v2697_v5  ;;  %v4236_v15 = vsel %vm1006_vm5, %v1632_v0, %v2696_v33  ;;  %v1625_v0 = vsel %vm997_vm4, %v4141_v60, %v2637_v51  ;;  %v2702_v6 = vunpack.i.h.bf16 %v2700_v37 }
 0x184   : > { %v2715_v31 = vpop.permute.xlu1 %2714  ;;  %v1641_v49 = vsel %vm1006_vm5, %v1625_v0, %v2677_v27  ;;  %v1655_v37 = vsel %vm1015_vm6, %v1639_v18, %v2701_v44  ;;  %v2737_v33 = vunpack.i.h.bf16 %v4230_v28  ;;  %v2736_v51 = vunpack.i.l.bf16 %v4230_v28 }
 0x185   : > { %v1656_v60 = vsel %vm1015_vm6, %v1640_v57, %v2702_v6  ;;  %v1657_v61 = vsel %vm1015_vm6, %v1641_v49, %v2702_v6  ;;  %v2717_v63 = vunpack.i.h.bf16 %v2715_v31  ;;  %v2716_v17 = vunpack.i.l.bf16 %v2715_v31 }
 0x186   : > { %v4261_v45 = vpop.permute.xlu2 %2764  ;;  %v1671_v41 = vsel %vm1024_vm7, %v1655_v37, %v2707_v26  ;;  %vm1899_vm4 = vcmask 56320  }
 0x187   : > { %v1686_v31 = vsel %vm1033_vm8, %v1670_v12, %v2716_v17  ;;  %v1687_v6 = vsel %vm1033_vm8, %v1671_v41, %v2717_v63 }
 0x188   : > { %v2710_v53 = vpop.permute.xlu0 %2709 }
 0x189   : > { %v2712_v58 = vunpack.i.h.bf16 %v2710_v53  ;;  %v2711_v10 = vunpack.i.l.bf16 %v2710_v53 }
 0x18b   : > { %v1672_v24 = vsel %vm1024_vm7, %v1656_v60, %v2711_v10  ;;  %v1673_v56 = vsel %vm1024_vm7, %v1657_v61, %v2712_v58 }
 0x18c   : > { %v2730_v20 = vpop.permute.xlu1 %2729  ;;  %v1688_v40 = vsel %vm1033_vm8, %v1672_v24, %v2721_v32  ;;  %v1689_v53 = vsel %vm1033_vm8, %v1673_v56, %v2722_v21 }
 0x18d   : > { %v2732_v4 = vunpack.i.h.bf16 %v2730_v20  ;;  %v2731_v58 = vunpack.i.l.bf16 %v2730_v20 }
 0x18e   : > { %v2780_v16 = vpop.permute.xlu2 %2779 }
 0x190   : > { %v2725_v55 = vpop.permute.xlu0 %2724 }
 0x191   : > { %v2727_v5 = vunpack.i.h.bf16 %v2725_v55  ;;  %v2726_v62 = vunpack.i.l.bf16 %v2725_v55 }
 0x193   : > { %v1704_v8 = vsel %vm1042_vm9, %v1688_v40, %v2727_v5  ;;  %v1705_v27 = vsel %vm1042_vm9, %v1689_v53, %v2727_v5  ;;  %v1702_v44 = vsel %vm1042_vm9, %v1686_v31, %v2726_v62  ;;  %v1703_v46 = vsel %vm1042_vm9, %v1687_v6, %v2726_v62 }
 0x194   : > { %v2745_v0 = vpop.permute.xlu1 %2744  ;;  %v1720_v10 = vsel %vm1051_vm10, %v1704_v8, %v2736_v51  ;;  %v1721_v11 = vsel %vm1051_vm10, %v1705_v27, %v2737_v33  ;;  %v1718_v20 = vsel %vm1051_vm10, %v1702_v44, %v2731_v58  ;;  %v1719_v24 = vsel %vm1051_vm10, %v1703_v46, %v2732_v4 }
 0x195   : > { %v2747_v50 = vunpack.i.h.bf16 %v2745_v0  ;;  %v2746_v28 = vunpack.i.l.bf16 %v2745_v0  ;;  %v2682_v5 = vunpack.i.h.bf16 %v4228_v39  ;;  %v2681_v33 = vunpack.i.l.bf16 %v4228_v39 }
 0x196   : > { %v2751_v51 = vunpack.i.l.bf16 %v4240_v29  ;;  %v2795_v62 = vpop.permute.xlu2 %2794  ;;  %v2686_v27 = vunpack.i.l.bf16 %v4225_v48  ;;  %v2767_v31 = vunpack.i.h.bf16 %v4261_v45  ;;  %v2766_v6 = vunpack.i.l.bf16 %v4261_v45 }
 0x197   : > { %v1736_v57 = vsel %vm1060_vm11, %v1720_v10, %v2746_v28  ;;  %v1737_v49 = vsel %vm1060_vm11, %v1721_v11, %v2747_v50  ;;  %v1643_v12 = vsel %vm1006_vm5, %v4182_v34, %v2682_v5  ;;  %v1642_v41 = vsel %vm1006_vm5, %v4179_v2, %v2681_v33 }
 0x198   : > { %v1771_v21 = vrot.slane %v1736_v57, 1  ;;  %v1772_v32 = vrot.slane %v1737_v49, 1  ;;  %v2740_v60 = vpop.permute.xlu0 %2739  ;;  %v1658_v0 = vsel %vm1015_vm6, %v1642_v41, %v2751_v51  ;;  %v1659_v39 = vsel %vm1015_vm6, %v1643_v12, %v2751_v51 }
 0x199   : > { %v2742_v61 = vunpack.i.h.bf16 %v2740_v60  ;;  %v2741_v54 = vunpack.i.l.bf16 %v2740_v60  ;;  %v2687_v58 = vunpack.i.h.bf16 %v4225_v48  ;;  %v2752_v34 = vunpack.i.h.bf16 %v4240_v29 }
 0x19a   : > { %v1773_v56 = vsel %vm480_vm0, %v1771_v21, %v1772_v32  ;;  %v1644_v2 = vsel %vm1006_vm5, %v4117_v9, %v2686_v27  ;;  %v2782_v44 = vunpack.i.h.bf16 %v2780_v16  ;;  %v2781_v49 = vunpack.i.l.bf16 %v2780_v16 }
 0x19b   : > { %v1734_v26 = vsel %vm1060_vm11, %v1718_v20, %v2741_v54  ;;  %v1735_v42 = vsel %vm1060_vm11, %v1719_v24, %v2742_v61  ;;  %v1645_v29 = vsel %vm1006_vm5, %v4129_v43, %v2687_v58  ;;  %v1660_v61 = vsel %vm1015_vm6, %v1644_v2, %v2752_v34 }
 0x19c   : > { %v1768_v18 = vrot.slane %v1734_v26, 1  ;;  %v1769_v13 = vrot.slane %v1735_v42, 1  ;;  %v2760_v55 = vpop.permute.xlu1 %2759  ;;  %v1661_v54 = vsel %vm1015_vm6, %v1645_v29, %v2752_v34  ;;  %v2797_v51 = vunpack.i.h.bf16 %v2795_v62 }
 0x19d   : > { %v2761_v11 = vunpack.i.l.bf16 %v2760_v55  ;;  %v2762_v46 = vunpack.i.h.bf16 %v2760_v55  ;;  %vm1985_vm5 = vcmask 64512  }
 0x19e   : > { %v1770_v37 = vsel %vm480_vm0, %v1768_v18, %v1769_v13  ;;  %v4318_v26 = vpop.permute.xlu2 %2809 }
 0x19f   : > { %v2898_v63 = vpack.i.bf16 %v1773_v56, %v1770_v37  ;;  %v1676_v20 = vsel %vm1024_vm7, %v1660_v61, %v2761_v11  ;;  %v1677_v16 = vsel %vm1024_vm7, %v1661_v54, %v2762_v46 }
 0x1a0   : > { %v2755_v17 = vpop.permute.xlu0 %2754 }
 0x1a1   : > { %2899 = vrot.lane.b32.xlu2 %v2898_v63, %s2974_s8  ;;  %v2757_v40 = vunpack.i.h.bf16 %v2755_v17  ;;  %v2756_v53 = vunpack.i.l.bf16 %v2755_v17 }
 0x1a3   : > { %v1674_v50 = vsel %vm1024_vm7, %v1658_v0, %v2756_v53  ;;  %v1675_v28 = vsel %vm1024_vm7, %v1659_v39, %v2757_v40  ;;  %v2796_v40 = vunpack.i.l.bf16 %v2795_v62 }
 0x1a4   : > { %v2775_v8 = vpop.permute.xlu1 %2774  ;;  %v1690_v57 = vsel %vm1033_vm8, %v1674_v50, %v2766_v6  ;;  %v1691_v45 = vsel %vm1033_vm8, %v1675_v28, %v2767_v31 }
 0x1a5   : > { %v2776_v4 = vunpack.i.l.bf16 %v2775_v8  ;;  %v2777_v42 = vunpack.i.h.bf16 %v2775_v8 }
 0x1a6   : > { %v2825_v58 = vpop.permute.xlu2 %2824 }
 0x1a7   : > { %v1706_v21 = vsel %vm1042_vm9, %v1690_v57, %v2776_v4  ;;  %v1707_v32 = vsel %vm1042_vm9, %v1691_v45, %v2776_v4  ;;  %v2826_v54 = vunpack.i.l.bf16 %v2825_v58 }
 0x1a8   : > { %v2770_v10 = vpop.permute.xlu0 %2769  ;;  %v1722_v18 = vsel %vm1051_vm10, %v1706_v21, %v2781_v49  ;;  %v1723_v13 = vsel %vm1051_vm10, %v1707_v32, %v2782_v44 }
 0x1a9   : > { %v2772_v60 = vunpack.i.h.bf16 %v2770_v10  ;;  %v2771_v48 = vunpack.i.l.bf16 %v2770_v10 }
 0x1ab   : > { %v1693_v43 = vsel %vm1033_vm8, %v1677_v16, %v2772_v60  ;;  %v1692_v55 = vsel %vm1033_vm8, %v1676_v20, %v2771_v48 }
 0x1ac   : > { %v2790_v9 = vpop.permute.xlu1 %2789  ;;  %v1708_v8 = vsel %vm1042_vm9, %v1692_v55, %v2777_v42  ;;  %v1709_v12 = vsel %vm1042_vm9, %v1693_v43, %v2777_v42 }
 0x1ad   : > { %v2792_v24 = vunpack.i.h.bf16 %v2790_v9  ;;  %v2791_v56 = vunpack.i.l.bf16 %v2790_v9 }
 0x1ae   : > { %v2840_v46 = vpop.permute.xlu2 %2839 }
 0x1af   : > { %v1738_v37 = vsel %vm1060_vm11, %v1722_v18, %v2791_v56  ;;  %v1739_v63 = vsel %vm1060_vm11, %v1723_v13, %v2792_v24  ;;  %v2812_v56 = vunpack.i.h.bf16 %v4318_v26  ;;  %v2842_v42 = vunpack.i.h.bf16 %v2840_v46 }
 0x1b0   : > { %v1774_v17 = vrot.slane %v1738_v37, 1  ;;  %v1775_v5 = vrot.slane %v1739_v63, 1  ;;  %v2785_v33 = vpop.permute.xlu0 %2784 }
 0x1b1   : > { %v2787_v53 = vunpack.i.h.bf16 %v2785_v33  ;;  %v2786_v27 = vunpack.i.l.bf16 %v2785_v33 }
 0x1b2   : > { %v1776_v41 = vsel %vm480_vm0, %v1774_v17, %v1775_v5 }
 0x1b3   : > { %v1724_v0 = vsel %vm1051_vm10, %v1708_v8, %v2786_v27  ;;  %v1725_v39 = vsel %vm1051_vm10, %v1709_v12, %v2787_v53 }
 0x1b4   : > { %v1740_v31 = vsel %vm1060_vm11, %v1724_v0, %v2796_v40  ;;  %v1741_v6 = vsel %vm1060_vm11, %v1725_v39, %v2797_v51  ;;  %v2805_v50 = vpop.permute.xlu1 %2804  ;;  %v2827_v40 = vunpack.i.h.bf16 %v2825_v58 }
 0x1b5   : > { %v1777_v28 = vrot.slane %v1740_v31, 1  ;;  %v1778_v4 = vrot.slane %v1741_v6, 1  ;;  %v2807_v57 = vunpack.i.h.bf16 %v2805_v50  ;;  %v2806_v45 = vunpack.i.l.bf16 %v2805_v50 }
 0x1b6   : > { %v4354_v51 = vpop.permute.xlu2 %2854 }
 0x1b7   : > { %v1779_v62 = vsel %vm480_vm0, %v1777_v28, %v1778_v4 }
 0x1b8   : > { %v2800_v34 = vpop.permute.xlu0 %2799  ;;  %v2903_v10 = vpack.i.bf16 %v1779_v62, %v1776_v41 }
 0x1b9   : > { %v2801_v11 = vunpack.i.l.bf16 %v2800_v34  ;;  %v2802_v29 = vunpack.i.h.bf16 %v2800_v34 }
 0x1ba   : > { %2904 = vrot.lane.b32.xlu0 %v2903_v10, %s2974_s8 }
 0x1bb   : > { %v1650_v49 = vsel %vm1015_vm6, %v4171_v38, %v2801_v11  ;;  %v1651_v21 = vsel %vm1015_vm6, %v4174_v35, %v2801_v11  ;;  %v2811_v38 = vunpack.i.l.bf16 %v4318_v26  ;;  %v2841_v35 = vunpack.i.l.bf16 %v2840_v46 }
 0x1bc   : > { %v2820_v2 = vpop.permute.xlu1 %2819  ;;  %v1666_v61 = vsel %vm1024_vm7, %v1650_v49, %v2806_v45  ;;  %v1667_v9 = vsel %vm1024_vm7, %v1651_v21, %v2807_v57  ;;  %v1652_v18 = vsel %vm1015_vm6, %v4223_v1, %v2802_v29  ;;  %v1653_v13 = vsel %vm1015_vm6, %v4219_v22, %v2802_v29 }
 0x1bd   : > { %v2822_v37 = vunpack.i.h.bf16 %v2820_v2  ;;  %v2821_v63 = vunpack.i.l.bf16 %v2820_v2  ;;  %v1668_v27 = vsel %vm1024_vm7, %v1652_v18, %v2811_v38  ;;  %v1669_v8 = vsel %vm1024_vm7, %v1653_v13, %v2812_v56 }
 0x1be   : > { %v2870_v49 = vpop.permute.xlu2 %2869 }
 0x1bf   : > { %v1684_v0 = vsel %vm1033_vm8, %v1668_v27, %v2821_v63  ;;  %v1685_v39 = vsel %vm1033_vm8, %v1669_v8, %v2822_v37 }
 0x1c0   : > { %v2815_v44 = vpop.permute.xlu0 %2814  ;;  %v1700_v4 = vsel %vm1042_vm9, %v1684_v0, %v2827_v40  ;;  %v1701_v62 = vsel %vm1042_vm9, %v1685_v39, %v2827_v40 }
 0x1c1   : > { %v2817_v32 = vunpack.i.h.bf16 %v2815_v44  ;;  %v2816_v60 = vunpack.i.l.bf16 %v2815_v44 }
 0x1c3   : > { %v1682_v20 = vsel %vm1033_vm8, %v1666_v61, %v2816_v60  ;;  %v1683_v24 = vsel %vm1033_vm8, %v1667_v9, %v2817_v32  ;;  %v1843_v60 = vld [vmem:[%s4496_s3 + $0x40] sm:$0xf] }
 0x1c4   : > { %v2835_v48 = vpop.permute.xlu1 %2834  ;;  %v1698_v17 = vsel %vm1042_vm9, %v1682_v20, %v2826_v54  ;;  %v1699_v5 = vsel %vm1042_vm9, %v1683_v24, %v2826_v54  ;;  %v1881_v29 = vunpack.c.l.b16 %v1843_v60  ;;  %v2975_v54 = vmov 65535  }
 0x1c5   : > { %v2837_v31 = vunpack.i.h.bf16 %v2835_v48  ;;  %v2836_v6 = vunpack.i.l.bf16 %v2835_v48  ;;  %v1914_v20 = vsel %vm1912_vm2, 4294967295, %v2975_v54  ;;  %v2184_v54 = vld [vmem:[%s4496_s3 + $0x20] sm:$0xff] }
 0x1c6   : > { %v1890_v9 = vpack.c.b16 %v1881_v29, %v1881_v29  ;;  %v1915_v38 = vsel %vm1913_vm3, %v1914_v20, 0 }
 0x1c7   : > { %v1716_v10 = vsel %vm1051_vm10, %v1700_v4, %v2836_v6  ;;  %v1717_v2 = vsel %vm1051_vm10, %v1701_v62, %v2837_v31 }
 0x1c8   : > { %v2830_v16 = vpop.permute.xlu0 %2829 }
 0x1c9   : > { %v2832_v43 = vunpack.i.h.bf16 %v2830_v16  ;;  %v2831_v55 = vunpack.i.l.bf16 %v2830_v16 }
 0x1cb   : > { %v1714_v33 = vsel %vm1051_vm10, %v1698_v17, %v2831_v55  ;;  %v1715_v26 = vsel %vm1051_vm10, %v1699_v5, %v2832_v43  ;;  %v2872_v43 = vunpack.i.h.bf16 %v2870_v49  ;;  %v2871_v55 = vunpack.i.l.bf16 %v2870_v49  ;;  %v2885_v17 = vpop.permute.xlu2 %2884 }
 0x1cc   : > { %v1730_v1 = vsel %vm1060_vm11, %v1714_v33, %v2841_v35  ;;  %v1731_v53 = vsel %vm1060_vm11, %v1715_v26, %v2842_v42  ;;  %v2850_v22 = vpop.permute.xlu1 %2849  ;;  %v1917_v35 = vand.u32 %v1915_v38, %v1890_v9  ;;  %v2857_v33 = vunpack.i.h.bf16 %v4354_v51 }
 0x1cd   : > { %v1762_v12 = vrot.slane %v1730_v1, 1  ;;  %v1763_v41 = vrot.slane %v1731_v53, 1  ;;  %v2852_v61 = vunpack.i.h.bf16 %v2850_v22  ;;  %v2851_v16 = vunpack.i.l.bf16 %v2850_v22 }
 0x1ce   : > { %2196 = vmatpush.bf16.msra.mxu3 %v1917_v35  ;;  %1955 = vmatpush.bf16.msra.mxu1 %v1917_v35  ;;  %v2856_v26 = vunpack.i.l.bf16 %v4354_v51  ;;  %v2186_v51 = vld [vmem:[%s4496_s3 + $0x30] sm:$0xff] }
 0x1cf   : > { %v1764_v28 = vsel %vm480_vm0, %v1762_v12, %v1763_v41  ;;  %v1664_v18 = vsel %vm1015_vm6, %v4236_v15, %v2852_v61  ;;  %v1665_v13 = vsel %vm1015_vm6, %v4233_v3, %v2852_v61  ;;  %v1662_v5 = vsel %vm1015_vm6, %v4210_v36, %v2851_v16  ;;  %v2187_v3 = vld [vmem:[%s4496_s3 + $0x38] sm:$0xff] }
 0x1d0   : > { %v2845_v50 = vpop.permute.xlu0 %2844  ;;  %v1663_v40 = vsel %vm1015_vm6, %v4213_v19, %v2851_v16  ;;  %v2887_v36 = vunpack.i.h.bf16 %v2885_v17  ;;  %v2886_v12 = vunpack.i.l.bf16 %v2885_v17  ;;  %2188 = vmatpush.bf16.msra.mxu2 %v2187_v3  ;;  %1919 = vmatpush.bf16.msra.mxu0 %v2187_v3  ;;  %v1678_v39 = vsel %vm1024_vm7, %v1662_v5, %v2856_v26  ;;  %v2180_v26 = vld [vmem:[%s4496_s3] sm:$0xff] }
 0x1d1   : > { %v2847_v58 = vunpack.i.h.bf16 %v2845_v50  ;;  %v2846_v34 = vunpack.i.l.bf16 %v2845_v50  ;;  %v1679_v31 = vsel %vm1024_vm7, %v1663_v40, %v2857_v33 }
 0x1d3   : > { %v1732_v11 = vsel %vm1060_vm11, %v1716_v10, %v2846_v34  ;;  %v1733_v44 = vsel %vm1060_vm11, %v1717_v2, %v2847_v58 }
 0x1d4   : > { %v1765_v46 = vrot.slane %v1732_v11, 1  ;;  %v1766_v57 = vrot.slane %v1733_v44, 1  ;;  %v2865_v45 = vpop.permute.xlu1 %2864  ;;  %2189 = vmatpush.bf16.msra.mxu2 %v2186_v51  ;;  %v2185_v11 = vld [vmem:[%s4496_s3 + $0x28] sm:$0xff]  ;;  %1920 = vmatpush.bf16.msra.mxu0 %v2186_v51 }
 0x1d5   : > { %v2867_v1 = vunpack.i.h.bf16 %v2865_v45  ;;  %v2866_v53 = vunpack.i.l.bf16 %v2865_v45 }
 0x1d6   : > { %v1767_v21 = vsel %vm480_vm0, %v1765_v46, %v1766_v57 }
 0x1d7   : > { %v2908_v32 = vpack.i.bf16 %v1767_v21, %v1764_v28  ;;  %v1694_v50 = vsel %vm1033_vm8, %v1678_v39, %v2866_v53  ;;  %v1695_v28 = vsel %vm1033_vm8, %v1679_v31, %v2867_v1 }
 0x1d8   : > { %v2860_v48 = vpop.permute.xlu0 %2859  ;;  %2190 = vmatpush.bf16.msra.mxu2 %v2185_v11  ;;  %1921 = vmatpush.bf16.msra.mxu0 %v2185_v11 }
 0x1d9   : > { %2909 = vrot.lane.b32.xlu1 %v2908_v32, %s2974_s8  ;;  %v2862_v24 = vunpack.i.h.bf16 %v2860_v48  ;;  %v2861_v56 = vunpack.i.l.bf16 %v2860_v48 }
 0x1db   : > { %v1680_v37 = vsel %vm1024_vm7, %v1664_v18, %v2861_v56  ;;  %v1681_v63 = vsel %vm1024_vm7, %v1665_v13, %v2862_v24  ;;  %v2182_v18 = vld [vmem:[%s4496_s3 + $0x10] sm:$0xff]  ;;  %v2181_v13 = vld [vmem:[%s4496_s3 + $0x8] sm:$0xff] }
 0x1dc   : > { %v2880_v42 = vpop.permute.xlu1 %2879  ;;  %v1696_v27 = vsel %vm1033_vm8, %v1680_v37, %v2871_v55  ;;  %v1697_v8 = vsel %vm1033_vm8, %v1681_v63, %v2872_v43  ;;  %2191 = vmatpush.bf16.msra.mxu2 %v2184_v54  ;;  %1922 = vmatpush.bf16.msra.mxu0 %v2184_v54 }
 0x1dd   : > { %v2882_v58 = vunpack.i.h.bf16 %v2880_v42  ;;  %v2881_v34 = vunpack.i.l.bf16 %v2880_v42  ;;  %v2183_v42 = vld [vmem:[%s4496_s3 + $0x18] sm:$0xff] }
 0x1e0   : > { %v2875_v15 = vpop.permute.xlu0 %2874  ;;  %2192 = vmatpush.bf16.msra.mxu2 %v2183_v42  ;;  %1923 = vmatpush.bf16.msra.mxu0 %v2183_v42 }
 0x1e1   : > { %v2877_v22 = vunpack.i.h.bf16 %v2875_v15  ;;  %v2876_v41 = vunpack.i.l.bf16 %v2875_v15 }
 0x1e3   : > { %v1712_v0 = vsel %vm1042_vm9, %v1696_v27, %v2877_v22  ;;  %v1713_v19 = vsel %vm1042_vm9, %v1697_v8, %v2877_v22  ;;  %v1710_v44 = vsel %vm1042_vm9, %v1694_v50, %v2876_v41  ;;  %v1711_v46 = vsel %vm1042_vm9, %v1695_v28, %v2876_v41 }
 0x1e4   : > { %v2895_v6 = vpop.permute.xlu1 %2894  ;;  %v1728_v10 = vsel %vm1051_vm10, %v1712_v0, %v2886_v12  ;;  %v1729_v2 = vsel %vm1051_vm10, %v1713_v19, %v2887_v36  ;;  %v1726_v29 = vsel %vm1051_vm10, %v1710_v44, %v2881_v34  ;;  %v1727_v61 = vsel %vm1051_vm10, %v1711_v46, %v2882_v58  ;;  %2193 = vmatpush.bf16.msra.mxu2 %v2182_v18 }
 0x1e5   : > { %v2897_v4 = vunpack.i.h.bf16 %v2895_v6  ;;  %v2896_v62 = vunpack.i.l.bf16 %v2895_v6  ;;  %1924 = vmatpush.bf16.msra.mxu0 %v2182_v18 }
 0x1e7   : > { %v1744_v57 = vsel %vm1060_vm11, %v1728_v10, %v2896_v62  ;;  %v1745_v45 = vsel %vm1060_vm11, %v1729_v2, %v2897_v4 }
 0x1e8   : > { %v1783_v49 = vrot.slane %v1744_v57, 1  ;;  %v1784_v21 = vrot.slane %v1745_v45, 1  ;;  %v2890_v32 = vpop.permute.xlu0 %2889  ;;  %2194 = vmatpush.bf16.msra.mxu2 %v2181_v13 }
 0x1e9   : > { %v2892_v60 = vunpack.i.h.bf16 %v2890_v32  ;;  %v2891_v48 = vunpack.i.l.bf16 %v2890_v32  ;;  %1925 = vmatpush.bf16.msra.mxu0 %v2181_v13 }
 0x1ea   : > { %v1785_v9 = vsel %vm480_vm0, %v1783_v49, %v1784_v21 }
 0x1eb   : > { %v1742_v20 = vsel %vm1060_vm11, %v1726_v29, %v2891_v48  ;;  %v1743_v24 = vsel %vm1060_vm11, %v1727_v61, %v2892_v60 }
 0x1ec   : > { %v1780_v56 = vrot.slane %v1742_v20, 1  ;;  %v1781_v38 = vrot.slane %v1743_v24, 1  ;;  %2195 = vmatpush.bf16.msra.mxu2 %v2180_v26 }
 0x1ed   : > { %1926 = vmatpush.bf16.msra.mxu0 %v2180_v26 }
 0x1ee   : > { %v1782_v16 = vsel %vm480_vm0, %v1780_v56, %v1781_v38  ;;  %vm1810_vm0 = vcmask 654336  }
 0x1ef   : > { %v2913_v35 = vpack.i.bf16 %v1785_v9, %v1782_v16 }
 0x1f1   : > { %2914 = vrot.lane.b32.xlu2 %v2913_v35, %s2974_s8 }
 0x1fb   : > { %v2900_v43 = vpop.permute.xlu2 %2899 }
 0x1fc   : > { %v2902_v55 = vunpack.i.h.bf16 %v2900_v43  ;;  %v2901_v37 = vunpack.i.l.bf16 %v2900_v43 }
 0x1fe   : > { %v1822_v63 = vpack.c.bf16 %v2902_v55, %v2901_v37  ;;  %v1813_v17 = vsel %vm1810_vm0, %v4022_v14, %v2901_v37  ;;  %v1814_v5 = vsel %vm1810_vm0, %v4025_v23, %v2902_v55 }
 0x1ff   : > { %v1821_v33 = vpack.c.bf16 %v1814_v5, %v1813_v17 }
 0x200   : > { %2175 = vmatmul.msk.bf16.vlgmr.msra.gmra.mxu3 %vm1899_vm4, %v1822_v63 }
 0x22c   : > { %v2905_v15 = vpop.permute.xlu0 %2904 }
 0x22d   : > { %v2907_v3 = vunpack.i.h.bf16 %v2905_v15  ;;  %v2906_v40 = vunpack.i.l.bf16 %v2905_v15 }
 0x22f   : > { %v1824_v1 = vpack.c.bf16 %v2907_v3, %v2906_v40  ;;  %v1815_v53 = vsel %vm1810_vm0, %v4014_v52, %v2906_v40  ;;  %v1816_v14 = vsel %vm1810_vm0, %v4017_v30, %v2907_v3 }
 0x230   : > { %v1823_v23 = vpack.c.bf16 %v1816_v14, %v1815_v53 }
 0x231   : > { %2176 = vmatmul.msk.bf16.gmra.mxu3 %vm1899_vm4, %v1824_v1 }
 0x232   : > { %1937 = vmatmul.bf16.vlgmr.msra.gmra.mxu2 %v1823_v23 }
 0x24b   : > { %v2915_v22 = vpop.permute.xlu2 %2914  ;;  %v2910_v27 = vpop.permute.xlu1 %2909 }
 0x24c   : > { %v2917_v8 = vunpack.i.h.bf16 %v2915_v22  ;;  %v2916_v36 = vunpack.i.l.bf16 %v2915_v22  ;;  %v2912_v12 = vunpack.i.h.bf16 %v2910_v27  ;;  %v2911_v51 = vunpack.i.l.bf16 %v2910_v27 }
 0x24e   : > { %v1826_v41 = vpack.c.bf16 %v2917_v8, %v2916_v36  ;;  %v1820_v0 = vpack.c.bf16 %v2912_v12, %v2911_v51  ;;  %v1811_v52 = vsel %vm1810_vm0, %v3979_v25, %v2911_v51  ;;  %v1812_v30 = vsel %vm1810_vm0, %v3982_v47, %v2912_v12  ;;  %v2918_v47 = vld [vmem:[%s4497_s4] ss:$0 sm:$0xff] }
 0x24f   : > { %v1819_v19 = vpack.c.bf16 %v1812_v30, %v1811_v52  ;;  %v1817_v39 = vsel %vm1810_vm0, %v3998_v7, %v2916_v36  ;;  %v1818_v31 = vsel %vm1810_vm0, %v4001_v59, %v2917_v8 }
 0x250   : > { %2174 = vmatmul.msk.bf16.vlgmr.msra.gmra.mxu1 %vm1899_vm4, %v1820_v0  ;;  %2177 = vmatmul.msk.bf16.gmra.mxu3 %vm1899_vm4, %v1826_v41  ;;  %v1825_v6 = vpack.c.bf16 %v1818_v31, %v1817_v39 }
 0x251   : > { %1927 = vmatmul.bf16.vlgmr.msra.gmra.mxu0 %v1819_v19 }
 0x252   : > { %1942 = vmatmul.bf16.gmra.mxu2 %v1825_v6 }
 0x261   : > { %1932 = vmatmul.bf16.gmra.mxu0 %v1821_v33 }
 0x283   : > { %v1962_v25 = vpop.f32.mrf.mxu3 }
 0x28b   : > { %v1964_v50 = vpop.f32.mrf.mxu3 }
 0x2b4   : > { %v1967_v7 = vpop.f32.mrf.mxu3 }
 0x2b5   : > { %v1938_v59 = vpop.f32.mrf.mxu2 }
 0x2b6   : > { %v1939_v28 = vadd.f32 %v2918_v47, %v1938_v59 }
 0x2b8   : > { %v1968_v4 = vadd.f32 %v1967_v7, %v1939_v28 }
 0x2ba   : > { %v1981_v62 = vmax.f32 %v1968_v4, 0.0 }
 0x2bc   : > { %1990 = vst.msk [vmem:[%s4460_s6 + $0x20] sm:$0xff] %vm1985_vm5, %v1981_v62  ;;  %v1969_v10 = vpop.f32.mrf.mxu3 }
 0x2bd   : > { %v1940_v58 = vpop.f32.mrf.mxu2 }
 0x2be   : > { %v1941_v34 = vadd.f32 %v2918_v47, %v1940_v58 }
 0x2c0   : > { %v1970_v2 = vadd.f32 %v1969_v10, %v1941_v34 }
 0x2c2   : > { %v1982_v11 = vmax.f32 %v1970_v2, 0.0 }
 0x2c4   : > { %1991 = vst.msk [vmem:[%s4460_s6 + $0x28] sm:$0xff] %vm1985_vm5, %v1982_v11 }
 0x2cd   : > { %v1957_v44 = vpop.f32.mrf.mxu1 }
 0x2ce   : > { %v1928_v46 = vpop.f32.mrf.mxu0 }
 0x2cf   : > { %v1929_v57 = vadd.f32 %v2918_v47, %v1928_v46 }
 0x2d1   : > { %v1958_v45 = vadd.f32 %v1957_v44, %v1929_v57 }
 0x2d3   : > { %v1977_v49 = vmax.f32 %v1958_v45, 0.0  ;;  %v1972_v21 = vpop.f32.mrf.mxu3 }
 0x2d5   : > { %1986 = vst.msk [vmem:[%s4460_s6] sm:$0xff] %vm1985_vm5, %v1977_v49  ;;  %v1943_v32 = vpop.f32.mrf.mxu2  ;;  %v1959_v9 = vpop.f32.mrf.mxu1 }
 0x2d6   : > { %v1944_v60 = vadd.f32 %v2918_v47, %v1943_v32  ;;  %v1930_v48 = vpop.f32.mrf.mxu0 }
 0x2d7   : > { %v1931_v29 = vadd.f32 %v2918_v47, %v1930_v48 }
 0x2d8   : > { %v1973_v61 = vadd.f32 %v1972_v21, %v1944_v60 }
 0x2d9   : > { %v1960_v54 = vadd.f32 %v1959_v9, %v1931_v29 }
 0x2da   : > { %v1983_v20 = vmax.f32 %v1973_v61, 0.0 }
 0x2db   : > { %v1978_v24 = vmax.f32 %v1960_v54, 0.0  ;;  %v1974_v42 = vpop.f32.mrf.mxu3 }
 0x2dc   : > { %1992 = vst.msk [vmem:[%s4460_s6 + $0x30] sm:$0xff] %vm1985_vm5, %v1983_v20 }
 0x2dd   : > { %1987 = vst.msk [vmem:[%s4460_s6 + $0x8] sm:$0xff] %vm1985_vm5, %v1978_v24  ;;  %v1945_v56 = vpop.f32.mrf.mxu2 }
 0x2de   : > { %v1946_v38 = vadd.f32 %v2918_v47, %v1945_v56  ;;  %v1933_v16 = vpop.f32.mrf.mxu0 }
 0x2df   : > { %v1934_v35 = vadd.f32 %v2918_v47, %v1933_v16 }
 0x2e0   : > { %v1975_v18 = vadd.f32 %v1974_v42, %v1946_v38 }
 0x2e1   : > { %v1963_v13 = vadd.f32 %v1962_v25, %v1934_v35 }
 0x2e2   : > { %v1984_v43 = vmax.f32 %v1975_v18, 0.0 }
 0x2e3   : > { %v1979_v55 = vmax.f32 %v1963_v13, 0.0 }
 0x2e4   : > { %1993 = vst.msk [vmem:[%s4460_s6 + $0x38] sm:$0xff] %vm1985_vm5, %v1984_v43 }
 0x2e5   : > { %1988 = vst.msk [vmem:[%s4460_s6 + $0x10] sm:$0xff] %vm1985_vm5, %v1979_v55 }
 0x2e6   : > { %v1935_v37 = vpop.f32.mrf.mxu0 }
 0x2e7   : > { %v1936_v63 = vadd.f32 %v2918_v47, %v1935_v37 }
 0x2e9   : > { %v1965_v17 = vadd.f32 %v1964_v50, %v1936_v63 }
 0x2eb   : > { %v1980_v5 = vmax.f32 %v1965_v17, 0.0 }
 0x2ed   : > { %1989 = vst.msk [vmem:[%s4460_s6 + $0x18] sm:$0xff] %vm1985_vm5, %v1980_v5 }
 0x2ee PF: > { %s15_s22 = sadd.s32 1, %s2957_s22   ;;  %s4532_s18 = smov %s2949_s20 }
 0x2ef   : > { %p12_p10 = scmp.ge.s32.totalorder %s15_s22, 18   ;;  %s4533_s19 = smov %s2953_s21 }
 0x2f0   : > { %s4534_s20 = smov %s4537_s23  ;;  %s4535_s21 = smov %s4541_s24 }
 0x2f1   :  { %14 = sbr.rel (!%p12_p10) target bundleno = 3 (0x3), region = 76 }

// kernel: axis_aligned_conv_gaussian_forward.7
= control target key start
LH: loop header
LB: loop body
LE: loop exit
PB: predicated region body
PF: predicated region fallthrough
CT: control target
= control target key end

     0   :  { %s3022_s18 = smov 0   ;;  %s3024_s19 = smov 0   ;;  %s4559_s0 = inlined_call_operand.vmem [shape: bf16[2,10,10,10,8], index: 0, kind: input, shape index: {}, may-alias: {0,1,2}]   ;;  %s4560_s1 = inlined_call_operand.vmem [shape: bf16[2,10,10,10,8], index: 1, kind: input, shape index: {}, may-alias: {0,1,2}]   ;;  %s4561_s2 = inlined_call_operand.vmem [shape: bf16[2,10,10,10,8], index: 2, kind: input, shape index: {}, may-alias: {0,1,2}]   ;;  %s4562_s3 = inlined_call_operand.vmem [shape: bf16[216,8], index: 3, kind: input, shape index: {}]   ;;  %s4563_s4 = inlined_call_operand.vmem [shape: f32[1,8], index: 4, kind: input, shape index: {}]   ;;  %s4564_s5 = inlined_call_operand.vmem [shape: f32[2,8,64,8], index: 5, kind: output, shape index: {}]  }
   0x1   :  { %s3026_s20 = smov 0   ;;  %s3028_s21 = smov 0  }
   0x2   :  { %s3030_s22 = smov 0  }
   0x3 LB: > { %s24_s23 = sadd.s32 1, %s2967_s20  ;;  %s27_s24 = sadd.s32 1, %s2971_s21  ;;  %s2975_s22 = sphi %s3030_s22, %s15_s22   ;;  %s2971_s21 = sphi %s3028_s21, %s4633_s21   ;;  %s2967_s20 = sphi %s3026_s20, %s4632_s20   ;;  %s2963_s19 = sphi %s3024_s19, %s4631_s19   ;;  %s2959_s18 = sphi %s3022_s18, %s4630_s18  }
   0x4   : > { %p25_p0 = scmp.ge.s32.totalorder %s24_s23, 8  ;;  %p2145_p1 = scmp.ge.s32.totalorder %s2975_s22, 1 }
   0x5   : > { %p247_p2 = scmp.lt.s32.totalorder %s2975_s22, 17 }
   0x6   : > { %s4635_s23 = smov (%p25_p0, %s24_s23), 0  ;;  %s4637_s24 = smov (!%p25_p0, %s27_s24), %s2971_s21 }
   0x7   : > { %p248_p3 = pnand %p2145_p1, %p247_p2  ;;  %p29_p4 = scmp.ge.s32.totalorder %s4637_s24, 2 }
   0x9   : > { %s4639_s24 = smov (%p29_p4, %s4637_s24), 0  ;;  %251 = sbr.rel (%p248_p3) target bundleno = 636 (0x27c), region = 40 }
   0xe   : > { %p303_p5 = scmp.lt.s32.totalorder %s2963_s19, 1  ;;  %p305_p6 = scmp.lt.s32.totalorder %s2959_s18, 9  ;;  %vm480_vm0 = vcmask 1046528   ;;  %vm529_vm1 = vcmask 1045504   ;;  %vm979_vm2 = vcmask 64512   ;;  %vm988_vm3 = vcmask 130048  }
   0xf   : > { %s2977_s8 = smov 8   ;;  %s2978_s9 = smov 16   ;;  %vm997_vm4 = vcmask 195584   ;;  %vm1006_vm5 = vcmask 261120   ;;  %vm1015_vm6 = vcmask 326656   ;;  %vm1024_vm7 = vcmask 392192  }
  0x10   : > { %s4641_s19 = smov (!%p303_p5, %s2963_s19), 1  ;;  %s2979_s10 = smov 24   ;;  %vm1033_vm8 = vcmask 457728   ;;  %vm1042_vm9 = vcmask 523264   ;;  %vm1051_vm10 = vcmask 588800   ;;  %vm1060_vm11 = vcmask 654336  }
  0x11   : > { %s306_s25 = scalar_select %p305_p6, %s2959_s18, 9  ;;  %vm1069_vm12 = vcmask 719872   ;;  %vm1078_vm13 = vcmask 785408   ;;  %vm1087_vm14 = vcmask 850944   ;;  %vm1096_vm15 = vcmask 916480  }
  0x12   : > { %s3059_s26 = smul.u32 200, %s4641_s19  ;;  %s2980_s11 = smov 32  }
  0x13   : > { %s2237_s27 = smul.u32 20, %s306_s25  ;;  %s2981_s12 = smov 40  }
  0x14   : > { %s312_s13 = sadd.s32 1, %s2959_s18  ;;  %s2982_s14 = smov 48  }
  0x15   : > { %s309_s28 = sadd.s32 %s3059_s26, %s2237_s27  ;;  %p315_p7 = scmp.lt.s32.totalorder %s312_s13, 9 }
  0x16   : > { %s2146_s29 = sshll.u32 %s309_s28, 2  ;;  %s2983_s17 = smov 56  }
  0x17   : > { %s3065_s7 = scalar_lea.vmem %s4559_s0, %s2146_s29  ;;  %s4643_s13 = smov (!%p315_p7, %s312_s13), 9 }
  0x18   : > { %v352_v0 = vld [vmem:[%s3065_s7 + $0x20] sm:$0xf]  ;;  %v3069_v1 = vld [vmem:[%s3065_s7 + $0x24] sm:$0x1]  ;;  %v354_v2 = vld [vmem:[%s3065_s7 + $0x28] sm:$0xf] }
  0x19   : > { %v3073_v3 = vld [vmem:[%s3065_s7 + $0x2c] sm:$0x1]  ;;  %v3075_v4 = vunpack.c.l.bf16 %v352_v0  ;;  %v373_v5 = vunpack.c.l.bf16 %v3069_v1  ;;  %v3078_v6 = vunpack.c.l.bf16 %v354_v2  ;;  %v346_v7 = vld [vmem:[%s3065_s7 + $0x8] sm:$0xf]  ;;  %v348_v10 = vld [vmem:[%s3065_s7 + $0x10] sm:$0xf] }
  0x1a   : > { %v347_v8 = vld [vmem:[%s3065_s7 + $0xc] sm:$0x1]  ;;  %v375_v9 = vunpack.c.l.bf16 %v3073_v3  ;;  %v349_v11 = vld [vmem:[%s3065_s7 + $0x14] sm:$0x1]  ;;  %v3085_v12 = vunpack.c.l.bf16 %v346_v7  ;;  %v344_v14 = vld [vmem:[%s3065_s7] sm:$0xf]  ;;  %v3092_v18 = vunpack.c.l.bf16 %v348_v10 }
  0x1b   : > { %v367_v13 = vunpack.c.l.bf16 %v347_v8  ;;  %v493_v15 = vrot.slane %v3075_v4, 1  ;;  %v494_v16 = vrot.slane %v373_v5, 1  ;;  %v496_v17 = vrot.slane %v3078_v6, 1  ;;  %v345_v19 = vld [vmem:[%s3065_s7 + $0x4] sm:$0x1]  ;;  %s2239_s15 = smul.u32 20, %s4643_s13 }
  0x1c   : > { %v497_v20 = vrot.slane %v375_v9, 1  ;;  %v369_v21 = vunpack.c.l.bf16 %v349_v11  ;;  %v533_v22 = vrot.slane %v3085_v12, 2  ;;  %v536_v25 = vrot.slane %v3092_v18, 2  ;;  %v356_v32 = vld [vmem:[%s3065_s7 + $0x30] sm:$0xf]  ;;  %s2984_s30 = smov 64  }
  0x1d   : > { %v534_v23 = vrot.slane %v367_v13, 2  ;;  %v3099_v24 = vsel %vm480_vm0, %v493_v15, %v494_v16  ;;  %v3102_v26 = vunpack.c.l.bf16 %v344_v14  ;;  %v365_v27 = vunpack.c.l.bf16 %v345_v19  ;;  %v357_v33 = vld [vmem:[%s3065_s7 + $0x34] sm:$0x1]  ;;  %v358_v38 = vld [vmem:[%s3065_s7 + $0x38] sm:$0xf]  ;;  %s319_s16 = sadd.s32 %s2239_s15, %s3059_s26  ;;  %s2985_s6 = smov 72  }
  0x1e   : > { %v3105_v28 = vsel %vm480_vm0, %v496_v17, %v497_v20  ;;  %v537_v30 = vrot.slane %v369_v21, 2  ;;  %v484_v31 = vrot.slane %v3085_v12, 1  ;;  %v485_v37 = vrot.slane %v367_v13, 1  ;;  %v359_v42 = vld [vmem:[%s3065_s7 + $0x3c] sm:$0x1]  ;;  %s2147_s25 = sshll.u32 %s319_s16, 2 }
  0x1f   : > { %v3108_v29 = vsel %vm529_vm1, %v533_v22, %v534_v23  ;;  %v3115_v34 = vpack.i.bf16 %v3105_v28, %v3099_v24  ;;  %v530_v35 = vrot.slane %v3102_v26, 2  ;;  %v531_v36 = vrot.slane %v365_v27, 2  ;;  %v350_v46 = vld [vmem:[%s3065_s7 + $0x18] sm:$0xf]  ;;  %v351_v51 = vld [vmem:[%s3065_s7 + $0x1c] sm:$0x1]  ;;  %s3241_s29 = scalar_lea.vmem %s4560_s1, %s2147_s25 }
  0x20   : > { %v487_v39 = vrot.slane %v3092_v18, 1  ;;  %v488_v40 = vrot.slane %v369_v21, 1  ;;  %v481_v41 = vrot.slane %v3102_v26, 1  ;;  %v3126_v44 = vsel %vm480_vm0, %v484_v31, %v485_v37  ;;  %s2987_s13 = smov 88   ;;  %s2988_s15 = smov 96  }
  0x21   : > { %2307 = vrot.lane.b32.xlu1 %v3115_v34, %s2977_s8  ;;  %v532_v43 = vsel %vm529_vm1, %v530_v35, %v531_v36  ;;  %v482_v45 = vrot.slane %v365_v27, 1  ;;  %v3130_v47 = vsel %vm529_vm1, %v536_v25, %v537_v30  ;;  %v3133_v49 = vunpack.c.l.bf16 %v356_v32  ;;  %s2989_s16 = smov 104   ;;  %s2990_s25 = smov 112  }
  0x22   : > { %v2316_v48 = vpack.i.bf16 %v3108_v29, %v532_v43  ;;  %v377_v50 = vunpack.c.l.bf16 %v357_v33  ;;  %v3137_v52 = vsel %vm480_vm0, %v487_v39, %v488_v40  ;;  %v3140_v54 = vunpack.c.l.bf16 %v358_v38  ;;  %v361_v39 = vld [vmem:[%s3065_s7 + $0x44] sm:$0x1]  ;;  %s323_s27 = sadd.s32 2, %s2959_s18  ;;  %s2991_s28 = smov 120  }
  0x23   : > { %v483_v53 = vsel %vm480_vm0, %v481_v41, %v482_v45  ;;  %v379_v55 = vunpack.c.l.bf16 %v359_v42  ;;  %v499_v57 = vrot.slane %v3133_v49, 1  ;;  %v3145_v59 = vunpack.c.l.bf16 %v350_v46  ;;  %p326_p8 = scmp.lt.s32.totalorder %s323_s27, 9  ;;  %p336_p9 = scmp.lt.s32.totalorder %s2959_s18, 7 }
  0x24   : > { %2317 = vrot.lane.b32.xlu2 %v2316_v48, %s2978_s9  ;;  %v2296_v56 = vpack.i.bf16 %v3126_v44, %v483_v53  ;;  %v500_v58 = vrot.slane %v377_v50, 1  ;;  %v502_v60 = vrot.slane %v3140_v54, 1  ;;  %v371_v62 = vunpack.c.l.bf16 %v351_v51 }
  0x25   : > { %v503_v61 = vrot.slane %v379_v55, 1  ;;  %v548_v63 = vrot.slane %v3133_v49, 2  ;;  %v539_v2 = vrot.slane %v3145_v59, 2  ;;  %v490_v7 = vrot.slane %v3145_v59, 1  ;;  %s4645_s27 = smov (!%p326_p8, %s323_s27), 9  ;;  %s4647_s18 = smov (!%p336_p9, %s2959_s18), 7 }
  0x26   : > { %2297 = vrot.lane.b32.xlu0 %v2296_v56, %s2977_s8  ;;  %v501_v0 = vsel %vm480_vm0, %v499_v57, %v500_v58  ;;  %v549_v8 = vrot.slane %v377_v50, 2  ;;  %v540_v11 = vrot.slane %v371_v62, 2  ;;  %v491_v13 = vrot.slane %v371_v62, 1 }
  0x27   : > { %v504_v10 = vsel %vm480_vm0, %v502_v60, %v503_v61  ;;  %v551_v14 = vrot.slane %v3140_v54, 2  ;;  %v552_v16 = vrot.slane %v379_v55, 2  ;;  %v542_v23 = vrot.slane %v3075_v4, 2  ;;  %v363_v61 = vld [vmem:[%s3065_s7 + $0x4c] sm:$0x1] }
  0x28   : > { %v3155_v15 = vpack.i.bf16 %v504_v10, %v501_v0  ;;  %v541_v17 = vsel %vm529_vm1, %v539_v2, %v540_v11  ;;  %v492_v19 = vsel %vm480_vm0, %v490_v7, %v491_v13  ;;  %v550_v22 = vsel %vm529_vm1, %v548_v63, %v549_v8  ;;  %v384_v8 = vld [vmem:[%s3241_s29] sm:$0xf] }
  0x29   : > { %v3162_v20 = vpack.i.bf16 %v541_v17, %v3130_v47  ;;  %v3165_v21 = vpack.i.bf16 %v492_v19, %v3137_v52  ;;  %v553_v25 = vsel %vm529_vm1, %v551_v14, %v552_v16  ;;  %v543_v27 = vrot.slane %v373_v5, 2  ;;  %v360_v5 = vld [vmem:[%s3065_s7 + $0x40] sm:$0xf] }
  0x2a   : > { %2312 = vrot.lane.b32.xlu1 %v3155_v15, %s2977_s8  ;;  %v545_v30 = vrot.slane %v3078_v6, 2  ;;  %v546_v31 = vrot.slane %v375_v9, 2  ;;  %v3179_v32 = vpack.i.bf16 %v553_v25, %v550_v22  ;;  %v2336_v1 = vpack.i.bf16 %v3092_v18, %v3085_v12 }
  0x2b   : > { %v544_v33 = vsel %vm529_vm1, %v542_v23, %v543_v27  ;;  %v380_v9 = vunpack.c.l.bf16 %v360_v5  ;;  %v2346_v36 = vpack.i.bf16 %v3133_v49, %v3078_v6  ;;  %v2341_v38 = vpack.i.bf16 %v3075_v4, %v3145_v59  ;;  %v396_v23 = vld [vmem:[%s3241_s29 + $0x30] sm:$0xf]  ;;  %v393_v5 = vld [vmem:[%s3241_s29 + $0x24] sm:$0x1] }
  0x2c   : > { %2322 = vrot.lane.b32.xlu2 %v3162_v20, %s2978_s9  ;;  %v547_v35 = vsel %vm529_vm1, %v545_v30, %v546_v31  ;;  %v2361_v40 = vpack.i.bf16 %v3099_v24, %v492_v19  ;;  %v381_v41 = vunpack.c.l.bf16 %v361_v39  ;;  %v2366_v42 = vpack.i.bf16 %v501_v0, %v3105_v28  ;;  %v394_v19 = vld [vmem:[%s3241_s29 + $0x28] sm:$0xf]  ;;  %v398_v30 = vld [vmem:[%s3241_s29 + $0x38] sm:$0xf]  ;;  %v388_v31 = vld [vmem:[%s3241_s29 + $0x10] sm:$0xf] }
  0x2d   : > { %v3188_v3 = vpack.i.bf16 %v547_v35, %v544_v33  ;;  %v2351_v37 = vpack.i.bf16 %v380_v9, %v3140_v54  ;;  %v2356_v43 = vpack.i.bf16 %v3137_v52, %v3126_v44  ;;  %v604_v45 = vrot.slane %v380_v9, 1  ;;  %v385_v39 = vld [vmem:[%s3241_s29 + $0x4] sm:$0x1] }
  0x2e   : > { %2302 = vrot.lane.b32.xlu0 %v3165_v21, %s2977_s8  ;;  %v605_v46 = vrot.slane %v381_v41, 1  ;;  %v2376_v48 = vpack.i.bf16 %v3130_v47, %v3108_v29  ;;  %v631_v28 = vrot.slane %v380_v9, 2  ;;  %v632_v50 = vrot.slane %v381_v41, 2  ;;  %v362_v47 = vld [vmem:[%s3065_s7 + $0x48] sm:$0xf]  ;;  %s2986_s7 = smov 80  }
  0x2f   : > { %v2381_v51 = vpack.i.bf16 %v544_v33, %v541_v17  ;;  %v2396_v29 = vpack.i.bf16 %v3145_v59, %v3092_v18  ;;  %v2386_v55 = vpack.i.bf16 %v550_v22, %v547_v35  ;;  %v382_v56 = vunpack.c.l.bf16 %v362_v47  ;;  %v392_v17 = vld [vmem:[%s3241_s29 + $0x20] sm:$0xf]  ;;  %v390_v33 = vld [vmem:[%s3241_s29 + $0x18] sm:$0xf] }
  0x30   : > { %v606_v24 = vsel %vm480_vm0, %v604_v45, %v605_v46  ;;  %v633_v52 = vsel %vm529_vm1, %v631_v28, %v632_v50  ;;  %v2406_v57 = vpack.i.bf16 %v3140_v54, %v3133_v49  ;;  %v2401_v60 = vpack.i.bf16 %v3078_v6, %v3075_v4 }
  0x31   : > { %v2371_v44 = vpack.i.bf16 %v606_v24, %v504_v10  ;;  %v2391_v53 = vpack.i.bf16 %v633_v52, %v553_v25  ;;  %v2411_v58 = vpack.i.bf16 %v382_v56, %v380_v9  ;;  %v383_v62 = vunpack.c.l.bf16 %v363_v61  ;;  %v386_v10 = vld [vmem:[%s3241_s29 + $0x8] sm:$0xf]  ;;  %v397_v61 = vld [vmem:[%s3241_s29 + $0x34] sm:$0x1] }
  0x32   : > { %2332 = vrot.lane.b32.xlu1 %v3179_v32, %s2978_s9  ;;  %v684_v63 = vrot.slane %v382_v56, 1  ;;  %v711_v2 = vrot.slane %v382_v56, 2  ;;  %v3251_v14 = vunpack.c.l.bf16 %v384_v8  ;;  %v3263_v25 = vunpack.c.l.bf16 %v392_v17 }
  0x33   : > { %v685_v0 = vrot.slane %v383_v62, 1  ;;  %v712_v7 = vrot.slane %v383_v62, 2  ;;  %v3265_v27 = vunpack.c.l.bf16 %v394_v19  ;;  %v3278_v9 = vunpack.c.l.bf16 %v396_v23  ;;  %v399_v62 = vld [vmem:[%s3241_s29 + $0x3c] sm:$0x1] }
  0x34   : > { %2337 = vrot.lane.b32.xlu2 %v2336_v1, %s2979_s10  ;;  %4591 = vst [vmem:[#allocation2_spill] sm:$0xff] %v3263_v25  ;;  %v405_v28 = vunpack.c.l.bf16 %v385_v39  ;;  %v778_v56 = vrot.slane %v3251_v14, 1  ;;  %v3354_v17 = vunpack.c.l.bf16 %v397_v61  ;;  %v3356_v19 = vunpack.c.l.bf16 %v399_v62 }
  0x35   : > { %v713_v13 = vsel %vm529_vm1, %v711_v2, %v712_v7  ;;  %4592 = vst [vmem:[#allocation3_spill] sm:$0xff] %v3265_v27  ;;  %v3290_v41 = vpack.i.bf16 %v3265_v27, %v3263_v25  ;;  %v826_v7 = vrot.slane %v3251_v14, 2 }
  0x36   : > { %2327 = vrot.lane.b32.xlu0 %v3188_v3, %s2978_s9  ;;  %v2451_v16 = vpack.i.bf16 %v713_v13, %v633_v52  ;;  %4593 = vst [vmem:[#allocation4_spill] sm:$0xff] %v3278_v9  ;;  %v793_v52 = vrot.slane %v3265_v27, 1  ;;  %v827_v8 = vrot.slane %v405_v28, 2 }
  0x37   : > { %4596 = vst [vmem:[#allocation7_spill] sm:$0xff] %v3354_v17 }
  0x3a   : > { %2347 = vrot.lane.b32.xlu1 %v2346_v36, %s2979_s10  ;;  %v3280_v36 = vunpack.c.l.bf16 %v398_v30 }
  0x3c   : > { %2352 = vrot.lane.b32.xlu2 %v2351_v37, %s2979_s10  ;;  %v3282_v37 = vunpack.c.l.bf16 %v388_v31  ;;  %v828_v31 = vsel %vm529_vm1, %v826_v7, %v827_v8  ;;  %v799_v39 = vrot.slane %v3280_v36, 1  ;;  %v838_v8 = vrot.slane %v3263_v25, 2 }
  0x3e   : > { %2342 = vrot.lane.b32.xlu0 %v2341_v38, %s2979_s10  ;;  %v3284_v38 = vunpack.c.l.bf16 %v390_v33  ;;  %v784_v45 = vrot.slane %v3282_v37, 1 }
  0x42   : > { %2362 = vrot.lane.b32.xlu1 %v2361_v40, %s2980_s11  ;;  %v387_v40 = vld [vmem:[%s3241_s29 + $0xc] sm:$0x1] }
  0x43   : > { %v407_v50 = vunpack.c.l.bf16 %v387_v40  ;;  %v800_v40 = vrot.slane %v3356_v19, 1 }
  0x44   : > { %2367 = vrot.lane.b32.xlu2 %v2366_v42, %s2980_s11  ;;  %v3292_v42 = vunpack.c.l.bf16 %v393_v5  ;;  %v796_v5 = vrot.slane %v3278_v9, 1 }
  0x46   : > { %2357 = vrot.lane.b32.xlu0 %v2356_v43, %s2980_s11  ;;  %4594 = vst [vmem:[#allocation5_spill] sm:$0xff] %v3292_v42 }
  0x4a   : > { %2377 = vrot.lane.b32.xlu1 %v2376_v48, %s2981_s12  ;;  %v787_v48 = vrot.slane %v3284_v38, 1 }
  0x4c   : > { %2382 = vrot.lane.b32.xlu2 %v2381_v51, %s2981_s12  ;;  %v3304_v51 = vpack.i.bf16 %v3280_v36, %v3278_v9 }
  0x4e   : > { %2372 = vrot.lane.b32.xlu0 %v2371_v44, %s2980_s11  ;;  %v790_v44 = vrot.slane %v3263_v25, 1 }
  0x52   : > { %2392 = vrot.lane.b32.xlu1 %v2391_v53, %s2981_s12 }
  0x54   : > { %2397 = vrot.lane.b32.xlu2 %v2396_v29, %s2982_s14  ;;  %v3314_v29 = vpack.i.bf16 %v3284_v38, %v3282_v37 }
  0x56   : > { %2387 = vrot.lane.b32.xlu0 %v2386_v55, %s2981_s12 }
  0x5a   : > { %2407 = vrot.lane.b32.xlu1 %v2406_v57, %s2982_s14  ;;  %v779_v57 = vrot.slane %v405_v28, 1 }
  0x5c   : > { %2412 = vrot.lane.b32.xlu2 %v2411_v58, %s2982_s14  ;;  %v780_v13 = vsel %vm480_vm0, %v778_v56, %v779_v57  ;;  %v847_v56 = vrot.slane %v3280_v36, 2  ;;  %v848_v57 = vrot.slane %v3356_v19, 2 }
  0x5e   : > { %2402 = vrot.lane.b32.xlu0 %v2401_v60, %s2982_s14  ;;  %v782_v60 = vrot.slane %v407_v50, 1  ;;  %v3407_v7 = vsel %vm529_vm1, %v847_v56, %v848_v57 }
  0x62   : > { %2422 = vrot.lane.b32.xlu1 %v3115_v34, %s2983_s17  ;;  %v686_v34 = vsel %vm480_vm0, %v684_v63, %v685_v0 }
  0x63   : > { %v2431_v11 = vpack.i.bf16 %v686_v34, %v606_v24 }
  0x64   : > { %2427 = vrot.lane.b32.xlu2 %v3155_v15, %s2983_s17  ;;  %v3253_v15 = vunpack.c.l.bf16 %v386_v10 }
  0x66   : > { %2417 = vrot.lane.b32.xlu0 %v3165_v21, %s2983_s17  ;;  %v391_v21 = vld [vmem:[%s3241_s29 + $0x1c] sm:$0x1]  ;;  %v2456_v22 = vpack.i.bf16 %v3253_v15, %v3251_v14  ;;  %v781_v58 = vrot.slane %v3253_v15, 1  ;;  %v829_v10 = vrot.slane %v3253_v15, 2 }
  0x67   : > { %v3273_v1 = vunpack.c.l.bf16 %v391_v21  ;;  %v832_v21 = vrot.slane %v3282_v37, 2 }
  0x69   : > { %v788_v24 = vrot.slane %v3273_v1, 1  ;;  %v836_v23 = vrot.slane %v3273_v1, 2 }
  0x6a   : > { %2437 = vrot.lane.b32.xlu1 %v3162_v20, %s2984_s30  ;;  %v389_v20 = vld [vmem:[%s3241_s29 + $0x14] sm:$0x1] }
  0x6b   : > { %v3271_v35 = vunpack.c.l.bf16 %v389_v20  ;;  %v3324_v55 = vsel %vm480_vm0, %v787_v48, %v788_v24 }
  0x6c   : > { %2442 = vrot.lane.b32.xlu2 %v3188_v3, %s2984_s30  ;;  %v395_v3 = vld [vmem:[%s3241_s29 + $0x2c] sm:$0x1] }
  0x6d   : > { %v3294_v43 = vunpack.c.l.bf16 %v395_v3  ;;  %v785_v46 = vrot.slane %v3271_v35, 1  ;;  %v833_v14 = vrot.slane %v3271_v35, 2  ;;  %v797_v3 = vrot.slane %v3354_v17, 1 }
  0x6e   : > { %2432 = vrot.lane.b32.xlu0 %v2431_v11, %s2983_s17  ;;  %v830_v11 = vrot.slane %v407_v50, 2 }
  0x6f   : > { %4595 = vst [vmem:[#allocation6_spill] sm:$0xff] %v3294_v43  ;;  %v4565_v53 = vrot.slane %v3294_v43, 1  ;;  %v3319_v47 = vsel %vm480_vm0, %v784_v45, %v785_v46  ;;  %v3377_v48 = vsel %vm529_vm1, %v832_v21, %v833_v14 }
  0x70   : > { %v2481_v63 = vpack.i.bf16 %v3324_v55, %v3319_v47  ;;  %v3368_v33 = vsel %vm529_vm1, %v829_v10, %v830_v11  ;;  %v839_v10 = vrot.slane %v3292_v42, 2  ;;  %v841_v11 = vrot.slane %v3265_v27, 2 }
  0x71   : > { %v3342_v34 = vsel %vm480_vm0, %v793_v52, %v4565_v53  ;;  %v2496_v45 = vpack.i.bf16 %v3368_v33, %v828_v31  ;;  %v845_v52 = vrot.slane %v3354_v17, 2 }
  0x72   : > { %2452 = vrot.lane.b32.xlu1 %v2451_v16, %s2984_s30  ;;  %v3352_v16 = vsel %vm480_vm0, %v781_v58, %v782_v60  ;;  %v3392_v58 = vsel %vm480_vm0, %v796_v5, %v797_v3  ;;  %v3397_v60 = vsel %vm480_vm0, %v799_v39, %v800_v40  ;;  %v3417_v14 = vsel %vm529_vm1, %v838_v8, %v839_v10 }
  0x73   : > { %v2476_v30 = vpack.i.bf16 %v3352_v16, %v780_v13  ;;  %v2491_v62 = vpack.i.bf16 %v3397_v60, %v3392_v58  ;;  %v842_v13 = vrot.slane %v3294_v43, 2 }
  0x74   : > { %2457 = vrot.lane.b32.xlu2 %v2456_v22, %s2985_s6  ;;  %v835_v22 = vrot.slane %v3284_v38, 2 }
  0x76   : > { %2447 = vrot.lane.b32.xlu0 %v3179_v32, %s2984_s30  ;;  %v791_v32 = vrot.slane %v3292_v42, 1  ;;  %v3380_v28 = vsel %vm529_vm1, %v835_v22, %v836_v23  ;;  %v3420_v22 = vsel %vm529_vm1, %v841_v11, %v842_v13  ;;  %v2516_v23 = vpack.i.bf16 %v3282_v37, %v3253_v15  ;;  %v401_v13 = vld [vmem:[%s3241_s29 + $0x44] sm:$0x1] }
  0x77   : > { %v2501_v61 = vpack.i.bf16 %v3380_v28, %v3377_v48  ;;  %v2506_v31 = vpack.i.bf16 %v3420_v22, %v3417_v14  ;;  %v2521_v11 = vpack.i.bf16 %v3263_v25, %v3284_v38 }
  0x78   : > { %v3337_v0 = vsel %vm480_vm0, %v790_v44, %v791_v32  ;;  %v844_v44 = vrot.slane %v3278_v9, 2 }
  0x79   : > { %v2486_v20 = vpack.i.bf16 %v3342_v34, %v3337_v0 }
  0x7a   : > { %2467 = vrot.lane.b32.xlu1 %v3290_v41, %s2985_s6 }
  0x7c   : > { %2472 = vrot.lane.b32.xlu2 %v3304_v51, %s2985_s6 }
  0x7e   : > { %2462 = vrot.lane.b32.xlu0 %v3314_v29, %s2985_s6  ;;  %v3346_v2 = vpop.permute.xlu2 %2317 }
  0x7f   : > { %v2320_v15 = vunpack.i.h.bf16 %v3346_v2 }
  0x82   : > { %2482 = vrot.lane.b32.xlu1 %v2481_v63, %s2986_s7  ;;  %v3404_v63 = vsel %vm529_vm1, %v844_v44, %v845_v52  ;;  %v2526_v44 = vpack.i.bf16 %v3278_v9, %v3265_v27  ;;  %v2319_v52 = vunpack.i.l.bf16 %v3346_v2 }
  0x83   : > { %v2511_v21 = vpack.i.bf16 %v3407_v7, %v3404_v63 }
  0x84   : > { %2487 = vrot.lane.b32.xlu2 %v2486_v20, %s2986_s7 }
  0x86   : > { %2477 = vrot.lane.b32.xlu0 %v2476_v30, %s2986_s7  ;;  %v3383_v50 = vpop.permute.xlu2 %2322  ;;  %v400_v30 = vld [vmem:[%s3241_s29 + $0x40] sm:$0xf] }
  0x87   : > { %v3429_v39 = vunpack.c.l.bf16 %v400_v30 }
  0x89   : > { %4597 = vst [vmem:[#allocation8_spill] sm:$0xff] %v3429_v39  ;;  %v2531_v57 = vpack.i.bf16 %v3429_v39, %v3280_v36 }
  0x8a   : > { %2497 = vrot.lane.b32.xlu1 %v2496_v45, %s2987_s13 }
  0x8c   : > { %2502 = vrot.lane.b32.xlu2 %v2501_v61, %s2987_s13 }
  0x8e   : > { %2492 = vrot.lane.b32.xlu0 %v2491_v62, %s2986_s7  ;;  %v2338_v20 = vpop.permute.xlu2 %2337 }
  0x8f   : > { %v2340_v61 = vunpack.i.h.bf16 %v2338_v20  ;;  %v2339_v62 = vunpack.i.l.bf16 %v2338_v20 }
  0x92   : > { %2512 = vrot.lane.b32.xlu1 %v2511_v21, %s2987_s13 }
  0x93   : > { %v3427_v5 = vpop.permute.xlu1 %2307 }
  0x94   : > { %2517 = vrot.lane.b32.xlu2 %v2516_v23, %s2988_s15 }
  0x96   : > { %2507 = vrot.lane.b32.xlu0 %v2506_v31, %s2987_s13  ;;  %v3431_v45 = vpop.permute.xlu2 %2352  ;;  %v3448_v31 = vunpack.c.l.bf16 %v401_v13  ;;  %s2240_s13 = smul.u32 20, %s4645_s27 }
  0x98   : > { %v2298_v56 = vpop.permute.xlu0 %2297 }
  0x99   : > { %v2300_v8 = vunpack.i.h.bf16 %v2298_v56  ;;  %v2299_v10 = vunpack.i.l.bf16 %v2298_v56 }
  0x9a   : > { %2527 = vrot.lane.b32.xlu1 %v2526_v44, %s2988_s15 }
  0x9b   : > { %v981_v21 = vsel %vm979_vm2, %v3085_v12, %v2300_v8  ;;  %v980_v2 = vsel %vm979_vm2, %v3102_v26, %v2299_v10  ;;  %v2541_v12 = vpack.i.bf16 %v3337_v0, %v3324_v55  ;;  %v2325_v26 = vunpack.i.h.bf16 %v3383_v50 }
  0x9c   : > { %v990_v23 = vsel %vm988_vm3, %v981_v21, %v2320_v15  ;;  %v989_v30 = vsel %vm988_vm3, %v980_v2, %v2319_v52  ;;  %2532 = vrot.lane.b32.xlu2 %v2531_v57, %s2988_s15  ;;  %v2313_v20 = vpop.permute.xlu1 %2312  ;;  %v2324_v15 = vunpack.i.l.bf16 %v3383_v50  ;;  %v2546_v57 = vpack.i.bf16 %v3392_v58, %v3342_v34 }
  0x9d   : > { %v3451_v44 = vsel %vm997_vm4, %v989_v30, %v2339_v62  ;;  %v3454_v56 = vsel %vm997_vm4, %v990_v23, %v2340_v61  ;;  %v900_v10 = vrot.slane %v3429_v39, 1  ;;  %v901_v61 = vrot.slane %v3448_v31, 1 }
  0x9e   : > { %2522 = vrot.lane.b32.xlu0 %v2521_v11, %s2988_s15  ;;  %v3456_v53 = vpop.permute.xlu2 %2367  ;;  %v2315_v11 = vunpack.i.h.bf16 %v2313_v20  ;;  %v2314_v13 = vunpack.i.l.bf16 %v2313_v20  ;;  %v2536_v21 = vpack.i.bf16 %v3319_v47, %v3352_v16  ;;  %v3476_v23 = vpack.i.bf16 %v788_v24, %v3324_v55  ;;  %s330_s15 = sadd.s32 %s2240_s13, %s3059_s26 }
  0x9f   : > { %v3481_v30 = vpack.i.bf16 %v791_v32, %v3337_v0  ;;  %v2355_v20 = vunpack.i.h.bf16 %v3431_v45  ;;  %v2354_v16 = vunpack.i.l.bf16 %v3431_v45  ;;  %v2556_v24 = vpack.i.bf16 %v3377_v48, %v3368_v33 }
  0xa0   : > { %v2303_v52 = vpop.permute.xlu0 %2302  ;;  %v3493_v32 = vsel %vm480_vm0, %v900_v10, %v901_v61  ;;  %v2310_v55 = vunpack.i.h.bf16 %v3427_v5  ;;  %v2309_v0 = vunpack.i.l.bf16 %v3427_v5  ;;  %v987_v45 = vsel %vm979_vm2, %v3140_v54, %v2315_v11 }
  0xa1   : > { %v2305_v8 = vunpack.i.h.bf16 %v2303_v52  ;;  %v2304_v62 = vunpack.i.l.bf16 %v2303_v52  ;;  %v2561_v54 = vpack.i.bf16 %v3417_v14, %v3380_v28  ;;  %v2551_v28 = vpack.i.bf16 %v3493_v32, %v3397_v60 }
  0xa2   : > { %2542 = vrot.lane.b32.xlu1 %v2541_v12, %s2989_s16 }
  0xa3   : > { %v983_v50 = vsel %vm979_vm2, %v3145_v59, %v2305_v8  ;;  %v982_v2 = vsel %vm979_vm2, %v3092_v18, %v2304_v62  ;;  %v928_v62 = vrot.slane %v3448_v31, 2 }
  0xa4   : > { %2547 = vrot.lane.b32.xlu2 %v2546_v57, %s2989_s16  ;;  %v2333_v59 = vpop.permute.xlu1 %2332  ;;  %v991_v12 = vsel %vm988_vm3, %v982_v2, %v2324_v15  ;;  %v992_v18 = vsel %vm988_vm3, %v983_v50, %v2325_v26  ;;  %v986_v26 = vsel %vm979_vm2, %v3133_v49, %v2314_v13  ;;  %v927_v57 = vrot.slane %v3429_v39, 2 }
  0xa5   : > { %v2335_v52 = vunpack.i.h.bf16 %v2333_v59  ;;  %v2334_v8 = vunpack.i.l.bf16 %v2333_v59  ;;  %v984_v50 = vsel %vm979_vm2, %v3075_v4, %v2309_v0 }
  0xa6   : > { %2537 = vrot.lane.b32.xlu0 %v2536_v21, %s2989_s16  ;;  %v3502_v15 = vpop.permute.xlu2 %2382  ;;  %v985_v21 = vsel %vm979_vm2, %v3078_v6, %v2310_v55  ;;  %v2369_v6 = vunpack.i.l.bf16 %v3456_v53 }
  0xa7   : > { %v995_v33 = vsel %vm988_vm3, %v986_v26, %v2334_v8  ;;  %v996_v48 = vsel %vm988_vm3, %v987_v45, %v2335_v52 }
  0xa8   : > { %v2328_v5 = vpop.permute.xlu0 %2327  ;;  %v3511_v10 = vsel %vm997_vm4, %v995_v33, %v2354_v16  ;;  %v3514_v49 = vsel %vm997_vm4, %v996_v48, %v2355_v20  ;;  %v929_v20 = vsel %vm529_vm1, %v927_v57, %v928_v62  ;;  %v2370_v16 = vunpack.i.h.bf16 %v3456_v53  ;;  %v402_v57 = vld [vmem:[%s3241_s29 + $0x48] sm:$0xf] }
  0xa9   : > { %v2330_v11 = vunpack.i.h.bf16 %v2328_v5  ;;  %v2329_v13 = vunpack.i.l.bf16 %v2328_v5  ;;  %vm1105_vm1 = vcmask 982016  }
  0xaa   : > { %2557 = vrot.lane.b32.xlu1 %v2556_v24, %s2990_s25  ;;  %v2571_v24 = vpack.i.bf16 %v929_v20, %v3407_v7  ;;  %v2566_v7 = vpack.i.bf16 %v3404_v63, %v3420_v22 }
  0xab   : > { %v994_v14 = vsel %vm988_vm3, %v985_v21, %v2330_v11  ;;  %v993_v2 = vsel %vm988_vm3, %v984_v50, %v2329_v13  ;;  %v2384_v11 = vunpack.i.l.bf16 %v3502_v15  ;;  %v3550_v21 = vunpack.c.l.bf16 %v402_v57 }
  0xac   : > { %2562 = vrot.lane.b32.xlu2 %v2561_v54, %s2990_s25  ;;  %v2348_v4 = vpop.permute.xlu1 %2347  ;;  %v2385_v54 = vunpack.i.h.bf16 %v3502_v15  ;;  %v2596_v57 = vpack.i.bf16 %v785_v46, %v3319_v47  ;;  %v2616_v47 = vpack.i.bf16 %v797_v3, %v3392_v58  ;;  %v2621_v3 = vpack.i.bf16 %v800_v40, %v3397_v60 }
  0xad   : > { %v2350_v59 = vunpack.i.h.bf16 %v2348_v4  ;;  %v2349_v52 = vunpack.i.l.bf16 %v2348_v4  ;;  %v2591_v15 = vpack.i.bf16 %v3550_v21, %v3429_v39 }
  0xae   : > { %2552 = vrot.lane.b32.xlu0 %v2551_v28, %s2989_s16  ;;  %v2398_v8 = vpop.permute.xlu2 %2397  ;;  %s2148_s16 = sshll.u32 %s330_s15, 2 }
  0xaf   : > { %v1002_v55 = vsel %vm997_vm4, %v993_v2, %v2349_v52  ;;  %v1003_v0 = vsel %vm997_vm4, %v994_v14, %v2350_v59  ;;  %v2400_v4 = vunpack.i.h.bf16 %v2398_v8  ;;  %v2399_v59 = vunpack.i.l.bf16 %v2398_v8  ;;  %s3583_s27 = scalar_lea.vmem %s4561_s2, %s2148_s16 }
  0xb0   : > { %v2343_v45 = vpop.permute.xlu0 %2342  ;;  %v3535_v53 = vsel %vm1006_vm5, %v1002_v55, %v2369_v6  ;;  %v3538_v26 = vsel %vm1006_vm5, %v1003_v0, %v2370_v16 }
  0xb1   : > { %v2345_v33 = vunpack.i.h.bf16 %v2343_v45  ;;  %v2344_v48 = vunpack.i.l.bf16 %v2343_v45 }
  0xb2   : > { %2572 = vrot.lane.b32.xlu1 %v2571_v24, %s2990_s25 }
  0xb3   : > { %v1000_v62 = vsel %vm997_vm4, %v991_v12, %v2344_v48  ;;  %v1001_v5 = vsel %vm997_vm4, %v992_v18, %v2345_v33 }
  0xb4   : > { %2577 = vrot.lane.b32.xlu2 %v3314_v29, %s2991_s28  ;;  %v2363_v13 = vpop.permute.xlu1 %2362 }
  0xb5   : > { %v2365_v50 = vunpack.i.h.bf16 %v2363_v13  ;;  %v2364_v28 = vunpack.i.l.bf16 %v2363_v13 }
  0xb6   : > { %2567 = vrot.lane.b32.xlu0 %v2566_v7, %s2990_s25  ;;  %v2413_v63 = vpop.permute.xlu2 %2412 }
  0xb7   : > { %v1009_v22 = vsel %vm1006_vm5, %v1000_v62, %v2364_v28  ;;  %v1010_v12 = vsel %vm1006_vm5, %v1001_v5, %v2365_v50  ;;  %v2414_v13 = vunpack.i.l.bf16 %v2413_v63 }
  0xb8   : > { %v2358_v18 = vpop.permute.xlu0 %2357  ;;  %v3558_v29 = vsel %vm1015_vm6, %v1009_v22, %v2384_v11  ;;  %v3561_v14 = vsel %vm1015_vm6, %v1010_v12, %v2385_v54  ;;  %v424_v54 = vld [vmem:[%s3583_s27] sm:$0xf]  ;;  %v2415_v11 = vunpack.i.h.bf16 %v2413_v63 }
  0xb9   : > { %v2360_v2 = vunpack.i.h.bf16 %v2358_v18  ;;  %v2359_v20 = vunpack.i.l.bf16 %v2358_v18 }
  0xba   : > { %2587 = vrot.lane.b32.xlu1 %v3304_v51, %s2991_s28 }
  0xbb   : > { %v1007_v16 = vsel %vm1006_vm5, %v3451_v44, %v2359_v20  ;;  %v1008_v6 = vsel %vm1006_vm5, %v3454_v56, %v2360_v2  ;;  %v3578_v56 = vld [vmem:[%s3241_s29 + $0x4c] sm:$0x1]  ;;  %s2149_s29 = sshll.u32 %s4647_s18, 3 }
  0xbc   : > { %2592 = vrot.lane.b32.xlu2 %v2591_v15, %s2991_s28  ;;  %v2378_v52 = vpop.permute.xlu1 %2377  ;;  %v4566_v5 = vunpack.c.l.bf16 %v3578_v56 }
  0xbd   : > { %v2380_v24 = vunpack.i.h.bf16 %v2378_v52  ;;  %v2379_v55 = vunpack.i.l.bf16 %v2378_v52 }
  0xbe   : > { %2582 = vrot.lane.b32.xlu0 %v3290_v41, %s2991_s28  ;;  %v3573_v51 = vpop.permute.xlu2 %2427  ;;  %v1116_v12 = vrot.slane %v4566_v5, 1  ;;  %s2150_s28 = sshll.u32 %s4641_s19, 6 }
  0xbf   : > { %v1016_v0 = vsel %vm1015_vm6, %v1007_v16, %v2379_v55  ;;  %v1017_v44 = vsel %vm1015_vm6, %v1008_v6, %v2380_v24  ;;  %v4598_v6 = vrot.slane %v3294_v43, 1  ;;  %v432_v55 = vld [vmem:[%s3583_s27 + $0x20] sm:$0xf]  ;;  %s340_s13 = sadd.s32 %s2150_s28, %s2149_s29 }
  0xc0   : > { %v2373_v45 = vpop.permute.xlu0 %2372  ;;  %v3586_v8 = vsel %vm1024_vm7, %v1016_v0, %v2399_v59  ;;  %v3589_v41 = vsel %vm1024_vm7, %v1017_v44, %v2400_v4  ;;  %v434_v0 = vld [vmem:[%s3583_s27 + $0x28] sm:$0xf]  ;;  %v2430_v44 = vunpack.i.h.bf16 %v3573_v51  ;;  %s2151_s15 = sshll.u32 %s340_s13, 3 }
  0xc1   : > { %v2375_v33 = vunpack.i.h.bf16 %v2373_v45  ;;  %v2374_v48 = vunpack.i.l.bf16 %v2373_v45  ;;  %v2611_v4 = vpack.i.bf16 %v4598_v6, %v3342_v34  ;;  %v2429_v45 = vunpack.i.l.bf16 %v3573_v51 }
  0xc2   : > { %2602 = vrot.lane.b32.xlu1 %v3476_v23, %s2977_s8  ;;  %v426_v23 = vld [vmem:[%s3583_s27 + $0x8] sm:$0xf] }
  0xc3   : > { %v1014_v7 = vsel %vm1006_vm5, %v3514_v49, %v2375_v33  ;;  %v1013_v62 = vsel %vm1006_vm5, %v3511_v10, %v2374_v48  ;;  %v1115_v10 = vrot.slane %v3550_v21, 1  ;;  %v3612_v49 = vunpack.c.l.bf16 %v424_v54  ;;  %v436_v48 = vld [vmem:[%s3583_s27 + $0x30] sm:$0xf] }
  0xc4   : > { %2607 = vrot.lane.b32.xlu2 %v3481_v30, %s2977_s8  ;;  %v2393_v50 = vpop.permute.xlu1 %2392  ;;  %v3618_v18 = vunpack.c.l.bf16 %v426_v23  ;;  %v3652_v54 = vunpack.c.l.bf16 %v434_v0  ;;  %v430_v23 = vld [vmem:[%s3583_s27 + $0x18] sm:$0xf] }
  0xc5   : > { %v2395_v28 = vunpack.i.h.bf16 %v2393_v50  ;;  %v2394_v22 = vunpack.i.l.bf16 %v2393_v50  ;;  %v1174_v59 = vrot.slane %v3612_v49, 7  ;;  %v1117_v52 = vsel %vm480_vm0, %v1115_v10, %v1116_v12  ;;  %v428_v50 = vld [vmem:[%s3583_s27 + $0x10] sm:$0xf] }
  0xc6   : > { %2597 = vrot.lane.b32.xlu0 %v2596_v57, %s2977_s8  ;;  %v3606_v46 = vpop.permute.xlu2 %2442  ;;  %v4573_v24 = vrot.slane %v3618_v18, 7  ;;  %v3678_v6 = vunpack.c.l.bf16 %v430_v23 }
  0xc7   : > { %v1022_v63 = vsel %vm1015_vm6, %v1013_v62, %v2394_v22  ;;  %v1023_v30 = vsel %vm1015_vm6, %v1014_v7, %v2395_v28  ;;  %v2631_v7 = vpack.i.bf16 %v1116_v12, %v1117_v52  ;;  %v3650_v62 = vunpack.c.l.bf16 %v432_v55 }
  0xc8   : > { %v2388_v15 = vpop.permute.xlu0 %2387  ;;  %v3624_v58 = vsel %vm1024_vm7, %v1022_v63, %v2414_v13  ;;  %v3627_v2 = vsel %vm1024_vm7, %v1023_v30, %v2415_v11  ;;  %v2636_v13 = vpack.i.bf16 %v4573_v24, %v1174_v59  ;;  %v3660_v22 = vunpack.c.l.bf16 %v436_v48  ;;  %v2215_v24 = vld [vmem:[%s4562_s3 + $0x28] sm:$0xff] }
  0xc9   : > { %v2390_v20 = vunpack.i.h.bf16 %v2388_v15  ;;  %v2389_v16 = vunpack.i.l.bf16 %v2388_v15  ;;  %v2626_v15 = vpack.i.bf16 %v901_v61, %v3493_v32  ;;  %v2444_v61 = vunpack.i.l.bf16 %v3606_v46 }
  0xca   : > { %2617 = vrot.lane.b32.xlu1 %v2616_v47, %s2977_s8  ;;  %v4610_v9 = vrot.slane %v3650_v62, 7 }
  0xcb   : > { %v1020_v40 = vsel %vm1015_vm6, %v3535_v53, %v2389_v16  ;;  %v1021_v60 = vsel %vm1015_vm6, %v3538_v26, %v2390_v20  ;;  %v438_v26 = vld [vmem:[%s3583_s27 + $0x38] sm:$0xf]  ;;  %v4569_v20 = vrot.slane %v3652_v54, 7  ;;  %v3676_v16 = vunpack.c.l.bf16 %v428_v50  ;;  %v425_v50 = vld [vmem:[%s3583_s27 + $0x4] sm:$0x1] }
  0xcc   : > { %2622 = vrot.lane.b32.xlu2 %v2621_v3, %s2977_s8  ;;  %v2408_v34 = vpop.permute.xlu1 %2407  ;;  %v3662_v47 = vunpack.c.l.bf16 %v438_v26  ;;  %v4570_v3 = vrot.slane %v3650_v62, 7 }
  0xcd   : > { %v2410_v33 = vunpack.i.h.bf16 %v2408_v34  ;;  %v2409_v53 = vunpack.i.l.bf16 %v2408_v34 }
  0xce   : > { %2612 = vrot.lane.b32.xlu0 %v2611_v4, %s2977_s8  ;;  %v3648_v57 = vpop.permute.xlu2 %2457  ;;  %v4567_v52 = vrot.slane %v3662_v47, 7 }
  0xcf   : > { %v1029_v51 = vsel %vm1024_vm7, %v1020_v40, %v2409_v53  ;;  %v1030_v11 = vsel %vm1024_vm7, %v1021_v60, %v2410_v33  ;;  %v2445_v40 = vunpack.i.h.bf16 %v3606_v46  ;;  %v4568_v60 = vrot.slane %v3660_v22, 7  ;;  %v3701_v33 = vld [vmem:[%s3583_s27 + $0xc] sm:$0x1] }
  0xd0   : > { %v2403_v28 = vpop.permute.xlu0 %2402  ;;  %v3665_v10 = vsel %vm1033_vm8, %v1029_v51, %v2429_v45  ;;  %v3668_v63 = vsel %vm1033_vm8, %v1030_v11, %v2430_v44  ;;  %v4572_v46 = vrot.slane %v3676_v16, 7  ;;  %v4571_v44 = vrot.slane %v3678_v6, 7  ;;  %v3718_v51 = vld [vmem:[%s3583_s27 + $0x14] sm:$0x1] }
  0xd1   : > { %v2405_v30 = vunpack.i.h.bf16 %v2403_v28  ;;  %v2404_v12 = vunpack.i.l.bf16 %v2403_v28  ;;  %v3709_v48 = vpack.i.bf16 %v4567_v52, %v4568_v60  ;;  %v449_v28 = vunpack.c.l.bf16 %v3718_v51 }
  0xd2   : > { %2632 = vrot.lane.b32.xlu1 %v2631_v7, %s2977_s8  ;;  %v3726_v11 = vpack.i.bf16 %v4571_v44, %v4572_v46 }
  0xd3   : > { %v1027_v4 = vsel %vm1024_vm7, %v3558_v29, %v2404_v12  ;;  %v1028_v59 = vsel %vm1024_vm7, %v3561_v14, %v2405_v30  ;;  %v3694_v14 = vpack.i.bf16 %v4569_v20, %v4570_v3 }
  0xd4   : > { %2637 = vrot.lane.b32.xlu2 %v2636_v13, %s2978_s9  ;;  %v2423_v32 = vpop.permute.xlu1 %2422  ;;  %4599 = vst [vmem:[#allocation9_spill] sm:$0xff] %v3726_v11  ;;  %v4575_v13 = vunpack.c.l.bf16 %v3701_v33 }
  0xd5   : > { %v2425_v55 = vunpack.i.h.bf16 %v2423_v32  ;;  %v2424_v0 = vunpack.i.l.bf16 %v2423_v32 }
  0xd6   : > { %2627 = vrot.lane.b32.xlu0 %v2626_v15, %s2977_s8  ;;  %v2473_v29 = vpop.permute.xlu2 %2472  ;;  %v3742_v12 = vpack.i.bf16 %v4575_v13, %v3618_v18  ;;  %v445_v15 = vunpack.c.l.bf16 %v425_v50  ;;  %v431_v50 = vld [vmem:[%s3583_s27 + $0x1c] sm:$0x1]  ;;  %v1269_v13 = vrot.slane %v449_v28, 1 }
  0xd7   : > { %v1036_v45 = vsel %vm1033_vm8, %v1027_v4, %v2424_v0  ;;  %v1037_v34 = vsel %vm1033_vm8, %v1028_v59, %v2425_v55  ;;  %v3745_v4 = vld [vmem:[%s3583_s27 + $0x24] sm:$0x1]  ;;  %v3751_v55 = vld [vmem:[%s3583_s27 + $0x2c] sm:$0x1]  ;;  %v2475_v5 = vunpack.i.h.bf16 %v2473_v29  ;;  %v2474_v52 = vunpack.i.l.bf16 %v2473_v29  ;;  %v2217_v29 = vld [vmem:[%s4562_s3 + $0x38] sm:$0xff] }
  0xd8   : > { %v3703_v53 = vpop.permute.xlu0 %2417  ;;  %v3712_v26 = vsel %vm1042_vm9, %v1036_v45, %v2444_v61  ;;  %v3715_v7 = vsel %vm1042_vm9, %v1037_v34, %v2445_v40  ;;  %4600 = vst [vmem:[#allocation10_spill] sm:$0xff] %v3742_v12  ;;  %v3748_v40 = vpack.i.bf16 %v449_v28, %v3676_v16  ;;  %v2656_v0 = vpack.i.bf16 %v445_v15, %v3612_v49 }
  0xd9   : > { %v4574_v45 = vunpack.c.l.bf16 %v3745_v4  ;;  %v455_v60 = vunpack.c.l.bf16 %v3751_v55  ;;  %v3779_v55 = vld [vmem:[%s3583_s27 + $0x3c] sm:$0x1]  ;;  %1930 = vmatpush.bf16.msra.mxu0 %v2217_v29  ;;  %2223 = vmatpush.bf16.msra.mxu2 %v2217_v29  ;;  %v2419_v39 = vunpack.i.l.bf16 %v3703_v53 }
  0xda   : > { %2647 = vrot.lane.b32.xlu1 %v3694_v14, %s2978_s9  ;;  %4601 = vst [vmem:[#allocation11_spill] sm:$0xff] %v3748_v40 }
  0xdc   : > { %2652 = vrot.lane.b32.xlu2 %v3709_v48, %s2978_s9  ;;  %v3732_v23 = vpop.permute.xlu1 %2437 }
  0xde   : > { %2642 = vrot.lane.b32.xlu0 %v3726_v11, %s2978_s9  ;;  %v3737_v30 = vpop.permute.xlu2 %2487  ;;  %v1271_v11 = vrot.slane %v3678_v6, 1 }
  0xe0   : > { %v2433_v59 = vpop.permute.xlu0 %2432 }
  0xe1   : > { %v2435_v61 = vunpack.i.h.bf16 %v2433_v59  ;;  %v2434_v32 = vunpack.i.l.bf16 %v2433_v59 }
  0xe2   : > { %2662 = vrot.lane.b32.xlu1 %v3742_v12, %s2979_s10  ;;  %v1265_v12 = vrot.slane %v3618_v18, 1 }
  0xe3   : > { %v1040_v34 = vsel %vm1033_vm8, %v3624_v58, %v2434_v32  ;;  %v1041_v51 = vsel %vm1033_vm8, %v3627_v2, %v2435_v61  ;;  %v3771_v58 = vpack.i.bf16 %v4574_v45, %v3650_v62  ;;  %v451_v2 = vunpack.c.l.bf16 %v431_v50 }
  0xe4   : > { %2667 = vrot.lane.b32.xlu2 %v3748_v40, %s2979_s10  ;;  %v2453_v59 = vpop.permute.xlu1 %2452  ;;  %v1268_v45 = vrot.slane %v3676_v16, 1 }
  0xe5   : > { %v2455_v20 = vunpack.i.h.bf16 %v2453_v59  ;;  %v2454_v3 = vunpack.i.l.bf16 %v2453_v59  ;;  %v3784_v59 = vpack.i.bf16 %v455_v60, %v3652_v54  ;;  %v1272_v40 = vrot.slane %v451_v2, 1 }
  0xe6   : > { %2657 = vrot.lane.b32.xlu0 %v2656_v0, %s2979_s10  ;;  %v3766_v44 = vpop.permute.xlu2 %2502  ;;  %v1270_v28 = vsel %vm480_vm0, %v1268_v45, %v1269_v13 }
  0xe7   : > { %v1049_v61 = vsel %vm1042_vm9, %v1040_v34, %v2454_v3  ;;  %v1050_v32 = vsel %vm1042_vm9, %v1041_v51, %v2455_v20  ;;  %v1262_v3 = vrot.slane %v3612_v49, 1  ;;  %v1263_v34 = vrot.slane %v445_v15, 1 }
  0xe8   : > { %v3781_v0 = vpop.permute.xlu0 %2447  ;;  %v3787_v46 = vsel %vm1051_vm10, %v1049_v61, %v2474_v52  ;;  %v3790_v50 = vsel %vm1051_vm10, %v1050_v32, %v2475_v5  ;;  %v3796_v20 = vpack.i.bf16 %v451_v2, %v3678_v6  ;;  %v4579_v51 = vunpack.c.l.bf16 %v3779_v55  ;;  %v2216_v52 = vld [vmem:[%s4562_s3 + $0x30] sm:$0xff] }
  0xe9   : > { %v437_v61 = vld [vmem:[%s3583_s27 + $0x34] sm:$0x1]  ;;  %1931 = vmatpush.bf16.msra.mxu0 %v2216_v52  ;;  %v1264_v49 = vsel %vm480_vm0, %v1262_v3, %v1263_v34  ;;  %2224 = vmatpush.bf16.msra.mxu2 %v2216_v52  ;;  %v1273_v2 = vsel %vm480_vm0, %v1271_v11, %v1272_v40  ;;  %v3844_v43 = vpack.i.bf16 %v1269_v13, %v1270_v28  ;;  %v1274_v28 = vrot.slane %v3650_v62, 1 }
  0xea   : > { %2677 = vrot.lane.b32.xlu1 %v3771_v58, %s2979_s10  ;;  %v3815_v29 = vpack.i.bf16 %v4579_v51, %v3662_v47  ;;  %v457_v32 = vunpack.c.l.bf16 %v437_v61  ;;  %v2696_v52 = vpack.i.bf16 %v1263_v34, %v1264_v49  ;;  %v2214_v51 = vld [vmem:[%s4562_s3 + $0x20] sm:$0xff]  ;;  %v4602_v34 = vunpack.c.l.bf16 %v3701_v33  ;;  %v2213_v33 = vld [vmem:[%s4562_s3 + $0x18] sm:$0xff] }
  0xeb   : > { %4603 = vst [vmem:[#allocation12_spill] sm:$0xff] %v3844_v43  ;;  %v3853_v11 = vpack.i.bf16 %v1272_v40, %v1273_v2  ;;  %v4605_v40 = vunpack.c.l.bf16 %v3745_v4  ;;  %v2211_v4 = vld [vmem:[%s4562_s3 + $0x8] sm:$0xff]  ;;  %v2459_v62 = vunpack.i.l.bf16 %v3648_v57 }
  0xec   : > { %2682 = vrot.lane.b32.xlu2 %v3784_v59, %s2979_s10  ;;  %v3805_v5 = vpop.permute.xlu1 %2467  ;;  %v3827_v61 = vpack.i.bf16 %v457_v32, %v3660_v22  ;;  %v1266_v49 = vrot.slane %v4602_v34, 1  ;;  %v1278_v34 = vrot.slane %v455_v60, 1  ;;  %v1281_v42 = vrot.slane %v457_v32, 1 }
  0xed   : > { %1932 = vmatpush.bf16.msra.mxu0 %v2215_v24  ;;  %2225 = vmatpush.bf16.msra.mxu2 %v2215_v24  ;;  %v1275_v2 = vrot.slane %v4605_v40, 1 }
  0xee   : > { %2672 = vrot.lane.b32.xlu0 %v3796_v20, %s2979_s10  ;;  %v3810_v15 = vpop.permute.xlu2 %2517  ;;  %v1267_v45 = vsel %vm480_vm0, %v1265_v12, %v1266_v49  ;;  %v2212_v12 = vld [vmem:[%s4562_s3 + $0x10] sm:$0xff] }
  0xef   : > { %v3858_v13 = vpack.i.bf16 %v1266_v49, %v1267_v45 }
  0xf0   : > { %v3821_v3 = vpop.permute.xlu0 %2462 }
  0xf1   : > { %1933 = vmatpush.bf16.msra.mxu0 %v2214_v51  ;;  %2226 = vmatpush.bf16.msra.mxu2 %v2214_v51  ;;  %v1280_v51 = vrot.slane %v3660_v22, 1  ;;  %4604 = vst [vmem:[#allocation13_spill] sm:$0xff] %v3858_v13 }
  0xf2   : > { %2692 = vrot.lane.b32.xlu1 %v3815_v29, %s2979_s10 }
  0xf3   : > { %v1282_v49 = vsel %vm480_vm0, %v1280_v51, %v1281_v42 }
  0xf4   : > { %2697 = vrot.lane.b32.xlu2 %v2696_v52, %s2980_s11  ;;  %v3837_v24 = vpop.permute.xlu1 %2482  ;;  %v1277_v52 = vrot.slane %v3652_v54, 1 }
  0xf5   : > { %1934 = vmatpush.bf16.msra.mxu0 %v2213_v33  ;;  %2227 = vmatpush.bf16.msra.mxu2 %v2213_v33 }
  0xf6   : > { %2687 = vrot.lane.b32.xlu0 %v3827_v61, %s2979_s10  ;;  %v3842_v27 = vpop.permute.xlu2 %2532  ;;  %v1279_v60 = vsel %vm480_vm0, %v1277_v52, %v1278_v34  ;;  %v1276_v52 = vsel %vm480_vm0, %v1274_v28, %v1275_v2 }
  0xf7   : > { %v3876_v45 = vpack.i.bf16 %v1278_v34, %v1279_v60  ;;  %v3888_v51 = vpack.i.bf16 %v1275_v2, %v1276_v52  ;;  %v2210_v34 = vld [vmem:[%s4562_s3] sm:$0xff]  ;;  %v4606_v60 = vunpack.c.l.bf16 %v3779_v55 }
  0xf8   : > { %v3851_v25 = vpop.permute.xlu0 %2477 }
  0xf9   : > { %1935 = vmatpush.bf16.msra.mxu0 %v2212_v12  ;;  %2228 = vmatpush.bf16.msra.mxu2 %v2212_v12  ;;  %v1283_v12 = vrot.slane %v3662_v47, 1  ;;  %v1284_v28 = vrot.slane %v4606_v60, 1 }
  0xfa   : > { %2707 = vrot.lane.b32.xlu1 %v3844_v43, %s2980_s11  ;;  %v3884_v43 = vpack.i.bf16 %v1281_v42, %v1282_v49  ;;  %v4607_v49 = vrot.slane %v3618_v18, 7  ;;  %v2420_v18 = vunpack.i.h.bf16 %v3703_v53  ;;  %v2460_v53 = vunpack.i.h.bf16 %v3648_v57 }
  0xfb   : > { %v1285_v55 = vsel %vm480_vm0, %v1283_v12, %v1284_v28 }
  0xfc   : > { %2712 = vrot.lane.b32.xlu2 %v3853_v11, %s2980_s11  ;;  %v3869_v32 = vpop.permute.xlu1 %2497 }
  0xfd   : > { %1936 = vmatpush.bf16.msra.mxu0 %v2211_v4  ;;  %2229 = vmatpush.bf16.msra.mxu2 %v2211_v4  ;;  %v4608_v4 = vrot.slane %v3676_v16, 7  ;;  %v2439_v16 = vunpack.i.l.bf16 %v3732_v23 }
  0xfe   : > { %2702 = vrot.lane.b32.xlu0 %v3858_v13, %s2980_s11  ;;  %v3874_v33 = vpop.permute.xlu2 %2547  ;;  %v4609_v13 = vrot.slane %v3678_v6, 7  ;;  %v1034_v6 = vsel %vm1033_vm8, %v3586_v8, %v2419_v39  ;;  %v2469_v39 = vunpack.i.l.bf16 %v3805_v5  ;;  %v4611_v8 = vrot.slane %v3652_v54, 7 }
  0xff   : > { %v2736_v52 = vpack.i.bf16 %v4608_v4, %v4607_v49  ;;  %v2440_v49 = vunpack.i.h.bf16 %v3732_v23  ;;  %v2450_v4 = vunpack.i.h.bf16 %v3781_v0 }
 0x100   : > { %v3882_v40 = vpop.permute.xlu0 %2492  ;;  %v2741_v17 = vpack.i.bf16 %v4610_v9, %v4609_v13  ;;  %v1035_v13 = vsel %vm1033_vm8, %v3589_v41, %v2420_v18  ;;  %v4612_v41 = vrot.slane %v3660_v22, 7  ;;  %v2520_v22 = vunpack.i.h.bf16 %v3810_v15 }
 0x101   : > { %1937 = vmatpush.bf16.msra.mxu0 %v2210_v34  ;;  %2230 = vmatpush.bf16.msra.mxu2 %v2210_v34  ;;  %v3916_v34 = vpack.i.bf16 %v1284_v28, %v1285_v55  ;;  %v1044_v23 = vsel %vm1042_vm9, %v1035_v13, %v2440_v49  ;;  %v2470_v55 = vunpack.i.h.bf16 %v3805_v5  ;;  %v2499_v13 = vunpack.i.l.bf16 %v3869_v32 }
 0x102   : > { %2722 = vrot.lane.b32.xlu1 %v3876_v45, %s2980_s11  ;;  %v2746_v57 = vpack.i.bf16 %v4612_v41, %v4611_v8  ;;  %v1053_v5 = vsel %vm1051_vm10, %v1044_v23, %v2460_v53  ;;  %v2500_v41 = vunpack.i.h.bf16 %v3869_v32  ;;  %v2519_v18 = vunpack.i.l.bf16 %v3810_v15 }
 0x104   : > { %2727 = vrot.lane.b32.xlu2 %v3884_v43, %s2980_s11  ;;  %v3898_v42 = vpop.permute.xlu1 %2512 }
 0x106   : > { %2717 = vrot.lane.b32.xlu0 %v3888_v51, %s2980_s11  ;;  %v3902_v2 = vpop.permute.xlu2 %2562 }
 0x108   : > { %v3909_v60 = vpop.permute.xlu0 %2507 }
 0x10a   : > { %2737 = vrot.lane.b32.xlu1 %v2736_v52, %s2981_s12  ;;  %v2449_v52 = vunpack.i.l.bf16 %v3781_v0  ;;  %v2479_v0 = vunpack.i.l.bf16 %v3851_v25 }
 0x10c   : > { %2742 = vrot.lane.b32.xlu2 %v2741_v17, %s2981_s12  ;;  %v3922_v12 = vpop.permute.xlu1 %2527  ;;  %v1043_v17 = vsel %vm1042_vm9, %v1034_v6, %v2439_v16  ;;  %v2489_v16 = vunpack.i.l.bf16 %v3737_v30  ;;  %v1047_v8 = vsel %vm1042_vm9, %v3665_v10, %v2449_v52  ;;  %v2465_v10 = vunpack.i.h.bf16 %v3821_v3 }
 0x10d   : > { %v1052_v49 = vsel %vm1051_vm10, %v1043_v17, %v2459_v62  ;;  %v1048_v62 = vsel %vm1042_vm9, %v3668_v63, %v2450_v4  ;;  %v2480_v17 = vunpack.i.h.bf16 %v3851_v25  ;;  %v1056_v53 = vsel %vm1051_vm10, %v1047_v8, %v2469_v39 }
 0x10e   : > { %2732 = vrot.lane.b32.xlu0 %v3916_v34, %s2980_s11  ;;  %v3927_v9 = vpop.permute.xlu2 %2577  ;;  %v1057_v23 = vsel %vm1051_vm10, %v1048_v62, %v2470_v55  ;;  %v1061_v63 = vsel %vm1060_vm11, %v1052_v49, %v2479_v0  ;;  %v2464_v25 = vunpack.i.l.bf16 %v3821_v3  ;;  %v2485_v4 = vunpack.i.h.bf16 %v3837_v24 }
 0x10f   : > { %v1070_v52 = vsel %vm1069_vm12, %v1061_v63, %v2499_v13  ;;  %v2484_v55 = vunpack.i.l.bf16 %v3837_v24  ;;  %v2535_v39 = vunpack.i.h.bf16 %v3842_v27  ;;  %v2494_v8 = vunpack.i.l.bf16 %v3882_v40 }
 0x110   : > { %v3936_v28 = vpop.permute.xlu0 %2522  ;;  %v2534_v3 = vunpack.i.l.bf16 %v3842_v27  ;;  %v2495_v49 = vunpack.i.h.bf16 %v3882_v40  ;;  %v1079_v13 = vsel %vm1078_vm13, %v1070_v52, %v2519_v18  ;;  %v2515_v24 = vunpack.i.h.bf16 %v3898_v42 }
 0x111   : > { %v1067_v40 = vsel %vm1060_vm11, %v3787_v46, %v2494_v8 }
 0x112   : > { %2752 = vrot.lane.b32.xlu1 %v3796_v20, %s2982_s14 }
 0x114   : > { %2757 = vrot.lane.b32.xlu2 %v3771_v58, %s2982_s14  ;;  %v3958_v54 = vpop.permute.xlu1 %2542 }
 0x116   : > { %2747 = vrot.lane.b32.xlu0 %v2746_v57, %s2981_s12  ;;  %v3970_v6 = vpop.permute.xlu2 %2592  ;;  %v1062_v57 = vsel %vm1060_vm11, %v1053_v5, %v2480_v17  ;;  %v2514_v5 = vunpack.i.l.bf16 %v3898_v42  ;;  %v2580_v17 = vunpack.i.h.bf16 %v3927_v9 }
 0x117   : > { %v1071_v15 = vsel %vm1069_vm12, %v1062_v57, %v2500_v41  ;;  %v2579_v41 = vunpack.i.l.bf16 %v3927_v9 }
 0x118   : > { %v2538_v32 = vpop.permute.xlu0 %2537 }
 0x119   : > { %v2540_v62 = vunpack.i.h.bf16 %v2538_v32  ;;  %v2539_v0 = vunpack.i.l.bf16 %v2538_v32  ;;  %v1080_v32 = vsel %vm1078_vm13, %v1071_v15, %v2520_v22  ;;  %v1076_v15 = vsel %vm1069_vm12, %v1067_v40, %v2514_v5 }
 0x11a   : > { %2767 = vrot.lane.b32.xlu1 %v3888_v51, %s2983_s17 }
 0x11b   : > { %v1088_v18 = vsel %vm1087_vm14, %v1079_v13, %v2539_v0  ;;  %v1089_v42 = vsel %vm1087_vm14, %v1080_v32, %v2540_v62  ;;  %v1054_v13 = vsel %vm1051_vm10, %v3712_v26, %v2464_v25 }
 0x11c   : > { %2772 = vrot.lane.b32.xlu2 %v3694_v14, %s2984_s30  ;;  %v2558_v63 = vpop.permute.xlu1 %2557  ;;  %v1068_v14 = vsel %vm1060_vm11, %v3790_v50, %v2495_v49  ;;  %v1065_v50 = vsel %vm1060_vm11, %v1056_v53, %v2489_v16  ;;  %v4613_v49 = vunpack.i.h.bf16 %v3737_v30  ;;  %v2510_v16 = vunpack.i.h.bf16 %v3909_v60 }
 0x11d   : > { %v2560_v27 = vunpack.i.h.bf16 %v2558_v63  ;;  %v2559_v57 = vunpack.i.l.bf16 %v2558_v63  ;;  %v1077_v46 = vsel %vm1069_vm12, %v1068_v14, %v2515_v24  ;;  %v1055_v63 = vsel %vm1051_vm10, %v3715_v7, %v2465_v10 }
 0x11e   : > { %2762 = vrot.lane.b32.xlu0 %v3853_v11, %s2983_s17  ;;  %v4002_v9 = vpop.permute.xlu2 %2607  ;;  %v1066_v5 = vsel %vm1060_vm11, %v1057_v23, %v4613_v49  ;;  %v1064_v26 = vsel %vm1060_vm11, %v1055_v63, %v2485_v4  ;;  %v1085_v7 = vsel %vm1078_vm13, %v1076_v15, %v2534_v3  ;;  %v1086_v10 = vsel %vm1078_vm13, %v1077_v46, %v2535_v39 }
 0x11f   : > { %v1097_v22 = vsel %vm1096_vm15, %v1088_v18, %v2559_v57  ;;  %v1098_v52 = vsel %vm1096_vm15, %v1089_v42, %v2560_v27  ;;  %v2509_v30 = vunpack.i.l.bf16 %v3909_v60  ;;  %v2595_v53 = vunpack.i.h.bf16 %v3970_v6 }
 0x120   : > { %v2553_v8 = vpop.permute.xlu0 %2552  ;;  %v1106_v0 = vsel %vm1105_vm1, %v1097_v22, %v2579_v41  ;;  %v1107_v62 = vsel %vm1105_vm1, %v1098_v52, %v2580_v17  ;;  %v1063_v41 = vsel %vm1060_vm11, %v1054_v13, %v2484_v55  ;;  %v2594_v23 = vunpack.i.l.bf16 %v3970_v6 }
 0x121   : > { %v2555_v24 = vunpack.i.h.bf16 %v2553_v8  ;;  %v2554_v32 = vunpack.i.l.bf16 %v2553_v8  ;;  %v1794_v17 = vpack.c.bf16 %v1107_v62, %v1106_v0  ;;  %v2530_v55 = vunpack.i.h.bf16 %v3922_v12 }
 0x122   : > { %2782 = vrot.lane.b32.xlu1 %v3784_v59, %s2985_s6  ;;  %v2529_v4 = vunpack.i.l.bf16 %v3922_v12  ;;  %v2550_v39 = vunpack.i.h.bf16 %v3874_v33  ;;  %v1074_v12 = vsel %vm1069_vm12, %v1065_v50, %v2509_v30  ;;  %v1075_v42 = vsel %vm1069_vm12, %v1066_v5, %v2510_v16 }
 0x123   : > { %1938 = vmatmul.bf16.vlgmr.msra.gmra.mxu0 %v1794_v17  ;;  %v1094_v57 = vsel %vm1087_vm14, %v1085_v7, %v2554_v32  ;;  %v1095_v60 = vsel %vm1087_vm14, %v1086_v10, %v2555_v24  ;;  %v1084_v15 = vsel %vm1078_vm13, %v1075_v42, %v2530_v55  ;;  %v2524_v46 = vunpack.i.l.bf16 %v3936_v28 }
 0x124   : > { %2787 = vrot.lane.b32.xlu2 %v3888_v51, %s2986_s7  ;;  %v2573_v25 = vpop.permute.xlu1 %2572  ;;  %v2549_v51 = vunpack.i.l.bf16 %v3874_v33  ;;  %v2525_v33 = vunpack.i.h.bf16 %v3936_v28  ;;  %v4614_v13 = vunpack.i.l.bf16 %v3766_v44  ;;  %v2545_v50 = vunpack.i.h.bf16 %v3958_v54 }
 0x125   : > { %v2575_v3 = vunpack.i.h.bf16 %v2573_v25  ;;  %v2574_v27 = vunpack.i.l.bf16 %v2573_v25  ;;  %v2544_v49 = vunpack.i.l.bf16 %v3958_v54  ;;  %v2565_v5 = vunpack.i.h.bf16 %v3902_v2 }
 0x126   : > { %2777 = vrot.lane.b32.xlu0 %v3771_v58, %s2985_s6  ;;  %v4041_v6 = vpop.permute.xlu2 %2622  ;;  %v1083_v58 = vsel %vm1078_vm13, %v1074_v12, %v2529_v4  ;;  %v1072_v63 = vsel %vm1069_vm12, %v1063_v41, %v4614_v13  ;;  %v2564_v28 = vunpack.i.l.bf16 %v3902_v2  ;;  %v4615_v24 = vunpack.i.h.bf16 %v3766_v44 }
 0x127   : > { %v1103_v40 = vsel %vm1096_vm15, %v1094_v57, %v2574_v27  ;;  %v1104_v18 = vsel %vm1096_vm15, %v1095_v60, %v2575_v3  ;;  %v1092_v17 = vsel %vm1087_vm14, %v1083_v58, %v2549_v51  ;;  %v1093_v10 = vsel %vm1087_vm14, %v1084_v15, %v2550_v39 }
 0x128   : > { %v2568_v14 = vpop.permute.xlu0 %2567  ;;  %v4049_v22 = vsel %vm1105_vm1, %v1103_v40, %v2594_v23  ;;  %v4052_v52 = vsel %vm1105_vm1, %v1104_v18, %v2595_v53  ;;  %v1073_v32 = vsel %vm1069_vm12, %v1064_v26, %v4615_v24  ;;  %v1081_v54 = vsel %vm1078_vm13, %v1072_v63, %v2524_v46  ;;  %v440_v40 = vld [vmem:[%s3583_s27 + $0x40] sm:$0xf] }
 0x129   : > { %v2570_v8 = vunpack.i.h.bf16 %v2568_v14  ;;  %v2569_v0 = vunpack.i.l.bf16 %v2568_v14  ;;  %v1800_v62 = vpack.c.bf16 %v4052_v52, %v4049_v22  ;;  %v1082_v16 = vsel %vm1078_vm13, %v1073_v32, %v2525_v33 }
 0x12a   : > { %2797 = vrot.lane.b32.xlu1 %v3784_v59, %s2982_s14  ;;  %v1090_v30 = vsel %vm1087_vm14, %v1081_v54, %v2544_v49  ;;  %v1091_v53 = vsel %vm1087_vm14, %v1082_v16, %v2545_v50  ;;  %v4099_v33 = vunpack.c.l.bf16 %v440_v40  ;;  %v442_v54 = vld [vmem:[%s3583_s27 + $0x48] sm:$0xf]  ;;  %v2624_v16 = vunpack.i.l.bf16 %v4041_v6 }
 0x12b   : > { %v1101_v2 = vsel %vm1096_vm15, %v1092_v17, %v2569_v0  ;;  %v1102_v26 = vsel %vm1096_vm15, %v1093_v10, %v2570_v8  ;;  %v1099_v39 = vsel %vm1096_vm15, %v1090_v30, %v2564_v28  ;;  %v1100_v57 = vsel %vm1096_vm15, %v1091_v53, %v2565_v5  ;;  %v441_v5 = vld [vmem:[%s3583_s27 + $0x44] sm:$0x1] }
 0x12c   : > { %2802 = vrot.lane.b32.xlu2 %v3827_v61, %s2982_s14  ;;  %v2588_v59 = vpop.permute.xlu1 %2587  ;;  %v1335_v49 = vrot.slane %v4099_v33, 7  ;;  %v2610_v30 = vunpack.i.h.bf16 %v4002_v9  ;;  %v2609_v52 = vunpack.i.l.bf16 %v4002_v9  ;;  %v1596_v9 = vsel %vm979_vm2, %v3280_v36, %v2624_v16  ;;  %v4622_v16 = vld [vmem:[#allocation2_spill] sm:$0xff] }
 0x12d   : > { %v2590_v7 = vunpack.i.h.bf16 %v2588_v59  ;;  %v2589_v41 = vunpack.i.l.bf16 %v2588_v59  ;;  %v461_v59 = vunpack.c.l.bf16 %v441_v5 }
 0x12e   : > { %2792 = vrot.lane.b32.xlu0 %v3876_v45, %s2986_s7  ;;  %v2638_v44 = vpop.permute.xlu2 %2637 }
 0x12f   : > { %v1110_v23 = vsel %vm1105_vm1, %v1101_v2, %v2589_v41  ;;  %v1111_v25 = vsel %vm1105_vm1, %v1102_v26, %v2590_v7  ;;  %v2640_v18 = vunpack.i.h.bf16 %v2638_v44  ;;  %v1409_v7 = vrot.slane %v4099_v33, 1 }
 0x130   : > { %v2583_v55 = vpop.permute.xlu0 %2582  ;;  %v1798_v4 = vpack.c.bf16 %v1111_v25, %v1110_v23  ;;  %v1410_v41 = vrot.slane %v461_v59, 1  ;;  %v462_v23 = vunpack.c.l.bf16 %v442_v54 }
 0x131   : > { %v2585_v3 = vunpack.i.h.bf16 %v2583_v55  ;;  %v2584_v27 = vunpack.i.l.bf16 %v2583_v55 }
 0x132   : > { %2812 = vrot.lane.b32.xlu1 %v3884_v43, %s2983_s17  ;;  %1948 = vmatmul.bf16.vlgmr.msra.gmra.mxu2 %v1798_v4  ;;  %v1411_v26 = vsel %vm480_vm0, %v1409_v7, %v1410_v41 }
 0x133   : > { %v1108_v60 = vsel %vm1105_vm1, %v1099_v39, %v2584_v27  ;;  %v1109_v51 = vsel %vm1105_vm1, %v1100_v57, %v2585_v3  ;;  %v4160_v4 = vpack.i.bf16 %v1410_v41, %v1411_v26 }
 0x134   : > { %2817 = vrot.lane.b32.xlu2 %v3709_v48, %s2984_s30  ;;  %v1796_v12 = vpack.c.bf16 %v1109_v51, %v1108_v60  ;;  %v2603_v42 = vpop.permute.xlu1 %2602  ;;  %v2639_v48 = vunpack.i.l.bf16 %v2638_v44  ;;  %v2851_v51 = vpack.i.bf16 %v461_v59, %v4099_v33 }
 0x135   : > { %v2605_v14 = vunpack.i.h.bf16 %v2603_v42  ;;  %v2604_v58 = vunpack.i.l.bf16 %v2603_v42 }
 0x136   : > { %2807 = vrot.lane.b32.xlu0 %v3876_v45, %s2983_s17  ;;  %1943 = vmatmul.bf16.gmra.mxu0 %v1796_v12  ;;  %v4097_v15 = vpop.permute.xlu2 %2652  ;;  %v4618_v12 = vld [vmem:[#allocation8_spill] sm:$0xff] }
 0x137   : > { %v1589_v46 = vsel %vm979_vm2, %v3273_v1, %v2605_v14  ;;  %v1588_v8 = vsel %vm979_vm2, %v3284_v38, %v2604_v58  ;;  %v2655_v10 = vunpack.i.h.bf16 %v4097_v15  ;;  %v2654_v25 = vunpack.i.l.bf16 %v4097_v15 }
 0x138   : > { %v2598_v0 = vpop.permute.xlu0 %2597  ;;  %v4106_v13 = vsel %vm988_vm3, %v1588_v8, %v2640_v18  ;;  %v4109_v63 = vsel %vm988_vm3, %v1589_v46, %v2640_v18 }
 0x139   : > { %v2600_v45 = vunpack.i.h.bf16 %v2598_v0  ;;  %v2599_v50 = vunpack.i.l.bf16 %v2598_v0  ;;  %v4619_v0 = vld [vmem:[#allocation7_spill] sm:$0xff] }
 0x13a   : > { %2827 = vrot.lane.b32.xlu1 %v3815_v29, %s2985_s6 }
 0x13b   : > { %v1587_v1 = vsel %vm979_vm2, %v3271_v35, %v2600_v45  ;;  %v1586_v38 = vsel %vm979_vm2, %v3282_v37, %v2599_v50  ;;  %v4616_v35 = vrot.slane %v3662_v47, 7  ;;  %v4620_v50 = vld [vmem:[#allocation4_spill] sm:$0xff] }
 0x13c   : > { %2832 = vrot.lane.b32.xlu2 %v3884_v43, %s2986_s7  ;;  %v2618_v28 = vpop.permute.xlu1 %2617  ;;  %v4122_v24 = vsel %vm988_vm3, %v1586_v38, %v2639_v48  ;;  %v4125_v32 = vsel %vm988_vm3, %v1587_v1, %v2639_v48  ;;  %v1535_v48 = vrot.slane %v462_v23, 1 }
 0x13d   : > { %v2841_v37 = vpack.i.bf16 %v1335_v49, %v4616_v35  ;;  %v2620_v57 = vunpack.i.h.bf16 %v2618_v28  ;;  %v2619_v60 = vunpack.i.l.bf16 %v2618_v28 }
 0x13e   : > { %2822 = vrot.lane.b32.xlu0 %v3827_v61, %s2985_s6  ;;  %v4129_v17 = vpop.permute.xlu2 %2667  ;;  %v2625_v61 = vunpack.i.h.bf16 %v4041_v6  ;;  %v443_v6 = vld [vmem:[%s3583_s27 + $0x4c] sm:$0x1] }
 0x13f   : > { %v463_v40 = vunpack.c.l.bf16 %v443_v6  ;;  %v1595_v45 = vsel %vm979_vm2, %v4619_v0, %v2620_v57  ;;  %v1594_v5 = vsel %vm979_vm2, %v4620_v50, %v2619_v60 }
 0x140   : > { %v4135_v43 = vpop.permute.xlu0 %2612 }
 0x141   : > { %v2615_v1 = vunpack.i.h.bf16 %v4135_v43  ;;  %v2614_v38 = vunpack.i.l.bf16 %v4135_v43  ;;  %v4621_v43 = vld [vmem:[#allocation5_spill] sm:$0xff] }
 0x142   : > { %2842 = vrot.lane.b32.xlu1 %v2841_v37, %s2981_s12  ;;  %1953 = vmatmul.bf16.gmra.mxu2 %v1800_v62  ;;  %v4617_v62 = vunpack.c.l.bf16 %v3578_v56  ;;  %v1597_v56 = vsel %vm979_vm2, %v3356_v19, %v2625_v61  ;;  %v1461_v19 = vrot.slane %v462_v23, 7  ;;  %v2876_v61 = vpack.i.bf16 %v463_v40, %v462_v23 }
 0x143   : > { %v1591_v54 = vsel %vm979_vm2, %v4621_v43, %v2610_v30 }
 0x144   : > { %2847 = vrot.lane.b32.xlu2 %v3815_v29, %s2982_s14  ;;  %v2633_v47 = vpop.permute.xlu1 %2632  ;;  %v2866_v6 = vpack.i.bf16 %v1461_v19, %v1335_v49 }
 0x145   : > { %v2635_v44 = vunpack.i.h.bf16 %v2633_v47  ;;  %v2634_v2 = vunpack.i.l.bf16 %v2633_v47 }
 0x146   : > { %2837 = vrot.lane.b32.xlu0 %v3916_v34, %s2986_s7  ;;  %v2683_v22 = vpop.permute.xlu2 %2682 }
 0x147   : > { %v1601_v29 = vsel %vm979_vm2, %v4617_v62, %v2635_v44  ;;  %v1600_v53 = vsel %vm979_vm2, %v3550_v21, %v2634_v2  ;;  %v2685_v14 = vunpack.i.h.bf16 %v2683_v22  ;;  %v2684_v58 = vunpack.i.l.bf16 %v2683_v22  ;;  %v4623_v22 = vld [vmem:[#allocation6_spill] sm:$0xff] }
 0x148   : > { %v2628_v55 = vpop.permute.xlu0 %2627  ;;  %v4163_v3 = vsel %vm988_vm3, %v1600_v53, %v2655_v10  ;;  %v4166_v27 = vsel %vm988_vm3, %v1601_v29, %v2655_v10  ;;  %v1590_v44 = vsel %vm979_vm2, %v4622_v16, %v2609_v52  ;;  %v1593_v62 = vsel %vm979_vm2, %v4623_v22, %v2615_v1  ;;  %v4624_v29 = vld [vmem:[#allocation3_spill] sm:$0xff] }
 0x149   : > { %v2630_v21 = vunpack.i.h.bf16 %v2628_v55  ;;  %v2629_v39 = vunpack.i.l.bf16 %v2628_v55  ;;  %v1592_v53 = vsel %vm979_vm2, %v4624_v29, %v2614_v38 }
 0x14a   : > { %2857 = vrot.lane.b32.xlu1 %v3916_v34, %s2983_s17 }
 0x14b   : > { %v1599_v18 = vsel %vm979_vm2, %v3448_v31, %v2630_v21  ;;  %v1598_v42 = vsel %vm979_vm2, %v4618_v12, %v2629_v39  ;;  %v1536_v31 = vrot.slane %v463_v40, 1 }
 0x14c   : > { %2862 = vrot.lane.b32.xlu2 %v4160_v4, %s2983_s17  ;;  %v2648_v36 = vpop.permute.xlu1 %2647  ;;  %v4182_v15 = vsel %vm988_vm3, %v1598_v42, %v2654_v25  ;;  %v4185_v34 = vsel %vm988_vm3, %v1599_v18, %v2654_v25 }
 0x14d   : > { %v2650_v46 = vunpack.i.h.bf16 %v2648_v36  ;;  %v2649_v8 = vunpack.i.l.bf16 %v2648_v36  ;;  %v1537_v23 = vsel %vm480_vm0, %v1535_v48, %v1536_v31 }
 0x14e   : > { %2852 = vrot.lane.b32.xlu0 %v2851_v51, %s2982_s14  ;;  %v2698_v28 = vpop.permute.xlu2 %2697  ;;  %v2886_v21 = vpack.i.bf16 %v1536_v31, %v1537_v23  ;;  %v4626_v31 = vld [vmem:[#allocation13_spill] sm:$0xff] }
 0x14f   : > { %v1610_v59 = vsel %vm988_vm3, %v1594_v5, %v2649_v8  ;;  %v1611_v35 = vsel %vm988_vm3, %v1595_v45, %v2649_v8  ;;  %v1612_v37 = vsel %vm988_vm3, %v1596_v9, %v2650_v46  ;;  %v1613_v7 = vsel %vm988_vm3, %v1597_v56, %v2650_v46  ;;  %v4627_v45 = vld [vmem:[#allocation12_spill] sm:$0xff] }
 0x150   : > { %v2643_v41 = vpop.permute.xlu0 %2642  ;;  %v4199_v10 = vsel %vm997_vm4, %v1612_v37, %v2684_v58  ;;  %v4202_v47 = vsel %vm997_vm4, %v1613_v7, %v2685_v14  ;;  %v2700_v60 = vunpack.i.h.bf16 %v2698_v28  ;;  %v4625_v14 = vld [vmem:[#allocation10_spill] sm:$0xff] }
 0x151   : > { %v2645_v2 = vunpack.i.h.bf16 %v2643_v41  ;;  %v2644_v26 = vunpack.i.l.bf16 %v2643_v41 }
 0x152   : > { %2872 = vrot.lane.b32.xlu1 %v2851_v51, %s2985_s6  ;;  %v2699_v51 = vunpack.i.l.bf16 %v2698_v28 }
 0x153   : > { %v4217_v30 = vsel %vm988_vm3, %v1590_v44, %v2644_v26  ;;  %v4220_v52 = vsel %vm988_vm3, %v1591_v54, %v2644_v26  ;;  %v4223_v25 = vsel %vm988_vm3, %v1592_v53, %v2645_v2  ;;  %v4226_v55 = vsel %vm988_vm3, %v1593_v62, %v2645_v2 }
 0x154   : > { %2877 = vrot.lane.b32.xlu2 %v2876_v61, %s2985_s6  ;;  %v2663_v56 = vpop.permute.xlu1 %2662  ;;  %vm1926_vm3 = vcmask 1043456  }
 0x155   : > { %v2665_v9 = vunpack.i.h.bf16 %v2663_v56  ;;  %v2664_v33 = vunpack.i.l.bf16 %v2663_v56  ;;  %v2221_v56 = vld [vmem:[%s4562_s3 + $0x58] sm:$0xff] }
 0x156   : > { %2867 = vrot.lane.b32.xlu0 %v2866_v6, %s2984_s30  ;;  %v4230_v49 = vpop.permute.xlu2 %2712  ;;  %v2222_v6 = vld [vmem:[%s4562_s3 + $0x60] sm:$0xff] }
 0x157   : > { %v1620_v39 = vsel %vm997_vm4, %v4106_v13, %v2664_v33  ;;  %v1621_v57 = vsel %vm997_vm4, %v4109_v63, %v2665_v9  ;;  %v2220_v33 = vld [vmem:[%s4562_s3 + $0x50] sm:$0xff] }
 0x158   : > { %v2658_v40 = vpop.permute.xlu0 %2657 }
 0x159   : > { %v2660_v18 = vunpack.i.h.bf16 %v2658_v40  ;;  %v2659_v12 = vunpack.i.l.bf16 %v2658_v40 }
 0x15a   : > { %2887 = vrot.lane.b32.xlu1 %v2886_v21, %s2986_s7 }
 0x15b   : > { %v1618_v42 = vsel %vm997_vm4, %v4122_v24, %v2659_v12  ;;  %v1619_v19 = vsel %vm997_vm4, %v4125_v32, %v2660_v18 }
 0x15c   : > { %2892 = vrot.lane.b32.xlu2 %v4625_v14, %s2982_s14  ;;  %v2678_v13 = vpop.permute.xlu1 %2677  ;;  %v1634_v58 = vsel %vm1006_vm5, %v1618_v42, %v2699_v51  ;;  %v1635_v63 = vsel %vm1006_vm5, %v1619_v19, %v2700_v60  ;;  %v2219_v42 = vld [vmem:[%s4562_s3 + $0x48] sm:$0xff] }
 0x15d   : > { %v2680_v36 = vunpack.i.h.bf16 %v2678_v13  ;;  %v2679_v46 = vunpack.i.l.bf16 %v2678_v13 }
 0x15e   : > { %2882 = vrot.lane.b32.xlu0 %v4160_v4, %s2986_s7  ;;  %v2728_v32 = vpop.permute.xlu2 %2727  ;;  %v4628_v4 = vld [vmem:[#allocation11_spill] sm:$0xff] }
 0x15f   : > { %v4248_v8 = vsel %vm997_vm4, %v1610_v59, %v2679_v46  ;;  %v4251_v24 = vsel %vm997_vm4, %v1611_v35, %v2680_v36  ;;  %v2730_v28 = vunpack.i.h.bf16 %v2728_v32  ;;  %v2729_v59 = vunpack.i.l.bf16 %v2728_v32  ;;  %v2218_v36 = vld [vmem:[%s4562_s3 + $0x40] sm:$0xff] }
 0x160   : > { %v4253_v48 = vpop.permute.xlu0 %2672 }
 0x162   : > { %2902 = vrot.lane.b32.xlu1 %v4626_v31, %s2983_s17 }
 0x164   : > { %v2693_v0 = vpop.permute.xlu1 %2692  ;;  %2907 = vrot.lane.b32.xlu2 %v4627_v45, %s2983_s17 }
 0x165   : > { %v2695_v50 = vunpack.i.h.bf16 %v2693_v0  ;;  %v2694_v5 = vunpack.i.l.bf16 %v2693_v0  ;;  %v2670_v0 = vunpack.i.h.bf16 %v4129_v17 }
 0x166   : > { %2897 = vrot.lane.b32.xlu0 %v4628_v4, %s2982_s14  ;;  %v4265_v37 = vpop.permute.xlu2 %2742  ;;  %s4519_s14 = scalar_lea.vmem %s4564_s5, %s2151_s15 }
 0x167   : > { %v1632_v1 = vsel %vm997_vm4, %v4163_v3, %v2694_v5  ;;  %v1633_v38 = vsel %vm997_vm4, %v4166_v27, %v2695_v50  ;;  %v1828_v27 = vld [vmem:[%s4562_s3 + $0x68] sm:$0xf] }
 0x168   : > { %v2688_v35 = vpop.permute.xlu0 %2687  ;;  %v1886_v44 = vunpack.c.l.b16 %v1828_v27  ;;  %v2675_v27 = vunpack.i.h.bf16 %v4253_v48 }
 0x169   : > { %v2690_v7 = vunpack.i.h.bf16 %v2688_v35  ;;  %v2689_v41 = vunpack.i.l.bf16 %v2688_v35 }
 0x16a   : > { %2917 = vrot.lane.b32.xlu1 %v4628_v4, %s2985_s6  ;;  %v1900_v2 = vpack.c.b16 %v1886_v44, %v1886_v44 }
 0x16b   : > { %v1630_v61 = vsel %vm997_vm4, %v4182_v15, %v2689_v41  ;;  %v1631_v43 = vsel %vm997_vm4, %v4185_v34, %v2690_v7  ;;  %v4629_v15 = vld [vmem:[#allocation9_spill] sm:$0xff] }
 0x16c   : > { %v4273_v3 = vpop.permute.xlu1 %2707  ;;  %2922 = vrot.lane.b32.xlu2 %v3796_v20, %s2985_s6  ;;  %v4281_v54 = vsel %vm1006_vm5, %v1630_v61, %v2729_v59  ;;  %v4284_v16 = vsel %vm1006_vm5, %v1631_v43, %v2730_v28  ;;  %v1928_v20 = vsel %vm1926_vm3, %v1900_v2, 0  ;;  %v1623_v59 = vsel %vm997_vm4, %v4220_v52, %v2670_v0 }
 0x16d   : > { %2231 = vmatpush.bf16.msra.mxu3 %v1928_v20  ;;  %1961 = vmatpush.bf16.msra.mxu1 %v1928_v20  ;;  %v2710_v50 = vunpack.i.h.bf16 %v4273_v3  ;;  %v2709_v5 = vunpack.i.l.bf16 %v4273_v3  ;;  %v2715_v20 = vunpack.i.h.bf16 %v4230_v49 }
 0x16e   : > { %2912 = vrot.lane.b32.xlu0 %v4629_v15, %s2984_s30  ;;  %v4290_v62 = vpop.permute.xlu2 %2757  ;;  %v2714_v15 = vunpack.i.l.bf16 %v4230_v49 }
 0x170   : > { %v2703_v34 = vpop.permute.xlu0 %2702 }
 0x171   : > { %v2705_v26 = vunpack.i.h.bf16 %v2703_v34  ;;  %v2704_v22 = vunpack.i.l.bf16 %v2703_v34  ;;  %2232 = vmatpush.bf16.msra.mxu3 %v2222_v6  ;;  %1962 = vmatpush.bf16.msra.mxu1 %v2222_v6  ;;  %v1625_v6 = vsel %vm997_vm4, %v4226_v55, %v2675_v27 }
 0x172   : > { %2932 = vrot.lane.b32.xlu1 %v3853_v11, %s2986_s7 }
 0x173   : > { %v1637_v29 = vsel %vm1006_vm5, %v1621_v57, %v2705_v26  ;;  %v1636_v53 = vsel %vm1006_vm5, %v1620_v39, %v2704_v22 }
 0x174   : > { %v4297_v23 = vpop.permute.xlu1 %2722 }
 0x175   : > { %2233 = vmatpush.bf16.msra.mxu3 %v2221_v56  ;;  %1963 = vmatpush.bf16.msra.mxu1 %v2221_v56  ;;  %v2759_v56 = vunpack.i.l.bf16 %v4290_v62 }
 0x176   : > { %2927 = vrot.lane.b32.xlu0 %v4627_v45, %s2986_s7  ;;  %v4309_v21 = vpop.permute.xlu2 %2772  ;;  %v2669_v45 = vunpack.i.l.bf16 %v4129_v17  ;;  %v1639_v17 = vsel %vm1006_vm5, %v1623_v59, %v2710_v50 }
 0x177   : > { %v2774_v2 = vunpack.i.l.bf16 %v4309_v21 }
 0x178   : > { %v4301_v11 = vpop.permute.xlu0 %2717  ;;  %v1622_v28 = vsel %vm997_vm4, %v4217_v30, %v2669_v45 }
 0x179   : > { %2234 = vmatpush.bf16.msra.mxu3 %v2220_v33  ;;  %1964 = vmatpush.bf16.msra.mxu1 %v2220_v33  ;;  %v1638_v7 = vsel %vm1006_vm5, %v1622_v28, %v2709_v5 }
 0x17c   : > { %v2738_v9 = vpop.permute.xlu1 %2737 }
 0x17d   : > { %v2740_v39 = vunpack.i.h.bf16 %v2738_v9  ;;  %v2739_v57 = vunpack.i.l.bf16 %v2738_v9  ;;  %2235 = vmatpush.bf16.msra.mxu3 %v2219_v42  ;;  %1965 = vmatpush.bf16.msra.mxu1 %v2219_v42 }
 0x17e   : > { %v2788_v46 = vpop.permute.xlu2 %2787 }
 0x17f   : > { %v4312_v60 = vsel %vm1015_vm6, %v1634_v58, %v2739_v57  ;;  %v4315_v51 = vsel %vm1015_vm6, %v1635_v63, %v2739_v57  ;;  %v4318_v40 = vsel %vm1015_vm6, %v1636_v53, %v2740_v39  ;;  %v4321_v18 = vsel %vm1015_vm6, %v1637_v29, %v2740_v39 }
 0x180   : > { %v2733_v12 = vpop.permute.xlu0 %2732  ;;  %v2789_v9 = vunpack.i.l.bf16 %v2788_v46  ;;  %v2760_v57 = vunpack.i.h.bf16 %v4290_v62 }
 0x181   : > { %v2735_v19 = vunpack.i.h.bf16 %v2733_v12  ;;  %v2734_v14 = vunpack.i.l.bf16 %v2733_v12  ;;  %2236 = vmatpush.bf16.msra.mxu3 %v2218_v36  ;;  %1966 = vmatpush.bf16.msra.mxu1 %v2218_v36 }
 0x183   : > { %v4327_v13 = vsel %vm1006_vm5, %v1633_v38, %v2735_v19  ;;  %v4330_v58 = vsel %vm1006_vm5, %v1632_v1, %v2734_v14  ;;  %v2674_v1 = vunpack.i.l.bf16 %v4253_v48  ;;  %v2744_v38 = vunpack.i.l.bf16 %v4265_v37 }
 0x184   : > { %v2753_v63 = vpop.permute.xlu1 %2752  ;;  %v2745_v48 = vunpack.i.h.bf16 %v4265_v37 }
 0x185   : > { %v2755_v41 = vunpack.i.h.bf16 %v2753_v63  ;;  %v2754_v61 = vunpack.i.l.bf16 %v2753_v63  ;;  %v1654_v30 = vsel %vm1015_vm6, %v1638_v7, %v2744_v38  ;;  %v1655_v34 = vsel %vm1015_vm6, %v1639_v17, %v2744_v38 }
 0x186   : > { %v4347_v35 = vpop.permute.xlu2 %2802  ;;  %v1624_v52 = vsel %vm997_vm4, %v4223_v25, %v2674_v1  ;;  %v2790_v25 = vunpack.i.h.bf16 %v2788_v46  ;;  %v1641_v63 = vsel %vm1006_vm5, %v1625_v6, %v2715_v20  ;;  %v2775_v1 = vunpack.i.h.bf16 %v4309_v21 }
 0x187   : > { %v1670_v26 = vsel %vm1024_vm7, %v1654_v30, %v2754_v61  ;;  %v1671_v22 = vsel %vm1024_vm7, %v1655_v34, %v2755_v41  ;;  %v1640_v39 = vsel %vm1006_vm5, %v1624_v52, %v2714_v15  ;;  %v1657_v62 = vsel %vm1015_vm6, %v1641_v63, %v2745_v48  ;;  %v4388_v61 = vld [vmem:[%s4563_s4] ss:$0 sm:$0xff] }
 0x188   : > { %v4335_v32 = vpop.permute.xlu0 %2747  ;;  %v1656_v55 = vsel %vm1015_vm6, %v1640_v39, %v2745_v48 }
 0x189   : > { %v1672_v45 = vsel %vm1024_vm7, %v1656_v55, %v2759_v56  ;;  %v2720_v56 = vunpack.i.h.bf16 %v4301_v11  ;;  %v2749_v39 = vunpack.i.l.bf16 %v4335_v32 }
 0x18c   : > { %v2768_v31 = vpop.permute.xlu1 %2767 }
 0x18d   : > { %v2770_v42 = vunpack.i.h.bf16 %v2768_v31  ;;  %v2769_v37 = vunpack.i.l.bf16 %v2768_v31 }
 0x18e   : > { %v4373_v36 = vpop.permute.xlu2 %2817 }
 0x18f   : > { %v1688_v59 = vsel %vm1033_vm8, %v1672_v45, %v2769_v37  ;;  %v2725_v37 = vunpack.i.h.bf16 %v4297_v23 }
 0x190   : > { %v2763_v4 = vpop.permute.xlu0 %2762  ;;  %v1704_v27 = vsel %vm1042_vm9, %v1688_v59, %v2775_v1 }
 0x191   : > { %v2765_v43 = vunpack.i.h.bf16 %v2763_v4  ;;  %v2764_v3 = vunpack.i.l.bf16 %v2763_v4  ;;  %v1673_v4 = vsel %vm1024_vm7, %v1657_v62, %v2760_v57 }
 0x192   : > { %v1689_v7 = vsel %vm1033_vm8, %v1673_v4, %v2770_v42 }
 0x193   : > { %v1686_v29 = vsel %vm1033_vm8, %v1670_v26, %v2764_v3  ;;  %v1687_v53 = vsel %vm1033_vm8, %v1671_v22, %v2765_v43  ;;  %v1705_v21 = vsel %vm1042_vm9, %v1689_v7, %v2775_v1  ;;  %v2805_v1 = vunpack.i.h.bf16 %v4347_v35 }
 0x194   : > { %v2783_v44 = vpop.permute.xlu1 %2782  ;;  %v1702_v19 = vsel %vm1042_vm9, %v1686_v29, %v2774_v2  ;;  %v1703_v14 = vsel %vm1042_vm9, %v1687_v53, %v2774_v2 }
 0x195   : > { %v2785_v17 = vunpack.i.h.bf16 %v2783_v44  ;;  %v2784_v41 = vunpack.i.l.bf16 %v2783_v44 }
 0x196   : > { %v2833_v53 = vpop.permute.xlu2 %2832 }
 0x197   : > { %v1720_v52 = vsel %vm1051_vm10, %v1704_v27, %v2784_v41  ;;  %v1721_v2 = vsel %vm1051_vm10, %v1705_v21, %v2785_v17  ;;  %v2834_v59 = vunpack.i.l.bf16 %v2833_v53 }
 0x198   : > { %v2778_v33 = vpop.permute.xlu0 %2777 }
 0x199   : > { %v2780_v12 = vunpack.i.h.bf16 %v2778_v33  ;;  %v2779_v49 = vunpack.i.l.bf16 %v2778_v33 }
 0x19b   : > { %v1718_v46 = vsel %vm1051_vm10, %v1702_v19, %v2779_v49  ;;  %v1719_v0 = vsel %vm1051_vm10, %v1703_v14, %v2780_v12  ;;  %v2724_v19 = vunpack.i.l.bf16 %v4297_v23 }
 0x19c   : > { %v1734_v31 = vsel %vm1060_vm11, %v1718_v46, %v2789_v9  ;;  %v1735_v50 = vsel %vm1060_vm11, %v1719_v0, %v2790_v25  ;;  %v2798_v5 = vpop.permute.xlu1 %2797  ;;  %v2719_v25 = vunpack.i.l.bf16 %v4301_v11  ;;  %v1643_v11 = vsel %vm1006_vm5, %v4251_v24, %v2720_v56 }
 0x19d   : > { %v1768_v38 = vrot.slane %v1734_v31, 1  ;;  %v1769_v28 = vrot.slane %v1735_v50, 1  ;;  %v2800_v12 = vunpack.i.h.bf16 %v2798_v5  ;;  %v2799_v49 = vunpack.i.l.bf16 %v2798_v5 }
 0x19e   : > { %v1642_v55 = vsel %vm1006_vm5, %v4248_v8, %v2719_v25  ;;  %v2750_v0 = vunpack.i.h.bf16 %v4335_v32  ;;  %v1659_v45 = vsel %vm1015_vm6, %v1643_v11, %v2749_v39  ;;  %v2819_v31 = vunpack.i.l.bf16 %v4373_v36  ;;  %v4424_v8 = vpop.permute.xlu2 %2847 }
 0x19f   : > { %v1770_v3 = vsel %vm480_vm0, %v1768_v38, %v1769_v28  ;;  %v1658_v62 = vsel %vm1015_vm6, %v1642_v55, %v2749_v39  ;;  %v1675_v23 = vsel %vm1024_vm7, %v1659_v45, %v2800_v12  ;;  %v1644_v5 = vsel %vm1006_vm5, %v4199_v10, %v2724_v19 }
 0x1a0   : > { %v2793_v43 = vpop.permute.xlu0 %2792  ;;  %v1939_v34 = vpop.f32.mrf.mxu0  ;;  %v1674_v50 = vsel %vm1024_vm7, %v1658_v62, %v2799_v49  ;;  %v1645_v24 = vsel %vm1006_vm5, %v4202_v47, %v2725_v37  ;;  %v2804_v38 = vunpack.i.l.bf16 %v4347_v35  ;;  %v2835_v28 = vunpack.i.h.bf16 %v2833_v53 }
 0x1a1   : > { %v2795_v15 = vunpack.i.h.bf16 %v2793_v43  ;;  %v2794_v30 = vunpack.i.l.bf16 %v2793_v43  ;;  %v4396_v44 = vadd.f32 %v4388_v61, %v1939_v34  ;;  %v1660_v17 = vsel %vm1015_vm6, %v1644_v5, %v2750_v0 }
 0x1a2   : > { %v1661_v47 = vsel %vm1015_vm6, %v1645_v24, %v2750_v0  ;;  %v2820_v35 = vunpack.i.h.bf16 %v4373_v36  ;;  %v1676_v34 = vsel %vm1024_vm7, %v1660_v17, %v2804_v38  ;;  %v2849_v17 = vunpack.i.l.bf16 %v4424_v8 }
 0x1a3   : > { %v1736_v26 = vsel %vm1060_vm11, %v1720_v52, %v2794_v30  ;;  %v1737_v22 = vsel %vm1060_vm11, %v1721_v2, %v2795_v15 }
 0x1a4   : > { %v1771_v20 = vrot.slane %v1736_v26, 1  ;;  %v1772_v48 = vrot.slane %v1737_v22, 1  ;;  %v2813_v29 = vpop.permute.xlu1 %2812  ;;  %v1677_v22 = vsel %vm1024_vm7, %v1661_v47, %v2805_v1 }
 0x1a5   : > { %v2814_v41 = vunpack.i.l.bf16 %v2813_v29 }
 0x1a6   : > { %v1773_v6 = vsel %vm480_vm0, %v1771_v20, %v1772_v48 }
 0x1a7   : > { %v1797_v33 = vpack.c.bf16 %v1773_v6, %v1770_v3  ;;  %v2815_v3 = vunpack.i.h.bf16 %v2813_v29  ;;  %v1692_v20 = vsel %vm1033_vm8, %v1676_v34, %v2814_v41 }
 0x1a8   : > { %v2808_v9 = vpop.permute.xlu0 %2807  ;;  %v1941_v57 = vpop.f32.mrf.mxu0  ;;  %v1708_v25 = vsel %vm1042_vm9, %v1692_v20, %v2820_v35 }
 0x1a9   : > { %2205 = vmatmul.msk.bf16.vlgmr.msra.gmra.mxu3 %vm1069_vm12, %v1797_v33  ;;  %v4406_v42 = vadd.f32 %v4388_v61, %v1941_v57  ;;  %v2810_v14 = vunpack.i.h.bf16 %v2808_v9  ;;  %v2809_v63 = vunpack.i.l.bf16 %v2808_v9  ;;  %v1693_v53 = vsel %vm1033_vm8, %v1677_v22, %v2815_v3  ;;  %v2863_v9 = vpop.permute.xlu2 %2862 }
 0x1aa   : > { %v1709_v33 = vsel %vm1042_vm9, %v1693_v53, %v2820_v35 }
 0x1ab   : > { %v1690_v32 = vsel %vm1033_vm8, %v1674_v50, %v2809_v63  ;;  %v1691_v4 = vsel %vm1033_vm8, %v1675_v23, %v2810_v14 }
 0x1ac   : > { %v2828_v46 = vpop.permute.xlu1 %2827  ;;  %v1706_v27 = vsel %vm1042_vm9, %v1690_v32, %v2819_v31  ;;  %v1707_v21 = vsel %vm1042_vm9, %v1691_v4, %v2819_v31  ;;  %v2865_v32 = vunpack.i.h.bf16 %v2863_v9  ;;  %v2864_v4 = vunpack.i.l.bf16 %v2863_v9 }
 0x1ad   : > { %v2830_v6 = vunpack.i.h.bf16 %v2828_v46  ;;  %v2829_v56 = vunpack.i.l.bf16 %v2828_v46 }
 0x1af   : > { %v1724_v49 = vsel %vm1051_vm10, %v1708_v25, %v2829_v56  ;;  %v1725_v37 = vsel %vm1051_vm10, %v1709_v33, %v2830_v6 }
 0x1b0   : > { %v2823_v7 = vpop.permute.xlu0 %2822 }
 0x1b1   : > { %v2825_v10 = vunpack.i.h.bf16 %v2823_v7  ;;  %v2824_v43 = vunpack.i.l.bf16 %v2823_v7  ;;  %v2878_v31 = vpop.permute.xlu2 %2877  ;;  %v2850_v7 = vunpack.i.h.bf16 %v4424_v8 }
 0x1b3   : > { %v1722_v15 = vsel %vm1051_vm10, %v1706_v27, %v2824_v43  ;;  %v1723_v30 = vsel %vm1051_vm10, %v1707_v21, %v2825_v10  ;;  %v2880_v27 = vunpack.i.h.bf16 %v2878_v31 }
 0x1b4   : > { %v1738_v52 = vsel %vm1060_vm11, %v1722_v15, %v2834_v59  ;;  %v1739_v2 = vsel %vm1060_vm11, %v1723_v30, %v2835_v28  ;;  %v2843_v26 = vpop.permute.xlu1 %2842 }
 0x1b5   : > { %v1774_v48 = vrot.slane %v1738_v52, 1  ;;  %v1775_v29 = vrot.slane %v1739_v2, 1  ;;  %v2845_v45 = vunpack.i.h.bf16 %v2843_v26  ;;  %v2844_v5 = vunpack.i.l.bf16 %v2843_v26 }
 0x1b7   : > { %v1776_v12 = vsel %vm480_vm0, %v1774_v48, %v1775_v29  ;;  %v1664_v1 = vsel %vm1015_vm6, %v4330_v58, %v2845_v45  ;;  %v1665_v38 = vsel %vm1015_vm6, %v4327_v13, %v2845_v45  ;;  %v1662_v41 = vsel %vm1015_vm6, %v4281_v54, %v2844_v5 }
 0x1b8   : > { %v2838_v36 = vpop.permute.xlu0 %2837  ;;  %v1663_v43 = vsel %vm1015_vm6, %v4284_v16, %v2844_v5  ;;  %v2879_v13 = vunpack.i.l.bf16 %v2878_v31  ;;  %v1678_v54 = vsel %vm1024_vm7, %v1662_v41, %v2849_v17 }
 0x1b9   : > { %v2840_v39 = vunpack.i.h.bf16 %v2838_v36  ;;  %v2839_v57 = vunpack.i.l.bf16 %v2838_v36  ;;  %v1679_v34 = vsel %vm1024_vm7, %v1663_v43, %v2850_v7  ;;  %v2893_v16 = vpop.permute.xlu2 %2892 }
 0x1ba   : > { %v2894_v7 = vunpack.i.l.bf16 %v2893_v16 }
 0x1bb   : > { %v1740_v19 = vsel %vm1060_vm11, %v1724_v49, %v2839_v57  ;;  %v1741_v14 = vsel %vm1060_vm11, %v1725_v37, %v2840_v39 }
 0x1bc   : > { %v1777_v63 = vrot.slane %v1740_v19, 1  ;;  %v1778_v11 = vrot.slane %v1741_v14, 1  ;;  %v2858_v55 = vpop.permute.xlu1 %2857 }
 0x1bd   : > { %v2860_v47 = vunpack.i.h.bf16 %v2858_v55  ;;  %v2859_v58 = vunpack.i.l.bf16 %v2858_v55 }
 0x1be   : > { %v1779_v46 = vsel %vm480_vm0, %v1777_v63, %v1778_v11 }
 0x1bf   : > { %v1799_v0 = vpack.c.bf16 %v1779_v46, %v1776_v12  ;;  %v1694_v2 = vsel %vm1033_vm8, %v1678_v54, %v2859_v58  ;;  %v1695_v26 = vsel %vm1033_vm8, %v1679_v34, %v2860_v47 }
 0x1c0   : > { %v2853_v62 = vpop.permute.xlu0 %2852 }
 0x1c1   : > { %2206 = vmatmul.msk.bf16.gmra.mxu3 %vm1069_vm12, %v1799_v0  ;;  %v2855_v50 = vunpack.i.h.bf16 %v2853_v62  ;;  %v2854_v23 = vunpack.i.l.bf16 %v2853_v62  ;;  %v2908_v62 = vpop.permute.xlu2 %2907 }
 0x1c3   : > { %v1680_v28 = vsel %vm1024_vm7, %v1664_v1, %v2854_v23  ;;  %v1681_v59 = vsel %vm1024_vm7, %v1665_v38, %v2855_v50 }
 0x1c4   : > { %v2873_v24 = vpop.permute.xlu1 %2872  ;;  %v1696_v21 = vsel %vm1033_vm8, %v1680_v28, %v2864_v4  ;;  %v1697_v15 = vsel %vm1033_vm8, %v1681_v59, %v2865_v32  ;;  %v2910_v32 = vunpack.i.h.bf16 %v2908_v62  ;;  %v2909_v4 = vunpack.i.l.bf16 %v2908_v62 }
 0x1c5   : > { %v2875_v48 = vunpack.i.h.bf16 %v2873_v24  ;;  %v2874_v29 = vunpack.i.l.bf16 %v2873_v24  ;;  %v2895_v59 = vunpack.i.h.bf16 %v2893_v16 }
 0x1c8   : > { %v2868_v10 = vpop.permute.xlu0 %2867 }
 0x1c9   : > { %v2870_v3 = vunpack.i.h.bf16 %v2868_v10  ;;  %v2869_v30 = vunpack.i.l.bf16 %v2868_v10  ;;  %v2923_v28 = vpop.permute.xlu2 %2922 }
 0x1cb   : > { %v1712_v35 = vsel %vm1042_vm9, %v1696_v21, %v2870_v3  ;;  %v1713_v8 = vsel %vm1042_vm9, %v1697_v15, %v2870_v3  ;;  %v1710_v56 = vsel %vm1042_vm9, %v1694_v2, %v2869_v30  ;;  %v1711_v25 = vsel %vm1042_vm9, %v1695_v26, %v2869_v30 }
 0x1cc   : > { %v2888_v52 = vpop.permute.xlu1 %2887  ;;  %v1728_v53 = vsel %vm1051_vm10, %v1712_v35, %v2879_v13  ;;  %v1729_v6 = vsel %vm1051_vm10, %v1713_v8, %v2880_v27  ;;  %v1726_v37 = vsel %vm1051_vm10, %v1710_v56, %v2874_v29  ;;  %v1727_v19 = vsel %vm1051_vm10, %v1711_v25, %v2875_v48 }
 0x1cd   : > { %v2890_v22 = vunpack.i.h.bf16 %v2888_v52  ;;  %v2889_v20 = vunpack.i.l.bf16 %v2888_v52  ;;  %v2925_v3 = vunpack.i.h.bf16 %v2923_v28  ;;  %v2924_v27 = vunpack.i.l.bf16 %v2923_v28 }
 0x1ce   : > { %v1667_v15 = vsel %vm1024_vm7, %v4315_v51, %v2895_v59 }
 0x1cf   : > { %v1744_v36 = vsel %vm1060_vm11, %v1728_v53, %v2889_v20  ;;  %v1745_v9 = vsel %vm1060_vm11, %v1729_v6, %v2890_v22 }
 0x1d0   : > { %v1783_v33 = vrot.slane %v1744_v36, 1  ;;  %v1784_v39 = vrot.slane %v1745_v9, 1  ;;  %v2883_v57 = vpop.permute.xlu0 %2882 }
 0x1d1   : > { %v2885_v12 = vunpack.i.h.bf16 %v2883_v57  ;;  %v2884_v49 = vunpack.i.l.bf16 %v2883_v57 }
 0x1d2   : > { %v1785_v14 = vsel %vm480_vm0, %v1783_v33, %v1784_v39 }
 0x1d3   : > { %v1742_v63 = vsel %vm1060_vm11, %v1726_v37, %v2884_v49  ;;  %v1743_v11 = vsel %vm1060_vm11, %v1727_v19, %v2885_v12  ;;  %v1944_v19 = vpop.f32.mrf.mxu0 }
 0x1d4   : > { %v1780_v55 = vrot.slane %v1742_v63, 1  ;;  %v1781_v46 = vrot.slane %v1743_v11, 1  ;;  %v2903_v0 = vpop.permute.xlu1 %2902 }
 0x1d5   : > { %v2905_v41 = vunpack.i.h.bf16 %v2903_v0  ;;  %v2904_v10 = vunpack.i.l.bf16 %v2903_v0 }
 0x1d6   : > { %v1782_v45 = vsel %vm480_vm0, %v1780_v55, %v1781_v46 }
 0x1d7   : > { %v1801_v31 = vpack.c.bf16 %v1785_v14, %v1782_v45  ;;  %v1683_v8 = vsel %vm1033_vm8, %v1667_v15, %v2905_v41  ;;  %v1945_v14 = vadd.f32 %v4388_v61, %v1944_v19 }
 0x1d8   : > { %v2898_v50 = vpop.permute.xlu0 %2897 }
 0x1d9   : > { %2207 = vmatmul.msk.bf16.gmra.mxu3 %vm1069_vm12, %v1801_v31  ;;  %v2900_v23 = vunpack.i.h.bf16 %v2898_v50  ;;  %v2899_v5 = vunpack.i.l.bf16 %v2898_v50  ;;  %v1949_v50 = vpop.f32.mrf.mxu2 }
 0x1db   : > { %v1668_v1 = vsel %vm1024_vm7, %v4318_v40, %v2899_v5  ;;  %v1669_v38 = vsel %vm1024_vm7, %v4321_v18, %v2900_v23  ;;  %v1666_v18 = vsel %vm1024_vm7, %v4312_v60, %v2894_v7  ;;  %v1946_v46 = vpop.f32.mrf.mxu0  ;;  %v1950_v23 = vadd.f32 %v4388_v61, %v1949_v50 }
 0x1dc   : > { %v2918_v24 = vpop.permute.xlu1 %2917  ;;  %v1684_v47 = vsel %vm1033_vm8, %v1668_v1, %v2909_v4  ;;  %v1685_v58 = vsel %vm1033_vm8, %v1669_v38, %v2910_v32  ;;  %v1682_v35 = vsel %vm1033_vm8, %v1666_v18, %v2904_v10  ;;  %v1947_v0 = vadd.f32 %v4388_v61, %v1946_v46 }
 0x1dd   : > { %v2920_v52 = vunpack.i.h.bf16 %v2918_v24  ;;  %v2919_v16 = vunpack.i.l.bf16 %v2918_v24 }
 0x1e0   : > { %v2913_v17 = vpop.permute.xlu0 %2912 }
 0x1e1   : > { %v2915_v43 = vunpack.i.h.bf16 %v2913_v17  ;;  %v2914_v13 = vunpack.i.l.bf16 %v2913_v17  ;;  %v1951_v4 = vpop.f32.mrf.mxu2 }
 0x1e2   : > { %v1952_v1 = vadd.f32 %v4388_v61, %v1951_v4 }
 0x1e3   : > { %v1700_v21 = vsel %vm1042_vm9, %v1684_v47, %v2915_v43  ;;  %v1701_v40 = vsel %vm1042_vm9, %v1685_v58, %v2915_v43  ;;  %v1698_v22 = vsel %vm1042_vm9, %v1682_v35, %v2914_v13  ;;  %v1699_v60 = vsel %vm1042_vm9, %v1683_v8, %v2914_v13 }
 0x1e4   : > { %v2933_v30 = vpop.permute.xlu1 %2932  ;;  %v1716_v2 = vsel %vm1051_vm10, %v1700_v21, %v2924_v27  ;;  %v1717_v26 = vsel %vm1051_vm10, %v1701_v40, %v2925_v3  ;;  %v1714_v25 = vsel %vm1051_vm10, %v1698_v22, %v2919_v16  ;;  %v1715_v36 = vsel %vm1051_vm10, %v1699_v60, %v2920_v52 }
 0x1e5   : > { %v2935_v54 = vunpack.i.h.bf16 %v2933_v30  ;;  %v2934_v34 = vunpack.i.l.bf16 %v2933_v30 }
 0x1e7   : > { %v1732_v20 = vsel %vm1060_vm11, %v1716_v2, %v2934_v34  ;;  %v1733_v51 = vsel %vm1060_vm11, %v1717_v26, %v2935_v54 }
 0x1e8   : > { %v1765_v48 = vrot.slane %v1732_v20, 1  ;;  %v1766_v29 = vrot.slane %v1733_v51, 1  ;;  %v2928_v53 = vpop.permute.xlu0 %2927 }
 0x1e9   : > { %v2930_v6 = vunpack.i.h.bf16 %v2928_v53  ;;  %v2929_v56 = vunpack.i.l.bf16 %v2928_v53  ;;  %v1954_v7 = vpop.f32.mrf.mxu2 }
 0x1ea   : > { %v1767_v9 = vsel %vm480_vm0, %v1765_v48, %v1766_v29  ;;  %v1955_v17 = vadd.f32 %v4388_v61, %v1954_v7 }
 0x1eb   : > { %v1730_v33 = vsel %vm1060_vm11, %v1714_v25, %v2929_v56  ;;  %v1731_v39 = vsel %vm1060_vm11, %v1715_v36, %v2930_v6 }
 0x1ec   : > { %v1762_v57 = vrot.slane %v1730_v33, 1  ;;  %v1763_v12 = vrot.slane %v1731_v39, 1 }
 0x1ee   : > { %v1764_v49 = vsel %vm480_vm0, %v1762_v57, %v1763_v12 }
 0x1ef   : > { %v1795_v37 = vpack.c.bf16 %v1767_v9, %v1764_v49 }
 0x1f1   : > { %2204 = vmatmul.msk.bf16.vlgmr.msra.gmra.mxu1 %vm1069_vm12, %v1795_v37  ;;  %v1956_v47 = vpop.f32.mrf.mxu2 }
 0x1f2   : > { %v1957_v58 = vadd.f32 %v4388_v61, %v1956_v47 }
 0x22c   : > { %v1973_v63 = vpop.f32.mrf.mxu3 }
 0x22d   : > { %v1974_v11 = vadd.f32 %v1973_v63, %v1945_v14 }
 0x22f   : > { %v1990_v55 = vmax.f32 %v1974_v11, 0.0 }
 0x231   : > { %1998 = vst.msk [vmem:[%s4519_s14 + $0x10] sm:$0xff] %vm979_vm2, %v1990_v55 }
 0x234   : > { %v1975_v62 = vpop.f32.mrf.mxu3 }
 0x235   : > { %v1976_v45 = vadd.f32 %v1975_v62, %v1947_v0 }
 0x237   : > { %v1991_v31 = vmax.f32 %v1976_v45, 0.0 }
 0x239   : > { %1999 = vst.msk [vmem:[%s4519_s14 + $0x18] sm:$0xff] %vm979_vm2, %v1991_v31 }
 0x244   : > { %v1978_v5 = vpop.f32.mrf.mxu3 }
 0x245   : > { %v1979_v24 = vadd.f32 %v1978_v5, %v1950_v23 }
 0x247   : > { %v1992_v32 = vmax.f32 %v1979_v24, 0.0 }
 0x249   : > { %2000 = vst.msk [vmem:[%s4519_s14 + $0x20] sm:$0xff] %vm979_vm2, %v1992_v32 }
 0x24c   : > { %v1980_v38 = vpop.f32.mrf.mxu3 }
 0x24d   : > { %v1981_v28 = vadd.f32 %v1980_v38, %v1952_v1 }
 0x24f   : > { %v1993_v59 = vmax.f32 %v1981_v28, 0.0 }
 0x251   : > { %2001 = vst.msk [vmem:[%s4519_s14 + $0x28] sm:$0xff] %vm979_vm2, %v1993_v59 }
 0x25c   : > { %v1983_v41 = vpop.f32.mrf.mxu3 }
 0x25d   : > { %v1984_v10 = vadd.f32 %v1983_v41, %v1955_v17 }
 0x25f   : > { %v1994_v43 = vmax.f32 %v1984_v10, 0.0 }
 0x261   : > { %2002 = vst.msk [vmem:[%s4519_s14 + $0x30] sm:$0xff] %vm979_vm2, %v1994_v43 }
 0x264   : > { %v1985_v3 = vpop.f32.mrf.mxu3 }
 0x265   : > { %v1986_v27 = vadd.f32 %v1985_v3, %v1957_v58 }
 0x267   : > { %v1995_v13 = vmax.f32 %v1986_v27, 0.0 }
 0x269   : > { %2003 = vst.msk [vmem:[%s4519_s14 + $0x38] sm:$0xff] %vm979_vm2, %v1995_v13 }
 0x26e   : > { %v1968_v21 = vpop.f32.mrf.mxu1 }
 0x26f   : > { %v1969_v40 = vadd.f32 %v1968_v21, %v4396_v44 }
 0x271   : > { %v1988_v18 = vmax.f32 %v1969_v40, 0.0 }
 0x273   : > { %1996 = vst.msk [vmem:[%s4519_s14] sm:$0xff] %vm979_vm2, %v1988_v18 }
 0x276   : > { %v1970_v15 = vpop.f32.mrf.mxu1 }
 0x277   : > { %v1971_v30 = vadd.f32 %v1970_v15, %v4406_v42 }
 0x279   : > { %v1989_v35 = vmax.f32 %v1971_v30, 0.0 }
 0x27b   : > { %1997 = vst.msk [vmem:[%s4519_s14 + $0x8] sm:$0xff] %vm979_vm2, %v1989_v35 }
 0x27c PF: > { %s15_s22 = sadd.s32 1, %s2975_s22   ;;  %s4630_s18 = smov %s2967_s20 }
 0x27d   : > { %p12_p10 = scmp.ge.s32.totalorder %s15_s22, 18   ;;  %s4631_s19 = smov %s2971_s21 }
 0x27e   : > { %s4632_s20 = smov %s4635_s23  ;;  %s4633_s21 = smov %s4639_s24 }
 0x27f   :  { %14 = sbr.rel (!%p12_p10) target bundleno = 3 (0x3), region = 76 }

// kernel: axis_aligned_conv_gaussian_forward.8
= control target key start
LH: loop header
LB: loop body
LE: loop exit
PB: predicated region body
PF: predicated region fallthrough
CT: control target
= control target key end

     0   :  { %s348_s12 = smov 0   ;;  %s375_s0 = inlined_call_operand.vmem [shape: f32[8,2,8,4,16], index: 0, kind: input, shape index: {}]   ;;  %s376_s1 = inlined_call_operand.vmem [shape: f32[1,8], index: 1, kind: input, shape index: {}]   ;;  %s377_s2 = inlined_call_operand.vmem [shape: f32[1,8], index: 2, kind: input, shape index: {}]   ;;  %s378_s3 = inlined_call_operand.vmem [shape: f32[8,4,4,8], index: 3, kind: output, shape index: {}]  }
   0x1 LB: > { %s295_s13 = sadd.s32 4294967295, %s325_s12   ;;  %p299_p0 = scmp.ge.s32.totalorder %s325_s12, 1  ;;  %s325_s12 = sphi %s348_s12, %s13_s12  }
   0x2   : > { %p137_p1 = scmp.lt.s32.totalorder %s325_s12, 9 }
   0x4   : > { %p138_p2 = pnand %p299_p0, %p137_p1 }
   0x5   : > { %p161_p3 = scmp.lt.s32.totalorder (!%p138_p2), %s295_s13, 7  ;;  %s327_s18 = smov (!%p138_p2), 120  }
   0x6   : > { %141 = sbr.rel (%p138_p2) target bundleno = 151 (0x97), region = 32 }
   0xb   : > { %s380_s13 = smov (!%p161_p3, %s295_s13), 7  ;;  %v317_v28 = vld [vmem:[%s376_s1] ss:$0 sm:$0xff]  ;;  %vm235_vm0 = vcmask 60416  }
   0xc   : > { %s306_s14 = sshll.u32 %s380_s13, 6  ;;  %s307_s21 = sshll.u32 %s380_s13, 4  ;;  %v318_v30 = vld [vmem:[%s377_s2] ss:$0 sm:$0xff] }
   0xd   : > { %s165_s17 = scalar_lea.vmem %s375_s0, %s306_s14  ;;  %s170_s26 = scalar_lea.vmem %s378_s3, %s307_s21 }
   0xe   : > { %v175_v0 = vld [vmem:[%s165_s17 + $0x10] sm:$0xf]  ;;  %v176_v1 = vld [vmem:[%s165_s17 + $0x14] sm:$0xf]  ;;  %v171_v5 = vld [vmem:[%s165_s17] sm:$0xf] }
   0xf   : > { %v183_v2 = vld [vmem:[%s165_s17 + $0x30] sm:$0xf]  ;;  %v184_v3 = vld [vmem:[%s165_s17 + $0x34] sm:$0xf]  ;;  %v172_v6 = vld [vmem:[%s165_s17 + $0x4] sm:$0xf] }
  0x10   : > { %v191_v4 = vadd.f32 %v183_v2, %v175_v0  ;;  %v192_v7 = vadd.f32 %v184_v3, %v176_v1  ;;  %v179_v8 = vld [vmem:[%s165_s17 + $0x20] sm:$0xf]  ;;  %v180_v9 = vld [vmem:[%s165_s17 + $0x24] sm:$0xf]  ;;  %v177_v10 = vld [vmem:[%s165_s17 + $0x18] sm:$0xf] }
  0x11   : > { %v187_v11 = vadd.f32 %v179_v8, %v171_v5  ;;  %v188_v12 = vadd.f32 %v180_v9, %v172_v6  ;;  %v178_v13 = vld [vmem:[%s165_s17 + $0x1c] sm:$0xf]  ;;  %v185_v14 = vld [vmem:[%s165_s17 + $0x38] sm:$0xf]  ;;  %v173_v17 = vld [vmem:[%s165_s17 + $0x8] sm:$0xf] }
  0x12   : > { %v186_v15 = vld [vmem:[%s165_s17 + $0x3c] sm:$0xf]  ;;  %v197_v16 = vadd.f32 %v192_v7, %v191_v4  ;;  %v174_v18 = vld [vmem:[%s165_s17 + $0xc] sm:$0xf]  ;;  %v181_v19 = vld [vmem:[%s165_s17 + $0x28] sm:$0xf]  ;;  %v193_v22 = vadd.f32 %v185_v14, %v177_v10 }
  0x13   : > { %v195_v20 = vadd.f32 %v188_v12, %v187_v11  ;;  %v182_v21 = vld [vmem:[%s165_s17 + $0x2c] sm:$0xf]  ;;  %v194_v23 = vadd.f32 %v186_v15, %v178_v13  ;;  %v189_v24 = vadd.f32 %v181_v19, %v173_v17 }
  0x14   : > { %207 = vrot.lane.b32.xlu1 %v197_v16, %s327_s18  ;;  %v190_v25 = vadd.f32 %v182_v21, %v174_v18 }
  0x15   : > { %203 = vrot.lane.b32.xlu0 %v195_v20, %s327_s18  ;;  %v198_v26 = vadd.f32 %v194_v23, %v193_v22 }
  0x16   : > { %v196_v27 = vadd.f32 %v190_v25, %v189_v24 }
  0x1c   : > { %209 = vrot.lane.b32.xlu1 %v198_v26, %s327_s18 }
  0x1d   : > { %205 = vrot.lane.b32.xlu0 %v196_v27, %s327_s18 }
  0x86   : > { %v208_v29 = vpop.permute.xlu1 %207 }
  0x87   : > { %v217_v31 = vadd.f32 %v208_v29, %v197_v16  ;;  %v204_v32 = vpop.permute.xlu0 %203 }
  0x88   : > { %v215_v33 = vadd.f32 %v204_v32, %v195_v20 }
  0x89   : > { %v225_v34 = vmul.f32 %v317_v28, %v217_v31 }
  0x8a   : > { %v223_v35 = vmul.f32 %v317_v28, %v215_v33 }
  0x8b   : > { %v233_v36 = vadd.f32 %v318_v30, %v225_v34 }
  0x8c   : > { %v231_v37 = vadd.f32 %v318_v30, %v223_v35 }
  0x8d   : > { %238 = vst.msk [vmem:[%s170_s26 + $0x8] sm:$0xf] %vm235_vm0, %v233_v36 }
  0x8e   : > { %236 = vst.msk [vmem:[%s170_s26] sm:$0xf] %vm235_vm0, %v231_v37  ;;  %v210_v38 = vpop.permute.xlu1 %209 }
  0x8f   : > { %v218_v39 = vadd.f32 %v210_v38, %v198_v26  ;;  %v206_v40 = vpop.permute.xlu0 %205 }
  0x90   : > { %v216_v41 = vadd.f32 %v206_v40, %v196_v27 }
  0x91   : > { %v226_v42 = vmul.f32 %v317_v28, %v218_v39 }
  0x92   : > { %v224_v43 = vmul.f32 %v317_v28, %v216_v41 }
  0x93   : > { %v234_v44 = vadd.f32 %v318_v30, %v226_v42 }
  0x94   : > { %v232_v45 = vadd.f32 %v318_v30, %v224_v43 }
  0x95   : > { %239 = vst.msk [vmem:[%s170_s26 + $0xc] sm:$0xf] %vm235_vm0, %v234_v44 }
  0x96   : > { %237 = vst.msk [vmem:[%s170_s26 + $0x4] sm:$0xf] %vm235_vm0, %v232_v45 }
  0x97 PF: > { %s13_s12 = sadd.s32 1, %s325_s12  }
  0x98   : > { %p10_p4 = scmp.ge.s32.totalorder %s13_s12, 10  }
  0x9a   :  { %12 = sbr.rel (!%p10_p4) target bundleno = 1 (0x1), region = 62 }

// kernel: axis_aligned_conv_gaussian_forward.9
= control target key start
LH: loop header
LB: loop body
LE: loop exit
PB: predicated region body
PF: predicated region fallthrough
CT: control target
= control target key end

     0   :  { %s1651_s18 = smov 0   ;;  %s1653_s19 = smov 0   ;;  %s2133_s0 = inlined_call_operand.vmem [shape: bf16[2,6,6,6,8], index: 0, kind: input, shape index: {}, may-alias: {0,1,2}]   ;;  %s2134_s1 = inlined_call_operand.vmem [shape: bf16[2,6,6,6,8], index: 1, kind: input, shape index: {}, may-alias: {0,1,2}]   ;;  %s2135_s2 = inlined_call_operand.vmem [shape: bf16[2,6,6,6,8], index: 2, kind: input, shape index: {}, may-alias: {0,1,2}]   ;;  %s2136_s3 = inlined_call_operand.vmem [shape: bf16[216,16], index: 3, kind: input, shape index: {}]   ;;  %s2137_s4 = inlined_call_operand.vmem [shape: f32[1,16], index: 4, kind: input, shape index: {}]   ;;  %s2138_s5 = inlined_call_operand.vmem [shape: f32[2,4,16,16], index: 5, kind: output, shape index: {}]  }
   0x1   :  { %s1655_s20 = smov 0   ;;  %s1657_s21 = smov 0  }
   0x2   :  { %s1659_s22 = smov 0  }
   0x3 LB: > { %s24_s23 = sadd.s32 1, %s1596_s20  ;;  %s27_s24 = sadd.s32 1, %s1600_s21  ;;  %s1604_s22 = sphi %s1659_s22, %s15_s22   ;;  %s1600_s21 = sphi %s1657_s21, %s2142_s21   ;;  %s1596_s20 = sphi %s1655_s20, %s2141_s20   ;;  %s1592_s19 = sphi %s1653_s19, %s2140_s19   ;;  %s1588_s18 = sphi %s1651_s18, %s2139_s18  }
   0x4   : > { %p25_p0 = scmp.ge.s32.totalorder %s24_s23, 4  ;;  %p1177_p1 = scmp.ge.s32.totalorder %s1604_s22, 1 }
   0x5   : > { %p247_p2 = scmp.lt.s32.totalorder %s1604_s22, 9 }
   0x6   : > { %s2144_s23 = smov (%p25_p0, %s24_s23), 0  ;;  %s2146_s24 = smov (!%p25_p0, %s27_s24), %s1600_s21 }
   0x7   : > { %p248_p3 = pnand %p1177_p1, %p247_p2  ;;  %p29_p4 = scmp.ge.s32.totalorder %s2146_s24, 2 }
   0x8   : > { %p303_p5 = scmp.lt.s32.totalorder (!%p248_p3), %s1592_s19, 1  ;;  %p305_p6 = scmp.lt.s32.totalorder (!%p248_p3), %s1588_s18, 5 }
   0x9   : > { %s2148_s24 = smov (%p29_p4, %s2146_s24), 0  ;;  %251 = sbr.rel (%p248_p3) target bundleno = 430 (0x1ae), region = 40 }
   0xa   : > { %s1606_s8 = smov (!%p248_p3), 16   ;;  %s1607_s9 = smov (!%p248_p3), 8  }
   0xb   : > { %s1608_s10 = smov (!%p248_p3), 24   ;;  %s312_s11 = sadd.s32 (!%p248_p3), 1, %s1588_s18 }
   0xc   : > { %p315_p7 = scmp.lt.s32.totalorder (!%p248_p3), %s312_s11, 5  ;;  %s323_s12 = sadd.s32 (!%p248_p3), 2, %s1588_s18 }
   0xd   : > { %p326_p8 = scmp.lt.s32.totalorder (!%p248_p3), %s323_s12, 5  ;;  %s1609_s14 = smov (!%p248_p3), 32  }
   0xe   : > { %s2150_s19 = smov (!%p303_p5, %s1592_s19), 1  ;;  %s2152_s11 = smov (!%p315_p7, %s312_s11), 5  ;;  %vm594_vm0 = vcmask 64512   ;;  %vm599_vm1 = vcmask 130048   ;;  %vm604_vm2 = vcmask 195584   ;;  %vm609_vm3 = vcmask 261120  }
   0xf   : > { %s306_s25 = scalar_select %p305_p6, %s1588_s18, 5  ;;  %vm614_vm4 = vcmask 326656   ;;  %vm619_vm5 = vcmask 392192   ;;  %vm624_vm6 = vcmask 457728   ;;  %vm629_vm7 = vcmask 523264  }
  0x10   : > { %s1688_s26 = smul.u32 36, %s2150_s19  ;;  %s2154_s12 = smov (!%p326_p8, %s323_s12), 5  ;;  %vm634_vm8 = vcmask 588800   ;;  %vm864_vm9 = vcmask 1043456   ;;  %vm639_vm10 = vcmask 654336   ;;  %vm644_vm11 = vcmask 719872  }
  0x11   : > { %s1256_s27 = smul.u32 6, %s306_s25  ;;  %s1610_s15 = smov 40   ;;  %vm649_vm12 = vcmask 785408   ;;  %vm654_vm13 = vcmask 850944   ;;  %vm659_vm14 = vcmask 916480   ;;  %vm664_vm15 = vcmask 982016  }
  0x12   : > { %s1258_s13 = smul.u32 6, %s2152_s11  ;;  %p336_p9 = scmp.lt.s32.totalorder %s1588_s18, 3 }
  0x13   : > { %s309_s28 = sadd.s32 %s1688_s26, %s1256_s27  ;;  %s1259_s17 = smul.u32 6, %s2154_s12 }
  0x14   : > { %s1178_s29 = sshll.u32 %s309_s28, 2  ;;  %s319_s16 = sadd.s32 %s1258_s13, %s1688_s26 }
  0x15   : > { %s1694_s7 = scalar_lea.vmem %s2133_s0, %s1178_s29  ;;  %s1179_s25 = sshll.u32 %s319_s16, 2 }
  0x16   : > { %v344_v0 = vld [vmem:[%s1694_s7] sm:$0x7]  ;;  %v345_v1 = vld [vmem:[%s1694_s7 + $0x4] sm:$0x7]  ;;  %v346_v2 = vld [vmem:[%s1694_s7 + $0x8] sm:$0x7]  ;;  %s330_s27 = sadd.s32 %s1259_s17, %s1688_s26  ;;  %s321_s6 = scalar_lea.vmem %s2134_s1, %s1179_s25 }
  0x17   : > { %v1699_v3 = vunpack.c.l.bf16 %v344_v0  ;;  %v1701_v4 = vunpack.c.l.bf16 %v345_v1  ;;  %v347_v5 = vld [vmem:[%s1694_s7 + $0xc] sm:$0x7]  ;;  %v1704_v6 = vunpack.c.l.bf16 %v346_v2  ;;  %v348_v19 = vld [vmem:[%s1694_s7 + $0x10] sm:$0x7]  ;;  %v349_v29 = vld [vmem:[%s1694_s7 + $0x14] sm:$0x7] }
  0x18   : > { %v1706_v7 = vunpack.c.l.bf16 %v347_v5  ;;  %v1722_v20 = vunpack.c.l.bf16 %v348_v19  ;;  %v355_v30 = vunpack.c.l.bf16 %v349_v29  ;;  %s1611_s28 = smov 48   ;;  %s1180_s7 = sshll.u32 %s330_s27, 2  ;;  %v358_v35 = vld [vmem:[%s321_s6 + $0x8] sm:$0x7]  ;;  %v359_v36 = vld [vmem:[%s321_s6 + $0xc] sm:$0x7] }
  0x19   : > { %v400_v8 = vrot.slane %v1699_v3, 2  ;;  %v401_v9 = vrot.slane %v1701_v4, 2  ;;  %v384_v10 = vrot.slane %v1699_v3, 1  ;;  %v385_v11 = vrot.slane %v1701_v4, 1  ;;  %v356_v38 = vld [vmem:[%s321_s6] sm:$0x7]  ;;  %s1751_s12 = scalar_lea.vmem %s2135_s2, %s1180_s7 }
  0x1a   : > { %v1315_v14 = vpack.i.bf16 %v1704_v6, %v1701_v4  ;;  %v402_v15 = vrot.slane %v1704_v6, 2  ;;  %v403_v16 = vrot.slane %v1706_v7, 2  ;;  %v386_v17 = vrot.slane %v1704_v6, 1  ;;  %v357_v39 = vld [vmem:[%s321_s6 + $0x4] sm:$0x7]  ;;  %s1612_s13 = smov 56  }
  0x1b   : > { %v1335_v12 = vpack.i.bf16 %v401_v9, %v400_v8  ;;  %v1325_v13 = vpack.i.bf16 %v385_v11, %v384_v10  ;;  %v387_v18 = vrot.slane %v1706_v7, 1  ;;  %v1320_v23 = vpack.i.bf16 %v1722_v20, %v1706_v7  ;;  %v368_v45 = vld [vmem:[%s1751_s12] sm:$0x7]  ;;  %v369_v46 = vld [vmem:[%s1751_s12 + $0x4] sm:$0x7]  ;;  %s1613_s16 = smov 64  }
  0x1c   : > { %1316 = vrot.lane.b32.xlu2 %v1315_v14, %s1608_s10  ;;  %v1340_v21 = vpack.i.bf16 %v403_v16, %v402_v15  ;;  %v429_v24 = vrot.slane %v1722_v20, 1  ;;  %v1345_v26 = vpack.i.bf16 %v386_v17, %v385_v11  ;;  %v1355_v27 = vpack.i.bf16 %v402_v15, %v401_v9  ;;  %v360_v47 = vld [vmem:[%s321_s6 + $0x10] sm:$0x7]  ;;  %v361_v48 = vld [vmem:[%s321_s6 + $0x14] sm:$0x7]  ;;  %s1614_s17 = smov 72  }
  0x1d   : > { %1336 = vrot.lane.b32.xlu1 %v1335_v12, %s1606_s8  ;;  %1326 = vrot.lane.b32.xlu0 %v1325_v13, %s1607_s9  ;;  %v1330_v22 = vpack.i.bf16 %v387_v18, %v386_v17  ;;  %v442_v28 = vrot.slane %v1722_v20, 2  ;;  %v1365_v31 = vpack.i.bf16 %v1706_v7, %v1704_v6  ;;  %v1370_v33 = vpack.i.bf16 %v355_v30, %v1722_v20  ;;  %v370_v57 = vld [vmem:[%s1751_s12 + $0x8] sm:$0x7]  ;;  %v371_v58 = vld [vmem:[%s1751_s12 + $0xc] sm:$0x7]  ;;  %s1620_s25 = smov 120  }
  0x1e   : > { %v1350_v25 = vpack.i.bf16 %v429_v24, %v387_v18  ;;  %v468_v34 = vrot.slane %v355_v30, 1  ;;  %v1753_v40 = vunpack.c.l.bf16 %v358_v35  ;;  %v1755_v41 = vunpack.c.l.bf16 %v359_v36  ;;  %v372_v13 = vld [vmem:[%s1751_s12 + $0x10] sm:$0x7]  ;;  %v373_v35 = vld [vmem:[%s1751_s12 + $0x14] sm:$0x7]  ;;  %s2156_s18 = smov (!%p336_p9, %s1588_s18), 3 }
  0x1f   : > { %v1360_v32 = vpack.i.bf16 %v442_v28, %v403_v16  ;;  %v1757_v42 = vunpack.c.l.bf16 %v356_v38  ;;  %v1759_v43 = vunpack.c.l.bf16 %v357_v39  ;;  %v481_v44 = vrot.slane %v355_v30, 2 }
  0x20   : > { %v1380_v37 = vpack.i.bf16 %v468_v34, %v429_v24  ;;  %v512_v49 = vrot.slane %v1753_v40, 1  ;;  %v513_v50 = vrot.slane %v1755_v41, 1  ;;  %v374_v53 = vunpack.c.l.bf16 %v368_v45 }
  0x21   : > { %v1395_v51 = vpack.i.bf16 %v1759_v43, %v1757_v42  ;;  %v1390_v52 = vpack.i.bf16 %v481_v44, %v442_v28  ;;  %v375_v54 = vunpack.c.l.bf16 %v369_v46  ;;  %v1770_v55 = vunpack.c.l.bf16 %v360_v47 }
  0x22   : > { %v1772_v56 = vunpack.c.l.bf16 %v361_v48  ;;  %v1400_v59 = vpack.i.bf16 %v513_v50, %v512_v49  ;;  %v376_v60 = vunpack.c.l.bf16 %v370_v57  ;;  %v377_v61 = vunpack.c.l.bf16 %v371_v58 }
  0x23   : > { %v686_v62 = vrot.slane %v374_v53, 7  ;;  %v687_v63 = vrot.slane %v375_v54, 7  ;;  %v555_v0 = vrot.slane %v1770_v55, 1  ;;  %v714_v11 = vrot.slane %v374_v53, 1 }
  0x24   : > { %1321 = vrot.lane.b32.xlu2 %v1320_v23, %s1608_s10  ;;  %v669_v1 = vrot.slane %v1772_v56, 1  ;;  %v688_v2 = vrot.slane %v376_v60, 7  ;;  %v689_v5 = vrot.slane %v377_v61, 7  ;;  %v715_v12 = vrot.slane %v375_v54, 1 }
  0x25   : > { %1341 = vrot.lane.b32.xlu1 %v1340_v21, %s1606_s8  ;;  %1331 = vrot.lane.b32.xlu0 %v1330_v22, %s1607_s9  ;;  %v1410_v8 = vpack.i.bf16 %v687_v63, %v686_v62  ;;  %v1425_v14 = vpack.i.bf16 %v377_v61, %v376_v60  ;;  %v1420_v15 = vpack.i.bf16 %v375_v54, %v374_v53  ;;  %v1787_v17 = vunpack.c.l.bf16 %v372_v13 }
  0x26   : > { %v1405_v9 = vpack.i.bf16 %v669_v1, %v555_v0  ;;  %v1415_v10 = vpack.i.bf16 %v689_v5, %v688_v2  ;;  %v1430_v16 = vpack.i.bf16 %v715_v12, %v714_v11  ;;  %v716_v18 = vrot.slane %v376_v60, 1 }
  0x27   : > { %v717_v19 = vrot.slane %v377_v61, 1  ;;  %v731_v20 = vrot.slane %v1787_v17, 7  ;;  %v1455_v24 = vpack.i.bf16 %v376_v60, %v375_v54  ;;  %v511_v28 = vrot.slane %v1759_v43, 1 }
  0x28   : > { %v1530_v29 = vpack.i.bf16 %v555_v0, %v513_v50  ;;  %v756_v34 = vrot.slane %v1787_v17, 1  ;;  %v528_v36 = vrot.slane %v1753_v40, 2  ;;  %v379_v44 = vunpack.c.l.bf16 %v373_v35 }
  0x29   : > { %v1445_v23 = vpack.i.bf16 %v731_v20, %v689_v5  ;;  %v1505_v48 = vpack.i.bf16 %v1753_v40, %v1759_v43  ;;  %v568_v57 = vrot.slane %v1770_v55, 2 }
  0x2a   : > { %v1480_v39 = vpack.i.bf16 %v756_v34, %v717_v19  ;;  %v795_v54 = vrot.slane %v379_v44, 1 }
  0x2c   : > { %1356 = vrot.lane.b32.xlu2 %v1355_v27, %s1610_s15  ;;  %v510_v27 = vrot.slane %v1757_v42, 1  ;;  %v1540_v5 = vpack.i.bf16 %v795_v54, %v756_v34 }
  0x2d   : > { %1351 = vrot.lane.b32.xlu1 %v1350_v25, %s1609_s14  ;;  %1346 = vrot.lane.b32.xlu0 %v1345_v26, %s1609_s14  ;;  %v1798_v25 = vpack.i.bf16 %v1755_v41, %v1753_v40  ;;  %v1460_v26 = vpack.i.bf16 %v1787_v17, %v377_v61 }
  0x2e   : > { %v1465_v30 = vpack.i.bf16 %v511_v28, %v510_v27 }
  0x34   : > { %1371 = vrot.lane.b32.xlu2 %v1370_v33, %s1611_s28  ;;  %v527_v33 = vrot.slane %v1759_v43, 2  ;;  %v1525_v43 = vpack.i.bf16 %v512_v49, %v511_v28 }
  0x35   : > { %1366 = vrot.lane.b32.xlu1 %v1365_v31, %s1611_s28  ;;  %1361 = vrot.lane.b32.xlu0 %v1360_v32, %s1610_s15  ;;  %v1475_v31 = vpack.i.bf16 %v716_v18, %v715_v12  ;;  %v526_v32 = vrot.slane %v1757_v42, 2  ;;  %v770_v42 = vrot.slane %v379_v44, 7 }
  0x36   : > { %v1545_v49 = vpack.i.bf16 %v528_v36, %v527_v33 }
  0x37   : > { %v1485_v38 = vpack.i.bf16 %v527_v33, %v526_v32  ;;  %v1500_v47 = vpack.i.bf16 %v770_v42, %v731_v20 }
  0x3c   : > { %1386 = vrot.lane.b32.xlu2 %v1340_v21, %s1613_s16  ;;  %v1440_v21 = vpack.i.bf16 %v688_v2, %v687_v63 }
  0x3d   : > { %1381 = vrot.lane.b32.xlu1 %v1380_v37, %s1612_s13  ;;  %1376 = vrot.lane.b32.xlu0 %v1330_v22, %s1612_s13  ;;  %v1435_v22 = vpack.i.bf16 %v717_v19, %v716_v18  ;;  %v529_v37 = vrot.slane %v1755_v41, 2 }
  0x3f   : > { %v1490_v45 = vpack.i.bf16 %v529_v37, %v528_v36 }
  0x44   : > { %1401 = vrot.lane.b32.xlu2 %v1400_v59, %s1607_s9 }
  0x45   : > { %1396 = vrot.lane.b32.xlu1 %v1395_v51, %s1614_s17  ;;  %1391 = vrot.lane.b32.xlu0 %v1390_v52, %s1613_s16  ;;  %v1510_v51 = vpack.i.bf16 %v1770_v55, %v1755_v41  ;;  %v1520_v52 = vpack.i.bf16 %v379_v44, %v1787_v17 }
  0x4c   : > { %1416 = vrot.lane.b32.xlu2 %v1415_v10, %s1606_s8 }
  0x4d   : > { %1411 = vrot.lane.b32.xlu1 %v1410_v8, %s1606_s8  ;;  %1406 = vrot.lane.b32.xlu0 %v1405_v9, %s1607_s9  ;;  %s1615_s8 = smov 80   ;;  %s1616_s9 = smov 88  }
  0x54   : > { %1431 = vrot.lane.b32.xlu2 %v1430_v16, %s1609_s14 }
  0x55   : > { %1426 = vrot.lane.b32.xlu1 %v1425_v14, %s1608_s10  ;;  %1421 = vrot.lane.b32.xlu0 %v1420_v15, %s1608_s10  ;;  %s1617_s10 = smov 96  }
  0x5c   : > { %1446 = vrot.lane.b32.xlu2 %v1445_v23, %s1610_s15 }
  0x5d   : > { %1441 = vrot.lane.b32.xlu1 %v1440_v21, %s1610_s15  ;;  %1436 = vrot.lane.b32.xlu0 %v1435_v22, %s1609_s14  ;;  %s1618_s14 = smov 104   ;;  %s1619_s15 = smov 112  }
  0x64   : > { %1461 = vrot.lane.b32.xlu2 %v1460_v26, %s1611_s28 }
  0x65   : > { %1456 = vrot.lane.b32.xlu1 %v1455_v24, %s1611_s28  ;;  %1451 = vrot.lane.b32.xlu0 %v1798_v25, %s1614_s17 }
  0x6c   : > { %1476 = vrot.lane.b32.xlu2 %v1475_v31, %s1612_s13 }
  0x6d   : > { %1471 = vrot.lane.b32.xlu1 %v1400_v59, %s1615_s8  ;;  %1466 = vrot.lane.b32.xlu0 %v1465_v30, %s1615_s8 }
  0x74   : > { %1491 = vrot.lane.b32.xlu2 %v1490_v45, %s1616_s9 }
  0x75   : > { %1486 = vrot.lane.b32.xlu1 %v1485_v38, %s1616_s9  ;;  %1481 = vrot.lane.b32.xlu0 %v1480_v39, %s1612_s13 }
  0x76   : > { %v1317_v46 = vpop.permute.xlu2 %1316 }
  0x77   : > { %v1319_v58 = vunpack.i.h.bf16 %v1317_v46  ;;  %v1318_v59 = vunpack.i.l.bf16 %v1317_v46 }
  0x7c   : > { %1506 = vrot.lane.b32.xlu2 %v1505_v48, %s1617_s10 }
  0x7d   : > { %1501 = vrot.lane.b32.xlu1 %v1500_v47, %s1613_s16  ;;  %1496 = vrot.lane.b32.xlu0 %v1415_v10, %s1613_s16  ;;  %v1550_v10 = vpack.i.bf16 %v568_v57, %v529_v37  ;;  %s1181_s16 = sshll.u32 %s2156_s18, 1 }
  0x7e   : > { %v1322_v50 = vpop.permute.xlu2 %1321 }
  0x7f   : > { %v1324_v15 = vunpack.i.h.bf16 %v1322_v50  ;;  %v1323_v16 = vunpack.i.l.bf16 %v1322_v50 }
  0x84   : > { %1521 = vrot.lane.b32.xlu2 %v1520_v52, %s1614_s17 }
  0x85   : > { %1516 = vrot.lane.b32.xlu1 %v1425_v14, %s1614_s17  ;;  %1511 = vrot.lane.b32.xlu0 %v1510_v51, %s1617_s10  ;;  %s1182_s17 = sshll.u32 %s2150_s19, 3 }
  0x86   : > { %v1826_v53 = vpop.permute.xlu2 %1356  ;;  %s340_s10 = sadd.s32 %s1182_s17, %s1181_s16 }
  0x87   : > { %v1359_v30 = vunpack.i.h.bf16 %v1826_v53  ;;  %v1358_v31 = vunpack.i.l.bf16 %v1826_v53 }
  0x8c   : > { %1536 = vrot.lane.b32.xlu2 %v1435_v22, %s1615_s8  ;;  %v1560_v22 = vpack.i.bf16 %v1772_v56, %v1770_v55 }
  0x8d   : > { %1531 = vrot.lane.b32.xlu1 %v1530_v29, %s1618_s14  ;;  %1526 = vrot.lane.b32.xlu0 %v1525_v43, %s1618_s14  ;;  %s1183_s14 = sshll.u32 %s340_s10, 3 }
  0x8e   : > { %v1832_v2 = vpop.permute.xlu2 %1371  ;;  %s342_s27 = scalar_lea.vmem %s2138_s5, %s1183_s14 }
  0x8f   : > { %v1337_v60 = vpop.permute.xlu1 %1336  ;;  %v1327_v61 = vpop.permute.xlu0 %1326  ;;  %v1374_v42 = vunpack.i.h.bf16 %v1832_v2  ;;  %v1373_v46 = vunpack.i.l.bf16 %v1832_v2 }
  0x90   : > { %v1339_v62 = vunpack.i.h.bf16 %v1337_v60  ;;  %v1338_v63 = vunpack.i.l.bf16 %v1337_v60  ;;  %v1329_v0 = vunpack.i.h.bf16 %v1327_v61  ;;  %v1328_v1 = vunpack.i.l.bf16 %v1327_v61 }
  0x92   : > { %v596_v8 = vsel %vm594_vm0, %v1701_v4, %v1329_v0  ;;  %v595_v9 = vsel %vm594_vm0, %v1699_v3, %v1328_v1 }
  0x93   : > { %v601_v11 = vsel %vm599_vm1, %v596_v8, %v1339_v62  ;;  %v600_v12 = vsel %vm599_vm1, %v595_v9, %v1338_v63 }
  0x94   : > { %v605_v13 = vsel %vm604_vm2, %v600_v12, %v1318_v59  ;;  %v606_v14 = vsel %vm604_vm2, %v601_v11, %v1319_v58  ;;  %1551 = vrot.lane.b32.xlu2 %v1550_v10, %s1619_s15 }
  0x95   : > { %1546 = vrot.lane.b32.xlu1 %v1545_v49, %s1619_s15  ;;  %1541 = vrot.lane.b32.xlu0 %v1540_v5, %s1615_s8 }
  0x96   : > { %v1387_v21 = vpop.permute.xlu2 %1386 }
  0x97   : > { %v1342_v4 = vpop.permute.xlu1 %1341  ;;  %v1332_v17 = vpop.permute.xlu0 %1331  ;;  %v1389_v62 = vunpack.i.h.bf16 %v1387_v21  ;;  %v1388_v63 = vunpack.i.l.bf16 %v1387_v21 }
  0x98   : > { %v1344_v18 = vunpack.i.h.bf16 %v1342_v4  ;;  %v1343_v3 = vunpack.i.l.bf16 %v1342_v4  ;;  %v1334_v19 = vunpack.i.h.bf16 %v1332_v17  ;;  %v1333_v20 = vunpack.i.l.bf16 %v1332_v17 }
  0x9a   : > { %v598_v23 = vsel %vm594_vm0, %v1706_v7, %v1334_v19  ;;  %v597_v24 = vsel %vm594_vm0, %v1704_v6, %v1333_v20 }
  0x9b   : > { %v603_v26 = vsel %vm599_vm1, %v598_v23, %v1344_v18  ;;  %v602_v27 = vsel %vm599_vm1, %v597_v24, %v1343_v3 }
  0x9c   : > { %v607_v28 = vsel %vm604_vm2, %v602_v27, %v1323_v16  ;;  %v608_v29 = vsel %vm604_vm2, %v603_v26, %v1324_v15 }
  0x9d   : > { %1561 = vrot.lane.b32.xlu1 %v1560_v22, %s1620_s25  ;;  %1556 = vrot.lane.b32.xlu0 %v1798_v25, %s1620_s25 }
  0x9e   : > { %v1402_v39 = vpop.permute.xlu2 %1401 }
  0x9f   : > { %v1352_v7 = vpop.permute.xlu1 %1351  ;;  %v1347_v32 = vpop.permute.xlu0 %1346  ;;  %v1404_v24 = vunpack.i.h.bf16 %v1402_v39  ;;  %v1403_v26 = vunpack.i.l.bf16 %v1402_v39 }
  0xa0   : > { %v1354_v6 = vunpack.i.h.bf16 %v1352_v7  ;;  %v1353_v33 = vunpack.i.l.bf16 %v1352_v7  ;;  %v1349_v34 = vunpack.i.h.bf16 %v1347_v32  ;;  %v1348_v35 = vunpack.i.l.bf16 %v1347_v32 }
  0xa1   : > { %v809_v27 = vsel %vm594_vm0, %v1755_v41, %v1404_v24 }
  0xa2   : > { %v612_v36 = vsel %vm609_vm3, %v607_v28, %v1353_v33  ;;  %v613_v37 = vsel %vm609_vm3, %v608_v29, %v1354_v6  ;;  %v610_v38 = vsel %vm609_vm3, %v605_v13, %v1348_v35  ;;  %v611_v25 = vsel %vm609_vm3, %v606_v14, %v1349_v34 }
  0xa3   : > { %v615_v44 = vsel %vm614_vm4, %v610_v38, %v1358_v31  ;;  %v616_v45 = vsel %vm614_vm4, %v611_v25, %v1359_v30  ;;  %v808_v28 = vsel %vm594_vm0, %v1753_v40, %v1403_v26 }
  0xa6   : > { %v1870_v61 = vpop.permute.xlu2 %1416 }
  0xa7   : > { %v1367_v47 = vpop.permute.xlu1 %1366  ;;  %v1362_v48 = vpop.permute.xlu0 %1361  ;;  %v1419_v29 = vunpack.i.h.bf16 %v1870_v61 }
  0xa8   : > { %v1369_v50 = vunpack.i.h.bf16 %v1367_v47  ;;  %v1368_v51 = vunpack.i.l.bf16 %v1367_v47  ;;  %v1364_v52 = vunpack.i.h.bf16 %v1362_v48  ;;  %v1363_v53 = vunpack.i.l.bf16 %v1362_v48 }
  0xaa   : > { %v620_v43 = vsel %vm619_vm5, %v615_v44, %v1368_v51  ;;  %v621_v54 = vsel %vm619_vm5, %v616_v45, %v1369_v50  ;;  %v617_v57 = vsel %vm614_vm4, %v612_v36, %v1363_v53  ;;  %v618_v58 = vsel %vm614_vm4, %v613_v37, %v1364_v52  ;;  %v1250_v50 = vld [vmem:[%s2136_s3 + $0x38] sm:$0xff] }
  0xab   : > { %v622_v59 = vsel %vm619_vm5, %v617_v57, %v1373_v46  ;;  %v623_v60 = vsel %vm619_vm5, %v618_v58, %v1374_v42  ;;  %1004 = vmatpush.bf16.msra.mxu0 %v1250_v50  ;;  %v1248_v57 = vld [vmem:[%s2136_s3 + $0x28] sm:$0xff] }
  0xae   : > { %v1878_v15 = vpop.permute.xlu2 %1431 }
  0xaf   : > { %v1382_v0 = vpop.permute.xlu1 %1381  ;;  %v1377_v1 = vpop.permute.xlu0 %1376 }
  0xb0   : > { %v1384_v2 = vunpack.i.h.bf16 %v1382_v0  ;;  %v1383_v49 = vunpack.i.l.bf16 %v1382_v0  ;;  %v1379_v5 = vunpack.i.h.bf16 %v1377_v1  ;;  %v1378_v8 = vunpack.i.l.bf16 %v1377_v1  ;;  %v1247_v1 = vld [vmem:[%s2136_s3 + $0x20] sm:$0xff] }
  0xb2   : > { %v627_v9 = vsel %vm624_vm6, %v622_v59, %v1383_v49  ;;  %v628_v10 = vsel %vm624_vm6, %v623_v60, %v1384_v2  ;;  %v625_v11 = vsel %vm624_vm6, %v620_v43, %v1378_v8  ;;  %v626_v12 = vsel %vm624_vm6, %v621_v54, %v1379_v5  ;;  %v1249_v43 = vld [vmem:[%s2136_s3 + $0x30] sm:$0xff]  ;;  %v912_v54 = vld [vmem:[%s2136_s3 + $0x68] sm:$0xf]  ;;  %v1255_v2 = vld [vmem:[%s2136_s3 + $0x60] sm:$0xff] }
  0xb3   : > { %v630_v13 = vsel %vm629_vm7, %v625_v11, %v1388_v63  ;;  %v631_v14 = vsel %vm629_vm7, %v626_v12, %v1389_v62  ;;  %1005 = vmatpush.bf16.msra.mxu0 %v1249_v43  ;;  %v970_v58 = vunpack.c.l.b16 %v912_v54  ;;  %v1246_v49 = vld [vmem:[%s2136_s3 + $0x18] sm:$0xff]  ;;  %v1418_v11 = vunpack.i.l.bf16 %v1870_v61  ;;  %v1253_v61 = vld [vmem:[%s2136_s3 + $0x50] sm:$0xff] }
  0xb4   : > { %v1254_v5 = vld [vmem:[%s2136_s3 + $0x58] sm:$0xff] }
  0xb5   : > { %v984_v59 = vpack.c.b16 %v970_v58, %v970_v58 }
  0xb6   : > { %v1897_v33 = vpop.permute.xlu2 %1446 }
  0xb7   : > { %v1397_v16 = vpop.permute.xlu1 %1396  ;;  %v1392_v4 = vpop.permute.xlu0 %1391  ;;  %1006 = vmatpush.bf16.msra.mxu0 %v1248_v57  ;;  %v1002_v0 = vsel %vm864_vm9, %v984_v59, 0  ;;  %v1449_v24 = vunpack.i.h.bf16 %v1897_v33  ;;  %v1448_v26 = vunpack.i.l.bf16 %v1897_v33 }
  0xb8   : > { %v1399_v17 = vunpack.i.h.bf16 %v1397_v16  ;;  %v1398_v18 = vunpack.i.l.bf16 %v1397_v16  ;;  %v1394_v3 = vunpack.i.h.bf16 %v1392_v4  ;;  %v1393_v19 = vunpack.i.l.bf16 %v1392_v4  ;;  %1020 = vmatpush.bf16.msra.mxu1 %v1002_v0 }
  0xba   : > { %v1881_v20 = vsel %vm634_vm8, %v630_v13, %v1398_v18  ;;  %v1884_v21 = vsel %vm634_vm8, %v631_v14, %v1399_v17  ;;  %v1887_v22 = vsel %vm629_vm7, %v627_v9, %v1393_v19  ;;  %v1890_v23 = vsel %vm629_vm7, %v628_v10, %v1394_v3  ;;  %v1245_v18 = vld [vmem:[%s2136_s3 + $0x10] sm:$0xff] }
  0xbb   : > { %1007 = vmatpush.bf16.msra.mxu0 %v1247_v1  ;;  %v1434_v3 = vunpack.i.h.bf16 %v1878_v15  ;;  %v1433_v19 = vunpack.i.l.bf16 %v1878_v15 }
  0xbc   : > { %1021 = vmatpush.bf16.msra.mxu1 %v1255_v2 }
  0xbe   : > { %v1912_v45 = vpop.permute.xlu2 %1461 }
  0xbf   : > { %v1412_v30 = vpop.permute.xlu1 %1411  ;;  %v1407_v31 = vpop.permute.xlu0 %1406  ;;  %1008 = vmatpush.bf16.msra.mxu0 %v1246_v49 }
  0xc0   : > { %v1414_v7 = vunpack.i.h.bf16 %v1412_v30  ;;  %v1413_v32 = vunpack.i.l.bf16 %v1412_v30  ;;  %v1409_v6 = vunpack.i.h.bf16 %v1407_v31  ;;  %v1408_v8 = vunpack.i.l.bf16 %v1407_v31  ;;  %1022 = vmatpush.bf16.msra.mxu1 %v1254_v5 }
  0xc1   : > { %v1463_v30 = vunpack.i.l.bf16 %v1912_v45 }
  0xc2   : > { %v813_v34 = vsel %vm599_vm1, %v809_v27, %v1414_v7  ;;  %v1901_v35 = vsel %vm599_vm1, %v808_v28, %v1413_v32  ;;  %v811_v41 = vsel %vm594_vm0, %v1772_v56, %v1409_v6  ;;  %v810_v13 = vsel %vm594_vm0, %v1770_v55, %v1408_v8  ;;  %v1244_v7 = vld [vmem:[%s2136_s3 + $0x8] sm:$0xff] }
  0xc3   : > { %v815_v36 = vsel %vm599_vm1, %v811_v41, %v1419_v29  ;;  %v814_v55 = vsel %vm599_vm1, %v810_v13, %v1418_v11  ;;  %1009 = vmatpush.bf16.msra.mxu0 %v1245_v18  ;;  %v1464_v29 = vunpack.i.h.bf16 %v1912_v45  ;;  %v1252_v32 = vld [vmem:[%s2136_s3 + $0x48] sm:$0xff] }
  0xc4   : > { %1023 = vmatpush.bf16.msra.mxu1 %v1253_v61 }
  0xc6   : > { %v1918_v47 = vpop.permute.xlu2 %1476 }
  0xc7   : > { %v1427_v40 = vpop.permute.xlu1 %1426  ;;  %v1422_v37 = vpop.permute.xlu0 %1421  ;;  %v1478_v45 = vunpack.i.l.bf16 %v1918_v47  ;;  %1010 = vmatpush.bf16.msra.mxu0 %v1244_v7 }
  0xc8   : > { %v1429_v38 = vunpack.i.h.bf16 %v1427_v40  ;;  %v1424_v25 = vunpack.i.h.bf16 %v1422_v37  ;;  %v1428_v14 = vunpack.i.l.bf16 %v1427_v40  ;;  %v1423_v16 = vunpack.i.l.bf16 %v1422_v37  ;;  %1024 = vmatpush.bf16.msra.mxu1 %v1252_v32 }
  0xc9   : > { %v1479_v40 = vunpack.i.h.bf16 %v1918_v47 }
  0xca   : > { %v1907_v39 = vsel %vm604_vm2, %v815_v36, %v1429_v38  ;;  %v1910_v44 = vsel %vm604_vm2, %v813_v34, %v1424_v25  ;;  %v818_v27 = vsel %vm604_vm2, %v814_v55, %v1428_v14  ;;  %v816_v28 = vsel %vm604_vm2, %v1901_v35, %v1423_v16 }
  0xcb   : > { %v820_v37 = vsel %vm609_vm3, %v816_v28, %v1433_v19  ;;  %v821_v38 = vsel %vm609_vm3, %v1910_v44, %v1434_v3  ;;  %v1251_v44 = vld [vmem:[%s2136_s3 + $0x40] sm:$0xff] }
  0xcc   : > { %1025 = vmatpush.bf16.msra.mxu1 %v1251_v44 }
  0xce   : > { %v1927_v51 = vpop.permute.xlu2 %1491 }
  0xcf   : > { %v1914_v42 = vpop.permute.xlu1 %1441  ;;  %v1916_v46 = vpop.permute.xlu0 %1436  ;;  %v1494_v57 = vunpack.i.h.bf16 %v1927_v51  ;;  %v1493_v1 = vunpack.i.l.bf16 %v1927_v51 }
  0xd0   : > { %v1439_v4 = vunpack.i.h.bf16 %v1916_v46  ;;  %v1438_v17 = vunpack.i.l.bf16 %v1916_v46  ;;  %v1444_v6 = vunpack.i.h.bf16 %v1914_v42  ;;  %v1443_v33 = vunpack.i.l.bf16 %v1914_v42 }
  0xd2   : > { %v822_v34 = vsel %vm609_vm3, %v818_v27, %v1438_v17  ;;  %v823_v35 = vsel %vm609_vm3, %v1907_v39, %v1439_v4  ;;  %v1243_v39 = vld [vmem:[%s2136_s3] sm:$0xff]  ;;  %v824_v47 = vsel %vm614_vm4, %v820_v37, %v1443_v33  ;;  %v825_v43 = vsel %vm614_vm4, %v821_v38, %v1444_v6 }
  0xd3   : > { %v826_v42 = vsel %vm614_vm4, %v822_v34, %v1448_v26  ;;  %v827_v46 = vsel %vm614_vm4, %v823_v35, %v1449_v24  ;;  %1011 = vmatpush.bf16.msra.mxu0 %v1243_v39 }
  0xd4   : > { %v830_v2 = vsel %vm619_vm5, %v826_v42, %v1463_v30  ;;  %v831_v49 = vsel %vm619_vm5, %v827_v46, %v1464_v29 }
  0xd6   : > { %v1946_v63 = vpop.permute.xlu2 %1506 }
  0xd7   : > { %v1920_v56 = vpop.permute.xlu1 %1456  ;;  %v1922_v48 = vpop.permute.xlu0 %1451  ;;  %v1509_v13 = vunpack.i.h.bf16 %v1946_v63  ;;  %v1508_v14 = vunpack.i.l.bf16 %v1946_v63 }
  0xd8   : > { %v1459_v41 = vunpack.i.h.bf16 %v1920_v56  ;;  %v1458_v36 = vunpack.i.l.bf16 %v1920_v56  ;;  %v1453_v25 = vunpack.i.l.bf16 %v1922_v48  ;;  %v1454_v56 = vunpack.i.h.bf16 %v1922_v48 }
  0xda   : > { %v828_v48 = vsel %vm619_vm5, %v824_v47, %v1458_v36  ;;  %v829_v59 = vsel %vm619_vm5, %v825_v43, %v1459_v41  ;;  %v638_v8 = vsel %vm634_vm8, %v1890_v23, %v1454_v56 }
  0xdb   : > { %v832_v4 = vsel %vm624_vm6, %v828_v48, %v1478_v45 }
  0xde   : > { %v1966_v12 = vpop.permute.xlu2 %1521 }
  0xdf   : > { %v1929_v52 = vpop.permute.xlu1 %1471  ;;  %v1931_v53 = vpop.permute.xlu0 %1466  ;;  %v1524_v18 = vunpack.i.h.bf16 %v1966_v12  ;;  %v1523_v61 = vunpack.i.l.bf16 %v1966_v12 }
  0xe0   : > { %v1473_v50 = vunpack.i.l.bf16 %v1929_v52  ;;  %v1474_v54 = vunpack.i.h.bf16 %v1929_v52  ;;  %v1468_v0 = vunpack.i.l.bf16 %v1931_v53  ;;  %v637_v52 = vsel %vm634_vm8, %v1887_v22, %v1453_v25 }
  0xe1   : > { %v1469_v5 = vunpack.i.h.bf16 %v1931_v53  ;;  %v833_v22 = vsel %vm624_vm6, %v829_v59, %v1479_v40 }
  0xe2   : > { %v642_v11 = vsel %vm639_vm10, %v637_v52, %v1473_v50  ;;  %v643_v53 = vsel %vm639_vm10, %v638_v8, %v1474_v54  ;;  %v640_v23 = vsel %vm639_vm10, %v1881_v20, %v1468_v0 }
  0xe3   : > { %v641_v63 = vsel %vm639_vm10, %v1884_v21, %v1469_v5  ;;  %v647_v3 = vsel %vm644_vm11, %v642_v11, %v1493_v1  ;;  %v648_v24 = vsel %vm644_vm11, %v643_v53, %v1494_v57 }
  0xe6   : > { %v2025_v58 = vpop.permute.xlu2 %1536 }
  0xe7   : > { %v1942_v60 = vpop.permute.xlu1 %1486  ;;  %v1944_v62 = vpop.permute.xlu0 %1481  ;;  %v1539_v30 = vunpack.i.h.bf16 %v2025_v58  ;;  %v1538_v7 = vunpack.i.l.bf16 %v2025_v58 }
  0xe8   : > { %v1488_v17 = vunpack.i.l.bf16 %v1942_v60  ;;  %v1489_v19 = vunpack.i.h.bf16 %v1942_v60  ;;  %v1483_v55 = vunpack.i.l.bf16 %v1944_v62  ;;  %v1484_v26 = vunpack.i.h.bf16 %v1944_v62 }
  0xea   : > { %v645_v12 = vsel %vm644_vm11, %v640_v23, %v1488_v17  ;;  %v646_v62 = vsel %vm644_vm11, %v641_v63, %v1489_v19  ;;  %v834_v32 = vsel %vm624_vm6, %v830_v2, %v1483_v55 }
  0xeb   : > { %v650_v34 = vsel %vm649_vm12, %v645_v12, %v1508_v14  ;;  %v651_v58 = vsel %vm649_vm12, %v646_v62, %v1509_v13 }
  0xee   : > { %v1552_v33 = vpop.permute.xlu2 %1551 }
  0xef   : > { %v1961_v9 = vpop.permute.xlu1 %1501  ;;  %v1963_v10 = vpop.permute.xlu0 %1496  ;;  %v1554_v39 = vunpack.i.h.bf16 %v1552_v33  ;;  %v1553_v42 = vunpack.i.l.bf16 %v1552_v33 }
  0xf0   : > { %v1499_v20 = vunpack.i.h.bf16 %v1963_v10  ;;  %v1498_v27 = vunpack.i.l.bf16 %v1963_v10  ;;  %v1504_v29 = vunpack.i.h.bf16 %v1961_v9  ;;  %v1503_v60 = vunpack.i.l.bf16 %v1961_v9 }
  0xf2   : > { %v836_v35 = vsel %vm629_vm7, %v832_v4, %v1498_v27  ;;  %v837_v9 = vsel %vm629_vm7, %v833_v22, %v1499_v20  ;;  %v838_v45 = vsel %vm629_vm7, %v834_v32, %v1503_v60 }
  0xf3   : > { %v842_v0 = vsel %vm634_vm8, %v838_v45, %v1523_v61 }
  0xf7   : > { %v1988_v31 = vpop.permute.xlu1 %1516  ;;  %v1990_v15 = vpop.permute.xlu0 %1511 }
  0xf8   : > { %v1519_v28 = vunpack.i.h.bf16 %v1988_v31  ;;  %v1518_v21 = vunpack.i.l.bf16 %v1988_v31  ;;  %v1514_v10 = vunpack.i.h.bf16 %v1990_v15  ;;  %v1513_v6 = vunpack.i.l.bf16 %v1990_v15 }
  0xf9   : > { %v835_v31 = vsel %vm624_vm6, %v831_v49, %v1484_v26 }
  0xfa   : > { %v840_v40 = vsel %vm634_vm8, %v836_v35, %v1518_v21  ;;  %v841_v37 = vsel %vm634_vm8, %v837_v9, %v1519_v28  ;;  %v839_v15 = vsel %vm629_vm7, %v835_v31, %v1504_v29  ;;  %v652_v46 = vsel %vm649_vm12, %v647_v3, %v1513_v6 }
  0xfb   : > { %v653_v56 = vsel %vm649_vm12, %v648_v24, %v1514_v10  ;;  %v844_v47 = vsel %vm639_vm10, %v840_v40, %v1538_v7  ;;  %v845_v43 = vsel %vm639_vm10, %v841_v37, %v1539_v30  ;;  %v843_v1 = vsel %vm634_vm8, %v839_v15, %v1524_v18  ;;  %v1565_v10 = vld [vmem:[%s2137_s4] ss:$0 sm:$0xff] }
  0xfc   : > { %v1184_v52 = vrot.slane %v844_v47, 5  ;;  %v1185_v5 = vrot.slane %v845_v43, 5 }
  0xff   : > { %v1532_v51 = vpop.permute.xlu1 %1531  ;;  %v2041_v16 = vpop.permute.xlu0 %1526 }
 0x100   : > { %v1534_v38 = vunpack.i.h.bf16 %v1532_v51  ;;  %v1533_v25 = vunpack.i.l.bf16 %v1532_v51  ;;  %v1529_v54 = vunpack.i.h.bf16 %v2041_v16  ;;  %v1528_v57 = vunpack.i.l.bf16 %v2041_v16 }
 0x102   : > { %v657_v48 = vsel %vm654_vm13, %v652_v46, %v1533_v25  ;;  %v658_v59 = vsel %vm654_vm13, %v653_v56, %v1534_v38  ;;  %v655_v14 = vsel %vm654_vm13, %v650_v34, %v1528_v57  ;;  %v656_v13 = vsel %vm654_vm13, %v651_v58, %v1529_v54 }
 0x103   : > { %v662_v51 = vsel %vm659_vm14, %v657_v48, %v1553_v42  ;;  %v663_v16 = vsel %vm659_vm14, %v658_v59, %v1554_v39 }
 0x107   : > { %v1547_v41 = vpop.permute.xlu1 %1546  ;;  %v1542_v36 = vpop.permute.xlu0 %1541 }
 0x108   : > { %v1544_v50 = vunpack.i.h.bf16 %v1542_v36  ;;  %v1543_v44 = vunpack.i.l.bf16 %v1542_v36  ;;  %v1549_v2 = vunpack.i.h.bf16 %v1547_v41  ;;  %v1548_v49 = vunpack.i.l.bf16 %v1547_v41 }
 0x10a   : > { %v846_v8 = vsel %vm639_vm10, %v842_v0, %v1543_v44  ;;  %v847_v11 = vsel %vm639_vm10, %v843_v1, %v1544_v50  ;;  %v660_v61 = vsel %vm659_vm14, %v655_v14, %v1548_v49  ;;  %v661_v63 = vsel %vm659_vm14, %v656_v13, %v1549_v2 }
 0x10b   : > { %v1186_v3 = vrot.slane %v846_v8, 5  ;;  %v1187_v19 = vrot.slane %v847_v11, 5 }
 0x10f   : > { %v1562_v4 = vpop.permute.xlu1 %1561  ;;  %v1557_v22 = vpop.permute.xlu0 %1556 }
 0x110   : > { %v1564_v53 = vunpack.i.h.bf16 %v1562_v4  ;;  %v1563_v17 = vunpack.i.l.bf16 %v1562_v4  ;;  %v1559_v23 = vunpack.i.h.bf16 %v1557_v22  ;;  %v1558_v18 = vunpack.i.l.bf16 %v1557_v22 }
 0x112   : > { %v667_v55 = vsel %vm664_vm15, %v662_v51, %v1563_v17  ;;  %v668_v24 = vsel %vm664_vm15, %v663_v16, %v1564_v53  ;;  %v665_v26 = vsel %vm664_vm15, %v660_v61, %v1558_v18  ;;  %v666_v20 = vsel %vm664_vm15, %v661_v63, %v1559_v23 }
 0x113   : > { %v867_v27 = vsel %vm864_vm9, %v667_v55, %v1186_v3  ;;  %v868_v12 = vsel %vm864_vm9, %v668_v24, %v1187_v19  ;;  %v865_v28 = vsel %vm864_vm9, %v665_v26, %v1184_v52  ;;  %v866_v21 = vsel %vm864_vm9, %v666_v20, %v1185_v5 }
 0x114   : > { %873 = vst [vmem:[#allocation1 + $0x10] ss:$2 sm:$0xff] %v867_v27 }
 0x115   : > { %875 = vst [vmem:[#allocation1 + $0x11] ss:$2 sm:$0xff] %v868_v12 }
 0x116   : > { %869 = vst [vmem:[#allocation1] ss:$2 sm:$0xff] %v865_v28 }
 0x117   : > { %871 = vst [vmem:[#allocation1 + $0x1] ss:$2 sm:$0xff] %v866_v21 }
 0x11c   : > { %v878_v29 = vld.sshfl [vmem:[#allocation1 + $0x10] sm:$0xff pattern:$0x75316420]  ;;  %v879_v60 = vld.sshfl [vmem:[#allocation1 + $0x18] sm:$0xff pattern:$0x75316420] }
 0x11e   : > { %v876_v30 = vld.sshfl [vmem:[#allocation1] sm:$0xff pattern:$0x75316420]  ;;  %v877_v7 = vld.sshfl [vmem:[#allocation1 + $0x8] sm:$0xff pattern:$0x75316420] }
 0x11f   : > { %v884_v62 = vpack.c.bf16 %v878_v29, %v876_v30  ;;  %v885_v32 = vpack.c.bf16 %v879_v60, %v877_v7 }
 0x121   : > { %1012 = vmatmul.bf16.vlgmr.msra.gmra.mxu0 %v884_v62  ;;  %1240 = vmatmul.msk.bf16.vlgmr.msra.gmra.mxu1 %vm644_vm11, %v885_v32 }
 0x19e   : > { %v1013_v6 = vpop.f32.mrf.mxu0  ;;  %v1027_v33 = vpop.f32.mrf.mxu1 }
 0x19f   : > { %v1014_v31 = vadd.f32 %v1565_v10, %v1013_v6 }
 0x1a1   : > { %v1028_v34 = vadd.f32 %v1027_v33, %v1014_v31 }
 0x1a3   : > { %v1032_v35 = vmax.f32 %v1028_v34, 0.0 }
 0x1a5   : > { %1034 = vst.msk [vmem:[%s342_s27] sm:$0xff] %vm599_vm1, %v1032_v35 }
 0x1a6   : > { %v1015_v9 = vpop.f32.mrf.mxu0  ;;  %v1029_v36 = vpop.f32.mrf.mxu1 }
 0x1a7   : > { %v1016_v41 = vadd.f32 %v1565_v10, %v1015_v9 }
 0x1a9   : > { %v1030_v40 = vadd.f32 %v1029_v36, %v1016_v41 }
 0x1ab   : > { %v1033_v37 = vmax.f32 %v1030_v40, 0.0 }
 0x1ad   : > { %1035 = vst.msk [vmem:[%s342_s27 + $0x8] sm:$0xff] %vm599_vm1, %v1033_v37 }
 0x1ae PF: > { %s15_s22 = sadd.s32 1, %s1604_s22   ;;  %s2139_s18 = smov %s1596_s20 }
 0x1af   : > { %p12_p10 = scmp.ge.s32.totalorder %s15_s22, 10   ;;  %s2140_s19 = smov %s1600_s21 }
 0x1b0   : > { %s2141_s20 = smov %s2144_s23  ;;  %s2142_s21 = smov %s2148_s24 }
 0x1b1   :  { %14 = sbr.rel (!%p12_p10) target bundleno = 3 (0x3), region = 79 }

// kernel: axis_aligned_conv_gaussian_forward.11
= control target key start
LH: loop header
LB: loop body
LE: loop exit
PB: predicated region body
PF: predicated region fallthrough
CT: control target
= control target key end

     0   :  { %11 = vsyncpa [#allocation3], 0  ;;  %vm35_vm0 = vcmask 130048   ;;  %v265_v7 = vmov 64.0   ;;  %s385_s0 = inlined_call_operand.vmem [shape: f32[2,64,16], index: 0, kind: input, shape index: {}]   ;;  %s386_s1 = inlined_call_operand.vmem [shape: f32[16,12], index: 1, kind: input, shape index: {}]   ;;  %s387_s2 = inlined_call_operand.vmem [shape: f32[1,12], index: 2, kind: input, shape index: {}]   ;;  %s388_s3 = inlined_call_operand.hbm [shape: f32[2,16], index: 3, kind: output, shape index: {0}]   ;;  %s389_s4 = inlined_call_operand.hbm [shape: f32[2,6], index: 4, kind: output, shape index: {1}]   ;;  %s390_s5 = inlined_call_operand.hbm [shape: f32[2,6], index: 5, kind: output, shape index: {2}]  }
   0x1   :  { %v95_v0 = vld [vmem:[%s386_s1 + $0x8] sm:$0xff]  ;;  %v94_v1 = vld [vmem:[%s386_s1] sm:$0xff]  ;;  %v21_v4 = vld [vmem:[%s385_s0 + $0x10] sm:$0xff]  ;;  %185 = vrcp.f32 %v265_v7 }
   0x2   :  { %v19_v2 = vld [vmem:[%s385_s0] sm:$0xff]  ;;  %116 = vmatpush.msra.mxu0 %v95_v0  ;;  %v20_v3 = vld [vmem:[%s385_s0 + $0x8] sm:$0xff]  ;;  %v22_v5 = vld [vmem:[%s385_s0 + $0x18] sm:$0xff]  ;;  %v39_v9 = vsel %vm35_vm0, %v21_v4, 0.0 }
   0x3   :  { %v36_v6 = vsel %vm35_vm0, %v19_v2, 0.0  ;;  %v37_v8 = vsel %vm35_vm0, %v20_v3, 0.0  ;;  %v23_v10 = vld [vmem:[%s385_s0 + $0x20] sm:$0xff]  ;;  %v28_v12 = vld [vmem:[%s385_s0 + $0x48] sm:$0xff]  ;;  %v29_v14 = vld [vmem:[%s385_s0 + $0x50] sm:$0xff]  ;;  %v41_v16 = vsel %vm35_vm0, %v22_v5, 0.0 }
   0x4   :  { %117 = vmatpush.msra.mxu0 %v94_v1  ;;  %v27_v11 = vld [vmem:[%s385_s0 + $0x40] sm:$0xff]  ;;  %v38_v13 = vadd.f32 %v37_v8, %v36_v6  ;;  %v30_v15 = vld [vmem:[%s385_s0 + $0x58] sm:$0xff]  ;;  %v58_v18 = vsel %vm35_vm0, %v28_v12, 0.0  ;;  %v24_v19 = vld [vmem:[%s385_s0 + $0x28] sm:$0xff]  ;;  %v60_v23 = vsel %vm35_vm0, %v29_v14, 0.0  ;;  %v43_v24 = vsel %vm35_vm0, %v23_v10, 0.0 }
   0x5   :  { %v57_v17 = vsel %vm35_vm0, %v27_v11, 0.0  ;;  %v31_v20 = vld [vmem:[%s385_s0 + $0x60] sm:$0xff]  ;;  %v62_v25 = vsel %vm35_vm0, %v30_v15, 0.0  ;;  %v25_v27 = vld [vmem:[%s385_s0 + $0x30] sm:$0xff]  ;;  %v32_v28 = vld [vmem:[%s385_s0 + $0x68] sm:$0xff] }
   0x6   :  { %v40_v21 = vadd.f32 %v39_v9, %v38_v13  ;;  %v59_v22 = vadd.f32 %v58_v18, %v57_v17 }
   0x7   :  { %v186_v26 = vpop.eup %185 }
   0x8   :  { %v42_v29 = vadd.f32 %v41_v16, %v40_v21  ;;  %v61_v30 = vadd.f32 %v60_v23, %v59_v22 }
   0x9   :  { %12 = vsyncpa [#allocation5], 0  ;;  %v45_v31 = vsel %vm35_vm0, %v24_v19, 0.0  ;;  %v64_v32 = vsel %vm35_vm0, %v31_v20, 0.0  ;;  %v26_v33 = vld [vmem:[%s385_s0 + $0x38] sm:$0xff]  ;;  %v33_v34 = vld [vmem:[%s385_s0 + $0x70] sm:$0xff]  ;;  %vm83_vm1 = vweird.f32 %v186_v26 }
   0xa   :  { %v44_v35 = vadd.f32 %v43_v24, %v42_v29  ;;  %v63_v36 = vadd.f32 %v62_v25, %v61_v30  ;;  %v47_v37 = vsel %vm35_vm0, %v25_v27, 0.0  ;;  %v66_v38 = vsel %vm35_vm0, %v32_v28, 0.0  ;;  %v34_v40 = vld [vmem:[%s385_s0 + $0x78] sm:$0xff]  ;;  %v184_v6 = vld [vmem:[%s387_s2] ss:$0 sm:$0xff]  ;;  %s266_s29 = smov [#allocation4]  }
   0xb   :  { %v79_v39 = vmul.f32 64.0, %v186_v26  ;;  %v49_v43 = vsel %vm35_vm0, %v26_v33, 0.0  ;;  %v68_v44 = vsel %vm35_vm0, %v33_v34, 0.0  ;;  %v70_v47 = vsel %vm35_vm0, %v34_v40, 0.0  ;;  %s147_s1 = sshll.u32 %s266_s29, 4  ;;  %s149_s7 = sshll.u32 %s389_s4, 4  ;;  %s148_s1 = int_to_ptr.vmem [resolvable:$true] %s147_s1  ;;  %s150_s7 = int_to_ptr.hbm [resolvable:$true] %s149_s7 }
   0xc   :  { %v46_v41 = vadd.f32 %v45_v31, %v44_v35  ;;  %v65_v42 = vadd.f32 %v64_v32, %v63_v36  ;;  %vm89_vm2 = vcmask 1041409   ;;  %vm122_vm3 = vcmask 41984   ;;  %s267_s8 = smov 122   ;;  %s268_s2 = smov [#allocation2]  }
   0xd   :  { %v80_v48 = vsub.f32 1.0, %v79_v39  ;;  %s136_s9 = sshll.u32 %s268_s2, 4  ;;  %s138_s12 = sshll.u32 %s388_s3, 4  ;;  %vm92_vm4 = vcmask 123904   ;;  %s137_s9 = int_to_ptr.vmem [resolvable:$true] %s136_s9  ;;  %s139_s12 = int_to_ptr.hbm [resolvable:$true] %s138_s12 }
   0xe   :  { %v48_v45 = vadd.f32 %v47_v37, %v46_v41  ;;  %v67_v46 = vadd.f32 %v66_v38, %v65_v42  ;;  %s269_s4 = smov [#allocation6]   ;;  %s160_s16 = sshll.u32 %s390_s5, 4  ;;  %s161_s16 = int_to_ptr.hbm [resolvable:$true] %s160_s16 }
   0xf   :  { %v81_v53 = vmul.f32 %v186_v26, %v80_v48  ;;  %s158_s13 = sshll.u32 %s269_s4, 4  ;;  %s159_s13 = int_to_ptr.vmem [resolvable:$true] %s158_s13 }
  0x10   :  { %v50_v49 = vadd.f32 %v49_v43, %v48_v45  ;;  %v69_v50 = vadd.f32 %v68_v44, %v67_v46 }
  0x11   :  { %v82_v58 = vadd.f32 %v186_v26, %v81_v53 }
  0x12   :  { %v51_v51 = vrot.slane %v50_v49, 4  ;;  %v71_v52 = vadd.f32 %v70_v47, %v69_v50 }
  0x13   :  { %v84_v63 = vsel %vm83_vm1, %v186_v26, %v82_v58 }
  0x14   :  { %v52_v54 = vadd.f32 %v51_v51, %v50_v49  ;;  %v72_v55 = vrot.slane %v71_v52, 4 }
  0x16   :  { %v53_v56 = vrot.slane %v52_v54, 2  ;;  %v73_v57 = vadd.f32 %v72_v55, %v71_v52 }
  0x18   :  { %v54_v59 = vadd.f32 %v53_v56, %v52_v54  ;;  %v74_v60 = vrot.slane %v73_v57, 2 }
  0x1a   :  { %v55_v61 = vrot.slane %v54_v59, 1  ;;  %v75_v62 = vadd.f32 %v74_v60, %v73_v57 }
  0x1c   :  { %v56_v0 = vadd.f32 %v55_v61, %v54_v59  ;;  %v76_v1 = vrot.slane %v75_v62, 1 }
  0x1e   :  { %v77_v2 = vadd.f32 %v76_v1, %v75_v62  ;;  %v85_v3 = vmul.f32 %v84_v63, %v56_v0 }
  0x20   :  { %v86_v4 = vmul.f32 %v84_v63, %v77_v2 }
  0x22   :  { %v90_v5 = vsel %vm89_vm2, %v86_v4, %v85_v3 }
  0x23   :  { %178 = vmatmul.msk.f32.vlgmr.msra.gmra.mxu0 %vm35_vm0, %v90_v5  ;;  %93 = vst.msk [vmem:[#allocation2] sm:$0x3] %vm92_vm4, %v90_v5 }
  0x24   :  { %141 = dma.vmem_to_hbm [thread:$0]  %s137_s9, 32, %s139_s12, [#allocation3]  }
  0xa0   :  { %v119_v7 = vpop.f32.mrf.mxu0 }
  0xa1   :  { %v120_v8 = vadd.f32 %v184_v6, %v119_v7 }
  0xa3   :  { %v124_v9 = vmul.f32 1.442695, %v120_v8  ;;  %123 = vst.msk [vmem:[#allocation4] sm:$0x3] %vm122_vm3, %v120_v8 }
  0xa4   :  { %152 = dma.vmem_to_hbm [thread:$0]  %s148_s1, 32, %s150_s7, [#allocation5]  }
  0xa5   :  { %187 = vpow2.f32 %v124_v9 }
  0xab   :  { %v188_v10 = vpop.eup %187 }
  0xac   :  { %127 = vrot.lane.b32.xlu0 %v188_v10, %s267_s8 }
 0x11e   :  { %v128_v11 = vpop.permute.xlu0 %127 }
 0x11f   :  { %130 = vst.msk [vmem:[#allocation6] sm:$0x3] %vm122_vm3, %v128_v11 }
 0x120   :  { %163 = dma.vmem_to_hbm [thread:$0]  %s159_s13, 32, %s161_s16, [#allocation5]  }
 0x121   :  { %261 = dma.done.wait [#allocation3], 32  }
 0x122   :  { %262 = vsyncadd [#allocation3], 4294967264 }
 0x123   :  { %263 = dma.done.wait [#allocation5], 64  }
 0x124   :  { %264 = vsyncadd [#allocation5], 4294967232 }
 0x125   :  { %176 = vsyncpa [#allocation3], 1 }
 0x126   :  { %177 = vsyncpa [#allocation5], 1 }

// kernel: axis_aligned_conv_gaussian_forward.10
= control target key start
LH: loop header
LB: loop body
LE: loop exit
PB: predicated region body
PF: predicated region fallthrough
CT: control target
= control target key end

     0   :  { %s1824_s18 = smov 0   ;;  %s1826_s19 = smov 0   ;;  %s2436_s0 = inlined_call_operand.vmem [shape: bf16[2,6,6,6,16], index: 0, kind: input, shape index: {}, may-alias: {0,1,2}]   ;;  %s2437_s1 = inlined_call_operand.vmem [shape: bf16[2,6,6,6,16], index: 1, kind: input, shape index: {}, may-alias: {0,1,2}]   ;;  %s2438_s2 = inlined_call_operand.vmem [shape: bf16[2,6,6,6,16], index: 2, kind: input, shape index: {}, may-alias: {0,1,2}]   ;;  %s2439_s3 = inlined_call_operand.vmem [shape: bf16[432,16], index: 3, kind: input, shape index: {}]   ;;  %s2440_s4 = inlined_call_operand.vmem [shape: f32[1,16], index: 4, kind: input, shape index: {}]   ;;  %s2441_s5 = inlined_call_operand.vmem [shape: f32[2,4,16,16], index: 5, kind: output, shape index: {}]  }
   0x1   :  { %s1828_s20 = smov 0   ;;  %s1830_s21 = smov 0  }
   0x2   :  { %s1832_s22 = smov 0  }
   0x3 LB: > { %s24_s23 = sadd.s32 1, %s1777_s20  ;;  %s27_s24 = sadd.s32 1, %s1781_s21  ;;  %s1785_s22 = sphi %s1832_s22, %s15_s22   ;;  %s1781_s21 = sphi %s1830_s21, %s2445_s21   ;;  %s1777_s20 = sphi %s1828_s20, %s2444_s20   ;;  %s1773_s19 = sphi %s1826_s19, %s2443_s19   ;;  %s1769_s18 = sphi %s1824_s18, %s2442_s18  }
   0x4   : > { %p25_p0 = scmp.ge.s32.totalorder %s24_s23, 4  ;;  %p1316_p1 = scmp.ge.s32.totalorder %s1785_s22, 1 }
   0x5   : > { %p247_p2 = scmp.lt.s32.totalorder %s1785_s22, 9 }
   0x6   : > { %s2447_s23 = smov (%p25_p0, %s24_s23), 0  ;;  %s2449_s24 = smov (!%p25_p0, %s27_s24), %s1781_s21 }
   0x7   : > { %p248_p3 = pnand %p1316_p1, %p247_p2  ;;  %p29_p4 = scmp.ge.s32.totalorder %s2449_s24, 2 }
   0x8   : > { %p303_p5 = scmp.lt.s32.totalorder (!%p248_p3), %s1773_s19, 1  ;;  %p305_p6 = scmp.lt.s32.totalorder (!%p248_p3), %s1769_s18, 5 }
   0x9   : > { %s2451_s24 = smov (%p29_p4, %s2449_s24), 0  ;;  %251 = sbr.rel (%p248_p3) target bundleno = 425 (0x1a9), region = 40 }
   0xa   : > { %s323_s30 = sadd.s32 (!%p248_p3), 2, %s1769_s18  ;;  %s312_s9 = sadd.s32 (!%p248_p3), 1, %s1769_s18 }
   0xb   : > { %p326_p7 = scmp.lt.s32.totalorder (!%p248_p3), %s323_s30, 5  ;;  %p315_p8 = scmp.lt.s32.totalorder (!%p248_p3), %s312_s9, 5 }
   0xc   : > { %s1787_s10 = smov (!%p248_p3), 48   ;;  %s1788_s11 = smov (!%p248_p3), 32  }
   0xd   : > { %s1789_s12 = smov (!%p248_p3), 16   ;;  %p336_p9 = scmp.lt.s32.totalorder (!%p248_p3), %s1769_s18, 3 }
   0xe   : > { %s2453_s19 = smov (!%p303_p5, %s1773_s19), 1  ;;  %s2455_s30 = smov (!%p326_p7, %s323_s30), 5  ;;  %vm586_vm0 = vcmask 130048   ;;  %vm591_vm1 = vcmask 261120   ;;  %vm596_vm2 = vcmask 392192   ;;  %vm601_vm3 = vcmask 523264  }
   0xf   : > { %s306_s25 = scalar_select %p305_p6, %s1769_s18, 5  ;;  %vm606_vm4 = vcmask 654336   ;;  %vm611_vm5 = vcmask 785408   ;;  %vm616_vm6 = vcmask 916480   ;;  %vm848_vm7 = vcmask 1043456  }
  0x10   : > { %s1861_s26 = smul.u32 36, %s2453_s19  ;;  %s2457_s9 = smov (!%p315_p8, %s312_s9), 5 }
  0x11   : > { %s1465_s27 = smul.u32 6, %s306_s25  ;;  %s2459_s18 = smov (!%p336_p9, %s1769_s18), 3 }
  0x12   : > { %s1468_s13 = smul.u32 6, %s2455_s30 }
  0x13   : > { %s309_s28 = sadd.s32 %s1861_s26, %s1465_s27  ;;  %s1467_s14 = smul.u32 6, %s2457_s9 }
  0x14   : > { %s1317_s29 = sshll.u32 %s309_s28, 2  ;;  %s330_s15 = sadd.s32 %s1468_s13, %s1861_s26 }
  0x15   : > { %s1868_s8 = scalar_lea.vmem %s2436_s0, %s1317_s29  ;;  %s319_s16 = sadd.s32 %s1467_s14, %s1861_s26 }
  0x16   : > { %v345_v0 = vld [vmem:[%s1868_s8 + $0x4] sm:$0x7]  ;;  %v346_v1 = vld [vmem:[%s1868_s8 + $0x8] sm:$0x7]  ;;  %v344_v2 = vld [vmem:[%s1868_s8] sm:$0x7] }
  0x17   : > { %v1874_v3 = vunpack.c.l.bf16 %v345_v0  ;;  %v1876_v4 = vunpack.c.l.bf16 %v346_v1  ;;  %v1878_v5 = vunpack.c.l.bf16 %v344_v2  ;;  %v347_v6 = vld [vmem:[%s1868_s8 + $0xc] sm:$0x7]  ;;  %v348_v7 = vld [vmem:[%s1868_s8 + $0x10] sm:$0x7]  ;;  %s1319_s17 = sshll.u32 %s330_s15, 2  ;;  %s1318_s25 = sshll.u32 %s319_s16, 2 }
  0x18   : > { %v1882_v8 = vunpack.c.l.bf16 %v347_v6  ;;  %v1891_v15 = vunpack.c.l.bf16 %v348_v7  ;;  %v349_v26 = vld [vmem:[%s1868_s8 + $0x14] sm:$0x7]  ;;  %s1923_s29 = scalar_lea.vmem %s2438_s2, %s1319_s17  ;;  %s1790_s26 = smov 80  }
  0x19   : > { %v1516_v9 = vpack.i.bf16 %v1876_v4, %v1874_v3  ;;  %v400_v10 = vrot.slane %v1878_v5, 2  ;;  %v401_v11 = vrot.slane %v1874_v3, 2  ;;  %v384_v12 = vrot.slane %v1878_v5, 1  ;;  %s1931_s7 = scalar_lea.vmem %s2437_s1, %s1318_s25  ;;  %v368_v30 = vld [vmem:[%s1923_s29] sm:$0x7]  ;;  %s1791_s8 = smov 64  }
  0x1a   : > { %v385_v13 = vrot.slane %v1874_v3, 1  ;;  %v1895_v17 = vrot.slane %v1876_v4, 2  ;;  %v1898_v18 = vrot.slane %v1882_v8, 2  ;;  %v386_v19 = vrot.slane %v1876_v4, 1  ;;  %v369_v31 = vld [vmem:[%s1923_s29 + $0x4] sm:$0x7] }
  0x1b   : > { %1517 = vrot.lane.b32.xlu2 %v1516_v9, %s1787_s10  ;;  %v1536_v14 = vpack.i.bf16 %v401_v11, %v400_v10  ;;  %v387_v20 = vrot.slane %v1882_v8, 1  ;;  %v1521_v21 = vpack.i.bf16 %v1891_v15, %v1882_v8  ;;  %v429_v24 = vrot.slane %v1891_v15, 1  ;;  %v360_v33 = vld [vmem:[%s1931_s7 + $0x10] sm:$0x7]  ;;  %v361_v34 = vld [vmem:[%s1931_s7 + $0x14] sm:$0x7] }
  0x1c   : > { %v1526_v16 = vpack.i.bf16 %v385_v13, %v384_v12  ;;  %v1541_v22 = vpack.i.bf16 %v1898_v18, %v1895_v17  ;;  %v1556_v25 = vpack.i.bf16 %v1895_v17, %v401_v11  ;;  %v1546_v28 = vpack.i.bf16 %v386_v19, %v385_v13  ;;  %v358_v38 = vld [vmem:[%s1931_s7 + $0x8] sm:$0x7]  ;;  %v359_v39 = vld [vmem:[%s1931_s7 + $0xc] sm:$0x7]  ;;  %s1792_s9 = smov 96   ;;  %s1320_s13 = sshll.u32 %s2459_s18, 1 }
  0x1d   : > { %1537 = vrot.lane.b32.xlu1 %v1536_v14, %s1788_s11  ;;  %v1907_v23 = vpack.i.bf16 %v387_v20, %v386_v19  ;;  %v1551_v27 = vpack.i.bf16 %v429_v24, %v387_v20  ;;  %v1926_v29 = vunpack.c.l.bf16 %v349_v26  ;;  %v442_v32 = vrot.slane %v1891_v15, 2  ;;  %v370_v53 = vld [vmem:[%s1923_s29 + $0x8] sm:$0x7]  ;;  %v371_v54 = vld [vmem:[%s1923_s29 + $0xc] sm:$0x7]  ;;  %s1321_s14 = sshll.u32 %s2453_s19, 3 }
  0x1e   : > { %1527 = vrot.lane.b32.xlu0 %v1526_v16, %s1789_s12  ;;  %v374_v36 = vunpack.c.l.bf16 %v368_v30  ;;  %v1942_v37 = vunpack.c.l.bf16 %v369_v31  ;;  %v1566_v40 = vpack.i.bf16 %v1882_v8, %v1876_v4  ;;  %v1948_v41 = vunpack.c.l.bf16 %v360_v33  ;;  %v356_v57 = vld [vmem:[%s1931_s7] sm:$0x7]  ;;  %v357_v58 = vld [vmem:[%s1931_s7 + $0x4] sm:$0x7]  ;;  %v372_v30 = vld [vmem:[%s1923_s29 + $0x10] sm:$0x7]  ;;  %s340_s15 = sadd.s32 %s1321_s14, %s1320_s13 }
  0x1f   : > { %v1571_v35 = vpack.i.bf16 %v1926_v29, %v1891_v15  ;;  %v1950_v42 = vunpack.c.l.bf16 %v361_v34  ;;  %v1561_v43 = vpack.i.bf16 %v442_v32, %v1898_v18  ;;  %v1955_v44 = vunpack.c.l.bf16 %v358_v38  ;;  %v1454_v15 = vld [vmem:[%s2439_s3 + $0x80] sm:$0xff]  ;;  %s1322_s16 = sshll.u32 %s340_s15, 3 }
  0x20   : > { %v1957_v45 = vunpack.c.l.bf16 %v359_v39  ;;  %v666_v46 = vrot.slane %v374_v36, 7  ;;  %v667_v47 = vrot.slane %v1942_v37, 7  ;;  %v547_v48 = vrot.slane %v1948_v41, 1  ;;  %s342_s27 = scalar_lea.vmem %s2441_s5, %s1322_s16 }
  0x21   : > { %v649_v49 = vrot.slane %v1950_v42, 1  ;;  %v504_v50 = vrot.slane %v1955_v44, 1  ;;  %v1977_v59 = vunpack.c.l.bf16 %v370_v53  ;;  %v1979_v60 = vunpack.c.l.bf16 %v371_v54 }
  0x22   : > { %v505_v51 = vrot.slane %v1957_v45, 1  ;;  %v1586_v52 = vpack.i.bf16 %v667_v47, %v666_v46  ;;  %v362_v61 = vunpack.c.l.bf16 %v356_v57  ;;  %v1983_v62 = vunpack.c.l.bf16 %v357_v58  ;;  %v373_v46 = vld [vmem:[%s1923_s29 + $0x14] sm:$0x7] }
  0x23   : > { %1522 = vrot.lane.b32.xlu2 %v1521_v21, %s1787_s10  ;;  %v1581_v55 = vpack.i.bf16 %v649_v49, %v547_v48  ;;  %v1987_v63 = vrot.slane %v1977_v59, 7  ;;  %v1990_v0 = vrot.slane %v1979_v60, 7  ;;  %v1994_v1 = vpack.i.bf16 %v1957_v45, %v1955_v44 }
  0x24   : > { %v1576_v56 = vpack.i.bf16 %v505_v51, %v504_v50  ;;  %v1596_v2 = vpack.i.bf16 %v1983_v62, %v362_v61  ;;  %v502_v7 = vrot.slane %v362_v61, 1  ;;  %v503_v9 = vrot.slane %v1983_v62, 1 }
  0x25   : > { %1542 = vrot.lane.b32.xlu1 %v1541_v22, %s1788_s11  ;;  %v1591_v6 = vpack.i.bf16 %v1990_v0, %v1987_v63  ;;  %v1611_v11 = vpack.i.bf16 %v1979_v60, %v1977_v59  ;;  %v1606_v12 = vpack.i.bf16 %v1942_v37, %v374_v36  ;;  %v696_v13 = vrot.slane %v1977_v59, 1 }
  0x26   : > { %1532 = vrot.lane.b32.xlu0 %v1907_v23, %s1789_s12  ;;  %v1616_v10 = vpack.i.bf16 %v503_v9, %v502_v7  ;;  %v697_v14 = vrot.slane %v1979_v60, 1  ;;  %v694_v16 = vrot.slane %v374_v36, 1  ;;  %v695_v19 = vrot.slane %v1942_v37, 1 }
  0x27   : > { %v520_v22 = vrot.slane %v1955_v44, 2  ;;  %v518_v26 = vrot.slane %v362_v61, 2  ;;  %v2021_v34 = vunpack.c.l.bf16 %v372_v30  ;;  %v1661_v36 = vpack.i.bf16 %v1948_v41, %v1957_v45 }
  0x28   : > { %v1631_v20 = vpack.i.bf16 %v697_v14, %v696_v13  ;;  %v1626_v21 = vpack.i.bf16 %v695_v19, %v694_v16  ;;  %v1656_v38 = vpack.i.bf16 %v1955_v44, %v1983_v62  ;;  %v1691_v49 = vpack.i.bf16 %v547_v48, %v505_v51 }
  0x29   : > { %v736_v54 = vrot.slane %v2021_v34, 1  ;;  %v560_v48 = vrot.slane %v1948_v41, 2  ;;  %v1731_v61 = vpack.i.bf16 %v1950_v42, %v1948_v41 }
  0x2b   : > { %1557 = vrot.lane.b32.xlu2 %v1556_v25, %s1790_s26  ;;  %v521_v25 = vrot.slane %v1957_v45, 2 }
  0x2d   : > { %1552 = vrot.lane.b32.xlu1 %v1551_v27, %s1791_s8  ;;  %v519_v27 = vrot.slane %v1983_v62, 2  ;;  %v1641_v31 = vpack.i.bf16 %v521_v25, %v520_v22  ;;  %v1721_v57 = vpack.i.bf16 %v560_v48, %v521_v25  ;;  %v468_v62 = vrot.slane %v1926_v29, 1 }
  0x2e   : > { %1547 = vrot.lane.b32.xlu0 %v1546_v28, %s1791_s8  ;;  %v1646_v28 = vpack.i.bf16 %v1987_v63, %v667_v47  ;;  %v2045_v47 = vunpack.c.l.bf16 %v373_v46 }
  0x2f   : > { %v1636_v33 = vpack.i.bf16 %v519_v27, %v518_v26  ;;  %v1716_v58 = vpack.i.bf16 %v520_v22, %v519_v27 }
  0x33   : > { %1572 = vrot.lane.b32.xlu2 %v1571_v35, %s1792_s9  ;;  %v711_v35 = vrot.slane %v2021_v34, 7 }
  0x35   : > { %1567 = vrot.lane.b32.xlu1 %v1566_v40, %s1792_s9  ;;  %v1651_v39 = vpack.i.bf16 %v711_v35, %v1990_v0  ;;  %v1671_v40 = vpack.i.bf16 %v2021_v34, %v1979_v60 }
  0x36   : > { %1562 = vrot.lane.b32.xlu0 %v1561_v43, %s1790_s26  ;;  %v1666_v43 = vpack.i.bf16 %v1977_v59, %v1942_v37  ;;  %v1681_v37 = vpack.i.bf16 %v2045_v47, %v2021_v34 }
  0x3b   : > { %1587 = vrot.lane.b32.xlu2 %v1586_v52, %s1788_s11  ;;  %v1686_v52 = vpack.i.bf16 %v504_v50, %v503_v9  ;;  %v767_v50 = vrot.slane %v2045_v47, 1 }
  0x3d   : > { %1582 = vrot.lane.b32.xlu1 %v1581_v55, %s1789_s12  ;;  %v1701_v55 = vpack.i.bf16 %v736_v54, %v697_v14  ;;  %v1711_v59 = vpack.i.bf16 %v767_v50, %v736_v54 }
  0x3e   : > { %1577 = vrot.lane.b32.xlu0 %v1576_v56, %s1789_s12 }
  0x43   : > { %1602 = vrot.lane.b32.xlu2 %v1994_v1, %s1789_s12 }
  0x45   : > { %1597 = vrot.lane.b32.xlu1 %v1596_v2, %s1789_s12 }
  0x46   : > { %1592 = vrot.lane.b32.xlu0 %v1591_v6, %s1788_s11 }
  0x4b   : > { %1617 = vrot.lane.b32.xlu2 %v1616_v10, %s1788_s11 }
  0x4d   : > { %1612 = vrot.lane.b32.xlu1 %v1611_v11, %s1787_s10 }
  0x4e   : > { %1607 = vrot.lane.b32.xlu0 %v1606_v12, %s1787_s10 }
  0x53   : > { %1632 = vrot.lane.b32.xlu2 %v1631_v20, %s1791_s8 }
  0x55   : > { %1627 = vrot.lane.b32.xlu1 %v1626_v21, %s1791_s8 }
  0x56   : > { %1622 = vrot.lane.b32.xlu0 %v1576_v56, %s1788_s11  ;;  %v1696_v56 = vpack.i.bf16 %v696_v13, %v695_v19 }
  0x5b   : > { %1647 = vrot.lane.b32.xlu2 %v1646_v28, %s1790_s26 }
  0x5d   : > { %1642 = vrot.lane.b32.xlu1 %v1641_v31, %s1787_s10 }
  0x5e   : > { %1637 = vrot.lane.b32.xlu0 %v1636_v33, %s1787_s10  ;;  %s1793_s10 = smov 112  }
  0x63   : > { %1662 = vrot.lane.b32.xlu2 %v1661_v36, %s1791_s8 }
  0x65   : > { %1657 = vrot.lane.b32.xlu1 %v1656_v38, %s1791_s8 }
  0x66   : > { %1652 = vrot.lane.b32.xlu0 %v1651_v39, %s1790_s26 }
  0x6b   : > { %1677 = vrot.lane.b32.xlu2 %v1611_v11, %s1789_s12 }
  0x6d   : > { %1672 = vrot.lane.b32.xlu1 %v1671_v40, %s1792_s9 }
  0x6e   : > { %1667 = vrot.lane.b32.xlu0 %v1666_v43, %s1792_s9 }
  0x73   : > { %1692 = vrot.lane.b32.xlu2 %v1691_v49, %s1790_s26 }
  0x75   : > { %v1518_v53 = vpop.permute.xlu2 %1517  ;;  %1687 = vrot.lane.b32.xlu1 %v1686_v52, %s1790_s26 }
  0x76   : > { %1682 = vrot.lane.b32.xlu0 %v1681_v37, %s1789_s12  ;;  %v1520_v11 = vunpack.i.h.bf16 %v1518_v53  ;;  %v1519_v12 = vunpack.i.l.bf16 %v1518_v53 }
  0x7b   : > { %1707 = vrot.lane.b32.xlu2 %v1631_v20, %s1788_s11 }
  0x7d   : > { %v1523_v51 = vpop.permute.xlu2 %1522  ;;  %1702 = vrot.lane.b32.xlu1 %v1701_v55, %s1793_s10 }
  0x7e   : > { %1697 = vrot.lane.b32.xlu0 %v1696_v56, %s1793_s10  ;;  %v1525_v28 = vunpack.i.h.bf16 %v1523_v51  ;;  %v1524_v30 = vunpack.i.l.bf16 %v1523_v51 }
  0x83   : > { %1722 = vrot.lane.b32.xlu2 %v1721_v57, %s1792_s9 }
  0x85   : > { %v1558_v60 = vpop.permute.xlu2 %1557  ;;  %1717 = vrot.lane.b32.xlu1 %v1716_v58, %s1792_s9 }
  0x86   : > { %1712 = vrot.lane.b32.xlu0 %v1711_v59, %s1788_s11  ;;  %v1560_v49 = vunpack.i.h.bf16 %v1558_v60  ;;  %v1559_v52 = vunpack.i.l.bf16 %v1558_v60 }
  0x8b   : > { %1737 = vrot.lane.b32.xlu2 %v1907_v23, %s1793_s10  ;;  %v1741_v23 = vpack.i.bf16 %v468_v62, %v429_v24 }
  0x8d   : > { %1732 = vrot.lane.b32.xlu1 %v1731_v61, %s1793_s10  ;;  %v2075_v2 = vpop.permute.xlu2 %1572 }
  0x8e   : > { %1727 = vrot.lane.b32.xlu0 %v1994_v1, %s1793_s10  ;;  %v1575_v60 = vunpack.i.h.bf16 %v2075_v2  ;;  %v1574_v61 = vunpack.i.l.bf16 %v2075_v2 }
  0x8f   : > { %v1538_v6 = vpop.permute.xlu1 %1537 }
  0x90   : > { %v1540_v7 = vunpack.i.h.bf16 %v1538_v6  ;;  %v1539_v9 = vunpack.i.l.bf16 %v1538_v6  ;;  %v1528_v10 = vpop.permute.xlu0 %1527 }
  0x91   : > { %v1530_v13 = vunpack.i.h.bf16 %v1528_v10  ;;  %v1529_v14 = vunpack.i.l.bf16 %v1528_v10 }
  0x93   : > { %v588_v1 = vsel %vm586_vm0, %v1874_v3, %v1530_v13  ;;  %v587_v16 = vsel %vm586_vm0, %v1878_v5, %v1529_v14 }
  0x94   : > { %v593_v19 = vsel %vm591_vm1, %v588_v1, %v1540_v7  ;;  %v592_v20 = vsel %vm591_vm1, %v587_v16, %v1539_v9 }
  0x95   : > { %v597_v21 = vsel %vm596_vm2, %v592_v20, %v1519_v12  ;;  %v598_v22 = vsel %vm596_vm2, %v593_v19, %v1520_v11  ;;  %v2088_v3 = vpop.permute.xlu2 %1587 }
  0x96   : > { %1742 = vrot.lane.b32.xlu0 %v1741_v23, %s1793_s10 }
  0x97   : > { %v1543_v25 = vpop.permute.xlu1 %1542 }
  0x98   : > { %v1545_v26 = vunpack.i.h.bf16 %v1543_v25  ;;  %v1544_v24 = vunpack.i.l.bf16 %v1543_v25  ;;  %v1533_v27 = vpop.permute.xlu0 %1532 }
  0x99   : > { %v1535_v31 = vunpack.i.h.bf16 %v1533_v27  ;;  %v1534_v5 = vunpack.i.l.bf16 %v1533_v27 }
  0x9b   : > { %v590_v33 = vsel %vm586_vm0, %v1882_v8, %v1535_v31  ;;  %v589_v36 = vsel %vm586_vm0, %v1876_v4, %v1534_v5  ;;  %v1460_v5 = vld [vmem:[%s2439_s3 + $0xb0] sm:$0xff] }
  0x9c   : > { %v595_v38 = vsel %vm591_vm1, %v590_v33, %v1545_v26  ;;  %v594_v39 = vsel %vm591_vm1, %v589_v36, %v1544_v24 }
  0x9d   : > { %v599_v40 = vsel %vm596_vm2, %v594_v39, %v1524_v30  ;;  %v600_v43 = vsel %vm596_vm2, %v595_v38, %v1525_v28  ;;  %v2100_v48 = vpop.permute.xlu2 %1602  ;;  %v1461_v30 = vld [vmem:[%s2439_s3 + $0xb8] sm:$0xff]  ;;  %v1459_v38 = vld [vmem:[%s2439_s3 + $0xa8] sm:$0xff] }
  0x9e   : > { %1143 = vmatpush.bf16.msra.mxu2 %v1461_v30  ;;  %v1442_v30 = vld [vmem:[%s2439_s3 + $0x20] sm:$0xff] }
  0x9f   : > { %v1553_v46 = vpop.permute.xlu1 %1552 }
  0xa0   : > { %v1555_v37 = vunpack.i.h.bf16 %v1553_v46  ;;  %v1554_v53 = vunpack.i.l.bf16 %v1553_v46  ;;  %v1548_v54 = vpop.permute.xlu0 %1547  ;;  %v1445_v46 = vld [vmem:[%s2439_s3 + $0x38] sm:$0xff] }
  0xa1   : > { %v1550_v55 = vunpack.i.h.bf16 %v1548_v54  ;;  %v1549_v8 = vunpack.i.l.bf16 %v1548_v54  ;;  %1115 = vmatpush.bf16.msra.mxu0 %v1445_v46  ;;  %v1452_v54 = vld [vmem:[%s2439_s3 + $0x70] sm:$0xff] }
  0xa2   : > { %v604_v4 = vsel %vm601_vm3, %v599_v40, %v1554_v53  ;;  %v605_v56 = vsel %vm601_vm3, %v600_v43, %v1555_v37  ;;  %1144 = vmatpush.bf16.msra.mxu2 %v1460_v5  ;;  %v1458_v40 = vld [vmem:[%s2439_s3 + $0xa0] sm:$0xff]  ;;  %v1457_v37 = vld [vmem:[%s2439_s3 + $0x98] sm:$0xff]  ;;  %v1444_v53 = vld [vmem:[%s2439_s3 + $0x30] sm:$0xff] }
  0xa3   : > { %v602_v51 = vsel %vm601_vm3, %v597_v21, %v1549_v8  ;;  %v603_v50 = vsel %vm601_vm3, %v598_v22, %v1550_v55  ;;  %v1456_v55 = vld [vmem:[%s2439_s3 + $0x90] sm:$0xff]  ;;  %v1450_v5 = vld [vmem:[%s2439_s3 + $0x60] sm:$0xff] }
  0xa4   : > { %v607_v57 = vsel %vm606_vm4, %v602_v51, %v1559_v52  ;;  %v608_v58 = vsel %vm606_vm4, %v603_v50, %v1560_v49  ;;  %v1453_v49 = vld [vmem:[%s2439_s3 + $0x78] sm:$0xff]  ;;  %v1464_v8 = vld [vmem:[%s2439_s3 + $0xd0] sm:$0xff]  ;;  %v1443_v50 = vld [vmem:[%s2439_s3 + $0x28] sm:$0xff] }
  0xa5   : > { %v2122_v1 = vpop.permute.xlu2 %1617  ;;  %1129 = vmatpush.bf16.msra.mxu1 %v1453_v49  ;;  %1116 = vmatpush.bf16.msra.mxu0 %v1444_v53 }
  0xa6   : > { %1145 = vmatpush.bf16.msra.mxu2 %v1459_v38  ;;  %1162 = vmatpush.bf16.msra.mxu3 %v1464_v8  ;;  %v1619_v38 = vunpack.i.l.bf16 %v2122_v1 }
  0xa7   : > { %v1568_v59 = vpop.permute.xlu1 %1567 }
  0xa8   : > { %v1570_v62 = vunpack.i.h.bf16 %v1568_v59  ;;  %v1569_v6 = vunpack.i.l.bf16 %v1568_v59  ;;  %v1563_v7 = vpop.permute.xlu0 %1562  ;;  %v1605_v59 = vunpack.i.h.bf16 %v2100_v48 }
  0xa9   : > { %v1565_v9 = vunpack.i.h.bf16 %v1563_v7  ;;  %v1564_v10 = vunpack.i.l.bf16 %v1563_v7  ;;  %1130 = vmatpush.bf16.msra.mxu1 %v1452_v54  ;;  %1117 = vmatpush.bf16.msra.mxu0 %v1443_v50  ;;  %v1455_v7 = vld [vmem:[%s2439_s3 + $0x88] sm:$0xff] }
  0xaa   : > { %v2109_v11 = vsel %vm611_vm5, %v607_v57, %v1569_v6  ;;  %v2112_v12 = vsel %vm611_vm5, %v608_v58, %v1570_v62  ;;  %1146 = vmatpush.bf16.msra.mxu2 %v1458_v40  ;;  %v1451_v57 = vld [vmem:[%s2439_s3 + $0x68] sm:$0xff]  ;;  %v481_v58 = vrot.slane %v1926_v29, 2 }
  0xab   : > { %v609_v13 = vsel %vm606_vm4, %v604_v4, %v1564_v10  ;;  %v610_v14 = vsel %vm606_vm4, %v605_v56, %v1565_v9  ;;  %v1463_v29 = vld [vmem:[%s2439_s3 + $0xc8] sm:$0xff]  ;;  %v1589_v9 = vunpack.i.l.bf16 %v2088_v3  ;;  %v1590_v10 = vunpack.i.h.bf16 %v2088_v3 }
  0xac   : > { %v2117_v23 = vsel %vm611_vm5, %v609_v13, %v1574_v61  ;;  %v2120_v2 = vsel %vm611_vm5, %v610_v14, %v1575_v60  ;;  %v1604_v60 = vunpack.i.l.bf16 %v2100_v48  ;;  %1163 = vmatpush.bf16.msra.mxu3 %v1463_v29  ;;  %v1620_v3 = vunpack.i.h.bf16 %v2122_v1 }
  0xad   : > { %v2128_v20 = vpop.permute.xlu2 %1632  ;;  %1131 = vmatpush.bf16.msra.mxu1 %v1451_v57  ;;  %1118 = vmatpush.bf16.msra.mxu0 %v1442_v30  ;;  %v1448_v30 = vld [vmem:[%s2439_s3 + $0x50] sm:$0xff] }
  0xae   : > { %1147 = vmatpush.bf16.msra.mxu2 %v1457_v37  ;;  %v1635_v40 = vunpack.i.h.bf16 %v2128_v20  ;;  %v1634_v46 = vunpack.i.l.bf16 %v2128_v20 }
  0xaf   : > { %v2124_v16 = vpop.permute.xlu1 %1582 }
  0xb0   : > { %v2126_v19 = vpop.permute.xlu0 %1577  ;;  %v1585_v6 = vunpack.i.h.bf16 %v2124_v16  ;;  %v1584_v48 = vunpack.i.l.bf16 %v2124_v16  ;;  %v2227_v16 = vsel %vm586_vm0, %v481_v58, %v1605_v59 }
  0xb1   : > { %v1579_v4 = vunpack.i.l.bf16 %v2126_v19  ;;  %v1580_v61 = vunpack.i.h.bf16 %v2126_v19  ;;  %1132 = vmatpush.bf16.msra.mxu1 %v1450_v5 }
  0xb2   : > { %1148 = vmatpush.bf16.msra.mxu2 %v1456_v55  ;;  %v783_v49 = vsel %vm586_vm0, %v1950_v42, %v1585_v6 }
  0xb3   : > { %v780_v13 = vsel %vm586_vm0, %v1955_v44, %v1579_v4  ;;  %v2232_v44 = vsel %vm586_vm0, %v442_v32, %v1604_v60  ;;  %v1462_v32 = vld [vmem:[%s2439_s3 + $0xc0] sm:$0xff] }
  0xb4   : > { %v784_v37 = vsel %vm591_vm1, %v780_v13, %v1589_v9  ;;  %1164 = vmatpush.bf16.msra.mxu3 %v1462_v32  ;;  %v1439_v32 = vld [vmem:[%s2439_s3 + $0x8] sm:$0xff] }
  0xb5   : > { %v2138_v24 = vpop.permute.xlu2 %1647 }
  0xb6   : > { %1149 = vmatpush.bf16.msra.mxu2 %v1455_v7  ;;  %v1650_v58 = vunpack.i.h.bf16 %v2138_v24  ;;  %v1649_v59 = vunpack.i.l.bf16 %v2138_v24 }
  0xb7   : > { %v2130_v21 = vpop.permute.xlu1 %1597 }
  0xb8   : > { %v2132_v22 = vpop.permute.xlu0 %1592  ;;  %v1600_v14 = vunpack.i.h.bf16 %v2130_v21  ;;  %v1599_v19 = vunpack.i.l.bf16 %v2130_v21  ;;  %v781_v21 = vsel %vm586_vm0, %v1957_v45, %v1580_v61  ;;  %v782_v45 = vsel %vm586_vm0, %v1948_v41, %v1584_v48  ;;  %v1441_v41 = vld [vmem:[%s2439_s3 + $0x18] sm:$0xff] }
  0xb9   : > { %v1595_v1 = vunpack.i.h.bf16 %v2132_v22  ;;  %v1594_v20 = vunpack.i.l.bf16 %v2132_v22  ;;  %v785_v55 = vsel %vm591_vm1, %v781_v21, %v1590_v10  ;;  %v1449_v22 = vld [vmem:[%s2439_s3 + $0x58] sm:$0xff]  ;;  %1119 = vmatpush.bf16.msra.mxu0 %v1441_v41 }
  0xba   : > { %v622_v42 = vsel %vm586_vm0, %v1898_v18, %v1600_v14  ;;  %v621_v53 = vsel %vm586_vm0, %v1895_v17, %v1599_v19  ;;  %1150 = vmatpush.bf16.msra.mxu2 %v1454_v15  ;;  %1133 = vmatpush.bf16.msra.mxu1 %v1449_v22  ;;  %v1440_v19 = vld [vmem:[%s2439_s3 + $0x10] sm:$0xff] }
  0xbb   : > { %v786_v7 = vsel %vm591_vm1, %v782_v45, %v1594_v20  ;;  %v2285_v24 = vsel %vm591_vm1, %v622_v42, %v1620_v3  ;;  %v1447_v45 = vld [vmem:[%s2439_s3 + $0x48] sm:$0xff] }
  0xbd   : > { %v2147_v31 = vpop.permute.xlu2 %1662  ;;  %1120 = vmatpush.bf16.msra.mxu0 %v1440_v19 }
  0xbe   : > { %v1665_v5 = vunpack.i.h.bf16 %v2147_v31  ;;  %v1664_v3 = vunpack.i.l.bf16 %v2147_v31  ;;  %1134 = vmatpush.bf16.msra.mxu1 %v1448_v30 }
  0xbf   : > { %v2134_v25 = vpop.permute.xlu1 %1612 }
  0xc0   : > { %v2136_v26 = vpop.permute.xlu0 %1607  ;;  %v1614_v54 = vunpack.i.l.bf16 %v2134_v25  ;;  %v1615_v18 = vunpack.i.h.bf16 %v2134_v25  ;;  %v787_v25 = vsel %vm591_vm1, %v783_v49, %v1595_v1 }
  0xc1   : > { %v1609_v17 = vunpack.i.l.bf16 %v2136_v26  ;;  %v1610_v60 = vunpack.i.h.bf16 %v2136_v26  ;;  %1121 = vmatpush.bf16.msra.mxu0 %v1439_v32 }
  0xc2   : > { %v790_v9 = vsel %vm596_vm2, %v786_v7, %v1614_v54  ;;  %v791_v10 = vsel %vm596_vm2, %v787_v25, %v1615_v18  ;;  %v750_v54 = vrot.slane %v2045_v47, 7  ;;  %1135 = vmatpush.bf16.msra.mxu1 %v1447_v45  ;;  %v1446_v47 = vld [vmem:[%s2439_s3 + $0x40] sm:$0xff] }
  0xc3   : > { %v788_v13 = vsel %vm596_vm2, %v784_v37, %v1609_v17  ;;  %v789_v21 = vsel %vm596_vm2, %v785_v55, %v1610_v60 }
  0xc5   : > { %v2159_v39 = vpop.permute.xlu2 %1677 }
  0xc6   : > { %v1680_v4 = vunpack.i.h.bf16 %v2159_v39  ;;  %v1679_v50 = vunpack.i.l.bf16 %v2159_v39  ;;  %v2281_v39 = vsel %vm591_vm1, %v621_v53, %v1619_v38  ;;  %1136 = vmatpush.bf16.msra.mxu1 %v1446_v47 }
  0xc7   : > { %v2140_v27 = vpop.permute.xlu1 %1627 }
  0xc8   : > { %v2142_v28 = vpop.permute.xlu0 %1622  ;;  %v1629_v61 = vunpack.i.l.bf16 %v2140_v27  ;;  %v1630_v29 = vunpack.i.h.bf16 %v2140_v27  ;;  %v809_v14 = vsel %vm586_vm0, %v1990_v0, %v1680_v4  ;;  %v808_v27 = vsel %vm586_vm0, %v1987_v63, %v1679_v50 }
  0xc9   : > { %v794_v63 = vsel %vm601_vm3, %v790_v9, %v1634_v46  ;;  %v795_v46 = vsel %vm601_vm3, %v791_v10, %v1635_v40  ;;  %v1624_v42 = vunpack.i.l.bf16 %v2142_v28 }
  0xca   : > { %v792_v38 = vsel %vm601_vm3, %v788_v13, %v1629_v61  ;;  %v793_v0 = vsel %vm601_vm3, %v789_v21, %v1630_v29 }
  0xcb   : > { %v796_v53 = vsel %vm606_vm4, %v792_v38, %v1649_v59  ;;  %v797_v41 = vsel %vm606_vm4, %v793_v0, %v1650_v58  ;;  %v627_v30 = vsel %vm591_vm1, %v2232_v44, %v1624_v42 }
  0xcd   : > { %v2190_v56 = vpop.permute.xlu2 %1692 }
  0xcf   : > { %v2152_v33 = vpop.permute.xlu1 %1642 }
  0xd0   : > { %v2154_v36 = vpop.permute.xlu0 %1637 }
  0xd1   : > { %v1639_v0 = vunpack.i.l.bf16 %v2154_v36 }
  0xd5   : > { %v1708_v6 = vpop.permute.xlu2 %1707 }
  0xd6   : > { %v1710_v26 = vunpack.i.h.bf16 %v1708_v6  ;;  %v1709_v48 = vunpack.i.l.bf16 %v1708_v6 }
  0xd7   : > { %v2164_v43 = vpop.permute.xlu1 %1657 }
  0xd8   : > { %v2172_v52 = vpop.permute.xlu0 %1652  ;;  %v812_v1 = vsel %vm591_vm1, %v808_v27, %v1709_v48  ;;  %v813_v20 = vsel %vm591_vm1, %v809_v14, %v1710_v26  ;;  %v1645_v26 = vunpack.i.h.bf16 %v2152_v33  ;;  %v1644_v48 = vunpack.i.l.bf16 %v2152_v33 }
  0xd9   : > { %v1323_v17 = vrot.slane %v812_v1, 5  ;;  %v1324_v4 = vrot.slane %v813_v20, 5  ;;  %v1655_v58 = vunpack.i.h.bf16 %v2172_v52  ;;  %v1654_v59 = vunpack.i.l.bf16 %v2172_v52 }
  0xda   : > { %v631_v1 = vsel %vm596_vm2, %v627_v30, %v1644_v48 }
  0xdb   : > { %v798_v33 = vsel %vm606_vm4, %v794_v63, %v1654_v59  ;;  %v799_v21 = vsel %vm606_vm4, %v795_v46, %v1655_v58  ;;  %v635_v47 = vsel %vm601_vm3, %v631_v1, %v1664_v3 }
  0xdd   : > { %v2331_v60 = vpop.permute.xlu2 %1722 }
  0xdf   : > { %v2192_v51 = vpop.permute.xlu1 %1672 }
  0xe0   : > { %v2204_v62 = vpop.permute.xlu0 %1667  ;;  %v1675_v25 = vunpack.i.h.bf16 %v2192_v51  ;;  %v1674_v7 = vunpack.i.l.bf16 %v2192_v51 }
  0xe1   : > { %v1670_v49 = vunpack.i.h.bf16 %v2204_v62  ;;  %v1669_v15 = vunpack.i.l.bf16 %v2204_v62  ;;  %v1625_v62 = vunpack.i.h.bf16 %v2142_v28  ;;  %v1438_v28 = vld [vmem:[%s2439_s3] sm:$0xff] }
  0xe2   : > { %1122 = vmatpush.bf16.msra.mxu0 %v1438_v28 }
  0xe3   : > { %v800_v40 = vsel %vm611_vm5, %v796_v53, %v1669_v15  ;;  %v801_v50 = vsel %vm611_vm5, %v797_v41, %v1670_v49  ;;  %v628_v51 = vsel %vm591_vm1, %v2227_v16, %v1625_v62  ;;  %v802_v49 = vsel %vm611_vm5, %v798_v33, %v1674_v7 }
  0xe4   : > { %v803_v15 = vsel %vm611_vm5, %v799_v21, %v1675_v25  ;;  %v632_v20 = vsel %vm596_vm2, %v628_v51, %v1645_v26  ;;  %v1659_v62 = vunpack.i.l.bf16 %v2164_v43 }
  0xe5   : > { %v636_v58 = vsel %vm601_vm3, %v632_v20, %v1665_v5 }
  0xe7   : > { %v2259_v8 = vpop.permute.xlu1 %1687 }
  0xe8   : > { %v2271_v57 = vpop.permute.xlu0 %1682  ;;  %v1690_v34 = vunpack.i.h.bf16 %v2259_v8 }
  0xe9   : > { %v1685_v52 = vunpack.i.h.bf16 %v2271_v57  ;;  %v1684_v14 = vunpack.i.l.bf16 %v2271_v57  ;;  %v1640_v57 = vunpack.i.h.bf16 %v2154_v36 }
  0xeb   : > { %v811_v46 = vsel %vm586_vm0, %v750_v54, %v1685_v52  ;;  %v810_v36 = vsel %vm586_vm0, %v711_v35, %v1684_v14  ;;  %v1694_v54 = vunpack.i.l.bf16 %v2190_v56  ;;  %v1689_v35 = vunpack.i.l.bf16 %v2259_v8 }
  0xec   : > { %v629_v8 = vsel %vm596_vm2, %v2281_v39, %v1639_v0  ;;  %v1724_v39 = vunpack.i.l.bf16 %v2331_v60 }
  0xed   : > { %v633_v59 = vsel %vm601_vm3, %v629_v8, %v1659_v62  ;;  %v639_v51 = vsel %vm606_vm4, %v635_v47, %v1694_v54 }
  0xee   : > { %v637_v31 = vsel %vm606_vm4, %v633_v59, %v1689_v35  ;;  %v643_v21 = vsel %vm611_vm5, %v639_v51, %v1724_v39 }
  0xef   : > { %v1703_v37 = vpop.permute.xlu1 %1702 }
  0xf0   : > { %v1698_v55 = vpop.permute.xlu0 %1697  ;;  %v1705_v10 = vunpack.i.h.bf16 %v1703_v37  ;;  %v1704_v13 = vunpack.i.l.bf16 %v1703_v37  ;;  %v1660_v37 = vunpack.i.h.bf16 %v2164_v43 }
  0xf1   : > { %v1700_v22 = vunpack.i.h.bf16 %v1698_v55  ;;  %v1699_v18 = vunpack.i.l.bf16 %v1698_v55 }
  0xf2   : > { %v806_v16 = vsel %vm616_vm6, %v802_v49, %v1704_v13  ;;  %v807_v44 = vsel %vm616_vm6, %v803_v15, %v1705_v10 }
  0xf3   : > { %v804_v61 = vsel %vm616_vm6, %v800_v40, %v1699_v18  ;;  %v805_v6 = vsel %vm616_vm6, %v801_v50, %v1700_v22  ;;  %v828_v55 = vrot.slane %v806_v16, 1  ;;  %v830_v41 = vrot.slane %v807_v44, 1 }
  0xf4   : > { %v824_v29 = vrot.slane %v804_v61, 1  ;;  %v826_v9 = vrot.slane %v805_v6, 1 }
  0xf6   : > { %v850_v27 = vsel %vm848_vm7, %v824_v29, %v1323_v17  ;;  %v852_v19 = vsel %vm848_vm7, %v826_v9, %v1324_v4  ;;  %v1695_v17 = vunpack.i.h.bf16 %v2190_v56  ;;  %v1738_v4 = vpop.permute.xlu2 %1737  ;;  %v630_v56 = vsel %vm596_vm2, %v2285_v24, %v1640_v57 }
  0xf7   : > { %861 = vst [vmem:[#allocation1 + $0x10] ss:$2 sm:$0xff] %v850_v27  ;;  %v1718_v38 = vpop.permute.xlu1 %1717  ;;  %v634_v61 = vsel %vm601_vm3, %v630_v56, %v1660_v37  ;;  %v1740_v6 = vunpack.i.h.bf16 %v1738_v4  ;;  %v1739_v25 = vunpack.i.l.bf16 %v1738_v4  ;;  %v1725_v24 = vunpack.i.h.bf16 %v2331_v60 }
  0xf8   : > { %863 = vst [vmem:[#allocation1 + $0x11] ss:$2 sm:$0xff] %v852_v19  ;;  %v1713_v32 = vpop.permute.xlu0 %1712  ;;  %v1720_v40 = vunpack.i.h.bf16 %v1718_v38  ;;  %v1719_v50 = vunpack.i.l.bf16 %v1718_v38  ;;  %v638_v5 = vsel %vm606_vm4, %v634_v61, %v1690_v34  ;;  %v640_v30 = vsel %vm606_vm4, %v636_v58, %v1695_v17 }
  0xf9   : > { %v1715_v45 = vunpack.i.h.bf16 %v1713_v32  ;;  %v1714_v63 = vunpack.i.l.bf16 %v1713_v32  ;;  %v617_v33 = vsel %vm616_vm6, %v2109_v11, %v1739_v25  ;;  %v618_v60 = vsel %vm616_vm6, %v2112_v12, %v1740_v6 }
  0xfa   : > { %v641_v26 = vsel %vm611_vm5, %v637_v31, %v1719_v50  ;;  %v642_v48 = vsel %vm611_vm5, %v638_v5, %v1720_v40  ;;  %v644_v38 = vsel %vm611_vm5, %v640_v30, %v1725_v24 }
  0xfb   : > { %v814_v42 = vsel %vm591_vm1, %v810_v36, %v1714_v63  ;;  %v815_v53 = vsel %vm591_vm1, %v811_v46, %v1715_v45 }
  0xfc   : > { %v1325_v22 = vrot.slane %v814_v42, 5  ;;  %v1326_v18 = vrot.slane %v815_v53, 5 }
  0xfe   : > { %v854_v43 = vsel %vm848_vm7, %v828_v55, %v1325_v22  ;;  %v856_v28 = vsel %vm848_vm7, %v830_v41, %v1326_v18 }
  0xff   : > { %869 = vst [vmem:[#allocation1 + $0x30] ss:$2 sm:$0xff] %v854_v43  ;;  %v1733_v7 = vpop.permute.xlu1 %1732  ;;  %v874_v49 = vld.sshfl [vmem:[#allocation1 + $0x10] sm:$0xff pattern:$0x75316420] }
 0x100   : > { %871 = vst [vmem:[#allocation1 + $0x31] ss:$2 sm:$0xff] %v856_v28  ;;  %v1728_v3 = vpop.permute.xlu0 %1727  ;;  %v1735_v10 = vunpack.i.h.bf16 %v1733_v7  ;;  %v1734_v13 = vunpack.i.l.bf16 %v1733_v7  ;;  %v875_v15 = vld.sshfl [vmem:[#allocation1 + $0x18] sm:$0xff pattern:$0x75316420] }
 0x101   : > { %v1730_v29 = vunpack.i.h.bf16 %v1728_v3  ;;  %v1729_v9 = vunpack.i.l.bf16 %v1728_v3 }
 0x102   : > { %v647_v32 = vsel %vm616_vm6, %v643_v21, %v1734_v13  ;;  %v648_v16 = vsel %vm616_vm6, %v644_v38, %v1735_v10 }
 0x103   : > { %v645_v52 = vsel %vm616_vm6, %v641_v26, %v1729_v9  ;;  %v646_v14 = vsel %vm616_vm6, %v642_v48, %v1730_v29  ;;  %v844_v46 = vrot.slane %v647_v32, 4  ;;  %v846_v36 = vrot.slane %v648_v16, 4 }
 0x104   : > { %v840_v27 = vrot.slane %v645_v52, 4  ;;  %v842_v19 = vrot.slane %v646_v14, 4 }
 0x106   : > { %v849_v57 = vsel %vm848_vm7, %v617_v33, %v840_v27  ;;  %v851_v0 = vsel %vm848_vm7, %v618_v60, %v842_v19 }
 0x107   : > { %857 = vst [vmem:[#allocation1] ss:$2 sm:$0xff] %v849_v57  ;;  %v878_v44 = vld.sshfl [vmem:[#allocation1 + $0x30] sm:$0xff pattern:$0x75316420] }
 0x108   : > { %859 = vst [vmem:[#allocation1 + $0x1] ss:$2 sm:$0xff] %v851_v0  ;;  %v1743_v11 = vpop.permute.xlu0 %1742  ;;  %v890_v45 = vpack.c.bf16 %v878_v44, %v874_v49  ;;  %v879_v12 = vld.sshfl [vmem:[#allocation1 + $0x38] sm:$0xff pattern:$0x75316420] }
 0x109   : > { %v1745_v63 = vunpack.i.h.bf16 %v1743_v11  ;;  %v1744_v1 = vunpack.i.l.bf16 %v1743_v11  ;;  %v891_v20 = vpack.c.bf16 %v879_v12, %v875_v15 }
 0x10a   : > { %1151 = vmatmul.bf16.vlgmr.msra.gmra.mxu2 %v890_v45 }
 0x10b   : > { %v619_v37 = vsel %vm616_vm6, %v2117_v23, %v1744_v1  ;;  %v620_v62 = vsel %vm616_vm6, %v2120_v2, %v1745_v63  ;;  %1435 = vmatmul.msk.bf16.vlgmr.msra.gmra.mxu3 %vm596_vm2, %v891_v20  ;;  %v1746_v23 = vld [vmem:[%s2440_s4] ss:$0 sm:$0xff] }
 0x10c   : > { %v853_v42 = vsel %vm848_vm7, %v619_v37, %v844_v46  ;;  %v855_v53 = vsel %vm848_vm7, %v620_v62, %v846_v36 }
 0x10d   : > { %865 = vst [vmem:[#allocation1 + $0x20] ss:$2 sm:$0xff] %v853_v42 }
 0x10e   : > { %867 = vst [vmem:[#allocation1 + $0x21] ss:$2 sm:$0xff] %v855_v53 }
 0x10f   : > { %v872_v55 = vld.sshfl [vmem:[#allocation1] sm:$0xff pattern:$0x75316420]  ;;  %v873_v41 = vld.sshfl [vmem:[#allocation1 + $0x8] sm:$0xff pattern:$0x75316420] }
 0x115   : > { %v876_v22 = vld.sshfl [vmem:[#allocation1 + $0x20] sm:$0xff pattern:$0x75316420]  ;;  %v877_v18 = vld.sshfl [vmem:[#allocation1 + $0x28] sm:$0xff pattern:$0x75316420] }
 0x116   : > { %v888_v17 = vpack.c.bf16 %v876_v22, %v872_v55  ;;  %v889_v54 = vpack.c.bf16 %v877_v18, %v873_v41 }
 0x118   : > { %1123 = vmatmul.bf16.vlgmr.msra.gmra.mxu0 %v888_v17  ;;  %1137 = vmatmul.bf16.vlgmr.msra.gmra.mxu1 %v889_v54 }
 0x18d   : > { %v1152_v35 = vpop.f32.mrf.mxu2 }
 0x18e   : > { %v1166_v50 = vpop.f32.mrf.mxu3 }
 0x195   : > { %v1124_v2 = vpop.f32.mrf.mxu0  ;;  %v1138_v4 = vpop.f32.mrf.mxu1 }
 0x196   : > { %v1125_v34 = vadd.f32 %v1746_v23, %v1124_v2  ;;  %v1154_v61 = vpop.f32.mrf.mxu2  ;;  %v1168_v25 = vpop.f32.mrf.mxu3 }
 0x198   : > { %v1139_v40 = vadd.f32 %v1138_v4, %v1125_v34 }
 0x19a   : > { %v1153_v43 = vadd.f32 %v1152_v35, %v1139_v40 }
 0x19c   : > { %v1167_v28 = vadd.f32 %v1166_v50, %v1153_v43 }
 0x19d   : > { %v1126_v47 = vpop.f32.mrf.mxu0  ;;  %v1140_v8 = vpop.f32.mrf.mxu1 }
 0x19e   : > { %v1171_v58 = vmax.f32 %v1167_v28, 0.0  ;;  %v1127_v56 = vadd.f32 %v1746_v23, %v1126_v47 }
 0x1a0   : > { %1173 = vst.msk [vmem:[%s342_s27] sm:$0xff] %vm586_vm0, %v1171_v58  ;;  %v1141_v59 = vadd.f32 %v1140_v8, %v1127_v56 }
 0x1a2   : > { %v1155_v6 = vadd.f32 %v1154_v61, %v1141_v59 }
 0x1a4   : > { %v1169_v7 = vadd.f32 %v1168_v25, %v1155_v6 }
 0x1a6   : > { %v1172_v3 = vmax.f32 %v1169_v7, 0.0 }
 0x1a8   : > { %1174 = vst.msk [vmem:[%s342_s27 + $0x8] sm:$0xff] %vm586_vm0, %v1172_v3 }
 0x1a9 PF: > { %s15_s22 = sadd.s32 1, %s1785_s22   ;;  %s2442_s18 = smov %s1777_s20 }
 0x1aa   : > { %p12_p10 = scmp.ge.s32.totalorder %s15_s22, 10   ;;  %s2443_s19 = smov %s1781_s21 }
 0x1ab   : > { %s2444_s20 = smov %s2447_s23  ;;  %s2445_s21 = smov %s2451_s24 }
 0x1ac   :  { %14 = sbr.rel (!%p12_p10) target bundleno = 3 (0x3), region = 83 }

</bundles_post_ra>
